<compile_context>
chip_gen: v6e
topology: v6e:2x2x1
jax: 0.10.0
libtpu: 0.0.40
codegen_flags: <defaults>
</compile_context>

<pallas_src>
import functools

import numpy as np

import jax
import jax.numpy as jnp
from jax.experimental import pallas as pl
from jax.experimental.pallas import tpu as pltpu


# ----------------------------------------------------------------------------
# In-kernel helpers
# ----------------------------------------------------------------------------
def _elu(x):
    # ELU(alpha=1).  expm1(x) computed as tanh(x/2) * (exp(x) + 1): exact
    # identity, avoids exp(x)-1 cancellation for small |x|, and uses only
    # EUP-native exp / tanh primitives.
    xn = jnp.minimum(x, 0.0)
    em1 = jnp.tanh(xn * 0.5) * (jnp.exp(xn) + 1.0)
    return jnp.where(x > 0, x, em1)


def _conv_pool_elu_kernel(xe_ref, xo_ref, w_ref, b_ref, o_ref, *, k, oh_out):
    """Fused valid-conv(k x k) + bias + 2x2 max-pool + ELU for one image.

    xe_ref/xo_ref: (1, H/2, W*Cin) even/odd input rows (f32)
    w_ref:         (2*k, W*Cin, OW2*Cp) banded weights, rows [q*k+dh] (bf16)
    b_ref:         (1, OW2*Cp) bias broadcast over pooled columns (f32)
    o_ref:         (1, OH2, OW2*Cp) pooled+ELU output (f32)
    """
    nout = w_ref.shape[2]
    m = None
    for p in (0, 1):                         # output-row parity (pool over H)
        acc0 = jnp.zeros((oh_out, nout), jnp.float32)
        acc1 = jnp.zeros((oh_out, nout), jnp.float32)
        for dh in range(k):
            r = p + dh                       # input row offset
            src = xe_ref if (r % 2 == 0) else xo_ref
            xs = src[0, pl.ds(r // 2, oh_out), :].astype(jnp.bfloat16)
            acc0 = acc0 + jnp.dot(xs, w_ref[dh],
                                  preferred_element_type=jnp.float32)
            acc1 = acc1 + jnp.dot(xs, w_ref[k + dh],
                                  preferred_element_type=jnp.float32)
        pm = jnp.maximum(acc0, acc1)         # pool over W (column parity)
        m = pm if m is None else jnp.maximum(m, pm)   # pool over H
    o_ref[0] = _elu(m + b_ref[...])


def _conv_elu_kernel(x_ref, w_ref, b_ref, o_ref, *, k, oh_out):
    """Fused valid-conv(k x k) + bias + ELU (no pooling) for one image."""
    nout = w_ref.shape[2]
    acc = jnp.zeros((oh_out, nout), jnp.float32)
    for dh in range(k):
        xs = x_ref[0, pl.ds(dh, oh_out), :].astype(jnp.bfloat16)
        acc = acc + jnp.dot(xs, w_ref[dh],
                            preferred_element_type=jnp.float32)
    o_ref[0] = _elu(acc + b_ref[...])


def _mlp_elu4_kernel(x_ref, w1_ref, b1_ref, w2_ref, b2_ref,
                     w3_ref, b3_ref, w4_ref, b4_ref, o_ref):
    """Four fused Linear + ELU layers; intermediates never leave VMEM."""
    h = x_ref[...]
    for w_ref, b_ref in ((w1_ref, b1_ref), (w2_ref, b2_ref),
                         (w3_ref, b3_ref), (w4_ref, b4_ref)):
        acc = jnp.dot(h.astype(jnp.bfloat16), w_ref[...],
                      preferred_element_type=jnp.float32)
        h = _elu(acc + b_ref[...])
    o_ref[...] = h


# ----------------------------------------------------------------------------
# pallas_call wrappers
# ----------------------------------------------------------------------------
_COMPILER_PARAMS = pltpu.CompilerParams(
    dimension_semantics=("parallel",),
    vmem_limit_bytes=32 * 1024 * 1024,
)


def conv_pool_elu(x, w, b, *, oh_out):
    """x: (N, H, W*Cin) f32; w: (2k, W*Cin, OW2*Cp) bf16; b: (1, OW2*Cp) f32."""
    N, H, K = x.shape
    k = w.shape[0] // 2
    nout = w.shape[2]
    xe = x[:, 0::2, :]
    xo = x[:, 1::2, :]
    He, Ho = xe.shape[1], xo.shape[1]
    kern = functools.partial(_conv_pool_elu_kernel, k=k, oh_out=oh_out)
    cost = pl.CostEstimate(
        flops=int(8 * k * N * oh_out * K * nout),
        transcendentals=int(2 * N * oh_out * nout),
        bytes_accessed=int(N * H * K * 4 + w.size * 2 + nout * 4
                           + N * oh_out * nout * 4),
    )
    return pl.pallas_call(
        kern,
        out_shape=jax.ShapeDtypeStruct((N, oh_out, nout), jnp.float32),
        grid=(N,),
        in_specs=[
            pl.BlockSpec((1, He, K), lambda n: (n, 0, 0)),
            pl.BlockSpec((1, Ho, K), lambda n: (n, 0, 0)),
            pl.BlockSpec(w.shape, lambda n: (0, 0, 0)),
            pl.BlockSpec((1, nout), lambda n: (0, 0)),
        ],
        out_specs=pl.BlockSpec((1, oh_out, nout), lambda n: (n, 0, 0)),
        compiler_params=_COMPILER_PARAMS,
        cost_estimate=cost,
    )(xe, xo, w, b)


def conv_elu(x, w, b, *, oh_out):
    """x: (N, H, W*Cin) f32; w: (k, W*Cin, OW*Cp) bf16; b: (1, OW*Cp) f32."""
    N, H, K = x.shape
    k = w.shape[0]
    nout = w.shape[2]
    kern = functools.partial(_conv_elu_kernel, k=k, oh_out=oh_out)
    cost = pl.CostEstimate(
        flops=int(2 * k * N * oh_out * K * nout),
        transcendentals=int(2 * N * oh_out * nout),
        bytes_accessed=int(N * H * K * 4 + w.size * 2 + nout * 4
                           + N * oh_out * nout * 4),
    )
    return pl.pallas_call(
        kern,
        out_shape=jax.ShapeDtypeStruct((N, oh_out, nout), jnp.float32),
        grid=(N,),
        in_specs=[
            pl.BlockSpec((1, H, K), lambda n: (n, 0, 0)),
            pl.BlockSpec(w.shape, lambda n: (0, 0, 0)),
            pl.BlockSpec((1, nout), lambda n: (0, 0)),
        ],
        out_specs=pl.BlockSpec((1, oh_out, nout), lambda n: (n, 0, 0)),
        compiler_params=_COMPILER_PARAMS,
        cost_estimate=cost,
    )(x, w, b)


def mlp_elu4(x, ws, bs):
    """x: (M, 320) f32; ws: 4 bf16 (K, N) weights; bs: 4 f32 (1, N) biases."""
    M, K = x.shape
    nout = ws[-1].shape[1]
    tm = M if M <= 512 else 512
    in_specs = [pl.BlockSpec((tm, K), lambda i: (i, 0))]
    args = [x]
    for w, b in zip(ws, bs):
        in_specs.append(pl.BlockSpec(w.shape, lambda i: (0, 0)))
        in_specs.append(pl.BlockSpec(b.shape, lambda i: (0, 0)))
        args.append(w)
        args.append(b)
    flops = sum(2 * M * w.shape[0] * w.shape[1] for w in ws)
    trans = sum(2 * M * w.shape[1] for w in ws)
    nbytes = (M * K * 4 + sum(int(w.size) * 2 for w in ws)
              + sum(int(b.size) * 4 for b in bs) + M * nout * 4)
    return pl.pallas_call(
        _mlp_elu4_kernel,
        out_shape=jax.ShapeDtypeStruct((M, nout), jnp.float32),
        grid=(pl.cdiv(M, tm),),
        in_specs=in_specs,
        out_specs=pl.BlockSpec((tm, nout), lambda i: (i, 0)),
        compiler_params=_COMPILER_PARAMS,
        cost_estimate=pl.CostEstimate(flops=int(flops),
                                      transcendentals=int(trans),
                                      bytes_accessed=int(nbytes)),
    )(*args)


# ----------------------------------------------------------------------------
# Weight preprocessing (host-side, once at init): banded conv weight slabs
# ----------------------------------------------------------------------------
def _banded(w_conv, *, w_in, ow_out, ow_stride, q, cin_act, coutp, k=5,
            k_pad=None):
    """Banded matrix B s.t. row-shifted matmuls implement the conv.

    B[dh, iw*cin_act + c, ow*coutp + co] = w_conv[co, c, dh, iw-(ow*s+q)]
    (zero outside the kernel band / for padded channels).
    """
    w_conv = np.asarray(w_conv, np.float32)
    cout, cin = w_conv.shape[0], w_conv.shape[1]
    B = np.zeros((k, w_in, cin_act, ow_out, coutp), np.float32)
    for dh in range(k):
        for dw in range(k):
            wt = np.ascontiguousarray(w_conv[:, :, dh, dw].T)   # (cin, cout)
            for ow in range(ow_out):
                iw = ow * ow_stride + q + dw
                B[dh, iw, :cin, ow, :cout] = wt
    B = B.reshape(k, w_in * cin_act, ow_out * coutp)
    if k_pad is not None and k_pad > B.shape[1]:
        B = np.pad(B, ((0, 0), (0, k_pad - B.shape[1]), (0, 0)))
    return B


def _banded_pooled(w_conv, *, w_in, ow2, cin_act, coutp, k=5, k_pad=None):
    parts = [_banded(w_conv, w_in=w_in, ow_out=ow2, ow_stride=2, q=q,
                     cin_act=cin_act, coutp=coutp, k=k, k_pad=k_pad)
             for q in (0, 1)]
    return np.concatenate(parts, axis=0)          # rows [q*k + dh]


def _bias_row(b, ow_out, coutp):
    b = np.asarray(b, np.float32)
    row = np.zeros((ow_out, coutp), np.float32)
    row[:, : b.shape[0]] = b[None, :]
    return jnp.asarray(row.reshape(1, ow_out * coutp))


def _upsample_pad_nhwc(x, stride, output_padding, k):
    """ConvTranspose2d input prep: zero-insert, output_padding, (k-1) halo."""
    N, H, W, C = x.shape
    UH = (H - 1) * stride + 1 + output_padding
    UW = (W - 1) * stride + 1 + output_padding
    up = jnp.zeros((N, UH, UW, C), x.dtype)
    up = up.at[:, ::stride, ::stride, :].set(x)
    return jnp.pad(up, ((0, 0), (k - 1, k - 1), (k - 1, k - 1), (0, 0)))


# ----------------------------------------------------------------------------
# Parameters (PyTorch-style uniform(-1/sqrt(fan_in), +1/sqrt(fan_in)))
# ----------------------------------------------------------------------------
_CP = 32      # padded output-channel count for conv/deconv1 (lane density)
_CP2 = 4      # padded output-channel count for the final deconv (Cout=1)


def init_params(key, hidden_dim):
    ks = jax.random.split(key, 16)

    def u(k, shape, fan_in):
        bound = 1.0 / float(fan_in) ** 0.5
        return np.asarray(jax.random.uniform(k, shape, jnp.float32,
                                             -bound, bound))

    p = {}

    # encoder Conv2d(1, 10, 5): 28x28 -> 24x24 -> pool 12x12
    w = u(ks[0], (10, 1, 5, 5), 25)
    b = u(ks[1], (10,), 25)
    p["c1_w"] = jnp.asarray(
        _banded_pooled(w, w_in=28, ow2=12, cin_act=1, coutp=_CP, k_pad=32),
        jnp.bfloat16)
    p["c1_b"] = _bias_row(b, 12, _CP)

    # encoder Conv2d(10, 20, 5): 12x12 -> 8x8 -> pool 4x4
    w = u(ks[2], (20, 10, 5, 5), 250)
    b = u(ks[3], (20,), 250)
    p["c2_w"] = jnp.asarray(
        _banded_pooled(w, w_in=12, ow2=4, cin_act=_CP, coutp=_CP),
        jnp.bfloat16)
    p["c2_b"] = _bias_row(b, 4, _CP)

    # Linear(320,50), Linear(50,h), Linear(h,50), Linear(50,320)
    p["l1_w"] = jnp.asarray(u(ks[4], (50, 320), 320).T, jnp.bfloat16)
    p["l1_b"] = jnp.asarray(u(ks[5], (50,), 320).reshape(1, -1))
    p["l2_w"] = jnp.asarray(u(ks[6], (hidden_dim, 50), 50).T, jnp.bfloat16)
    p["l2_b"] = jnp.asarray(u(ks[7], (hidden_dim,), 50).reshape(1, -1))
    p["l3_w"] = jnp.asarray(u(ks[8], (50, hidden_dim), hidden_dim).T,
                            jnp.bfloat16)
    p["l3_b"] = jnp.asarray(u(ks[9], (50,), hidden_dim).reshape(1, -1))
    p["l4_w"] = jnp.asarray(u(ks[10], (320, 50), 50).T, jnp.bfloat16)
    p["l4_b"] = jnp.asarray(u(ks[11], (320,), 50).reshape(1, -1))

    # decoder ConvTranspose2d(20, 10, 5, stride=2, output_padding=1): 4->12
    w = u(ks[12], (20, 10, 5, 5), 10 * 25)
    b = u(ks[13], (10,), 10 * 25)
    wc = np.flip(w, (2, 3)).transpose(1, 0, 2, 3)   # conv-equivalent (10,20,5,5)
    p["t1_w"] = jnp.asarray(
        _banded(wc, w_in=16, ow_out=12, ow_stride=1, q=0, cin_act=20,
                coutp=_CP), jnp.bfloat16)
    p["t1_b"] = _bias_row(b, 12, _CP)

    # decoder ConvTranspose2d(10, 1, 5, stride=2, output_padding=1): 12->28
    w = u(ks[14], (10, 1, 5, 5), 25)
    b = u(ks[15], (1,), 25)
    wc = np.flip(w, (2, 3)).transpose(1, 0, 2, 3)   # conv-equivalent (1,10,5,5)
    p["t2_w"] = jnp.asarray(
        _banded(wc, w_in=32, ow_out=28, ow_stride=1, q=0, cin_act=10,
                coutp=_CP2), jnp.bfloat16)
    p["t2_b"] = _bias_row(b, 28, _CP2)
    return p


# ----------------------------------------------------------------------------
# Forward pass (matches Autoencoder.forward)
# ----------------------------------------------------------------------------
def autoencoder_forward(params, x):
    N = x.shape[0]
    # ---------------- encoder ----------------
    a = x.reshape(N, 28, 28)                           # NCHW, C=1 -> (N,H,W)
    a = jnp.pad(a, ((0, 0), (0, 0), (0, 4)))           # pad K lanes 28 -> 32
    a = conv_pool_elu(a, params["c1_w"], params["c1_b"], oh_out=12)  # (N,12,384)
    a = conv_pool_elu(a, params["c2_w"], params["c2_b"], oh_out=4)   # (N,4,128)
    t = a.reshape(N, 4, 4, _CP)[:, :, :, :20]
    t = jnp.transpose(t, (0, 3, 1, 2)).reshape(N, 320)  # torch Flatten order
    # -------- fused 4x (Linear + ELU) bottleneck --------
    z = mlp_elu4(t,
                 (params["l1_w"], params["l2_w"], params["l3_w"], params["l4_w"]),
                 (params["l1_b"], params["l2_b"], params["l3_b"], params["l4_b"]))
    # ---------------- decoder ----------------
    d = jnp.transpose(z.reshape(N, 20, 4, 4), (0, 2, 3, 1))   # Unflatten -> NHWC
    d = _upsample_pad_nhwc(d, 2, 1, 5).reshape(N, 16, 16 * 20)
    d = conv_elu(d, params["t1_w"], params["t1_b"], oh_out=12)       # (N,12,384)
    d = d.reshape(N, 12, 12, _CP)[:, :, :, :10]
    d = _upsample_pad_nhwc(d, 2, 1, 5).reshape(N, 32, 32 * 10)
    d = conv_elu(d, params["t2_w"], params["t2_b"], oh_out=28)       # (N,28,112)
    out = d.reshape(N, 28, 28, _CP2)[:, :, :, :1]
    return jnp.transpose(out, (0, 3, 1, 2))                          # (N,1,28,28)


# ----------------------------------------------------------------------------
if __name__ == "__main__":
    key = jax.random.PRNGKey(0)
    k_param, k_x = jax.random.split(key)

    hidden_dim = 32
    batch = 2
    # The module's Linear(320, 50) after two conv+pool stages forces 1x28x28.
    x = jax.random.normal(k_x, (batch, 1, 28, 28), jnp.float32)
    params = init_params(k_param, hidden_dim)

    fwd = jax.jit(autoencoder_forward)
    out = jax.block_until_ready(fwd(params, x))

    assert out.shape == (batch, 1, 28, 28), out.shape
    assert out.dtype == jnp.float32
    assert bool(jnp.all(jnp.isfinite(out)))
    print("KERNEL_OK")
</pallas_src>

<mosaic_0001>
module attributes {stable_mosaic.version = 11 : i64} {
  func.func @_conv_pool_elu_kernel(%arg0: i32, %arg1: memref<1x14x32xf32, #tpu.memory_space<vmem>>, %arg2: memref<1x14x32xf32, #tpu.memory_space<vmem>>, %arg3: memref<10x32x384xbf16, #tpu.memory_space<vmem>>, %arg4: memref<1x384xf32, #tpu.memory_space<vmem>>, %arg5: memref<1x12x384xf32, #tpu.memory_space<vmem>>) attributes {dimension_semantics = [#tpu.dimension_semantics<parallel>], iteration_bounds = array<i64: 2>, scalar_prefetch = 0 : i64, scratch_operands = 0 : i64, tpu.core_type = #tpu.core_type<tc>, window_params = [{transform_indices = @transform_0, window_bounds = array<i64: 1, 14, 32>}, {transform_indices = @transform_1, window_bounds = array<i64: 1, 14, 32>}, {pipeline_mode = #tpu.pipeline_mode<synchronous>, transform_indices = @transform_2, window_bounds = array<i64: 10, 32, 384>}, {pipeline_mode = #tpu.pipeline_mode<synchronous>, transform_indices = @transform_3, window_bounds = array<i64: 1, 384>}, {transform_indices = @transform_4, window_bounds = array<i64: 1, 12, 384>}]} {
    %cst = arith.constant 0.000000e+00 : f32
    %0 = vector.broadcast %cst : f32 to vector<12x384xf32>
    %cst_0 = arith.constant 0.000000e+00 : f32
    %1 = vector.broadcast %cst_0 : f32 to vector<12x384xf32>
    %c0 = arith.constant 0 : index
    %c0_1 = arith.constant 0 : index
    %c0_2 = arith.constant 0 : index
    %2 = vector.load %arg1[%c0, %c0_1, %c0_2] : memref<1x14x32xf32, #tpu.memory_space<vmem>>, vector<1x12x32xf32>
    %3 = vector.shape_cast %2 : vector<1x12x32xf32> to vector<12x32xf32>
    %4 = arith.truncf %3 : vector<12x32xf32> to vector<12x32xbf16>
    %c0_3 = arith.constant 0 : index
    %c0_4 = arith.constant 0 : index
    %c0_5 = arith.constant 0 : index
    %5 = vector.load %arg3[%c0_3, %c0_4, %c0_5] : memref<10x32x384xbf16, #tpu.memory_space<vmem>>, vector<1x32x384xbf16>
    %6 = vector.shape_cast %5 : vector<1x32x384xbf16> to vector<32x384xbf16>
    %cst_6 = arith.constant dense<0.000000e+00> : vector<12x384xf32>
    %7 = tpu.matmul %4, %6, %cst_6 {dimension_numbers = #tpu.dot_dimension_numbers<[1], [0], [0], [1], [0, 0, 1, 1], [], []>} : vector<12x32xbf16>, vector<32x384xbf16>, vector<12x384xf32> -> vector<12x384xf32>
    %8 = arith.addf %0, %7 : vector<12x384xf32>
    %c5 = arith.constant 5 : index
    %c0_7 = arith.constant 0 : index
    %c0_8 = arith.constant 0 : index
    %9 = vector.load %arg3[%c5, %c0_7, %c0_8] : memref<10x32x384xbf16, #tpu.memory_space<vmem>>, vector<1x32x384xbf16>
    %10 = vector.shape_cast %9 : vector<1x32x384xbf16> to vector<32x384xbf16>
    %cst_9 = arith.constant dense<0.000000e+00> : vector<12x384xf32>
    %11 = tpu.matmul %4, %10, %cst_9 {dimension_numbers = #tpu.dot_dimension_numbers<[1], [0], [0], [1], [0, 0, 1, 1], [], []>} : vector<12x32xbf16>, vector<32x384xbf16>, vector<12x384xf32> -> vector<12x384xf32>
    %12 = arith.addf %1, %11 : vector<12x384xf32>
    %c0_10 = arith.constant 0 : index
    %c0_11 = arith.constant 0 : index
    %c0_12 = arith.constant 0 : index
    %13 = vector.load %arg2[%c0_10, %c0_11, %c0_12] : memref<1x14x32xf32, #tpu.memory_space<vmem>>, vector<1x12x32xf32>
    %14 = vector.shape_cast %13 : vector<1x12x32xf32> to vector<12x32xf32>
    %15 = arith.truncf %14 : vector<12x32xf32> to vector<12x32xbf16>
    %c1 = arith.constant 1 : index
    %c0_13 = arith.constant 0 : index
    %c0_14 = arith.constant 0 : index
    %16 = vector.load %arg3[%c1, %c0_13, %c0_14] : memref<10x32x384xbf16, #tpu.memory_space<vmem>>, vector<1x32x384xbf16>
    %17 = vector.shape_cast %16 : vector<1x32x384xbf16> to vector<32x384xbf16>
    %cst_15 = arith.constant dense<0.000000e+00> : vector<12x384xf32>
    %18 = tpu.matmul %15, %17, %cst_15 {dimension_numbers = #tpu.dot_dimension_numbers<[1], [0], [0], [1], [0, 0, 1, 1], [], []>} : vector<12x32xbf16>, vector<32x384xbf16>, vector<12x384xf32> -> vector<12x384xf32>
    %19 = arith.addf %8, %18 : vector<12x384xf32>
    %c6 = arith.constant 6 : index
    %c0_16 = arith.constant 0 : index
    %c0_17 = arith.constant 0 : index
    %20 = vector.load %arg3[%c6, %c0_16, %c0_17] : memref<10x32x384xbf16, #tpu.memory_space<vmem>>, vector<1x32x384xbf16>
    %21 = vector.shape_cast %20 : vector<1x32x384xbf16> to vector<32x384xbf16>
    %cst_18 = arith.constant dense<0.000000e+00> : vector<12x384xf32>
    %22 = tpu.matmul %15, %21, %cst_18 {dimension_numbers = #tpu.dot_dimension_numbers<[1], [0], [0], [1], [0, 0, 1, 1], [], []>} : vector<12x32xbf16>, vector<32x384xbf16>, vector<12x384xf32> -> vector<12x384xf32>
    %23 = arith.addf %12, %22 : vector<12x384xf32>
    %c0_19 = arith.constant 0 : index
    %c1_20 = arith.constant 1 : index
    %c0_21 = arith.constant 0 : index
    %24 = vector.load %arg1[%c0_19, %c1_20, %c0_21] : memref<1x14x32xf32, #tpu.memory_space<vmem>>, vector<1x12x32xf32>
    %25 = vector.shape_cast %24 : vector<1x12x32xf32> to vector<12x32xf32>
    %26 = arith.truncf %25 : vector<12x32xf32> to vector<12x32xbf16>
    %c2 = arith.constant 2 : index
    %c0_22 = arith.constant 0 : index
    %c0_23 = arith.constant 0 : index
    %27 = vector.load %arg3[%c2, %c0_22, %c0_23] : memref<10x32x384xbf16, #tpu.memory_space<vmem>>, vector<1x32x384xbf16>
    %28 = vector.shape_cast %27 : vector<1x32x384xbf16> to vector<32x384xbf16>
    %cst_24 = arith.constant dense<0.000000e+00> : vector<12x384xf32>
    %29 = tpu.matmul %26, %28, %cst_24 {dimension_numbers = #tpu.dot_dimension_numbers<[1], [0], [0], [1], [0, 0, 1, 1], [], []>} : vector<12x32xbf16>, vector<32x384xbf16>, vector<12x384xf32> -> vector<12x384xf32>
    %30 = arith.addf %19, %29 : vector<12x384xf32>
    %c7 = arith.constant 7 : index
    %c0_25 = arith.constant 0 : index
    %c0_26 = arith.constant 0 : index
    %31 = vector.load %arg3[%c7, %c0_25, %c0_26] : memref<10x32x384xbf16, #tpu.memory_space<vmem>>, vector<1x32x384xbf16>
    %32 = vector.shape_cast %31 : vector<1x32x384xbf16> to vector<32x384xbf16>
    %cst_27 = arith.constant dense<0.000000e+00> : vector<12x384xf32>
    %33 = tpu.matmul %26, %32, %cst_27 {dimension_numbers = #tpu.dot_dimension_numbers<[1], [0], [0], [1], [0, 0, 1, 1], [], []>} : vector<12x32xbf16>, vector<32x384xbf16>, vector<12x384xf32> -> vector<12x384xf32>
    %34 = arith.addf %23, %33 : vector<12x384xf32>
    %c0_28 = arith.constant 0 : index
    %c1_29 = arith.constant 1 : index
    %c0_30 = arith.constant 0 : index
    %35 = vector.load %arg2[%c0_28, %c1_29, %c0_30] : memref<1x14x32xf32, #tpu.memory_space<vmem>>, vector<1x12x32xf32>
    %36 = vector.shape_cast %35 : vector<1x12x32xf32> to vector<12x32xf32>
    %37 = arith.truncf %36 : vector<12x32xf32> to vector<12x32xbf16>
    %c3 = arith.constant 3 : index
    %c0_31 = arith.constant 0 : index
    %c0_32 = arith.constant 0 : index
    %38 = vector.load %arg3[%c3, %c0_31, %c0_32] : memref<10x32x384xbf16, #tpu.memory_space<vmem>>, vector<1x32x384xbf16>
    %39 = vector.shape_cast %38 : vector<1x32x384xbf16> to vector<32x384xbf16>
    %cst_33 = arith.constant dense<0.000000e+00> : vector<12x384xf32>
    %40 = tpu.matmul %37, %39, %cst_33 {dimension_numbers = #tpu.dot_dimension_numbers<[1], [0], [0], [1], [0, 0, 1, 1], [], []>} : vector<12x32xbf16>, vector<32x384xbf16>, vector<12x384xf32> -> vector<12x384xf32>
    %41 = arith.addf %30, %40 : vector<12x384xf32>
    %c8 = arith.constant 8 : index
    %c0_34 = arith.constant 0 : index
    %c0_35 = arith.constant 0 : index
    %42 = vector.load %arg3[%c8, %c0_34, %c0_35] : memref<10x32x384xbf16, #tpu.memory_space<vmem>>, vector<1x32x384xbf16>
    %43 = vector.shape_cast %42 : vector<1x32x384xbf16> to vector<32x384xbf16>
    %cst_36 = arith.constant dense<0.000000e+00> : vector<12x384xf32>
    %44 = tpu.matmul %37, %43, %cst_36 {dimension_numbers = #tpu.dot_dimension_numbers<[1], [0], [0], [1], [0, 0, 1, 1], [], []>} : vector<12x32xbf16>, vector<32x384xbf16>, vector<12x384xf32> -> vector<12x384xf32>
    %45 = arith.addf %34, %44 : vector<12x384xf32>
    %c0_37 = arith.constant 0 : index
    %c2_38 = arith.constant 2 : index
    %c0_39 = arith.constant 0 : index
    %46 = vector.load %arg1[%c0_37, %c2_38, %c0_39] : memref<1x14x32xf32, #tpu.memory_space<vmem>>, vector<1x12x32xf32>
    %47 = vector.shape_cast %46 : vector<1x12x32xf32> to vector<12x32xf32>
    %48 = arith.truncf %47 : vector<12x32xf32> to vector<12x32xbf16>
    %c4 = arith.constant 4 : index
    %c0_40 = arith.constant 0 : index
    %c0_41 = arith.constant 0 : index
    %49 = vector.load %arg3[%c4, %c0_40, %c0_41] : memref<10x32x384xbf16, #tpu.memory_space<vmem>>, vector<1x32x384xbf16>
    %50 = vector.shape_cast %49 : vector<1x32x384xbf16> to vector<32x384xbf16>
    %cst_42 = arith.constant dense<0.000000e+00> : vector<12x384xf32>
    %51 = tpu.matmul %48, %50, %cst_42 {dimension_numbers = #tpu.dot_dimension_numbers<[1], [0], [0], [1], [0, 0, 1, 1], [], []>} : vector<12x32xbf16>, vector<32x384xbf16>, vector<12x384xf32> -> vector<12x384xf32>
    %52 = arith.addf %41, %51 : vector<12x384xf32>
    %c9 = arith.constant 9 : index
    %c0_43 = arith.constant 0 : index
    %c0_44 = arith.constant 0 : index
    %53 = vector.load %arg3[%c9, %c0_43, %c0_44] : memref<10x32x384xbf16, #tpu.memory_space<vmem>>, vector<1x32x384xbf16>
    %54 = vector.shape_cast %53 : vector<1x32x384xbf16> to vector<32x384xbf16>
    %cst_45 = arith.constant dense<0.000000e+00> : vector<12x384xf32>
    %55 = tpu.matmul %48, %54, %cst_45 {dimension_numbers = #tpu.dot_dimension_numbers<[1], [0], [0], [1], [0, 0, 1, 1], [], []>} : vector<12x32xbf16>, vector<32x384xbf16>, vector<12x384xf32> -> vector<12x384xf32>
    %56 = arith.addf %45, %55 : vector<12x384xf32>
    %57 = arith.maximumf %52, %56 : vector<12x384xf32>
    %cst_46 = arith.constant 0.000000e+00 : f32
    %58 = vector.broadcast %cst_46 : f32 to vector<12x384xf32>
    %cst_47 = arith.constant 0.000000e+00 : f32
    %59 = vector.broadcast %cst_47 : f32 to vector<12x384xf32>
    %c0_48 = arith.constant 0 : index
    %c0_49 = arith.constant 0 : index
    %c0_50 = arith.constant 0 : index
    %60 = vector.load %arg2[%c0_48, %c0_49, %c0_50] : memref<1x14x32xf32, #tpu.memory_space<vmem>>, vector<1x12x32xf32>
    %61 = vector.shape_cast %60 : vector<1x12x32xf32> to vector<12x32xf32>
    %62 = arith.truncf %61 : vector<12x32xf32> to vector<12x32xbf16>
    %c0_51 = arith.constant 0 : index
    %c0_52 = arith.constant 0 : index
    %c0_53 = arith.constant 0 : index
    %63 = vector.load %arg3[%c0_51, %c0_52, %c0_53] : memref<10x32x384xbf16, #tpu.memory_space<vmem>>, vector<1x32x384xbf16>
    %64 = vector.shape_cast %63 : vector<1x32x384xbf16> to vector<32x384xbf16>
    %cst_54 = arith.constant dense<0.000000e+00> : vector<12x384xf32>
    %65 = tpu.matmul %62, %64, %cst_54 {dimension_numbers = #tpu.dot_dimension_numbers<[1], [0], [0], [1], [0, 0, 1, 1], [], []>} : vector<12x32xbf16>, vector<32x384xbf16>, vector<12x384xf32> -> vector<12x384xf32>
    %66 = arith.addf %58, %65 : vector<12x384xf32>
    %c5_55 = arith.constant 5 : index
    %c0_56 = arith.constant 0 : index
    %c0_57 = arith.constant 0 : index
    %67 = vector.load %arg3[%c5_55, %c0_56, %c0_57] : memref<10x32x384xbf16, #tpu.memory_space<vmem>>, vector<1x32x384xbf16>
    %68 = vector.shape_cast %67 : vector<1x32x384xbf16> to vector<32x384xbf16>
    %cst_58 = arith.constant dense<0.000000e+00> : vector<12x384xf32>
    %69 = tpu.matmul %62, %68, %cst_58 {dimension_numbers = #tpu.dot_dimension_numbers<[1], [0], [0], [1], [0, 0, 1, 1], [], []>} : vector<12x32xbf16>, vector<32x384xbf16>, vector<12x384xf32> -> vector<12x384xf32>
    %70 = arith.addf %59, %69 : vector<12x384xf32>
    %c0_59 = arith.constant 0 : index
    %c1_60 = arith.constant 1 : index
    %c0_61 = arith.constant 0 : index
    %71 = vector.load %arg1[%c0_59, %c1_60, %c0_61] : memref<1x14x32xf32, #tpu.memory_space<vmem>>, vector<1x12x32xf32>
    %72 = vector.shape_cast %71 : vector<1x12x32xf32> to vector<12x32xf32>
    %73 = arith.truncf %72 : vector<12x32xf32> to vector<12x32xbf16>
    %c1_62 = arith.constant 1 : index
    %c0_63 = arith.constant 0 : index
    %c0_64 = arith.constant 0 : index
    %74 = vector.load %arg3[%c1_62, %c0_63, %c0_64] : memref<10x32x384xbf16, #tpu.memory_space<vmem>>, vector<1x32x384xbf16>
    %75 = vector.shape_cast %74 : vector<1x32x384xbf16> to vector<32x384xbf16>
    %cst_65 = arith.constant dense<0.000000e+00> : vector<12x384xf32>
    %76 = tpu.matmul %73, %75, %cst_65 {dimension_numbers = #tpu.dot_dimension_numbers<[1], [0], [0], [1], [0, 0, 1, 1], [], []>} : vector<12x32xbf16>, vector<32x384xbf16>, vector<12x384xf32> -> vector<12x384xf32>
    %77 = arith.addf %66, %76 : vector<12x384xf32>
    %c6_66 = arith.constant 6 : index
    %c0_67 = arith.constant 0 : index
    %c0_68 = arith.constant 0 : index
    %78 = vector.load %arg3[%c6_66, %c0_67, %c0_68] : memref<10x32x384xbf16, #tpu.memory_space<vmem>>, vector<1x32x384xbf16>
    %79 = vector.shape_cast %78 : vector<1x32x384xbf16> to vector<32x384xbf16>
    %cst_69 = arith.constant dense<0.000000e+00> : vector<12x384xf32>
    %80 = tpu.matmul %73, %79, %cst_69 {dimension_numbers = #tpu.dot_dimension_numbers<[1], [0], [0], [1], [0, 0, 1, 1], [], []>} : vector<12x32xbf16>, vector<32x384xbf16>, vector<12x384xf32> -> vector<12x384xf32>
    %81 = arith.addf %70, %80 : vector<12x384xf32>
    %c0_70 = arith.constant 0 : index
    %c1_71 = arith.constant 1 : index
    %c0_72 = arith.constant 0 : index
    %82 = vector.load %arg2[%c0_70, %c1_71, %c0_72] : memref<1x14x32xf32, #tpu.memory_space<vmem>>, vector<1x12x32xf32>
    %83 = vector.shape_cast %82 : vector<1x12x32xf32> to vector<12x32xf32>
    %84 = arith.truncf %83 : vector<12x32xf32> to vector<12x32xbf16>
    %c2_73 = arith.constant 2 : index
    %c0_74 = arith.constant 0 : index
    %c0_75 = arith.constant 0 : index
    %85 = vector.load %arg3[%c2_73, %c0_74, %c0_75] : memref<10x32x384xbf16, #tpu.memory_space<vmem>>, vector<1x32x384xbf16>
    %86 = vector.shape_cast %85 : vector<1x32x384xbf16> to vector<32x384xbf16>
    %cst_76 = arith.constant dense<0.000000e+00> : vector<12x384xf32>
    %87 = tpu.matmul %84, %86, %cst_76 {dimension_numbers = #tpu.dot_dimension_numbers<[1], [0], [0], [1], [0, 0, 1, 1], [], []>} : vector<12x32xbf16>, vector<32x384xbf16>, vector<12x384xf32> -> vector<12x384xf32>
    %88 = arith.addf %77, %87 : vector<12x384xf32>
    %c7_77 = arith.constant 7 : index
    %c0_78 = arith.constant 0 : index
    %c0_79 = arith.constant 0 : index
    %89 = vector.load %arg3[%c7_77, %c0_78, %c0_79] : memref<10x32x384xbf16, #tpu.memory_space<vmem>>, vector<1x32x384xbf16>
    %90 = vector.shape_cast %89 : vector<1x32x384xbf16> to vector<32x384xbf16>
    %cst_80 = arith.constant dense<0.000000e+00> : vector<12x384xf32>
    %91 = tpu.matmul %84, %90, %cst_80 {dimension_numbers = #tpu.dot_dimension_numbers<[1], [0], [0], [1], [0, 0, 1, 1], [], []>} : vector<12x32xbf16>, vector<32x384xbf16>, vector<12x384xf32> -> vector<12x384xf32>
    %92 = arith.addf %81, %91 : vector<12x384xf32>
    %c0_81 = arith.constant 0 : index
    %c2_82 = arith.constant 2 : index
    %c0_83 = arith.constant 0 : index
    %93 = vector.load %arg1[%c0_81, %c2_82, %c0_83] : memref<1x14x32xf32, #tpu.memory_space<vmem>>, vector<1x12x32xf32>
    %94 = vector.shape_cast %93 : vector<1x12x32xf32> to vector<12x32xf32>
    %95 = arith.truncf %94 : vector<12x32xf32> to vector<12x32xbf16>
    %c3_84 = arith.constant 3 : index
    %c0_85 = arith.constant 0 : index
    %c0_86 = arith.constant 0 : index
    %96 = vector.load %arg3[%c3_84, %c0_85, %c0_86] : memref<10x32x384xbf16, #tpu.memory_space<vmem>>, vector<1x32x384xbf16>
    %97 = vector.shape_cast %96 : vector<1x32x384xbf16> to vector<32x384xbf16>
    %cst_87 = arith.constant dense<0.000000e+00> : vector<12x384xf32>
    %98 = tpu.matmul %95, %97, %cst_87 {dimension_numbers = #tpu.dot_dimension_numbers<[1], [0], [0], [1], [0, 0, 1, 1], [], []>} : vector<12x32xbf16>, vector<32x384xbf16>, vector<12x384xf32> -> vector<12x384xf32>
    %99 = arith.addf %88, %98 : vector<12x384xf32>
    %c8_88 = arith.constant 8 : index
    %c0_89 = arith.constant 0 : index
    %c0_90 = arith.constant 0 : index
    %100 = vector.load %arg3[%c8_88, %c0_89, %c0_90] : memref<10x32x384xbf16, #tpu.memory_space<vmem>>, vector<1x32x384xbf16>
    %101 = vector.shape_cast %100 : vector<1x32x384xbf16> to vector<32x384xbf16>
    %cst_91 = arith.constant dense<0.000000e+00> : vector<12x384xf32>
    %102 = tpu.matmul %95, %101, %cst_91 {dimension_numbers = #tpu.dot_dimension_numbers<[1], [0], [0], [1], [0, 0, 1, 1], [], []>} : vector<12x32xbf16>, vector<32x384xbf16>, vector<12x384xf32> -> vector<12x384xf32>
    %103 = arith.addf %92, %102 : vector<12x384xf32>
    %c0_92 = arith.constant 0 : index
    %c2_93 = arith.constant 2 : index
    %c0_94 = arith.constant 0 : index
    %104 = vector.load %arg2[%c0_92, %c2_93, %c0_94] : memref<1x14x32xf32, #tpu.memory_space<vmem>>, vector<1x12x32xf32>
    %105 = vector.shape_cast %104 : vector<1x12x32xf32> to vector<12x32xf32>
    %106 = arith.truncf %105 : vector<12x32xf32> to vector<12x32xbf16>
    %c4_95 = arith.constant 4 : index
    %c0_96 = arith.constant 0 : index
    %c0_97 = arith.constant 0 : index
    %107 = vector.load %arg3[%c4_95, %c0_96, %c0_97] : memref<10x32x384xbf16, #tpu.memory_space<vmem>>, vector<1x32x384xbf16>
    %108 = vector.shape_cast %107 : vector<1x32x384xbf16> to vector<32x384xbf16>
    %cst_98 = arith.constant dense<0.000000e+00> : vector<12x384xf32>
    %109 = tpu.matmul %106, %108, %cst_98 {dimension_numbers = #tpu.dot_dimension_numbers<[1], [0], [0], [1], [0, 0, 1, 1], [], []>} : vector<12x32xbf16>, vector<32x384xbf16>, vector<12x384xf32> -> vector<12x384xf32>
    %110 = arith.addf %99, %109 : vector<12x384xf32>
    %c9_99 = arith.constant 9 : index
    %c0_100 = arith.constant 0 : index
    %c0_101 = arith.constant 0 : index
    %111 = vector.load %arg3[%c9_99, %c0_100, %c0_101] : memref<10x32x384xbf16, #tpu.memory_space<vmem>>, vector<1x32x384xbf16>
    %112 = vector.shape_cast %111 : vector<1x32x384xbf16> to vector<32x384xbf16>
    %cst_102 = arith.constant dense<0.000000e+00> : vector<12x384xf32>
    %113 = tpu.matmul %106, %112, %cst_102 {dimension_numbers = #tpu.dot_dimension_numbers<[1], [0], [0], [1], [0, 0, 1, 1], [], []>} : vector<12x32xbf16>, vector<32x384xbf16>, vector<12x384xf32> -> vector<12x384xf32>
    %114 = arith.addf %103, %113 : vector<12x384xf32>
    %115 = arith.maximumf %110, %114 : vector<12x384xf32>
    %116 = arith.maximumf %57, %115 : vector<12x384xf32>
    %c0_103 = arith.constant 0 : index
    %c0_104 = arith.constant 0 : index
    %117 = vector.load %arg4[%c0_103, %c0_104] : memref<1x384xf32, #tpu.memory_space<vmem>>, vector<1x384xf32>
    %118 = vector.broadcast %117 : vector<1x384xf32> to vector<12x384xf32>
    %119 = arith.addf %116, %118 : vector<12x384xf32>
    %cst_105 = arith.constant 0.000000e+00 : f32
    %120 = vector.broadcast %cst_105 : f32 to vector<12x384xf32>
    %121 = arith.minimumf %119, %120 : vector<12x384xf32>
    %cst_106 = arith.constant 5.000000e-01 : f32
    %122 = vector.broadcast %cst_106 : f32 to vector<12x384xf32>
    %123 = arith.mulf %121, %122 : vector<12x384xf32>
    %124 = math.tanh %123 : vector<12x384xf32>
    %125 = math.exp %121 : vector<12x384xf32>
    %cst_107 = arith.constant 1.000000e+00 : f32
    %126 = vector.broadcast %cst_107 : f32 to vector<12x384xf32>
    %127 = arith.addf %125, %126 : vector<12x384xf32>
    %128 = arith.mulf %124, %127 : vector<12x384xf32>
    %cst_108 = arith.constant 0.000000e+00 : f32
    %129 = vector.broadcast %cst_108 : f32 to vector<12x384xf32>
    %130 = arith.cmpf ogt, %119, %129 : vector<12x384xf32>
    %131 = arith.select %130, %119, %128 : vector<12x384xi1>, vector<12x384xf32>
    %c0_109 = arith.constant 0 : index
    %c0_110 = arith.constant 0 : index
    %c0_111 = arith.constant 0 : index
    %132 = vector.load %arg5[%c0_109, %c0_110, %c0_111] : memref<1x12x384xf32, #tpu.memory_space<vmem>>, vector<1x12x384xf32>
    %133 = vector.shape_cast %132 : vector<1x12x384xf32> to vector<12x384xf32>
    %134 = vector.shape_cast %131 : vector<12x384xf32> to vector<1x12x384xf32>
    tpu.vector_store %arg5[%c0_109, %c0_110, %c0_111], %134 {strides = array<i32>} : memref<1x12x384xf32, #tpu.memory_space<vmem>>, vector<1x12x384xf32>,
    return
  }
  func.func @transform_0(%arg0: i32) -> (i32, i32, i32) {
    %c0_i32 = arith.constant 0 : i32
    %c0_i32_0 = arith.constant 0 : i32
    %c0_i32_1 = arith.constant 0 : i32
    return %arg0, %c0_i32, %c0_i32_0 : i32, i32, i32
  }
  func.func @transform_1(%arg0: i32) -> (i32, i32, i32) {
    %c0_i32 = arith.constant 0 : i32
    %c0_i32_0 = arith.constant 0 : i32
    %c0_i32_1 = arith.constant 0 : i32
    return %arg0, %c0_i32, %c0_i32_0 : i32, i32, i32
  }
  func.func @transform_2(%arg0: i32) -> (i32, i32, i32) {
    %c0_i32 = arith.constant 0 : i32
    %c0_i32_0 = arith.constant 0 : i32
    %c0_i32_1 = arith.constant 0 : i32
    %c0_i32_2 = arith.constant 0 : i32
    return %c0_i32, %c0_i32_0, %c0_i32_1 : i32, i32, i32
  }
  func.func @transform_3(%arg0: i32) -> (i32, i32) {
    %c0_i32 = arith.constant 0 : i32
    %c0_i32_0 = arith.constant 0 : i32
    %c0_i32_1 = arith.constant 0 : i32
    return %c0_i32, %c0_i32_0 : i32, i32
  }
  func.func @transform_4(%arg0: i32) -> (i32, i32, i32) {
    %c0_i32 = arith.constant 0 : i32
    %c0_i32_0 = arith.constant 0 : i32
    %c0_i32_1 = arith.constant 0 : i32
    return %arg0, %c0_i32, %c0_i32_0 : i32, i32, i32
  }
}

module attributes {stable_mosaic.version = 11 : i64} {
  func.func @_conv_pool_elu_kernel(%arg0: i32, %arg1: memref<1x6x384xf32, #tpu.memory_space<vmem>>, %arg2: memref<1x6x384xf32, #tpu.memory_space<vmem>>, %arg3: memref<10x384x128xbf16, #tpu.memory_space<vmem>>, %arg4: memref<1x128xf32, #tpu.memory_space<vmem>>, %arg5: memref<1x4x128xf32, #tpu.memory_space<vmem>>) attributes {dimension_semantics = [#tpu.dimension_semantics<parallel>], iteration_bounds = array<i64: 2>, scalar_prefetch = 0 : i64, scratch_operands = 0 : i64, tpu.core_type = #tpu.core_type<tc>, window_params = [{transform_indices = @transform_0, window_bounds = array<i64: 1, 6, 384>}, {transform_indices = @transform_1, window_bounds = array<i64: 1, 6, 384>}, {pipeline_mode = #tpu.pipeline_mode<synchronous>, transform_indices = @transform_2, window_bounds = array<i64: 10, 384, 128>}, {pipeline_mode = #tpu.pipeline_mode<synchronous>, transform_indices = @transform_3, window_bounds = array<i64: 1, 128>}, {transform_indices = @transform_4, window_bounds = array<i64: 1, 4, 128>}]} {
    %cst = arith.constant 0.000000e+00 : f32
    %0 = vector.broadcast %cst : f32 to vector<4x128xf32>
    %cst_0 = arith.constant 0.000000e+00 : f32
    %1 = vector.broadcast %cst_0 : f32 to vector<4x128xf32>
    %c0 = arith.constant 0 : index
    %c0_1 = arith.constant 0 : index
    %c0_2 = arith.constant 0 : index
    %2 = vector.load %arg1[%c0, %c0_1, %c0_2] : memref<1x6x384xf32, #tpu.memory_space<vmem>>, vector<1x4x384xf32>
    %3 = vector.shape_cast %2 : vector<1x4x384xf32> to vector<4x384xf32>
    %4 = arith.truncf %3 : vector<4x384xf32> to vector<4x384xbf16>
    %c0_3 = arith.constant 0 : index
    %c0_4 = arith.constant 0 : index
    %c0_5 = arith.constant 0 : index
    %5 = vector.load %arg3[%c0_3, %c0_4, %c0_5] : memref<10x384x128xbf16, #tpu.memory_space<vmem>>, vector<1x384x128xbf16>
    %6 = vector.shape_cast %5 : vector<1x384x128xbf16> to vector<384x128xbf16>
    %cst_6 = arith.constant dense<0.000000e+00> : vector<4x128xf32>
    %7 = tpu.matmul %4, %6, %cst_6 {dimension_numbers = #tpu.dot_dimension_numbers<[1], [0], [0], [1], [0, 0, 1, 1], [], []>} : vector<4x384xbf16>, vector<384x128xbf16>, vector<4x128xf32> -> vector<4x128xf32>
    %8 = arith.addf %0, %7 : vector<4x128xf32>
    %c5 = arith.constant 5 : index
    %c0_7 = arith.constant 0 : index
    %c0_8 = arith.constant 0 : index
    %9 = vector.load %arg3[%c5, %c0_7, %c0_8] : memref<10x384x128xbf16, #tpu.memory_space<vmem>>, vector<1x384x128xbf16>
    %10 = vector.shape_cast %9 : vector<1x384x128xbf16> to vector<384x128xbf16>
    %cst_9 = arith.constant dense<0.000000e+00> : vector<4x128xf32>
    %11 = tpu.matmul %4, %10, %cst_9 {dimension_numbers = #tpu.dot_dimension_numbers<[1], [0], [0], [1], [0, 0, 1, 1], [], []>} : vector<4x384xbf16>, vector<384x128xbf16>, vector<4x128xf32> -> vector<4x128xf32>
    %12 = arith.addf %1, %11 : vector<4x128xf32>
    %c0_10 = arith.constant 0 : index
    %c0_11 = arith.constant 0 : index
    %c0_12 = arith.constant 0 : index
    %13 = vector.load %arg2[%c0_10, %c0_11, %c0_12] : memref<1x6x384xf32, #tpu.memory_space<vmem>>, vector<1x4x384xf32>
    %14 = vector.shape_cast %13 : vector<1x4x384xf32> to vector<4x384xf32>
    %15 = arith.truncf %14 : vector<4x384xf32> to vector<4x384xbf16>
    %c1 = arith.constant 1 : index
    %c0_13 = arith.constant 0 : index
    %c0_14 = arith.constant 0 : index
    %16 = vector.load %arg3[%c1, %c0_13, %c0_14] : memref<10x384x128xbf16, #tpu.memory_space<vmem>>, vector<1x384x128xbf16>
    %17 = vector.shape_cast %16 : vector<1x384x128xbf16> to vector<384x128xbf16>
    %cst_15 = arith.constant dense<0.000000e+00> : vector<4x128xf32>
    %18 = tpu.matmul %15, %17, %cst_15 {dimension_numbers = #tpu.dot_dimension_numbers<[1], [0], [0], [1], [0, 0, 1, 1], [], []>} : vector<4x384xbf16>, vector<384x128xbf16>, vector<4x128xf32> -> vector<4x128xf32>
    %19 = arith.addf %8, %18 : vector<4x128xf32>
    %c6 = arith.constant 6 : index
    %c0_16 = arith.constant 0 : index
    %c0_17 = arith.constant 0 : index
    %20 = vector.load %arg3[%c6, %c0_16, %c0_17] : memref<10x384x128xbf16, #tpu.memory_space<vmem>>, vector<1x384x128xbf16>
    %21 = vector.shape_cast %20 : vector<1x384x128xbf16> to vector<384x128xbf16>
    %cst_18 = arith.constant dense<0.000000e+00> : vector<4x128xf32>
    %22 = tpu.matmul %15, %21, %cst_18 {dimension_numbers = #tpu.dot_dimension_numbers<[1], [0], [0], [1], [0, 0, 1, 1], [], []>} : vector<4x384xbf16>, vector<384x128xbf16>, vector<4x128xf32> -> vector<4x128xf32>
    %23 = arith.addf %12, %22 : vector<4x128xf32>
    %c0_19 = arith.constant 0 : index
    %c1_20 = arith.constant 1 : index
    %c0_21 = arith.constant 0 : index
    %24 = vector.load %arg1[%c0_19, %c1_20, %c0_21] : memref<1x6x384xf32, #tpu.memory_space<vmem>>, vector<1x4x384xf32>
    %25 = vector.shape_cast %24 : vector<1x4x384xf32> to vector<4x384xf32>
    %26 = arith.truncf %25 : vector<4x384xf32> to vector<4x384xbf16>
    %c2 = arith.constant 2 : index
    %c0_22 = arith.constant 0 : index
    %c0_23 = arith.constant 0 : index
    %27 = vector.load %arg3[%c2, %c0_22, %c0_23] : memref<10x384x128xbf16, #tpu.memory_space<vmem>>, vector<1x384x128xbf16>
    %28 = vector.shape_cast %27 : vector<1x384x128xbf16> to vector<384x128xbf16>
    %cst_24 = arith.constant dense<0.000000e+00> : vector<4x128xf32>
    %29 = tpu.matmul %26, %28, %cst_24 {dimension_numbers = #tpu.dot_dimension_numbers<[1], [0], [0], [1], [0, 0, 1, 1], [], []>} : vector<4x384xbf16>, vector<384x128xbf16>, vector<4x128xf32> -> vector<4x128xf32>
    %30 = arith.addf %19, %29 : vector<4x128xf32>
    %c7 = arith.constant 7 : index
    %c0_25 = arith.constant 0 : index
    %c0_26 = arith.constant 0 : index
    %31 = vector.load %arg3[%c7, %c0_25, %c0_26] : memref<10x384x128xbf16, #tpu.memory_space<vmem>>, vector<1x384x128xbf16>
    %32 = vector.shape_cast %31 : vector<1x384x128xbf16> to vector<384x128xbf16>
    %cst_27 = arith.constant dense<0.000000e+00> : vector<4x128xf32>
    %33 = tpu.matmul %26, %32, %cst_27 {dimension_numbers = #tpu.dot_dimension_numbers<[1], [0], [0], [1], [0, 0, 1, 1], [], []>} : vector<4x384xbf16>, vector<384x128xbf16>, vector<4x128xf32> -> vector<4x128xf32>
    %34 = arith.addf %23, %33 : vector<4x128xf32>
    %c0_28 = arith.constant 0 : index
    %c1_29 = arith.constant 1 : index
    %c0_30 = arith.constant 0 : index
    %35 = vector.load %arg2[%c0_28, %c1_29, %c0_30] : memref<1x6x384xf32, #tpu.memory_space<vmem>>, vector<1x4x384xf32>
    %36 = vector.shape_cast %35 : vector<1x4x384xf32> to vector<4x384xf32>
    %37 = arith.truncf %36 : vector<4x384xf32> to vector<4x384xbf16>
    %c3 = arith.constant 3 : index
    %c0_31 = arith.constant 0 : index
    %c0_32 = arith.constant 0 : index
    %38 = vector.load %arg3[%c3, %c0_31, %c0_32] : memref<10x384x128xbf16, #tpu.memory_space<vmem>>, vector<1x384x128xbf16>
    %39 = vector.shape_cast %38 : vector<1x384x128xbf16> to vector<384x128xbf16>
    %cst_33 = arith.constant dense<0.000000e+00> : vector<4x128xf32>
    %40 = tpu.matmul %37, %39, %cst_33 {dimension_numbers = #tpu.dot_dimension_numbers<[1], [0], [0], [1], [0, 0, 1, 1], [], []>} : vector<4x384xbf16>, vector<384x128xbf16>, vector<4x128xf32> -> vector<4x128xf32>
    %41 = arith.addf %30, %40 : vector<4x128xf32>
    %c8 = arith.constant 8 : index
    %c0_34 = arith.constant 0 : index
    %c0_35 = arith.constant 0 : index
    %42 = vector.load %arg3[%c8, %c0_34, %c0_35] : memref<10x384x128xbf16, #tpu.memory_space<vmem>>, vector<1x384x128xbf16>
    %43 = vector.shape_cast %42 : vector<1x384x128xbf16> to vector<384x128xbf16>
    %cst_36 = arith.constant dense<0.000000e+00> : vector<4x128xf32>
    %44 = tpu.matmul %37, %43, %cst_36 {dimension_numbers = #tpu.dot_dimension_numbers<[1], [0], [0], [1], [0, 0, 1, 1], [], []>} : vector<4x384xbf16>, vector<384x128xbf16>, vector<4x128xf32> -> vector<4x128xf32>
    %45 = arith.addf %34, %44 : vector<4x128xf32>
    %c0_37 = arith.constant 0 : index
    %c2_38 = arith.constant 2 : index
    %c0_39 = arith.constant 0 : index
    %46 = vector.load %arg1[%c0_37, %c2_38, %c0_39] : memref<1x6x384xf32, #tpu.memory_space<vmem>>, vector<1x4x384xf32>
    %47 = vector.shape_cast %46 : vector<1x4x384xf32> to vector<4x384xf32>
    %48 = arith.truncf %47 : vector<4x384xf32> to vector<4x384xbf16>
    %c4 = arith.constant 4 : index
    %c0_40 = arith.constant 0 : index
    %c0_41 = arith.constant 0 : index
    %49 = vector.load %arg3[%c4, %c0_40, %c0_41] : memref<10x384x128xbf16, #tpu.memory_space<vmem>>, vector<1x384x128xbf16>
    %50 = vector.shape_cast %49 : vector<1x384x128xbf16> to vector<384x128xbf16>
    %cst_42 = arith.constant dense<0.000000e+00> : vector<4x128xf32>
    %51 = tpu.matmul %48, %50, %cst_42 {dimension_numbers = #tpu.dot_dimension_numbers<[1], [0], [0], [1], [0, 0, 1, 1], [], []>} : vector<4x384xbf16>, vector<384x128xbf16>, vector<4x128xf32> -> vector<4x128xf32>
    %52 = arith.addf %41, %51 : vector<4x128xf32>
    %c9 = arith.constant 9 : index
    %c0_43 = arith.constant 0 : index
    %c0_44 = arith.constant 0 : index
    %53 = vector.load %arg3[%c9, %c0_43, %c0_44] : memref<10x384x128xbf16, #tpu.memory_space<vmem>>, vector<1x384x128xbf16>
    %54 = vector.shape_cast %53 : vector<1x384x128xbf16> to vector<384x128xbf16>
    %cst_45 = arith.constant dense<0.000000e+00> : vector<4x128xf32>
    %55 = tpu.matmul %48, %54, %cst_45 {dimension_numbers = #tpu.dot_dimension_numbers<[1], [0], [0], [1], [0, 0, 1, 1], [], []>} : vector<4x384xbf16>, vector<384x128xbf16>, vector<4x128xf32> -> vector<4x128xf32>
    %56 = arith.addf %45, %55 : vector<4x128xf32>
    %57 = arith.maximumf %52, %56 : vector<4x128xf32>
    %cst_46 = arith.constant 0.000000e+00 : f32
    %58 = vector.broadcast %cst_46 : f32 to vector<4x128xf32>
    %cst_47 = arith.constant 0.000000e+00 : f32
    %59 = vector.broadcast %cst_47 : f32 to vector<4x128xf32>
    %c0_48 = arith.constant 0 : index
    %c0_49 = arith.constant 0 : index
    %c0_50 = arith.constant 0 : index
    %60 = vector.load %arg2[%c0_48, %c0_49, %c0_50] : memref<1x6x384xf32, #tpu.memory_space<vmem>>, vector<1x4x384xf32>
    %61 = vector.shape_cast %60 : vector<1x4x384xf32> to vector<4x384xf32>
    %62 = arith.truncf %61 : vector<4x384xf32> to vector<4x384xbf16>
    %c0_51 = arith.constant 0 : index
    %c0_52 = arith.constant 0 : index
    %c0_53 = arith.constant 0 : index
    %63 = vector.load %arg3[%c0_51, %c0_52, %c0_53] : memref<10x384x128xbf16, #tpu.memory_space<vmem>>, vector<1x384x128xbf16>
    %64 = vector.shape_cast %63 : vector<1x384x128xbf16> to vector<384x128xbf16>
    %cst_54 = arith.constant dense<0.000000e+00> : vector<4x128xf32>
    %65 = tpu.matmul %62, %64, %cst_54 {dimension_numbers = #tpu.dot_dimension_numbers<[1], [0], [0], [1], [0, 0, 1, 1], [], []>} : vector<4x384xbf16>, vector<384x128xbf16>, vector<4x128xf32> -> vector<4x128xf32>
    %66 = arith.addf %58, %65 : vector<4x128xf32>
    %c5_55 = arith.constant 5 : index
    %c0_56 = arith.constant 0 : index
    %c0_57 = arith.constant 0 : index
    %67 = vector.load %arg3[%c5_55, %c0_56, %c0_57] : memref<10x384x128xbf16, #tpu.memory_space<vmem>>, vector<1x384x128xbf16>
    %68 = vector.shape_cast %67 : vector<1x384x128xbf16> to vector<384x128xbf16>
    %cst_58 = arith.constant dense<0.000000e+00> : vector<4x128xf32>
    %69 = tpu.matmul %62, %68, %cst_58 {dimension_numbers = #tpu.dot_dimension_numbers<[1], [0], [0], [1], [0, 0, 1, 1], [], []>} : vector<4x384xbf16>, vector<384x128xbf16>, vector<4x128xf32> -> vector<4x128xf32>
    %70 = arith.addf %59, %69 : vector<4x128xf32>
    %c0_59 = arith.constant 0 : index
    %c1_60 = arith.constant 1 : index
    %c0_61 = arith.constant 0 : index
    %71 = vector.load %arg1[%c0_59, %c1_60, %c0_61] : memref<1x6x384xf32, #tpu.memory_space<vmem>>, vector<1x4x384xf32>
    %72 = vector.shape_cast %71 : vector<1x4x384xf32> to vector<4x384xf32>
    %73 = arith.truncf %72 : vector<4x384xf32> to vector<4x384xbf16>
    %c1_62 = arith.constant 1 : index
    %c0_63 = arith.constant 0 : index
    %c0_64 = arith.constant 0 : index
    %74 = vector.load %arg3[%c1_62, %c0_63, %c0_64] : memref<10x384x128xbf16, #tpu.memory_space<vmem>>, vector<1x384x128xbf16>
    %75 = vector.shape_cast %74 : vector<1x384x128xbf16> to vector<384x128xbf16>
    %cst_65 = arith.constant dense<0.000000e+00> : vector<4x128xf32>
    %76 = tpu.matmul %73, %75, %cst_65 {dimension_numbers = #tpu.dot_dimension_numbers<[1], [0], [0], [1], [0, 0, 1, 1], [], []>} : vector<4x384xbf16>, vector<384x128xbf16>, vector<4x128xf32> -> vector<4x128xf32>
    %77 = arith.addf %66, %76 : vector<4x128xf32>
    %c6_66 = arith.constant 6 : index
    %c0_67 = arith.constant 0 : index
    %c0_68 = arith.constant 0 : index
    %78 = vector.load %arg3[%c6_66, %c0_67, %c0_68] : memref<10x384x128xbf16, #tpu.memory_space<vmem>>, vector<1x384x128xbf16>
    %79 = vector.shape_cast %78 : vector<1x384x128xbf16> to vector<384x128xbf16>
    %cst_69 = arith.constant dense<0.000000e+00> : vector<4x128xf32>
    %80 = tpu.matmul %73, %79, %cst_69 {dimension_numbers = #tpu.dot_dimension_numbers<[1], [0], [0], [1], [0, 0, 1, 1], [], []>} : vector<4x384xbf16>, vector<384x128xbf16>, vector<4x128xf32> -> vector<4x128xf32>
    %81 = arith.addf %70, %80 : vector<4x128xf32>
    %c0_70 = arith.constant 0 : index
    %c1_71 = arith.constant 1 : index
    %c0_72 = arith.constant 0 : index
    %82 = vector.load %arg2[%c0_70, %c1_71, %c0_72] : memref<1x6x384xf32, #tpu.memory_space<vmem>>, vector<1x4x384xf32>
    %83 = vector.shape_cast %82 : vector<1x4x384xf32> to vector<4x384xf32>
    %84 = arith.truncf %83 : vector<4x384xf32> to vector<4x384xbf16>
    %c2_73 = arith.constant 2 : index
    %c0_74 = arith.constant 0 : index
    %c0_75 = arith.constant 0 : index
    %85 = vector.load %arg3[%c2_73, %c0_74, %c0_75] : memref<10x384x128xbf16, #tpu.memory_space<vmem>>, vector<1x384x128xbf16>
    %86 = vector.shape_cast %85 : vector<1x384x128xbf16> to vector<384x128xbf16>
    %cst_76 = arith.constant dense<0.000000e+00> : vector<4x128xf32>
    %87 = tpu.matmul %84, %86, %cst_76 {dimension_numbers = #tpu.dot_dimension_numbers<[1], [0], [0], [1], [0, 0, 1, 1], [], []>} : vector<4x384xbf16>, vector<384x128xbf16>, vector<4x128xf32> -> vector<4x128xf32>
    %88 = arith.addf %77, %87 : vector<4x128xf32>
    %c7_77 = arith.constant 7 : index
    %c0_78 = arith.constant 0 : index
    %c0_79 = arith.constant 0 : index
    %89 = vector.load %arg3[%c7_77, %c0_78, %c0_79] : memref<10x384x128xbf16, #tpu.memory_space<vmem>>, vector<1x384x128xbf16>
    %90 = vector.shape_cast %89 : vector<1x384x128xbf16> to vector<384x128xbf16>
    %cst_80 = arith.constant dense<0.000000e+00> : vector<4x128xf32>
    %91 = tpu.matmul %84, %90, %cst_80 {dimension_numbers = #tpu.dot_dimension_numbers<[1], [0], [0], [1], [0, 0, 1, 1], [], []>} : vector<4x384xbf16>, vector<384x128xbf16>, vector<4x128xf32> -> vector<4x128xf32>
    %92 = arith.addf %81, %91 : vector<4x128xf32>
    %c0_81 = arith.constant 0 : index
    %c2_82 = arith.constant 2 : index
    %c0_83 = arith.constant 0 : index
    %93 = vector.load %arg1[%c0_81, %c2_82, %c0_83] : memref<1x6x384xf32, #tpu.memory_space<vmem>>, vector<1x4x384xf32>
    %94 = vector.shape_cast %93 : vector<1x4x384xf32> to vector<4x384xf32>
    %95 = arith.truncf %94 : vector<4x384xf32> to vector<4x384xbf16>
    %c3_84 = arith.constant 3 : index
    %c0_85 = arith.constant 0 : index
    %c0_86 = arith.constant 0 : index
    %96 = vector.load %arg3[%c3_84, %c0_85, %c0_86] : memref<10x384x128xbf16, #tpu.memory_space<vmem>>, vector<1x384x128xbf16>
    %97 = vector.shape_cast %96 : vector<1x384x128xbf16> to vector<384x128xbf16>
    %cst_87 = arith.constant dense<0.000000e+00> : vector<4x128xf32>
    %98 = tpu.matmul %95, %97, %cst_87 {dimension_numbers = #tpu.dot_dimension_numbers<[1], [0], [0], [1], [0, 0, 1, 1], [], []>} : vector<4x384xbf16>, vector<384x128xbf16>, vector<4x128xf32> -> vector<4x128xf32>
    %99 = arith.addf %88, %98 : vector<4x128xf32>
    %c8_88 = arith.constant 8 : index
    %c0_89 = arith.constant 0 : index
    %c0_90 = arith.constant 0 : index
    %100 = vector.load %arg3[%c8_88, %c0_89, %c0_90] : memref<10x384x128xbf16, #tpu.memory_space<vmem>>, vector<1x384x128xbf16>
    %101 = vector.shape_cast %100 : vector<1x384x128xbf16> to vector<384x128xbf16>
    %cst_91 = arith.constant dense<0.000000e+00> : vector<4x128xf32>
    %102 = tpu.matmul %95, %101, %cst_91 {dimension_numbers = #tpu.dot_dimension_numbers<[1], [0], [0], [1], [0, 0, 1, 1], [], []>} : vector<4x384xbf16>, vector<384x128xbf16>, vector<4x128xf32> -> vector<4x128xf32>
    %103 = arith.addf %92, %102 : vector<4x128xf32>
    %c0_92 = arith.constant 0 : index
    %c2_93 = arith.constant 2 : index
    %c0_94 = arith.constant 0 : index
    %104 = vector.load %arg2[%c0_92, %c2_93, %c0_94] : memref<1x6x384xf32, #tpu.memory_space<vmem>>, vector<1x4x384xf32>
    %105 = vector.shape_cast %104 : vector<1x4x384xf32> to vector<4x384xf32>
    %106 = arith.truncf %105 : vector<4x384xf32> to vector<4x384xbf16>
    %c4_95 = arith.constant 4 : index
    %c0_96 = arith.constant 0 : index
    %c0_97 = arith.constant 0 : index
    %107 = vector.load %arg3[%c4_95, %c0_96, %c0_97] : memref<10x384x128xbf16, #tpu.memory_space<vmem>>, vector<1x384x128xbf16>
    %108 = vector.shape_cast %107 : vector<1x384x128xbf16> to vector<384x128xbf16>
    %cst_98 = arith.constant dense<0.000000e+00> : vector<4x128xf32>
    %109 = tpu.matmul %106, %108, %cst_98 {dimension_numbers = #tpu.dot_dimension_numbers<[1], [0], [0], [1], [0, 0, 1, 1], [], []>} : vector<4x384xbf16>, vector<384x128xbf16>, vector<4x128xf32> -> vector<4x128xf32>
    %110 = arith.addf %99, %109 : vector<4x128xf32>
    %c9_99 = arith.constant 9 : index
    %c0_100 = arith.constant 0 : index
    %c0_101 = arith.constant 0 : index
    %111 = vector.load %arg3[%c9_99, %c0_100, %c0_101] : memref<10x384x128xbf16, #tpu.memory_space<vmem>>, vector<1x384x128xbf16>
    %112 = vector.shape_cast %111 : vector<1x384x128xbf16> to vector<384x128xbf16>
    %cst_102 = arith.constant dense<0.000000e+00> : vector<4x128xf32>
    %113 = tpu.matmul %106, %112, %cst_102 {dimension_numbers = #tpu.dot_dimension_numbers<[1], [0], [0], [1], [0, 0, 1, 1], [], []>} : vector<4x384xbf16>, vector<384x128xbf16>, vector<4x128xf32> -> vector<4x128xf32>
    %114 = arith.addf %103, %113 : vector<4x128xf32>
    %115 = arith.maximumf %110, %114 : vector<4x128xf32>
    %116 = arith.maximumf %57, %115 : vector<4x128xf32>
    %c0_103 = arith.constant 0 : index
    %c0_104 = arith.constant 0 : index
    %117 = vector.load %arg4[%c0_103, %c0_104] : memref<1x128xf32, #tpu.memory_space<vmem>>, vector<1x128xf32>
    %118 = vector.broadcast %117 : vector<1x128xf32> to vector<4x128xf32>
    %119 = arith.addf %116, %118 : vector<4x128xf32>
    %cst_105 = arith.constant 0.000000e+00 : f32
    %120 = vector.broadcast %cst_105 : f32 to vector<4x128xf32>
    %121 = arith.minimumf %119, %120 : vector<4x128xf32>
    %cst_106 = arith.constant 5.000000e-01 : f32
    %122 = vector.broadcast %cst_106 : f32 to vector<4x128xf32>
    %123 = arith.mulf %121, %122 : vector<4x128xf32>
    %124 = math.tanh %123 : vector<4x128xf32>
    %125 = math.exp %121 : vector<4x128xf32>
    %cst_107 = arith.constant 1.000000e+00 : f32
    %126 = vector.broadcast %cst_107 : f32 to vector<4x128xf32>
    %127 = arith.addf %125, %126 : vector<4x128xf32>
    %128 = arith.mulf %124, %127 : vector<4x128xf32>
    %cst_108 = arith.constant 0.000000e+00 : f32
    %129 = vector.broadcast %cst_108 : f32 to vector<4x128xf32>
    %130 = arith.cmpf ogt, %119, %129 : vector<4x128xf32>
    %131 = arith.select %130, %119, %128 : vector<4x128xi1>, vector<4x128xf32>
    %c0_109 = arith.constant 0 : index
    %c0_110 = arith.constant 0 : index
    %c0_111 = arith.constant 0 : index
    %132 = vector.load %arg5[%c0_109, %c0_110, %c0_111] : memref<1x4x128xf32, #tpu.memory_space<vmem>>, vector<1x4x128xf32>
    %133 = vector.shape_cast %132 : vector<1x4x128xf32> to vector<4x128xf32>
    %134 = vector.shape_cast %131 : vector<4x128xf32> to vector<1x4x128xf32>
    tpu.vector_store %arg5[%c0_109, %c0_110, %c0_111], %134 {strides = array<i32>} : memref<1x4x128xf32, #tpu.memory_space<vmem>>, vector<1x4x128xf32>,
    return
  }
  func.func @transform_0(%arg0: i32) -> (i32, i32, i32) {
    %c0_i32 = arith.constant 0 : i32
    %c0_i32_0 = arith.constant 0 : i32
    %c0_i32_1 = arith.constant 0 : i32
    return %arg0, %c0_i32, %c0_i32_0 : i32, i32, i32
  }
  func.func @transform_1(%arg0: i32) -> (i32, i32, i32) {
    %c0_i32 = arith.constant 0 : i32
    %c0_i32_0 = arith.constant 0 : i32
    %c0_i32_1 = arith.constant 0 : i32
    return %arg0, %c0_i32, %c0_i32_0 : i32, i32, i32
  }
  func.func @transform_2(%arg0: i32) -> (i32, i32, i32) {
    %c0_i32 = arith.constant 0 : i32
    %c0_i32_0 = arith.constant 0 : i32
    %c0_i32_1 = arith.constant 0 : i32
    %c0_i32_2 = arith.constant 0 : i32
    return %c0_i32, %c0_i32_0, %c0_i32_1 : i32, i32, i32
  }
  func.func @transform_3(%arg0: i32) -> (i32, i32) {
    %c0_i32 = arith.constant 0 : i32
    %c0_i32_0 = arith.constant 0 : i32
    %c0_i32_1 = arith.constant 0 : i32
    return %c0_i32, %c0_i32_0 : i32, i32
  }
  func.func @transform_4(%arg0: i32) -> (i32, i32, i32) {
    %c0_i32 = arith.constant 0 : i32
    %c0_i32_0 = arith.constant 0 : i32
    %c0_i32_1 = arith.constant 0 : i32
    return %arg0, %c0_i32, %c0_i32_0 : i32, i32, i32
  }
}

module attributes {stable_mosaic.version = 11 : i64} {
  func.func @_mlp_elu4_kernel(%arg0: i32, %arg1: memref<2x320xf32, #tpu.memory_space<vmem>>, %arg2: memref<320x50xbf16, #tpu.memory_space<vmem>>, %arg3: memref<1x50xf32, #tpu.memory_space<vmem>>, %arg4: memref<50x32xbf16, #tpu.memory_space<vmem>>, %arg5: memref<1x32xf32, #tpu.memory_space<vmem>>, %arg6: memref<32x50xbf16, #tpu.memory_space<vmem>>, %arg7: memref<1x50xf32, #tpu.memory_space<vmem>>, %arg8: memref<50x320xbf16, #tpu.memory_space<vmem>>, %arg9: memref<1x320xf32, #tpu.memory_space<vmem>>, %arg10: memref<2x320xf32, #tpu.memory_space<vmem>>) attributes {dimension_semantics = [#tpu.dimension_semantics<parallel>], iteration_bounds = array<i64: 1>, scalar_prefetch = 0 : i64, scratch_operands = 0 : i64, tpu.core_type = #tpu.core_type<tc>, window_params = [{transform_indices = @transform_0, window_bounds = array<i64: 2, 320>}, {pipeline_mode = #tpu.pipeline_mode<synchronous>, transform_indices = @transform_1, window_bounds = array<i64: 320, 50>}, {pipeline_mode = #tpu.pipeline_mode<synchronous>, transform_indices = @transform_2, window_bounds = array<i64: 1, 50>}, {pipeline_mode = #tpu.pipeline_mode<synchronous>, transform_indices = @transform_3, window_bounds = array<i64: 50, 32>}, {pipeline_mode = #tpu.pipeline_mode<synchronous>, transform_indices = @transform_4, window_bounds = array<i64: 1, 32>}, {pipeline_mode = #tpu.pipeline_mode<synchronous>, transform_indices = @transform_5, window_bounds = array<i64: 32, 50>}, {pipeline_mode = #tpu.pipeline_mode<synchronous>, transform_indices = @transform_6, window_bounds = array<i64: 1, 50>}, {pipeline_mode = #tpu.pipeline_mode<synchronous>, transform_indices = @transform_7, window_bounds = array<i64: 50, 320>}, {pipeline_mode = #tpu.pipeline_mode<synchronous>, transform_indices = @transform_8, window_bounds = array<i64: 1, 320>}, {transform_indices = @transform_9, window_bounds = array<i64: 2, 320>}]} {
    %c0 = arith.constant 0 : index
    %c0_0 = arith.constant 0 : index
    %0 = vector.load %arg1[%c0, %c0_0] : memref<2x320xf32, #tpu.memory_space<vmem>>, vector<2x320xf32>
    %1 = arith.truncf %0 : vector<2x320xf32> to vector<2x320xbf16>
    %c0_1 = arith.constant 0 : index
    %c0_2 = arith.constant 0 : index
    %2 = vector.load %arg2[%c0_1, %c0_2] : memref<320x50xbf16, #tpu.memory_space<vmem>>, vector<320x50xbf16>
    %cst = arith.constant dense<0.000000e+00> : vector<2x50xf32>
    %3 = tpu.matmul %1, %2, %cst {dimension_numbers = #tpu.dot_dimension_numbers<[1], [0], [0], [1], [0, 0, 1, 1], [], []>} : vector<2x320xbf16>, vector<320x50xbf16>, vector<2x50xf32> -> vector<2x50xf32>
    %c0_3 = arith.constant 0 : index
    %c0_4 = arith.constant 0 : index
    %4 = vector.load %arg3[%c0_3, %c0_4] : memref<1x50xf32, #tpu.memory_space<vmem>>, vector<1x50xf32>
    %5 = vector.broadcast %4 : vector<1x50xf32> to vector<2x50xf32>
    %6 = arith.addf %3, %5 : vector<2x50xf32>
    %cst_5 = arith.constant 0.000000e+00 : f32
    %7 = vector.broadcast %cst_5 : f32 to vector<2x50xf32>
    %8 = arith.minimumf %6, %7 : vector<2x50xf32>
    %cst_6 = arith.constant 5.000000e-01 : f32
    %9 = vector.broadcast %cst_6 : f32 to vector<2x50xf32>
    %10 = arith.mulf %8, %9 : vector<2x50xf32>
    %11 = math.tanh %10 : vector<2x50xf32>
    %12 = math.exp %8 : vector<2x50xf32>
    %cst_7 = arith.constant 1.000000e+00 : f32
    %13 = vector.broadcast %cst_7 : f32 to vector<2x50xf32>
    %14 = arith.addf %12, %13 : vector<2x50xf32>
    %15 = arith.mulf %11, %14 : vector<2x50xf32>
    %cst_8 = arith.constant 0.000000e+00 : f32
    %16 = vector.broadcast %cst_8 : f32 to vector<2x50xf32>
    %17 = arith.cmpf ogt, %6, %16 : vector<2x50xf32>
    %18 = arith.select %17, %6, %15 : vector<2x50xi1>, vector<2x50xf32>
    %19 = arith.truncf %18 : vector<2x50xf32> to vector<2x50xbf16>
    %c0_9 = arith.constant 0 : index
    %c0_10 = arith.constant 0 : index
    %20 = vector.load %arg4[%c0_9, %c0_10] : memref<50x32xbf16, #tpu.memory_space<vmem>>, vector<50x32xbf16>
    %cst_11 = arith.constant dense<0.000000e+00> : vector<2x32xf32>
    %21 = tpu.matmul %19, %20, %cst_11 {dimension_numbers = #tpu.dot_dimension_numbers<[1], [0], [0], [1], [0, 0, 1, 1], [], []>} : vector<2x50xbf16>, vector<50x32xbf16>, vector<2x32xf32> -> vector<2x32xf32>
    %c0_12 = arith.constant 0 : index
    %c0_13 = arith.constant 0 : index
    %22 = vector.load %arg5[%c0_12, %c0_13] : memref<1x32xf32, #tpu.memory_space<vmem>>, vector<1x32xf32>
    %23 = vector.broadcast %22 : vector<1x32xf32> to vector<2x32xf32>
    %24 = arith.addf %21, %23 : vector<2x32xf32>
    %cst_14 = arith.constant 0.000000e+00 : f32
    %25 = vector.broadcast %cst_14 : f32 to vector<2x32xf32>
    %26 = arith.minimumf %24, %25 : vector<2x32xf32>
    %cst_15 = arith.constant 5.000000e-01 : f32
    %27 = vector.broadcast %cst_15 : f32 to vector<2x32xf32>
    %28 = arith.mulf %26, %27 : vector<2x32xf32>
    %29 = math.tanh %28 : vector<2x32xf32>
    %30 = math.exp %26 : vector<2x32xf32>
    %cst_16 = arith.constant 1.000000e+00 : f32
    %31 = vector.broadcast %cst_16 : f32 to vector<2x32xf32>
    %32 = arith.addf %30, %31 : vector<2x32xf32>
    %33 = arith.mulf %29, %32 : vector<2x32xf32>
    %cst_17 = arith.constant 0.000000e+00 : f32
    %34 = vector.broadcast %cst_17 : f32 to vector<2x32xf32>
    %35 = arith.cmpf ogt, %24, %34 : vector<2x32xf32>
    %36 = arith.select %35, %24, %33 : vector<2x32xi1>, vector<2x32xf32>
    %37 = arith.truncf %36 : vector<2x32xf32> to vector<2x32xbf16>
    %c0_18 = arith.constant 0 : index
    %c0_19 = arith.constant 0 : index
    %38 = vector.load %arg6[%c0_18, %c0_19] : memref<32x50xbf16, #tpu.memory_space<vmem>>, vector<32x50xbf16>
    %cst_20 = arith.constant dense<0.000000e+00> : vector<2x50xf32>
    %39 = tpu.matmul %37, %38, %cst_20 {dimension_numbers = #tpu.dot_dimension_numbers<[1], [0], [0], [1], [0, 0, 1, 1], [], []>} : vector<2x32xbf16>, vector<32x50xbf16>, vector<2x50xf32> -> vector<2x50xf32>
    %c0_21 = arith.constant 0 : index
    %c0_22 = arith.constant 0 : index
    %40 = vector.load %arg7[%c0_21, %c0_22] : memref<1x50xf32, #tpu.memory_space<vmem>>, vector<1x50xf32>
    %41 = vector.broadcast %40 : vector<1x50xf32> to vector<2x50xf32>
    %42 = arith.addf %39, %41 : vector<2x50xf32>
    %cst_23 = arith.constant 0.000000e+00 : f32
    %43 = vector.broadcast %cst_23 : f32 to vector<2x50xf32>
    %44 = arith.minimumf %42, %43 : vector<2x50xf32>
    %cst_24 = arith.constant 5.000000e-01 : f32
    %45 = vector.broadcast %cst_24 : f32 to vector<2x50xf32>
    %46 = arith.mulf %44, %45 : vector<2x50xf32>
    %47 = math.tanh %46 : vector<2x50xf32>
    %48 = math.exp %44 : vector<2x50xf32>
    %cst_25 = arith.constant 1.000000e+00 : f32
    %49 = vector.broadcast %cst_25 : f32 to vector<2x50xf32>
    %50 = arith.addf %48, %49 : vector<2x50xf32>
    %51 = arith.mulf %47, %50 : vector<2x50xf32>
    %cst_26 = arith.constant 0.000000e+00 : f32
    %52 = vector.broadcast %cst_26 : f32 to vector<2x50xf32>
    %53 = arith.cmpf ogt, %42, %52 : vector<2x50xf32>
    %54 = arith.select %53, %42, %51 : vector<2x50xi1>, vector<2x50xf32>
    %55 = arith.truncf %54 : vector<2x50xf32> to vector<2x50xbf16>
    %c0_27 = arith.constant 0 : index
    %c0_28 = arith.constant 0 : index
    %56 = vector.load %arg8[%c0_27, %c0_28] : memref<50x320xbf16, #tpu.memory_space<vmem>>, vector<50x320xbf16>
    %cst_29 = arith.constant dense<0.000000e+00> : vector<2x320xf32>
    %57 = tpu.matmul %55, %56, %cst_29 {dimension_numbers = #tpu.dot_dimension_numbers<[1], [0], [0], [1], [0, 0, 1, 1], [], []>} : vector<2x50xbf16>, vector<50x320xbf16>, vector<2x320xf32> -> vector<2x320xf32>
    %c0_30 = arith.constant 0 : index
    %c0_31 = arith.constant 0 : index
    %58 = vector.load %arg9[%c0_30, %c0_31] : memref<1x320xf32, #tpu.memory_space<vmem>>, vector<1x320xf32>
    %59 = vector.broadcast %58 : vector<1x320xf32> to vector<2x320xf32>
    %60 = arith.addf %57, %59 : vector<2x320xf32>
    %cst_32 = arith.constant 0.000000e+00 : f32
    %61 = vector.broadcast %cst_32 : f32 to vector<2x320xf32>
    %62 = arith.minimumf %60, %61 : vector<2x320xf32>
    %cst_33 = arith.constant 5.000000e-01 : f32
    %63 = vector.broadcast %cst_33 : f32 to vector<2x320xf32>
    %64 = arith.mulf %62, %63 : vector<2x320xf32>
    %65 = math.tanh %64 : vector<2x320xf32>
    %66 = math.exp %62 : vector<2x320xf32>
    %cst_34 = arith.constant 1.000000e+00 : f32
    %67 = vector.broadcast %cst_34 : f32 to vector<2x320xf32>
    %68 = arith.addf %66, %67 : vector<2x320xf32>
    %69 = arith.mulf %65, %68 : vector<2x320xf32>
    %cst_35 = arith.constant 0.000000e+00 : f32
    %70 = vector.broadcast %cst_35 : f32 to vector<2x320xf32>
    %71 = arith.cmpf ogt, %60, %70 : vector<2x320xf32>
    %72 = arith.select %71, %60, %69 : vector<2x320xi1>, vector<2x320xf32>
    %c0_36 = arith.constant 0 : index
    %c0_37 = arith.constant 0 : index
    %73 = vector.load %arg10[%c0_36, %c0_37] : memref<2x320xf32, #tpu.memory_space<vmem>>, vector<2x320xf32>
    tpu.vector_store %arg10[%c0_36, %c0_37], %72 {strides = array<i32>} : memref<2x320xf32, #tpu.memory_space<vmem>>, vector<2x320xf32>,
    return
  }
  func.func @transform_0(%arg0: i32) -> (i32, i32) {
    %c0_i32 = arith.constant 0 : i32
    %c0_i32_0 = arith.constant 0 : i32
    return %arg0, %c0_i32 : i32, i32
  }
  func.func @transform_1(%arg0: i32) -> (i32, i32) {
    %c0_i32 = arith.constant 0 : i32
    %c0_i32_0 = arith.constant 0 : i32
    %c0_i32_1 = arith.constant 0 : i32
    return %c0_i32, %c0_i32_0 : i32, i32
  }
  func.func @transform_2(%arg0: i32) -> (i32, i32) {
    %c0_i32 = arith.constant 0 : i32
    %c0_i32_0 = arith.constant 0 : i32
    %c0_i32_1 = arith.constant 0 : i32
    return %c0_i32, %c0_i32_0 : i32, i32
  }
  func.func @transform_3(%arg0: i32) -> (i32, i32) {
    %c0_i32 = arith.constant 0 : i32
    %c0_i32_0 = arith.constant 0 : i32
    %c0_i32_1 = arith.constant 0 : i32
    return %c0_i32, %c0_i32_0 : i32, i32
  }
  func.func @transform_4(%arg0: i32) -> (i32, i32) {
    %c0_i32 = arith.constant 0 : i32
    %c0_i32_0 = arith.constant 0 : i32
    %c0_i32_1 = arith.constant 0 : i32
    return %c0_i32, %c0_i32_0 : i32, i32
  }
  func.func @transform_5(%arg0: i32) -> (i32, i32) {
    %c0_i32 = arith.constant 0 : i32
    %c0_i32_0 = arith.constant 0 : i32
    %c0_i32_1 = arith.constant 0 : i32
    return %c0_i32, %c0_i32_0 : i32, i32
  }
  func.func @transform_6(%arg0: i32) -> (i32, i32) {
    %c0_i32 = arith.constant 0 : i32
    %c0_i32_0 = arith.constant 0 : i32
    %c0_i32_1 = arith.constant 0 : i32
    return %c0_i32, %c0_i32_0 : i32, i32
  }
  func.func @transform_7(%arg0: i32) -> (i32, i32) {
    %c0_i32 = arith.constant 0 : i32
    %c0_i32_0 = arith.constant 0 : i32
    %c0_i32_1 = arith.constant 0 : i32
    return %c0_i32, %c0_i32_0 : i32, i32
  }
  func.func @transform_8(%arg0: i32) -> (i32, i32) {
    %c0_i32 = arith.constant 0 : i32
    %c0_i32_0 = arith.constant 0 : i32
    %c0_i32_1 = arith.constant 0 : i32
    return %c0_i32, %c0_i32_0 : i32, i32
  }
  func.func @transform_9(%arg0: i32) -> (i32, i32) {
    %c0_i32 = arith.constant 0 : i32
    %c0_i32_0 = arith.constant 0 : i32
    return %arg0, %c0_i32 : i32, i32
  }
}

module attributes {stable_mosaic.version = 11 : i64} {
  func.func @_conv_elu_kernel(%arg0: i32, %arg1: memref<1x16x320xf32, #tpu.memory_space<vmem>>, %arg2: memref<5x320x384xbf16, #tpu.memory_space<vmem>>, %arg3: memref<1x384xf32, #tpu.memory_space<vmem>>, %arg4: memref<1x12x384xf32, #tpu.memory_space<vmem>>) attributes {dimension_semantics = [#tpu.dimension_semantics<parallel>], iteration_bounds = array<i64: 2>, scalar_prefetch = 0 : i64, scratch_operands = 0 : i64, tpu.core_type = #tpu.core_type<tc>, window_params = [{transform_indices = @transform_0, window_bounds = array<i64: 1, 16, 320>}, {pipeline_mode = #tpu.pipeline_mode<synchronous>, transform_indices = @transform_1, window_bounds = array<i64: 5, 320, 384>}, {pipeline_mode = #tpu.pipeline_mode<synchronous>, transform_indices = @transform_2, window_bounds = array<i64: 1, 384>}, {transform_indices = @transform_3, window_bounds = array<i64: 1, 12, 384>}]} {
    %cst = arith.constant 0.000000e+00 : f32
    %0 = vector.broadcast %cst : f32 to vector<12x384xf32>
    %c0 = arith.constant 0 : index
    %c0_0 = arith.constant 0 : index
    %c0_1 = arith.constant 0 : index
    %1 = vector.load %arg1[%c0, %c0_0, %c0_1] : memref<1x16x320xf32, #tpu.memory_space<vmem>>, vector<1x12x320xf32>
    %2 = vector.shape_cast %1 : vector<1x12x320xf32> to vector<12x320xf32>
    %3 = arith.truncf %2 : vector<12x320xf32> to vector<12x320xbf16>
    %c0_2 = arith.constant 0 : index
    %c0_3 = arith.constant 0 : index
    %c0_4 = arith.constant 0 : index
    %4 = vector.load %arg2[%c0_2, %c0_3, %c0_4] : memref<5x320x384xbf16, #tpu.memory_space<vmem>>, vector<1x320x384xbf16>
    %5 = vector.shape_cast %4 : vector<1x320x384xbf16> to vector<320x384xbf16>
    %cst_5 = arith.constant dense<0.000000e+00> : vector<12x384xf32>
    %6 = tpu.matmul %3, %5, %cst_5 {dimension_numbers = #tpu.dot_dimension_numbers<[1], [0], [0], [1], [0, 0, 1, 1], [], []>} : vector<12x320xbf16>, vector<320x384xbf16>, vector<12x384xf32> -> vector<12x384xf32>
    %7 = arith.addf %0, %6 : vector<12x384xf32>
    %c0_6 = arith.constant 0 : index
    %c1 = arith.constant 1 : index
    %c0_7 = arith.constant 0 : index
    %8 = vector.load %arg1[%c0_6, %c1, %c0_7] : memref<1x16x320xf32, #tpu.memory_space<vmem>>, vector<1x12x320xf32>
    %9 = vector.shape_cast %8 : vector<1x12x320xf32> to vector<12x320xf32>
    %10 = arith.truncf %9 : vector<12x320xf32> to vector<12x320xbf16>
    %c1_8 = arith.constant 1 : index
    %c0_9 = arith.constant 0 : index
    %c0_10 = arith.constant 0 : index
    %11 = vector.load %arg2[%c1_8, %c0_9, %c0_10] : memref<5x320x384xbf16, #tpu.memory_space<vmem>>, vector<1x320x384xbf16>
    %12 = vector.shape_cast %11 : vector<1x320x384xbf16> to vector<320x384xbf16>
    %cst_11 = arith.constant dense<0.000000e+00> : vector<12x384xf32>
    %13 = tpu.matmul %10, %12, %cst_11 {dimension_numbers = #tpu.dot_dimension_numbers<[1], [0], [0], [1], [0, 0, 1, 1], [], []>} : vector<12x320xbf16>, vector<320x384xbf16>, vector<12x384xf32> -> vector<12x384xf32>
    %14 = arith.addf %7, %13 : vector<12x384xf32>
    %c0_12 = arith.constant 0 : index
    %c2 = arith.constant 2 : index
    %c0_13 = arith.constant 0 : index
    %15 = vector.load %arg1[%c0_12, %c2, %c0_13] : memref<1x16x320xf32, #tpu.memory_space<vmem>>, vector<1x12x320xf32>
    %16 = vector.shape_cast %15 : vector<1x12x320xf32> to vector<12x320xf32>
    %17 = arith.truncf %16 : vector<12x320xf32> to vector<12x320xbf16>
    %c2_14 = arith.constant 2 : index
    %c0_15 = arith.constant 0 : index
    %c0_16 = arith.constant 0 : index
    %18 = vector.load %arg2[%c2_14, %c0_15, %c0_16] : memref<5x320x384xbf16, #tpu.memory_space<vmem>>, vector<1x320x384xbf16>
    %19 = vector.shape_cast %18 : vector<1x320x384xbf16> to vector<320x384xbf16>
    %cst_17 = arith.constant dense<0.000000e+00> : vector<12x384xf32>
    %20 = tpu.matmul %17, %19, %cst_17 {dimension_numbers = #tpu.dot_dimension_numbers<[1], [0], [0], [1], [0, 0, 1, 1], [], []>} : vector<12x320xbf16>, vector<320x384xbf16>, vector<12x384xf32> -> vector<12x384xf32>
    %21 = arith.addf %14, %20 : vector<12x384xf32>
    %c0_18 = arith.constant 0 : index
    %c3 = arith.constant 3 : index
    %c0_19 = arith.constant 0 : index
    %22 = vector.load %arg1[%c0_18, %c3, %c0_19] : memref<1x16x320xf32, #tpu.memory_space<vmem>>, vector<1x12x320xf32>
    %23 = vector.shape_cast %22 : vector<1x12x320xf32> to vector<12x320xf32>
    %24 = arith.truncf %23 : vector<12x320xf32> to vector<12x320xbf16>
    %c3_20 = arith.constant 3 : index
    %c0_21 = arith.constant 0 : index
    %c0_22 = arith.constant 0 : index
    %25 = vector.load %arg2[%c3_20, %c0_21, %c0_22] : memref<5x320x384xbf16, #tpu.memory_space<vmem>>, vector<1x320x384xbf16>
    %26 = vector.shape_cast %25 : vector<1x320x384xbf16> to vector<320x384xbf16>
    %cst_23 = arith.constant dense<0.000000e+00> : vector<12x384xf32>
    %27 = tpu.matmul %24, %26, %cst_23 {dimension_numbers = #tpu.dot_dimension_numbers<[1], [0], [0], [1], [0, 0, 1, 1], [], []>} : vector<12x320xbf16>, vector<320x384xbf16>, vector<12x384xf32> -> vector<12x384xf32>
    %28 = arith.addf %21, %27 : vector<12x384xf32>
    %c0_24 = arith.constant 0 : index
    %c4 = arith.constant 4 : index
    %c0_25 = arith.constant 0 : index
    %29 = vector.load %arg1[%c0_24, %c4, %c0_25] : memref<1x16x320xf32, #tpu.memory_space<vmem>>, vector<1x12x320xf32>
    %30 = vector.shape_cast %29 : vector<1x12x320xf32> to vector<12x320xf32>
    %31 = arith.truncf %30 : vector<12x320xf32> to vector<12x320xbf16>
    %c4_26 = arith.constant 4 : index
    %c0_27 = arith.constant 0 : index
    %c0_28 = arith.constant 0 : index
    %32 = vector.load %arg2[%c4_26, %c0_27, %c0_28] : memref<5x320x384xbf16, #tpu.memory_space<vmem>>, vector<1x320x384xbf16>
    %33 = vector.shape_cast %32 : vector<1x320x384xbf16> to vector<320x384xbf16>
    %cst_29 = arith.constant dense<0.000000e+00> : vector<12x384xf32>
    %34 = tpu.matmul %31, %33, %cst_29 {dimension_numbers = #tpu.dot_dimension_numbers<[1], [0], [0], [1], [0, 0, 1, 1], [], []>} : vector<12x320xbf16>, vector<320x384xbf16>, vector<12x384xf32> -> vector<12x384xf32>
    %35 = arith.addf %28, %34 : vector<12x384xf32>
    %c0_30 = arith.constant 0 : index
    %c0_31 = arith.constant 0 : index
    %36 = vector.load %arg3[%c0_30, %c0_31] : memref<1x384xf32, #tpu.memory_space<vmem>>, vector<1x384xf32>
    %37 = vector.broadcast %36 : vector<1x384xf32> to vector<12x384xf32>
    %38 = arith.addf %35, %37 : vector<12x384xf32>
    %cst_32 = arith.constant 0.000000e+00 : f32
    %39 = vector.broadcast %cst_32 : f32 to vector<12x384xf32>
    %40 = arith.minimumf %38, %39 : vector<12x384xf32>
    %cst_33 = arith.constant 5.000000e-01 : f32
    %41 = vector.broadcast %cst_33 : f32 to vector<12x384xf32>
    %42 = arith.mulf %40, %41 : vector<12x384xf32>
    %43 = math.tanh %42 : vector<12x384xf32>
    %44 = math.exp %40 : vector<12x384xf32>
    %cst_34 = arith.constant 1.000000e+00 : f32
    %45 = vector.broadcast %cst_34 : f32 to vector<12x384xf32>
    %46 = arith.addf %44, %45 : vector<12x384xf32>
    %47 = arith.mulf %43, %46 : vector<12x384xf32>
    %cst_35 = arith.constant 0.000000e+00 : f32
    %48 = vector.broadcast %cst_35 : f32 to vector<12x384xf32>
    %49 = arith.cmpf ogt, %38, %48 : vector<12x384xf32>
    %50 = arith.select %49, %38, %47 : vector<12x384xi1>, vector<12x384xf32>
    %c0_36 = arith.constant 0 : index
    %c0_37 = arith.constant 0 : index
    %c0_38 = arith.constant 0 : index
    %51 = vector.load %arg4[%c0_36, %c0_37, %c0_38] : memref<1x12x384xf32, #tpu.memory_space<vmem>>, vector<1x12x384xf32>
    %52 = vector.shape_cast %51 : vector<1x12x384xf32> to vector<12x384xf32>
    %53 = vector.shape_cast %50 : vector<12x384xf32> to vector<1x12x384xf32>
    tpu.vector_store %arg4[%c0_36, %c0_37, %c0_38], %53 {strides = array<i32>} : memref<1x12x384xf32, #tpu.memory_space<vmem>>, vector<1x12x384xf32>,
    return
  }
  func.func @transform_0(%arg0: i32) -> (i32, i32, i32) {
    %c0_i32 = arith.constant 0 : i32
    %c0_i32_0 = arith.constant 0 : i32
    %c0_i32_1 = arith.constant 0 : i32
    return %arg0, %c0_i32, %c0_i32_0 : i32, i32, i32
  }
  func.func @transform_1(%arg0: i32) -> (i32, i32, i32) {
    %c0_i32 = arith.constant 0 : i32
    %c0_i32_0 = arith.constant 0 : i32
    %c0_i32_1 = arith.constant 0 : i32
    %c0_i32_2 = arith.constant 0 : i32
    return %c0_i32, %c0_i32_0, %c0_i32_1 : i32, i32, i32
  }
  func.func @transform_2(%arg0: i32) -> (i32, i32) {
    %c0_i32 = arith.constant 0 : i32
    %c0_i32_0 = arith.constant 0 : i32
    %c0_i32_1 = arith.constant 0 : i32
    return %c0_i32, %c0_i32_0 : i32, i32
  }
  func.func @transform_3(%arg0: i32) -> (i32, i32, i32) {
    %c0_i32 = arith.constant 0 : i32
    %c0_i32_0 = arith.constant 0 : i32
    %c0_i32_1 = arith.constant 0 : i32
    return %arg0, %c0_i32, %c0_i32_0 : i32, i32, i32
  }
}

module attributes {stable_mosaic.version = 11 : i64} {
  func.func @_conv_elu_kernel(%arg0: i32, %arg1: memref<1x32x320xf32, #tpu.memory_space<vmem>>, %arg2: memref<5x320x112xbf16, #tpu.memory_space<vmem>>, %arg3: memref<1x112xf32, #tpu.memory_space<vmem>>, %arg4: memref<1x28x112xf32, #tpu.memory_space<vmem>>) attributes {dimension_semantics = [#tpu.dimension_semantics<parallel>], iteration_bounds = array<i64: 2>, scalar_prefetch = 0 : i64, scratch_operands = 0 : i64, tpu.core_type = #tpu.core_type<tc>, window_params = [{transform_indices = @transform_0, window_bounds = array<i64: 1, 32, 320>}, {pipeline_mode = #tpu.pipeline_mode<synchronous>, transform_indices = @transform_1, window_bounds = array<i64: 5, 320, 112>}, {pipeline_mode = #tpu.pipeline_mode<synchronous>, transform_indices = @transform_2, window_bounds = array<i64: 1, 112>}, {transform_indices = @transform_3, window_bounds = array<i64: 1, 28, 112>}]} {
    %cst = arith.constant 0.000000e+00 : f32
    %0 = vector.broadcast %cst : f32 to vector<28x112xf32>
    %c0 = arith.constant 0 : index
    %c0_0 = arith.constant 0 : index
    %c0_1 = arith.constant 0 : index
    %1 = vector.load %arg1[%c0, %c0_0, %c0_1] : memref<1x32x320xf32, #tpu.memory_space<vmem>>, vector<1x28x320xf32>
    %2 = vector.shape_cast %1 : vector<1x28x320xf32> to vector<28x320xf32>
    %3 = arith.truncf %2 : vector<28x320xf32> to vector<28x320xbf16>
    %c0_2 = arith.constant 0 : index
    %c0_3 = arith.constant 0 : index
    %c0_4 = arith.constant 0 : index
    %4 = vector.load %arg2[%c0_2, %c0_3, %c0_4] : memref<5x320x112xbf16, #tpu.memory_space<vmem>>, vector<1x320x112xbf16>
    %5 = vector.shape_cast %4 : vector<1x320x112xbf16> to vector<320x112xbf16>
    %cst_5 = arith.constant dense<0.000000e+00> : vector<28x112xf32>
    %6 = tpu.matmul %3, %5, %cst_5 {dimension_numbers = #tpu.dot_dimension_numbers<[1], [0], [0], [1], [0, 0, 1, 1], [], []>} : vector<28x320xbf16>, vector<320x112xbf16>, vector<28x112xf32> -> vector<28x112xf32>
    %7 = arith.addf %0, %6 : vector<28x112xf32>
    %c0_6 = arith.constant 0 : index
    %c1 = arith.constant 1 : index
    %c0_7 = arith.constant 0 : index
    %8 = vector.load %arg1[%c0_6, %c1, %c0_7] : memref<1x32x320xf32, #tpu.memory_space<vmem>>, vector<1x28x320xf32>
    %9 = vector.shape_cast %8 : vector<1x28x320xf32> to vector<28x320xf32>
    %10 = arith.truncf %9 : vector<28x320xf32> to vector<28x320xbf16>
    %c1_8 = arith.constant 1 : index
    %c0_9 = arith.constant 0 : index
    %c0_10 = arith.constant 0 : index
    %11 = vector.load %arg2[%c1_8, %c0_9, %c0_10] : memref<5x320x112xbf16, #tpu.memory_space<vmem>>, vector<1x320x112xbf16>
    %12 = vector.shape_cast %11 : vector<1x320x112xbf16> to vector<320x112xbf16>
    %cst_11 = arith.constant dense<0.000000e+00> : vector<28x112xf32>
    %13 = tpu.matmul %10, %12, %cst_11 {dimension_numbers = #tpu.dot_dimension_numbers<[1], [0], [0], [1], [0, 0, 1, 1], [], []>} : vector<28x320xbf16>, vector<320x112xbf16>, vector<28x112xf32> -> vector<28x112xf32>
    %14 = arith.addf %7, %13 : vector<28x112xf32>
    %c0_12 = arith.constant 0 : index
    %c2 = arith.constant 2 : index
    %c0_13 = arith.constant 0 : index
    %15 = vector.load %arg1[%c0_12, %c2, %c0_13] : memref<1x32x320xf32, #tpu.memory_space<vmem>>, vector<1x28x320xf32>
    %16 = vector.shape_cast %15 : vector<1x28x320xf32> to vector<28x320xf32>
    %17 = arith.truncf %16 : vector<28x320xf32> to vector<28x320xbf16>
    %c2_14 = arith.constant 2 : index
    %c0_15 = arith.constant 0 : index
    %c0_16 = arith.constant 0 : index
    %18 = vector.load %arg2[%c2_14, %c0_15, %c0_16] : memref<5x320x112xbf16, #tpu.memory_space<vmem>>, vector<1x320x112xbf16>
    %19 = vector.shape_cast %18 : vector<1x320x112xbf16> to vector<320x112xbf16>
    %cst_17 = arith.constant dense<0.000000e+00> : vector<28x112xf32>
    %20 = tpu.matmul %17, %19, %cst_17 {dimension_numbers = #tpu.dot_dimension_numbers<[1], [0], [0], [1], [0, 0, 1, 1], [], []>} : vector<28x320xbf16>, vector<320x112xbf16>, vector<28x112xf32> -> vector<28x112xf32>
    %21 = arith.addf %14, %20 : vector<28x112xf32>
    %c0_18 = arith.constant 0 : index
    %c3 = arith.constant 3 : index
    %c0_19 = arith.constant 0 : index
    %22 = vector.load %arg1[%c0_18, %c3, %c0_19] : memref<1x32x320xf32, #tpu.memory_space<vmem>>, vector<1x28x320xf32>
    %23 = vector.shape_cast %22 : vector<1x28x320xf32> to vector<28x320xf32>
    %24 = arith.truncf %23 : vector<28x320xf32> to vector<28x320xbf16>
    %c3_20 = arith.constant 3 : index
    %c0_21 = arith.constant 0 : index
    %c0_22 = arith.constant 0 : index
    %25 = vector.load %arg2[%c3_20, %c0_21, %c0_22] : memref<5x320x112xbf16, #tpu.memory_space<vmem>>, vector<1x320x112xbf16>
    %26 = vector.shape_cast %25 : vector<1x320x112xbf16> to vector<320x112xbf16>
    %cst_23 = arith.constant dense<0.000000e+00> : vector<28x112xf32>
    %27 = tpu.matmul %24, %26, %cst_23 {dimension_numbers = #tpu.dot_dimension_numbers<[1], [0], [0], [1], [0, 0, 1, 1], [], []>} : vector<28x320xbf16>, vector<320x112xbf16>, vector<28x112xf32> -> vector<28x112xf32>
    %28 = arith.addf %21, %27 : vector<28x112xf32>
    %c0_24 = arith.constant 0 : index
    %c4 = arith.constant 4 : index
    %c0_25 = arith.constant 0 : index
    %29 = vector.load %arg1[%c0_24, %c4, %c0_25] : memref<1x32x320xf32, #tpu.memory_space<vmem>>, vector<1x28x320xf32>
    %30 = vector.shape_cast %29 : vector<1x28x320xf32> to vector<28x320xf32>
    %31 = arith.truncf %30 : vector<28x320xf32> to vector<28x320xbf16>
    %c4_26 = arith.constant 4 : index
    %c0_27 = arith.constant 0 : index
    %c0_28 = arith.constant 0 : index
    %32 = vector.load %arg2[%c4_26, %c0_27, %c0_28] : memref<5x320x112xbf16, #tpu.memory_space<vmem>>, vector<1x320x112xbf16>
    %33 = vector.shape_cast %32 : vector<1x320x112xbf16> to vector<320x112xbf16>
    %cst_29 = arith.constant dense<0.000000e+00> : vector<28x112xf32>
    %34 = tpu.matmul %31, %33, %cst_29 {dimension_numbers = #tpu.dot_dimension_numbers<[1], [0], [0], [1], [0, 0, 1, 1], [], []>} : vector<28x320xbf16>, vector<320x112xbf16>, vector<28x112xf32> -> vector<28x112xf32>
    %35 = arith.addf %28, %34 : vector<28x112xf32>
    %c0_30 = arith.constant 0 : index
    %c0_31 = arith.constant 0 : index
    %36 = vector.load %arg3[%c0_30, %c0_31] : memref<1x112xf32, #tpu.memory_space<vmem>>, vector<1x112xf32>
    %37 = vector.broadcast %36 : vector<1x112xf32> to vector<28x112xf32>
    %38 = arith.addf %35, %37 : vector<28x112xf32>
    %cst_32 = arith.constant 0.000000e+00 : f32
    %39 = vector.broadcast %cst_32 : f32 to vector<28x112xf32>
    %40 = arith.minimumf %38, %39 : vector<28x112xf32>
    %cst_33 = arith.constant 5.000000e-01 : f32
    %41 = vector.broadcast %cst_33 : f32 to vector<28x112xf32>
    %42 = arith.mulf %40, %41 : vector<28x112xf32>
    %43 = math.tanh %42 : vector<28x112xf32>
    %44 = math.exp %40 : vector<28x112xf32>
    %cst_34 = arith.constant 1.000000e+00 : f32
    %45 = vector.broadcast %cst_34 : f32 to vector<28x112xf32>
    %46 = arith.addf %44, %45 : vector<28x112xf32>
    %47 = arith.mulf %43, %46 : vector<28x112xf32>
    %cst_35 = arith.constant 0.000000e+00 : f32
    %48 = vector.broadcast %cst_35 : f32 to vector<28x112xf32>
    %49 = arith.cmpf ogt, %38, %48 : vector<28x112xf32>
    %50 = arith.select %49, %38, %47 : vector<28x112xi1>, vector<28x112xf32>
    %c0_36 = arith.constant 0 : index
    %c0_37 = arith.constant 0 : index
    %c0_38 = arith.constant 0 : index
    %51 = vector.load %arg4[%c0_36, %c0_37, %c0_38] : memref<1x28x112xf32, #tpu.memory_space<vmem>>, vector<1x28x112xf32>
    %52 = vector.shape_cast %51 : vector<1x28x112xf32> to vector<28x112xf32>
    %53 = vector.shape_cast %50 : vector<28x112xf32> to vector<1x28x112xf32>
    tpu.vector_store %arg4[%c0_36, %c0_37, %c0_38], %53 {strides = array<i32>} : memref<1x28x112xf32, #tpu.memory_space<vmem>>, vector<1x28x112xf32>,
    return
  }
  func.func @transform_0(%arg0: i32) -> (i32, i32, i32) {
    %c0_i32 = arith.constant 0 : i32
    %c0_i32_0 = arith.constant 0 : i32
    %c0_i32_1 = arith.constant 0 : i32
    return %arg0, %c0_i32, %c0_i32_0 : i32, i32, i32
  }
  func.func @transform_1(%arg0: i32) -> (i32, i32, i32) {
    %c0_i32 = arith.constant 0 : i32
    %c0_i32_0 = arith.constant 0 : i32
    %c0_i32_1 = arith.constant 0 : i32
    %c0_i32_2 = arith.constant 0 : i32
    return %c0_i32, %c0_i32_0, %c0_i32_1 : i32, i32, i32
  }
  func.func @transform_2(%arg0: i32) -> (i32, i32) {
    %c0_i32 = arith.constant 0 : i32
    %c0_i32_0 = arith.constant 0 : i32
    %c0_i32_1 = arith.constant 0 : i32
    return %c0_i32, %c0_i32_0 : i32, i32
  }
  func.func @transform_3(%arg0: i32) -> (i32, i32, i32) {
    %c0_i32 = arith.constant 0 : i32
    %c0_i32_0 = arith.constant 0 : i32
    %c0_i32_1 = arith.constant 0 : i32
    return %arg0, %c0_i32, %c0_i32_0 : i32, i32, i32
  }
}

</mosaic_0001>

<bundles_post_ra>
// kernel: autoencoder_forward.7
= control target key start
LH: loop header
LB: loop body
LE: loop exit
PB: predicated region body
PF: predicated region fallthrough
CT: control target
= control target key end

     0   :  { %v926_v1 = vmov 0.0   ;;  %vm927_vm0 = vmmov 0   ;;  %v928_v8 = vmov 1983009808   ;;  %v39_v10 = vlaneseq  ;;  %s1150_s1 = inlined_call_operand.vmem [shape: bf16[320,50], index: 1, kind: input, shape index: {}]   ;;  %s1151_s0 = inlined_call_operand.vmem [shape: f32[2,320], index: 0, kind: input, shape index: {}]   ;;  %s1152_s3 = inlined_call_operand.vmem [shape: bf16[50,32], index: 3, kind: input, shape index: {}]   ;;  %s1153_s2 = inlined_call_operand.vmem [shape: f32[1,50], index: 2, kind: input, shape index: {}]   ;;  %s1154_s5 = inlined_call_operand.vmem [shape: bf16[32,50], index: 5, kind: input, shape index: {}]   ;;  %s1155_s4 = inlined_call_operand.vmem [shape: f32[1,32], index: 4, kind: input, shape index: {}]   ;;  %s1156_s7 = inlined_call_operand.vmem [shape: bf16[50,320], index: 7, kind: input, shape index: {}]   ;;  %s1157_s6 = inlined_call_operand.vmem [shape: f32[1,50], index: 6, kind: input, shape index: {}]   ;;  %s1158_s8 = inlined_call_operand.vmem [shape: f32[1,320], index: 8, kind: input, shape index: {}]   ;;  %s1159_s9 = inlined_call_operand.vmem [shape: f32[2,320], index: 9, kind: output, shape index: {}]  }
   0x1   :  { %v860_v0 = vld [vmem:[%s1150_s1 + $0x78] sm:$0xff]   ;;  %812 = vmatprep.subr.bf16.mxu1 %v926_v1  ;;  %820 = vmatprep.mubr.msk.bf16.mxu1 %vm927_vm0, %v926_v1  ;;  %v862_v3 = vld [vmem:[%s1150_s1 + $0x70] sm:$0xff]   ;;  %v864_v5 = vld [vmem:[%s1150_s1 + $0x68] sm:$0xff]   ;;  %v37_v9 = vunpack.c.l.s4 %v928_v8  ;;  %vm224_vm1 = vcmask 523264   ;;  %vm357_vm2 = vcmask 1040384   ;;  %vm353_vm4 = vcmask 408576  }
   0x2   :  { %v861_v2 = vld [vmem:[%s1150_s1 + $0x38] sm:$0xff]   ;;  %772 = vmatprep.subr.bf16.mxu0 %v860_v0  ;;  %v863_v4 = vld [vmem:[%s1150_s1 + $0x30] sm:$0xff]   ;;  %v865_v6 = vld [vmem:[%s1150_s1 + $0x28] sm:$0xff]   ;;  %v1017_v16 = vshrl.u32 %v39_v10, 7  ;;  %vm434_vm6 = vcmask 261120   ;;  %vm715_vm8 = vcmask 1041408  }
   0x3   :  { %773 = vmatpush3.bf16.msra.mxu0 %v861_v2  ;;  %v866_v7 = vld [vmem:[%s1150_s1 + $0x60] sm:$0xff]   ;;  %v870_v11 = vld [vmem:[%s1150_s1 + $0x98] sm:$0xff]   ;;  %v873_v14 = vld [vmem:[%s1150_s1 + $0x90] sm:$0xff]   ;;  %v38_v15 = vunpack.c.0.s8 %v37_v9  ;;  %vm716_vm9 = vcmask 1043458   ;;  %vm718_vm14 = vcmask 521220  }
   0x4   :  { %774 = vmatprep.subr.bf16.mxu0 %v862_v3  ;;  %v867_v12 = vld [vmem:[%s1150_s1 + $0x20] sm:$0xff]   ;;  %v868_v13 = vld [vmem:[%s1150_s1 + $0x58] sm:$0xff]   ;;  %813 = vmatpush3.bf16.msra.mxu1 %v870_v11  ;;  %v871_v18 = vld [vmem:[%s1150_s1 + $0x50] sm:$0xff]  }
   0x5   :  { %814 = vmatprep.subr.bf16.mxu1 %v926_v1  ;;  %v869_v17 = vld [vmem:[%s1150_s1 + $0x18] sm:$0xff]   ;;  %v876_v19 = vld [vmem:[%s1150_s1 + $0x88] sm:$0xff]   ;;  %v1030_v20 = vsub.s32 %v38_v15, %v1017_v16  ;;  %v872_v21 = vld [vmem:[%s1150_s1 + $0x10] sm:$0xff]  }
   0x6   :  { %v874_v22 = vld [vmem:[%s1150_s1 + $0x48] sm:$0xff]   ;;  %v879_v23 = vld [vmem:[%s1150_s1 + $0x80] sm:$0xff]   ;;  %v881_v35 = vld [vmem:[%s1152_s3 + $0x18] ss:$0 sps:$4 sm:$0x11]  }
   0x7   :  { %775 = vmatpush3.bf16.msra.mxu0 %v863_v4  ;;  %v33_v24 = vld [vmem:[%s1151_s0] sm:$0x3f]  ;;  %v875_v27 = vld [vmem:[%s1150_s1 + $0x8] sm:$0xff]   ;;  %v359_v36 = vsel %vm357_vm2, %v881_v35, 0  ;;  %v882_v37 = vld [vmem:[%s1152_s3 + $0x10] sm:$0xff]  }
   0x8   :  { %776 = vmatprep.subr.bf16.mxu0 %v864_v5  ;;  %815 = vmatpush3.bf16.msra.mxu1 %v873_v14  ;;  %v35_v25 = vcombine.high %v33_v24, %v33_v24  ;;  %v42_v26 = vrot.slane %v33_v24, %v1030_v20  ;;  %v877_v30 = vld [vmem:[%s1150_s1 + $0x40] sm:$0xff]   ;;  %v883_v38 = vld [vmem:[%s1152_s3 + $0x8] sm:$0xff]   ;;  %v890_v24 = vld [vmem:[%s1156_s7 + $0x30] ss:$12 sps:$4 sm:$0xff]  }
   0x9   :  { %816 = vmatprep.subr.bf16.mxu1 %v926_v1  ;;  %v878_v33 = vld [vmem:[%s1150_s1] sm:$0xff]   ;;  %v885_v61 = vld [vmem:[%s1154_s5 + $0x8] sm:$0xff]   ;;  %vm717_vm13 = vmor %vm716_vm9, %vm715_vm8 }
   0xa   :  { %v49_v28 = vrot.slane %v35_v25, %v1030_v20  ;;  %v50_v29 = vcombine.high %v42_v26, %v42_v26  ;;  %v54_v34 = vpack.c.bf16 %v42_v26, %v42_v26  ;;  %v884_v39 = vld [vmem:[%s1152_s3] sm:$0xff]   ;;  %v500_v15 = vld [vmem:[%s1156_s7 + $0x48] sm:$0x11]  ;;  %vm719_vm15 = vmor %vm718_vm14, %vm717_vm13 }
   0xb   :  { %777 = vmatpush3.bf16.msra.mxu0 %v865_v6  ;;  %v725_v45 = vld [vmem:[%s1153_s2] ss:$0 sm:$0xff]  ;;  %v893_v25 = vld [vmem:[%s1156_s7 + $0x38] ss:$12 sps:$4 sm:$0xff]   ;;  %v896_v26 = vld [vmem:[%s1156_s7 + $0x1c] ss:$12 sps:$4 sm:$0xff]  }
   0xc   :  { %778 = vmatprep.subr.bf16.mxu0 %v866_v7  ;;  %817 = vmatpush3.bf16.msra.mxu1 %v876_v19  ;;  %v55_v31 = vpack.c.bf16 %v50_v29, %v50_v29  ;;  %v56_v32 = vpack.c.bf16 %v49_v28, %v49_v28  ;;  %v886_v62 = vld [vmem:[%s1154_s5] sm:$0xff]   ;;  %v889_v19 = vld [vmem:[%s1156_s7 + $0x50] ss:$0 sps:$4 sm:$0x11]  }
   0xd   :  { %818 = vmatprep.subr.bf16.mxu1 %v926_v1  ;;  %v747_v63 = vld [vmem:[%s1155_s4] ss:$0 sm:$0xff]  ;;  %v900_v29 = vld [vmem:[%s1156_s7 + $0x4] ss:$12 sps:$4 sm:$0xff]  }
   0xe   :  { %260 = vmatprep.mubr.bf16.mxu0 %v55_v31  ;;  %v897_v28 = vld [vmem:[%s1156_s7 + $0x20] ss:$12 sps:$4 sm:$0xff]   ;;  %v901_v31 = vld [vmem:[%s1156_s7 + $0x8] ss:$12 sps:$4 sm:$0xff]  }
   0xf   :  { %779 = vmatpush3.bf16.msra.mxu0 %v867_v12 }
  0x10   :  { %780 = vmatprep.subr.bf16.mxu0 %v868_v13  ;;  %819 = vmatpush3.bf16.msra.mxu1 %v879_v23  ;;  %v892_v23 = vld [vmem:[%s1156_s7 + $0x34] ss:$12 sps:$4 sm:$0xff]  }
  0x11   :  { %824 = vmatprep.subr.bf16.mxu1 %v926_v1 }
  0x13   :  { %781 = vmatpush3.bf16.msra.mxu0 %v869_v17  ;;  %821 = vmatmul.mubr.msk.bf16.vlgmr.msra.gmra.mxu1 %vm224_vm1, %v56_v32  ;;  %v767_v17 = vcombine.high %v500_v15, %v500_v15  ;;  %v929_v32 = vmov 0  }
  0x14   :  { %782 = vmatprep.subr.bf16.mxu0 %v871_v18  ;;  %832 = vmatprep.mubr.msk.bf16.mxu1 %vm927_vm0, %v926_v1  ;;  %v766_v18 = vcombine.low %v500_v15, %v500_v15 }
  0x15   :  { %825 = vmatpush3.bf16.msra.mxu1 %v359_v36 }
  0x16   :  { %826 = vmatprep.subr.bf16.mxu1 %v926_v1 }
  0x17   :  { %783 = vmatpush3.bf16.msra.mxu0 %v872_v21  ;;  %v579_v21 = vsel %vm357_vm2, %v766_v18, 0 }
  0x18   :  { %784 = vmatprep.subr.bf16.mxu0 %v874_v22  ;;  %v585_v22 = vsel %vm357_vm2, %v889_v19, 0 }
  0x19   :  { %827 = vmatpush3.bf16.msra.mxu1 %v882_v37 }
  0x1a   :  { %828 = vmatprep.subr.bf16.mxu1 %v926_v1 }
  0x1b   :  { %785 = vmatpush3.bf16.msra.mxu0 %v875_v27  ;;  %v894_v27 = vld [vmem:[%s1156_s7 + $0x18] ss:$12 sps:$4 sm:$0xff]  }
  0x1c   :  { %786 = vmatprep.subr.bf16.mxu0 %v877_v30  ;;  %v898_v30 = vld [vmem:[%s1156_s7] ss:$12 sps:$4 sm:$0xff]  }
  0x1d   :  { %829 = vmatpush3.bf16.msra.mxu1 %v883_v38 }
  0x1e   :  { %830 = vmatprep.subr.bf16.mxu1 %v926_v1 }
  0x1f   :  { %787 = vmatpush3.bf16.msra.mxu0 %v878_v33  ;;  %v753_v33 = vld [vmem:[%s1157_s6] ss:$0 sm:$0xff] }
  0x20   :  { %836 = vmatprep.subr.bf16.mxu0 %v926_v1 }
  0x21   :  { %831 = vmatpush3.bf16.msra.mxu1 %v884_v39 }
  0x22   :  { %261 = vmatmul.mubr.bf16.vlgmr.msra.gmra.mxu0 %v54_v34  ;;  %769 = vmatprep.subr.msk.bf16.mxu1 %vm357_vm2, %v767_v17 }
  0x23   :  { %840 = vmatprep.mubr.msk.bf16.mxu0 %vm927_vm0, %v926_v1  ;;  %837 = vmatpush3.bf16.msra.mxu0 %v885_v61 }
  0x24   :  { %838 = vmatprep.subr.bf16.mxu0 %v926_v1 }
  0x27   :  { %839 = vmatpush3.bf16.msra.mxu0 %v886_v62 }
  0x28   :  { %844 = vmatprep.subr.bf16.mxu0 %v926_v1 }
  0xd3   :  { %v302_v40 = vpop.f32.mrf.mxu1 }
  0xd5   :  { %v822_v41 = vpop.f32.mrf.mxu1 }
  0xd7   :  { %v305_v42 = vpop.f32.mrf.mxu1 }
  0xd9   :  { %v823_v44 = vpop.f32.mrf.mxu1 }
  0xe2   :  { %v788_v43 = vpop.f32.mrf.mxu0 }
  0xe4   :  { %v789_v46 = vpop.f32.mrf.mxu0 }
  0xe5   :  { %v790_v47 = vadd.f32 %v789_v46, %v788_v43 }
  0xe6   :  { %v791_v48 = vpop.f32.mrf.mxu0 }
  0xe7   :  { %v263_v49 = vadd.f32 %v790_v47, %v725_v45  ;;  %v506_v47 = vsub.s32 0, %v1017_v16  ;;  %v514_v48 = vsub.s32 2, %v1017_v16 }
  0xe8   :  { %v792_v50 = vpop.f32.mrf.mxu0 }
  0xe9   :  { %v303_v51 = vadd.f32 %v302_v40, %v263_v49  ;;  %v502_v49 = vld [vmem:[%s1158_s8] sm:$0x7]  ;;  %v510_v50 = vsub.s32 1, %v1017_v16 }
  0xeb   :  { %v308_v52 = vmin.f32 %v303_v51, 0.0  ;;  %vm315_vm3 = vcmp.gt.f32.partialorder %v303_v51, 0.0 }
  0xed   :  { %v311_v53 = vmul.f32 1.442695, %v308_v52  ;;  %v309_v54 = vmul.f32 0.5, %v308_v52  ;;  %v515_v52 = vrot.slane %v502_v49, %v514_v48 }
  0xef   :  { %902 = vpow2.f32 %v311_v53 }
  0xf0   :  { %904 = vtanh.f32 %v309_v54 }
  0xfc   :  { %v903_v55 = vpop.eup %902 }
  0xfd   :  { %v313_v56 = vadd.f32 1.0, %v903_v55  ;;  %v905_v57 = vpop.eup %904  ;;  %v511_v55 = vrot.slane %v502_v49, %v510_v50 }
  0xff   :  { %v314_v58 = vmul.f32 %v905_v57, %v313_v56 }
 0x101   :  { %v316_v59 = vsel %vm315_vm3, %v303_v51, %v314_v58  ;;  %v507_v51 = vrot.slane %v502_v49, %v506_v47 }
 0x102   :  { %v317_v60 = vpack.c.bf16 %v316_v59, %v316_v59 }
 0x104   :  { %833 = vmatmul.mubr.msk.bf16.vlgmr.msra.gmra.mxu1 %vm353_vm4, %v317_v60 }
 0x105   :  { %596 = vmatpush1.bf16.msra.mxu1 %v579_v21  ;;  %619 = vmatprep.mubr.bf16.mxu1 %v929_v32 }
 0x106   :  { %597 = vmatprep.subr.bf16.mxu1 %v892_v23 }
 0x109   :  { %598 = vmatpush1.bf16.msra.mxu1 %v890_v24 }
 0x10a   :  { %599 = vmatprep.subr.bf16.mxu1 %v896_v26 }
 0x10d   :  { %600 = vmatpush1.bf16.msra.mxu1 %v894_v27 }
 0x10e   :  { %601 = vmatprep.subr.bf16.mxu1 %v900_v29 }
 0x111   :  { %602 = vmatpush1.bf16.msra.mxu1 %v898_v30 }
 0x1c4   :  { %v395_v0 = vpop.f32.mrf.mxu1 }
 0x1c5   :  { %v396_v2 = vadd.f32 %v747_v63, %v395_v0 }
 0x1c6   :  { %v834_v3 = vpop.f32.mrf.mxu1 }
 0x1c7   :  { %v401_v4 = vmin.f32 %v396_v2, 0.0  ;;  %vm408_vm5 = vcmp.gt.f32.partialorder %v396_v2, 0.0 }
 0x1c8   :  { %v398_v5 = vpop.f32.mrf.mxu1 }
 0x1c9   :  { %v404_v6 = vmul.f32 1.442695, %v401_v4  ;;  %v402_v7 = vmul.f32 0.5, %v401_v4 }
 0x1ca   :  { %v835_v8 = vpop.f32.mrf.mxu1 }
 0x1cb   :  { %906 = vpow2.f32 %v404_v6 }
 0x1cc   :  { %908 = vtanh.f32 %v402_v7 }
 0x1d8   :  { %v907_v9 = vpop.eup %906 }
 0x1d9   :  { %v406_v10 = vadd.f32 1.0, %v907_v9  ;;  %v909_v11 = vpop.eup %908 }
 0x1db   :  { %v407_v12 = vmul.f32 %v909_v11, %v406_v10 }
 0x1dd   :  { %v409_v13 = vsel %vm408_vm5, %v396_v2, %v407_v12 }
 0x1de   :  { %v410_v14 = vpack.c.bf16 %v409_v13, %v409_v13 }
 0x1e0   :  { %841 = vmatmul.mubr.msk.bf16.vlgmr.msra.gmra.mxu0 %vm434_vm6, %v410_v14 }
 0x1e1   :  { %852 = vmatprep.mubr.msk.bf16.mxu0 %vm927_vm0, %v926_v1  ;;  %845 = vmatpush3.bf16.msra.mxu0 %v585_v22 }
 0x1e2   :  { %846 = vmatprep.subr.bf16.mxu0 %v926_v1 }
 0x1e5   :  { %847 = vmatpush3.bf16.msra.mxu0 %v893_v25 }
 0x1e6   :  { %848 = vmatprep.subr.bf16.mxu0 %v926_v1 }
 0x1e9   :  { %849 = vmatpush3.bf16.msra.mxu0 %v897_v28 }
 0x1ea   :  { %850 = vmatprep.subr.bf16.mxu0 %v926_v1 }
 0x1ed   :  { %851 = vmatpush3.bf16.msra.mxu0 %v901_v31 }
 0x2a0   :  { %v472_v34 = vpop.f32.mrf.mxu0 }
 0x2a1   :  { %v473_v35 = vadd.f32 %v753_v33, %v472_v34 }
 0x2a2   :  { %v842_v1 = vpop.f32.mrf.mxu0 }
 0x2a3   :  { %v478_v36 = vmin.f32 %v473_v35, 0.0  ;;  %vm485_vm7 = vcmp.gt.f32.partialorder %v473_v35, 0.0 }
 0x2a4   :  { %v475_v37 = vpop.f32.mrf.mxu0 }
 0x2a5   :  { %v481_v38 = vmul.f32 1.442695, %v478_v36  ;;  %v479_v39 = vmul.f32 0.5, %v478_v36 }
 0x2a6   :  { %v843_v40 = vpop.f32.mrf.mxu0 }
 0x2a7   :  { %910 = vpow2.f32 %v481_v38 }
 0x2a8   :  { %912 = vtanh.f32 %v479_v39 }
 0x2b4   :  { %v911_v41 = vpop.eup %910 }
 0x2b5   :  { %v483_v42 = vadd.f32 1.0, %v911_v41  ;;  %v913_v43 = vpop.eup %912 }
 0x2b7   :  { %v484_v44 = vmul.f32 %v913_v43, %v483_v42 }
 0x2b9   :  { %v486_v45 = vsel %vm485_vm7, %v473_v35, %v484_v44 }
 0x2ba   :  { %v487_v46 = vpack.c.bf16 %v486_v45, %v486_v45 }
 0x2bc   :  { %770 = vmatmul.mubr.msk.bf16.vlgmr.msra.gmra.mxu1 %vm353_vm4, %v487_v46  ;;  %853 = vmatmul.mubr.msk.bf16.vlgmr.msra.gmra.mxu0 %vm353_vm4, %v487_v46 }
 0x37c   :  { %v621_v53 = vpop.f32.mrf.mxu1  ;;  %v662_v54 = vpop.f32.mrf.mxu0 }
 0x37d   :  { %v622_v56 = vadd.f32 %v621_v53, %v507_v51  ;;  %v663_v57 = vadd.f32 %v662_v54, %v515_v52 }
 0x37e   :  { %v623_v58 = vpop.f32.mrf.mxu1  ;;  %v854_v59 = vpop.f32.mrf.mxu0 }
 0x37f   :  { %v668_v60 = vmin.f32 %v622_v56, 0.0  ;;  %v670_v61 = vmin.f32 %v663_v57, 0.0  ;;  %v624_v62 = vadd.f32 %v623_v58, %v511_v55  ;;  %vm689_vm10 = vcmp.gt.f32.partialorder %v622_v56, 0.0 }
 0x380   :  { %v625_v63 = vpop.f32.mrf.mxu1  ;;  %v665_v0 = vpop.f32.mrf.mxu0  ;;  %vm691_vm11 = vcmp.gt.f32.partialorder %v663_v57, 0.0 }
 0x381   :  { %v671_v2 = vmul.f32 0.5, %v668_v60  ;;  %v677_v3 = vmul.f32 1.442695, %v668_v60  ;;  %v681_v4 = vmul.f32 1.442695, %v670_v61  ;;  %v669_v5 = vmin.f32 %v624_v62, 0.0 }
 0x382   :  { %v626_v6 = vpop.f32.mrf.mxu1  ;;  %v855_v16 = vpop.f32.mrf.mxu0  ;;  %v673_v7 = vmul.f32 0.5, %v670_v61  ;;  %vm690_vm12 = vcmp.gt.f32.partialorder %v624_v62, 0.0 }
 0x383   :  { %914 = vpow2.f32 %v677_v3  ;;  %v679_v8 = vmul.f32 1.442695, %v669_v5  ;;  %v672_v9 = vmul.f32 0.5, %v669_v5 }
 0x384   :  { %916 = vtanh.f32 %v671_v2 }
 0x385   :  { %918 = vpow2.f32 %v681_v4 }
 0x386   :  { %920 = vtanh.f32 %v673_v7 }
 0x387   :  { %922 = vpow2.f32 %v679_v8 }
 0x388   :  { %924 = vtanh.f32 %v672_v9 }
 0x390   :  { %v915_v10 = vpop.eup %914 }
 0x391   :  { %v917_v11 = vpop.eup %916  ;;  %v683_v12 = vadd.f32 1.0, %v915_v10 }
 0x392   :  { %v919_v13 = vpop.eup %918 }
 0x393   :  { %v921_v14 = vpop.eup %920  ;;  %v685_v15 = vadd.f32 1.0, %v919_v13  ;;  %v686_v18 = vmul.f32 %v917_v11, %v683_v12 }
 0x394   :  { %v923_v17 = vpop.eup %922 }
 0x395   :  { %v688_v19 = vmul.f32 %v921_v14, %v685_v15  ;;  %v684_v21 = vadd.f32 1.0, %v923_v17  ;;  %v925_v22 = vpop.eup %924  ;;  %v692_v24 = vsel %vm689_vm10, %v622_v56, %v686_v18 }
 0x397   :  { %v687_v23 = vmul.f32 %v925_v22, %v684_v21  ;;  %v694_v25 = vsel %vm691_vm11, %v663_v57, %v688_v19 }
 0x398   :  { %v712_v28 = vrot.slane %v694_v25, %v1030_v20 }
 0x399   :  { %v693_v26 = vsel %vm690_vm12, %v624_v62, %v687_v23 }
 0x39a   :  { %v698_v27 = vcombine.low %v692_v24, %v693_v26 }
 0x39c   :  { %v705_v29 = vrot.slane %v698_v27, %v1030_v20 }
 0x39e   :  { %v713_v30 = vcombine.low %v705_v29, %v712_v28 }
 0x3a0   :  { %720 = vst.msk [vmem:[%s1159_s9] sm:$0x3f] %vm719_vm15, %v713_v30 }

// kernel: autoencoder_forward.5
= control target key start
LH: loop header
LB: loop body
LE: loop exit
PB: predicated region body
PF: predicated region fallthrough
CT: control target
= control target key end

     0   :  { %9 = vsyncpa [#allocation3], 0  ;;  %s3872_s0 = inlined_call_operand.vmem [shape: f32[2,14,32], index: 0, kind: input, shape index: {}]   ;;  %s3873_s1 = inlined_call_operand.vmem [shape: f32[2,14,32], index: 1, kind: input, shape index: {}]   ;;  %s3874_s2 = inlined_call_operand.hbm [shape: bf16[10,32,384], index: 2, kind: input, shape index: {}]   ;;  %s3875_s3 = inlined_call_operand.hbm [shape: f32[1,384], index: 3, kind: input, shape index: {}]   ;;  %s3876_s4 = inlined_call_operand.vmem [shape: f32[2,12,384], index: 4, kind: output, shape index: {}]  }
   0x1   :  { %10 = vsyncpa [#allocation5], 0  ;;  %s3212_s15 = smov 0  }
   0x2 LB: > { %s3218_s16 = sadd.s32 4294967295, %s3178_s15   ;;  %p2637_p0 = scmp.ge.s32.totalorder %s3178_s15, 1  ;;  %s3178_s15 = sphi %s3212_s15, %s16_s15  }
   0x3   : > { %p141_p1 = scmp.lt.s32.totalorder %s3178_s15, 3  ;;  %s3180_s17 = smov [#allocation2]  }
   0x4   : > { %s153_s18 = sshll.u32 %s3180_s17, 4  ;;  %p2989_p3 = scmp.eq.s32.totalorder %s3218_s16, 0  ;;  %s154_s18 = int_to_ptr.vmem [resolvable:$true] %s153_s18 }
   0x5   : > { %p3222_p2 = pnand %p2637_p0, %p141_p1  ;;  %s3181_s20 = smov [#allocation4]  }
   0x6   : > { %s167_s21 = sshll.u32 %s3181_s20, 4  ;;  %s3123_s23 = scalar_lea.vmem %s154_s18, 7680  ;;  %s168_s21 = int_to_ptr.vmem [resolvable:$true] %s167_s21 }
   0x7   : > { %p2982_p4 = pneg %p3222_p2  ;;  %p3124_p7 = scmp.ne.s32.totalorder %s154_s18, %s3123_s23 }
   0x8   : > { %p3131_p10 = scmp.lt.s32.totalorder %s154_s18, %s154_s18  ;;  %p3132_p11 = scmp.lt.s32.totalorder %s3123_s23, %s3123_s23 }
   0x9   : > { %p3231_p5 = pnand %p2989_p3, %p2982_p4 }
   0xa   : > { %p3133_p12 = por %p3132_p11, %p3131_p10 }
   0xb   : > { %p3114_p6 = pneg %p3231_p5 }
   0xd   : > { %p3126_p8 = pnand %p3124_p7, %p3114_p6 }
   0xf   : > { %p3127_p9 = pneg %p3126_p8 }
  0x11   : > { %p3134_p13 = pnand %p3133_p12, %p3127_p9 }
  0x13   : > { %3137 = shalt.err (!%p3134_p13)
}
  0x14   : > { %s3182_s24 = smov 192   ;;  %s3183_s25 = smov 12  }
  0x15   : > { %2985 = dma.hbm_to_vmem [thread:$0]  (!%p3231_p5), %s3874_s2, 7680, %s154_s18, [#allocation3], %s3182_s24, %s3182_s24, %s3183_s25  }
  0x16   : > { %s3149_s28 = scalar_lea.vmem %s168_s21, 48  ;;  %s3156_s29 = scalar_lea.vmem %s168_s21, 64 }
  0x17   : > { %p3150_p0 = scmp.ne.s32.totalorder %s168_s21, %s3149_s28  ;;  %p3157_p7 = scmp.lt.s32.totalorder %s168_s21, %s168_s21 }
  0x18   : > { %p3158_p8 = scmp.lt.s32.totalorder %s3156_s29, %s3149_s28 }
  0x19   : > { %p3152_p1 = pnand %p3150_p0, %p3114_p6 }
  0x1a   : > { %p3159_p9 = por %p3158_p8, %p3157_p7 }
  0x1b   : > { %p3153_p4 = pneg %p3152_p1 }
  0x1d   : > { %p3160_p10 = pnand %p3159_p9, %p3153_p4 }
  0x1f   : > { %3163 = shalt.err (!%p3160_p10)
}
  0x20   : > { %2988 = dma.hbm_to_vmem [thread:$0]  (!%p3231_p5), %s3875_s3, 48, %s168_s21, [#allocation5]  }
  0x21   : > { %196 = sbr.rel (%p3222_p2) target bundleno = 438 (0x1b6), region = 36 }
  0x26   : > { %3169 = dma.done.wait (%p2989_p3), [#allocation3], 7680  }
  0x27   : > { %3171 = vsyncadd (%p2989_p3), [#allocation3], 4294959616 }
  0x28   : > { %3173 = dma.done.wait (%p2989_p3), [#allocation5], 48  }
  0x29   : > { %3175 = vsyncadd (%p2989_p3), [#allocation5], 4294967248  ;;  %p231_p6 = scmp.lt.s32.totalorder %s3218_s16, 1  ;;  %v3184_v0 = vmov 0.0   ;;  %vm3185_vm0 = vmmov 0   ;;  %v3186_v1 = vmov 0  }
  0x2a   : > { %2813 = vmatprep.subr.bf16.mxu1 %v3184_v0  ;;  %2817 = vmatprep.mubr.msk.bf16.mxu1 %vm3185_vm0, %v3184_v0  ;;  %v3272_v2 = vld [vmem:[#allocation2 + $0x4c] ss:$12 sps:$4 sm:$0xff]   ;;  %v3274_v3 = vld [vmem:[#allocation2 + $0x50] ss:$12 sps:$4 sm:$0xff]   ;;  %v3282_v4 = vld [vmem:[#allocation2 + $0x48] ss:$12 sps:$4 sm:$0xff]  }
  0x2b   : > { %347 = vmatprep.mubr.bf16.mxu0 %v3186_v1  ;;  %s3927_s16 = smov (!%p231_p6, %s3218_s16), 1  ;;  %327 = vmatprep.subr.bf16.mxu0 %v3272_v2  ;;  %v3285_v5 = vld [vmem:[#allocation2 + $0x34] ss:$12 sps:$4 sm:$0xff]   ;;  %v3289_v6 = vld [vmem:[#allocation2 + $0x38] ss:$12 sps:$4 sm:$0xff]   ;;  %vm311_vm1 = vcmask 261120  }
  0x2c   : > { %s2751_s6 = sshll.u32 %s3927_s16, 4  ;;  %2814 = vmatpush3.bf16.msra.mxu1 %v3274_v3  ;;  %328 = vmatpush1.bf16.msra.mxu0 %v3282_v4  ;;  %v3291_v7 = vld [vmem:[#allocation2 + $0x30] ss:$12 sps:$4 sm:$0xff]   ;;  %v3301_v12 = vld [vmem:[#allocation2 + $0x20] ss:$12 sps:$4 sm:$0xff]   ;;  %s2973_s13 = smul.u32 48, %s3927_s16 }
  0x2d   : > { %s3279_s9 = scalar_lea.vmem %s3873_s1, %s2751_s6  ;;  %2815 = vmatprep.subr.bf16.mxu1 %v3184_v0  ;;  %329 = vmatprep.subr.bf16.mxu0 %v3285_v5  ;;  %v3298_v11 = vld [vmem:[#allocation2 + $0x1c] ss:$12 sps:$4 sm:$0xff]   ;;  %v3305_v13 = vld [vmem:[#allocation2 + $0x18] ss:$12 sps:$4 sm:$0xff]   ;;  %s3310_s12 = scalar_lea.vmem %s3872_s0, %s2751_s6  ;;  %v3326_v18 = vld [vmem:[#allocation2] ss:$12 sps:$4 sm:$0xff]  }
  0x2e   : > { %v267_v8 = vld [vmem:[%s3279_s9] sm:$0xff]  ;;  %v268_v9 = vld [vmem:[%s3279_s9 + $0x8] sm:$0xf]  ;;  %v3356_v26 = vld [vmem:[#allocation2 + $0x10c] ss:$12 sps:$4 sm:$0xff]   ;;  %s3855_s18 = scalar_lea.vmem %s3876_s4, %s2973_s13 }
  0x2f   : > { %v3296_v10 = vpack.c.bf16 %v268_v9, %v267_v8  ;;  %v3313_v14 = vld [vmem:[#allocation2 + $0x4] ss:$12 sps:$4 sm:$0xff]   ;;  %v3320_v15 = vld [vmem:[#allocation2 + $0x8] ss:$12 sps:$4 sm:$0xff]   ;;  %v3335_v21 = vld [vmem:[#allocation2 + $0x140] ss:$12 sps:$4 sm:$0xff]  }
  0x30   : > { %2816 = vmatpush3.bf16.msra.mxu1 %v3289_v6  ;;  %330 = vmatpush1.bf16.msra.mxu0 %v3291_v7  ;;  %v247_v16 = vld [vmem:[%s3310_s12] sm:$0xff]  ;;  %v248_v17 = vld [vmem:[%s3310_s12 + $0x8] sm:$0xf]  ;;  %v3360_v27 = vld [vmem:[#allocation2 + $0x110] ss:$12 sps:$4 sm:$0xff]  }
  0x31   : > { %2821 = vmatprep.subr.bf16.mxu1 %v3184_v0  ;;  %446 = vmatprep.subr.bf16.mxu0 %v3298_v11  ;;  %v3331_v19 = vld [vmem:[#allocation2 + $0x13c] ss:$12 sps:$4 sm:$0xff]   ;;  %v249_v20 = vpack.c.bf16 %v248_v17, %v247_v16  ;;  %v3339_v22 = vld [vmem:[#allocation2 + $0x138] ss:$12 sps:$4 sm:$0xff]   ;;  %v3351_v25 = vld [vmem:[#allocation2 + $0x120] ss:$12 sps:$4 sm:$0xff]  }
  0x32   : > { %v3342_v23 = vld [vmem:[#allocation2 + $0x124] ss:$12 sps:$4 sm:$0xff]   ;;  %v3347_v24 = vld [vmem:[#allocation2 + $0x128] ss:$12 sps:$4 sm:$0xff]   ;;  %v3387_v33 = vld [vmem:[#allocation2 + $0x80] ss:$12 sps:$4 sm:$0xff]  }
  0x33   : > { %2818 = vmatmul.mubr.msk.bf16.vlgmr.msra.gmra.mxu1 %vm311_vm1, %v3296_v10  ;;  %2655 = vmatmul.mubr.msk.bf16.vlgmr.msra.gmra.mxu0 %vm311_vm1, %v3296_v10  ;;  %v3364_v28 = vld [vmem:[#allocation2 + $0x108] ss:$12 sps:$4 sm:$0xff]   ;;  %v3374_v30 = vld [vmem:[#allocation2 + $0xf8] ss:$12 sps:$4 sm:$0xff]   ;;  %v3378_v31 = vld [vmem:[#allocation2 + $0xf0] ss:$12 sps:$4 sm:$0xff]  }
  0x34   : > { %2822 = vmatpush3.bf16.msra.mxu1 %v3301_v12  ;;  %447 = vmatpush1.bf16.msra.mxu0 %v3305_v13  ;;  %v3367_v29 = vld [vmem:[#allocation2 + $0xf4] ss:$12 sps:$4 sm:$0xff]   ;;  %v3383_v32 = vld [vmem:[#allocation2 + $0x7c] ss:$12 sps:$4 sm:$0xff]   ;;  %v3391_v34 = vld [vmem:[#allocation2 + $0x78] ss:$12 sps:$4 sm:$0xff]  }
  0x35   : > { %2823 = vmatprep.subr.bf16.mxu1 %v3184_v0  ;;  %448 = vmatprep.subr.bf16.mxu0 %v3313_v14  ;;  %v3394_v35 = vld [vmem:[#allocation2 + $0x64] ss:$12 sps:$4 sm:$0xff]   ;;  %v760_v37 = vld [vmem:[%s3310_s12 + $0x9] sm:$0xf]  ;;  %v3423_v44 = vld [vmem:[#allocation2 + $0x154] ss:$12 sps:$4 sm:$0xff]  }
  0x36   : > { %2825 = vmatprep.mubr.msk.bf16.mxu1 %vm3185_vm0, %v3184_v0  ;;  %466 = vmatprep.mubr.bf16.mxu0 %v3186_v1  ;;  %v759_v36 = vld [vmem:[%s3310_s12 + $0x1] sm:$0xff]  ;;  %v3410_v40 = vld [vmem:[#allocation2 + $0x16c] ss:$12 sps:$4 sm:$0xff]   ;;  %v3416_v42 = vld [vmem:[#allocation2 + $0x170] ss:$12 sps:$4 sm:$0xff]  }
  0x37   : > { %v3401_v38 = vld [vmem:[#allocation2 + $0x68] ss:$12 sps:$4 sm:$0xff]   ;;  %v3405_v39 = vld [vmem:[#allocation2 + $0x60] ss:$12 sps:$4 sm:$0xff]   ;;  %v3413_v41 = vpack.c.bf16 %v760_v37, %v759_v36  ;;  %v3430_v45 = vld [vmem:[#allocation2 + $0x158] ss:$12 sps:$4 sm:$0xff]  }
  0x38   : > { %2824 = vmatpush3.bf16.msra.mxu1 %v3320_v15  ;;  %449 = vmatpush1.bf16.msra.mxu0 %v3326_v18  ;;  %v3420_v43 = vld [vmem:[#allocation2 + $0x168] ss:$12 sps:$4 sm:$0xff]   ;;  %v3434_v46 = vld [vmem:[#allocation2 + $0x150] ss:$12 sps:$4 sm:$0xff]   ;;  %v3439_v47 = vld [vmem:[#allocation2 + $0xac] ss:$12 sps:$4 sm:$0xff]  }
  0x39   : > { %2829 = vmatprep.subr.bf16.mxu1 %v3184_v0  ;;  %571 = vmatprep.subr.bf16.mxu0 %v3331_v19  ;;  %v3443_v48 = vld [vmem:[#allocation2 + $0xb0] ss:$12 sps:$4 sm:$0xff]   ;;  %v3447_v49 = vld [vmem:[#allocation2 + $0xa8] ss:$12 sps:$4 sm:$0xff]   ;;  %v3457_v51 = vld [vmem:[#allocation2 + $0x98] ss:$12 sps:$4 sm:$0xff]  }
  0x3a   : > { %v3450_v50 = vld [vmem:[#allocation2 + $0x94] ss:$12 sps:$4 sm:$0xff]   ;;  %v1028_v53 = vld [vmem:[%s3279_s9 + $0x9] sm:$0xf]  ;;  %v3463_v54 = vld [vmem:[#allocation2 + $0x90] ss:$12 sps:$4 sm:$0xff]  }
  0x3b   : > { %2826 = vmatmul.mubr.msk.bf16.vlgmr.msra.gmra.mxu1 %vm311_vm1, %v249_v20  ;;  %2663 = vmatmul.mubr.msk.bf16.vlgmr.msra.gmra.mxu0 %vm311_vm1, %v249_v20  ;;  %v1027_v52 = vld [vmem:[%s3279_s9 + $0x1] sm:$0xff]  ;;  %v1296_v17 = vld [vmem:[%s3310_s12 + $0xa] sm:$0xf] }
  0x3c   : > { %2830 = vmatpush3.bf16.msra.mxu1 %v3335_v21  ;;  %572 = vmatpush1.bf16.msra.mxu0 %v3339_v22  ;;  %v3468_v55 = vld [vmem:[#allocation2 + $0x19c] ss:$12 sps:$4 sm:$0xff]   ;;  %v3471_v56 = vpack.c.bf16 %v1028_v53, %v1027_v52  ;;  %v3474_v57 = vld [vmem:[#allocation2 + $0x1a0] ss:$12 sps:$4 sm:$0xff]   ;;  %v3478_v58 = vld [vmem:[#allocation2 + $0x198] ss:$12 sps:$4 sm:$0xff]  }
  0x3d   : > { %2831 = vmatprep.subr.bf16.mxu1 %v3184_v0  ;;  %573 = vmatprep.subr.bf16.mxu0 %v3342_v23  ;;  %v3481_v59 = vld [vmem:[#allocation2 + $0x184] ss:$12 sps:$4 sm:$0xff]   ;;  %v3488_v60 = vld [vmem:[#allocation2 + $0x188] ss:$12 sps:$4 sm:$0xff]   ;;  %v3492_v61 = vld [vmem:[#allocation2 + $0x180] ss:$12 sps:$4 sm:$0xff]  }
  0x3e   : > { %2833 = vmatprep.mubr.msk.bf16.mxu1 %vm3185_vm0, %v3184_v0  ;;  %591 = vmatprep.mubr.bf16.mxu0 %v3186_v1  ;;  %v3497_v62 = vld [vmem:[#allocation2 + $0xdc] ss:$12 sps:$4 sm:$0xff]   ;;  %v3501_v63 = vld [vmem:[#allocation2 + $0xe0] ss:$12 sps:$4 sm:$0xff]   ;;  %v3505_v8 = vld [vmem:[#allocation2 + $0xd8] ss:$12 sps:$4 sm:$0xff]  }
  0x3f   : > { %3892 = vst [vmem:[#allocation8_spill] sm:$0xff] %v3505_v8  ;;  %v3508_v9 = vld [vmem:[#allocation2 + $0xc4] ss:$12 sps:$4 sm:$0xff]   ;;  %v3521_v36 = vld [vmem:[#allocation2 + $0xc0] ss:$12 sps:$4 sm:$0xff]  }
  0x40   : > { %2832 = vmatpush3.bf16.msra.mxu1 %v3347_v24  ;;  %574 = vmatpush1.bf16.msra.mxu0 %v3351_v25  ;;  %3893 = vst [vmem:[#allocation9_spill] sm:$0xff] %v3508_v9  ;;  %v1295_v16 = vld [vmem:[%s3310_s12 + $0x2] sm:$0xff]  ;;  %v3526_v37 = vld [vmem:[#allocation2 + $0x1cc] ss:$12 sps:$4 sm:$0xff]   ;;  %v3532_v53 = vld [vmem:[#allocation2 + $0x1d0] ss:$12 sps:$4 sm:$0xff]  }
  0x41   : > { %2837 = vmatprep.subr.bf16.mxu1 %v3184_v0  ;;  %687 = vmatprep.subr.bf16.mxu0 %v3356_v26  ;;  %v3529_v52 = vpack.c.bf16 %v1296_v17, %v1295_v16  ;;  %v3546_v16 = vld [vmem:[#allocation2 + $0x1b8] ss:$12 sps:$4 sm:$0xff]   ;;  %v3550_v17 = vld [vmem:[#allocation2 + $0x1b0] ss:$12 sps:$4 sm:$0xff]  }
  0x43   : > { %2834 = vmatmul.mubr.msk.bf16.vlgmr.msra.gmra.mxu1 %vm311_vm1, %v3296_v10  ;;  %2671 = vmatmul.mubr.msk.bf16.vlgmr.msra.gmra.mxu0 %vm311_vm1, %v3296_v10 }
  0x44   : > { %2838 = vmatpush3.bf16.msra.mxu1 %v3360_v27  ;;  %688 = vmatpush1.bf16.msra.mxu0 %v3364_v28 }
  0x45   : > { %2839 = vmatprep.subr.bf16.mxu1 %v3184_v0  ;;  %689 = vmatprep.subr.bf16.mxu0 %v3367_v29 }
  0x46   : > { %2841 = vmatprep.mubr.msk.bf16.mxu1 %vm3185_vm0, %v3184_v0  ;;  %707 = vmatprep.mubr.bf16.mxu0 %v3186_v1 }
  0x48   : > { %2840 = vmatpush3.bf16.msra.mxu1 %v3374_v30  ;;  %690 = vmatpush1.bf16.msra.mxu0 %v3378_v31 }
  0x49   : > { %2845 = vmatprep.subr.bf16.mxu1 %v3184_v0  ;;  %818 = vmatprep.subr.bf16.mxu0 %v3383_v32 }
  0x4b   : > { %2842 = vmatmul.mubr.msk.bf16.vlgmr.msra.gmra.mxu1 %vm311_vm1, %v249_v20  ;;  %2679 = vmatmul.mubr.msk.bf16.vlgmr.msra.gmra.mxu0 %vm311_vm1, %v249_v20  ;;  %v3517_v20 = vld [vmem:[#allocation2 + $0xc8] ss:$12 sps:$4 sm:$0xff]  }
  0x4c   : > { %2846 = vmatpush3.bf16.msra.mxu1 %v3387_v33  ;;  %819 = vmatpush1.bf16.msra.mxu0 %v3391_v34 }
  0x4d   : > { %2847 = vmatprep.subr.bf16.mxu1 %v3184_v0  ;;  %820 = vmatprep.subr.bf16.mxu0 %v3394_v35 }
  0x4e   : > { %2849 = vmatprep.mubr.msk.bf16.mxu1 %vm3185_vm0, %v3184_v0  ;;  %838 = vmatprep.mubr.bf16.mxu0 %v3186_v1 }
  0x50   : > { %2848 = vmatpush3.bf16.msra.mxu1 %v3401_v38  ;;  %821 = vmatpush1.bf16.msra.mxu0 %v3405_v39 }
  0x51   : > { %2853 = vmatprep.subr.bf16.mxu1 %v3184_v0  ;;  %949 = vmatprep.subr.bf16.mxu0 %v3410_v40 }
  0x53   : > { %2850 = vmatmul.mubr.msk.bf16.vlgmr.msra.gmra.mxu1 %vm311_vm1, %v3413_v41  ;;  %2687 = vmatmul.mubr.msk.bf16.vlgmr.msra.gmra.mxu0 %vm311_vm1, %v3413_v41 }
  0x54   : > { %2854 = vmatpush3.bf16.msra.mxu1 %v3416_v42  ;;  %950 = vmatpush1.bf16.msra.mxu0 %v3420_v43 }
  0x55   : > { %2855 = vmatprep.subr.bf16.mxu1 %v3184_v0  ;;  %951 = vmatprep.subr.bf16.mxu0 %v3423_v44 }
  0x56   : > { %2857 = vmatprep.mubr.msk.bf16.mxu1 %vm3185_vm0, %v3184_v0  ;;  %969 = vmatprep.mubr.bf16.mxu0 %v3186_v1 }
  0x58   : > { %2856 = vmatpush3.bf16.msra.mxu1 %v3430_v45  ;;  %952 = vmatpush1.bf16.msra.mxu0 %v3434_v46 }
  0x59   : > { %2861 = vmatprep.subr.bf16.mxu1 %v3184_v0  ;;  %1086 = vmatprep.subr.bf16.mxu0 %v3439_v47 }
  0x5b   : > { %2858 = vmatmul.mubr.msk.bf16.vlgmr.msra.gmra.mxu1 %vm311_vm1, %v3413_v41  ;;  %2695 = vmatmul.mubr.msk.bf16.vlgmr.msra.gmra.mxu0 %vm311_vm1, %v3413_v41 }
  0x5c   : > { %2862 = vmatpush3.bf16.msra.mxu1 %v3443_v48  ;;  %1087 = vmatpush1.bf16.msra.mxu0 %v3447_v49 }
  0x5d   : > { %2863 = vmatprep.subr.bf16.mxu1 %v3184_v0  ;;  %1088 = vmatprep.subr.bf16.mxu0 %v3450_v50 }
  0x5e   : > { %2865 = vmatprep.mubr.msk.bf16.mxu1 %vm3185_vm0, %v3184_v0  ;;  %1106 = vmatprep.mubr.bf16.mxu0 %v3186_v1 }
  0x60   : > { %2864 = vmatpush3.bf16.msra.mxu1 %v3457_v51  ;;  %1089 = vmatpush1.bf16.msra.mxu0 %v3463_v54 }
  0x61   : > { %2869 = vmatprep.subr.bf16.mxu1 %v3184_v0  ;;  %1217 = vmatprep.subr.bf16.mxu0 %v3468_v55 }
  0x63   : > { %2866 = vmatmul.mubr.msk.bf16.vlgmr.msra.gmra.mxu1 %vm311_vm1, %v3471_v56  ;;  %2703 = vmatmul.mubr.msk.bf16.vlgmr.msra.gmra.mxu0 %vm311_vm1, %v3471_v56 }
  0x64   : > { %2870 = vmatpush3.bf16.msra.mxu1 %v3474_v57  ;;  %1218 = vmatpush1.bf16.msra.mxu0 %v3478_v58 }
  0x65   : > { %2871 = vmatprep.subr.bf16.mxu1 %v3184_v0  ;;  %1219 = vmatprep.subr.bf16.mxu0 %v3481_v59 }
  0x66   : > { %2873 = vmatprep.mubr.msk.bf16.mxu1 %vm3185_vm0, %v3184_v0  ;;  %1237 = vmatprep.mubr.bf16.mxu0 %v3186_v1 }
  0x68   : > { %2872 = vmatpush3.bf16.msra.mxu1 %v3488_v60  ;;  %1220 = vmatpush1.bf16.msra.mxu0 %v3492_v61 }
  0x69   : > { %2877 = vmatprep.subr.bf16.mxu1 %v3184_v0  ;;  %1354 = vmatprep.subr.bf16.mxu0 %v3497_v62 }
  0x6b   : > { %2874 = vmatmul.mubr.msk.bf16.vlgmr.msra.gmra.mxu1 %vm311_vm1, %v3471_v56  ;;  %2711 = vmatmul.mubr.msk.bf16.vlgmr.msra.gmra.mxu0 %vm311_vm1, %v3471_v56 }
  0x6c   : > { %2878 = vmatpush3.bf16.msra.mxu1 %v3501_v63  ;;  %1355 = vmatpush1.bf16.msra.mxu0 %v3505_v8  ;;  %v3536_v8 = vld [vmem:[#allocation2 + $0x1c8] ss:$12 sps:$4 sm:$0xff]  }
  0x6d   : > { %2879 = vmatprep.subr.bf16.mxu1 %v3184_v0  ;;  %1356 = vmatprep.subr.bf16.mxu0 %v3508_v9  ;;  %v3539_v9 = vld [vmem:[#allocation2 + $0x1b4] ss:$12 sps:$4 sm:$0xff]  }
  0x6e   : > { %2881 = vmatprep.mubr.msk.bf16.mxu1 %vm3185_vm0, %v3184_v0  ;;  %1374 = vmatprep.mubr.bf16.mxu0 %v3186_v1 }
  0x70   : > { %2880 = vmatpush3.bf16.msra.mxu1 %v3517_v20  ;;  %1357 = vmatpush1.bf16.msra.mxu0 %v3521_v36 }
  0x71   : > { %2885 = vmatprep.subr.bf16.mxu1 %v3184_v0  ;;  %1485 = vmatprep.subr.bf16.mxu0 %v3526_v37 }
  0x73   : > { %2882 = vmatmul.mubr.msk.bf16.vlgmr.msra.gmra.mxu1 %vm311_vm1, %v3529_v52  ;;  %2719 = vmatmul.mubr.msk.bf16.vlgmr.msra.gmra.mxu0 %vm311_vm1, %v3529_v52 }
  0x74   : > { %2886 = vmatpush3.bf16.msra.mxu1 %v3532_v53  ;;  %1486 = vmatpush1.bf16.msra.mxu0 %v3536_v8 }
  0x75   : > { %2887 = vmatprep.subr.bf16.mxu1 %v3184_v0  ;;  %1487 = vmatprep.subr.bf16.mxu0 %v3539_v9 }
  0x76   : > { %2889 = vmatprep.mubr.msk.bf16.mxu1 %vm3185_vm0, %v3184_v0  ;;  %1505 = vmatprep.mubr.bf16.mxu0 %v3186_v1 }
  0x78   : > { %2888 = vmatpush3.bf16.msra.mxu1 %v3546_v16  ;;  %1488 = vmatpush1.bf16.msra.mxu0 %v3550_v17 }
  0x79   : > { %2893 = vmatprep.subr.bf16.mxu1 %v3184_v0  ;;  %1581 = vmatprep.subr.bf16.mxu0 %v3272_v2  ;;  %v2265_v2 = vld [vmem:[%s3279_s9 + $0x2] sm:$0xff] }
  0x7b   : > { %2890 = vmatmul.mubr.msk.bf16.vlgmr.msra.gmra.mxu1 %vm311_vm1, %v3529_v52  ;;  %2727 = vmatmul.mubr.msk.bf16.vlgmr.msra.gmra.mxu0 %vm311_vm1, %v3529_v52 }
  0x7c   : > { %2894 = vmatpush3.bf16.msra.mxu1 %v3274_v3  ;;  %1582 = vmatpush1.bf16.msra.mxu0 %v3282_v4  ;;  %v2266_v3 = vld [vmem:[%s3279_s9 + $0xa] sm:$0xf] }
  0x7d   : > { %2895 = vmatprep.subr.bf16.mxu1 %v3184_v0  ;;  %1583 = vmatprep.subr.bf16.mxu0 %v3285_v5  ;;  %v3894_v4 = vld [vmem:[#allocation8_spill] sm:$0xff]  ;;  %v3895_v5 = vld [vmem:[#allocation9_spill] sm:$0xff] }
  0x7e   : > { %2897 = vmatprep.mubr.msk.bf16.mxu1 %vm3185_vm0, %v3184_v0  ;;  %1601 = vmatprep.mubr.bf16.mxu0 %v3186_v1 }
  0x80   : > { %2896 = vmatpush3.bf16.msra.mxu1 %v3289_v6  ;;  %1584 = vmatpush1.bf16.msra.mxu0 %v3291_v7  ;;  %v2267_v6 = vpack.c.bf16 %v2266_v3, %v2265_v2 }
  0x81   : > { %2901 = vmatprep.subr.bf16.mxu1 %v3184_v0  ;;  %1665 = vmatprep.subr.bf16.mxu0 %v3298_v11 }
  0x83   : > { %2898 = vmatmul.mubr.msk.bf16.vlgmr.msra.gmra.mxu1 %vm311_vm1, %v3413_v41  ;;  %2729 = vmatmul.mubr.msk.bf16.vlgmr.msra.gmra.mxu0 %vm311_vm1, %v3413_v41 }
  0x84   : > { %2902 = vmatpush3.bf16.msra.mxu1 %v3301_v12  ;;  %1666 = vmatpush1.bf16.msra.mxu0 %v3305_v13 }
  0x85   : > { %2903 = vmatprep.subr.bf16.mxu1 %v3184_v0  ;;  %1667 = vmatprep.subr.bf16.mxu0 %v3313_v14 }
  0x86   : > { %2905 = vmatprep.mubr.msk.bf16.mxu1 %vm3185_vm0, %v3184_v0  ;;  %1685 = vmatprep.mubr.bf16.mxu0 %v3186_v1 }
  0x88   : > { %2904 = vmatpush3.bf16.msra.mxu1 %v3320_v15  ;;  %1668 = vmatpush1.bf16.msra.mxu0 %v3326_v18 }
  0x89   : > { %2909 = vmatprep.subr.bf16.mxu1 %v3184_v0  ;;  %1749 = vmatprep.subr.bf16.mxu0 %v3331_v19 }
  0x8b   : > { %2906 = vmatmul.mubr.msk.bf16.vlgmr.msra.gmra.mxu1 %vm311_vm1, %v3296_v10  ;;  %2731 = vmatmul.mubr.msk.bf16.vlgmr.msra.gmra.mxu0 %vm311_vm1, %v3296_v10 }
  0x8c   : > { %2910 = vmatpush3.bf16.msra.mxu1 %v3335_v21  ;;  %1750 = vmatpush1.bf16.msra.mxu0 %v3339_v22 }
  0x8d   : > { %2911 = vmatprep.subr.bf16.mxu1 %v3184_v0  ;;  %1751 = vmatprep.subr.bf16.mxu0 %v3342_v23 }
  0x8e   : > { %2913 = vmatprep.mubr.msk.bf16.mxu1 %vm3185_vm0, %v3184_v0  ;;  %1769 = vmatprep.mubr.bf16.mxu0 %v3186_v1 }
  0x90   : > { %2912 = vmatpush3.bf16.msra.mxu1 %v3347_v24  ;;  %1752 = vmatpush1.bf16.msra.mxu0 %v3351_v25 }
  0x91   : > { %2917 = vmatprep.subr.bf16.mxu1 %v3184_v0  ;;  %1833 = vmatprep.subr.bf16.mxu0 %v3356_v26 }
  0x93   : > { %2914 = vmatmul.mubr.msk.bf16.vlgmr.msra.gmra.mxu1 %vm311_vm1, %v3413_v41  ;;  %2733 = vmatmul.mubr.msk.bf16.vlgmr.msra.gmra.mxu0 %vm311_vm1, %v3413_v41 }
  0x94   : > { %2918 = vmatpush3.bf16.msra.mxu1 %v3360_v27  ;;  %1834 = vmatpush1.bf16.msra.mxu0 %v3364_v28 }
  0x95   : > { %2919 = vmatprep.subr.bf16.mxu1 %v3184_v0  ;;  %1835 = vmatprep.subr.bf16.mxu0 %v3367_v29 }
  0x96   : > { %2921 = vmatprep.mubr.msk.bf16.mxu1 %vm3185_vm0, %v3184_v0  ;;  %1853 = vmatprep.mubr.bf16.mxu0 %v3186_v1 }
  0x98   : > { %2920 = vmatpush3.bf16.msra.mxu1 %v3374_v30  ;;  %1836 = vmatpush1.bf16.msra.mxu0 %v3378_v31 }
  0x99   : > { %2925 = vmatprep.subr.bf16.mxu1 %v3184_v0  ;;  %1917 = vmatprep.subr.bf16.mxu0 %v3383_v32 }
  0x9b   : > { %2922 = vmatmul.mubr.msk.bf16.vlgmr.msra.gmra.mxu1 %vm311_vm1, %v3296_v10  ;;  %2735 = vmatmul.mubr.msk.bf16.vlgmr.msra.gmra.mxu0 %vm311_vm1, %v3296_v10 }
  0x9c   : > { %2926 = vmatpush3.bf16.msra.mxu1 %v3387_v33  ;;  %1918 = vmatpush1.bf16.msra.mxu0 %v3391_v34 }
  0x9d   : > { %2927 = vmatprep.subr.bf16.mxu1 %v3184_v0  ;;  %1919 = vmatprep.subr.bf16.mxu0 %v3394_v35 }
  0x9e   : > { %2929 = vmatprep.mubr.msk.bf16.mxu1 %vm3185_vm0, %v3184_v0  ;;  %1937 = vmatprep.mubr.bf16.mxu0 %v3186_v1 }
  0xa0   : > { %2928 = vmatpush3.bf16.msra.mxu1 %v3401_v38  ;;  %1920 = vmatpush1.bf16.msra.mxu0 %v3405_v39 }
  0xa1   : > { %2933 = vmatprep.subr.bf16.mxu1 %v3184_v0  ;;  %2007 = vmatprep.subr.bf16.mxu0 %v3410_v40 }
  0xa3   : > { %2930 = vmatmul.mubr.msk.bf16.vlgmr.msra.gmra.mxu1 %vm311_vm1, %v3471_v56  ;;  %2737 = vmatmul.mubr.msk.bf16.vlgmr.msra.gmra.mxu0 %vm311_vm1, %v3471_v56 }
  0xa4   : > { %2934 = vmatpush3.bf16.msra.mxu1 %v3416_v42  ;;  %2008 = vmatpush1.bf16.msra.mxu0 %v3420_v43 }
  0xa5   : > { %2935 = vmatprep.subr.bf16.mxu1 %v3184_v0  ;;  %2009 = vmatprep.subr.bf16.mxu0 %v3423_v44 }
  0xa6   : > { %2937 = vmatprep.mubr.msk.bf16.mxu1 %vm3185_vm0, %v3184_v0  ;;  %2027 = vmatprep.mubr.bf16.mxu0 %v3186_v1 }
  0xa8   : > { %2936 = vmatpush3.bf16.msra.mxu1 %v3430_v45  ;;  %2010 = vmatpush1.bf16.msra.mxu0 %v3434_v46 }
  0xa9   : > { %2941 = vmatprep.subr.bf16.mxu1 %v3184_v0  ;;  %2097 = vmatprep.subr.bf16.mxu0 %v3439_v47 }
  0xab   : > { %2938 = vmatmul.mubr.msk.bf16.vlgmr.msra.gmra.mxu1 %vm311_vm1, %v3471_v56  ;;  %2739 = vmatmul.mubr.msk.bf16.vlgmr.msra.gmra.mxu0 %vm311_vm1, %v3471_v56 }
  0xac   : > { %2942 = vmatpush3.bf16.msra.mxu1 %v3443_v48  ;;  %2098 = vmatpush1.bf16.msra.mxu0 %v3447_v49 }
  0xad   : > { %2943 = vmatprep.subr.bf16.mxu1 %v3184_v0  ;;  %2099 = vmatprep.subr.bf16.mxu0 %v3450_v50 }
  0xae   : > { %2945 = vmatprep.mubr.msk.bf16.mxu1 %vm3185_vm0, %v3184_v0  ;;  %2117 = vmatprep.mubr.bf16.mxu0 %v3186_v1 }
  0xb0   : > { %2944 = vmatpush3.bf16.msra.mxu1 %v3457_v51  ;;  %2100 = vmatpush1.bf16.msra.mxu0 %v3463_v54 }
  0xb1   : > { %2949 = vmatprep.subr.bf16.mxu1 %v3184_v0  ;;  %2187 = vmatprep.subr.bf16.mxu0 %v3468_v55 }
  0xb3   : > { %2946 = vmatmul.mubr.msk.bf16.vlgmr.msra.gmra.mxu1 %vm311_vm1, %v3529_v52  ;;  %2741 = vmatmul.mubr.msk.bf16.vlgmr.msra.gmra.mxu0 %vm311_vm1, %v3529_v52 }
  0xb4   : > { %2950 = vmatpush3.bf16.msra.mxu1 %v3474_v57  ;;  %2188 = vmatpush1.bf16.msra.mxu0 %v3478_v58 }
  0xb5   : > { %2951 = vmatprep.subr.bf16.mxu1 %v3184_v0  ;;  %2189 = vmatprep.subr.bf16.mxu0 %v3481_v59 }
  0xb6   : > { %2953 = vmatprep.mubr.msk.bf16.mxu1 %vm3185_vm0, %v3184_v0  ;;  %2207 = vmatprep.mubr.bf16.mxu0 %v3186_v1 }
  0xb8   : > { %2952 = vmatpush3.bf16.msra.mxu1 %v3488_v60  ;;  %2190 = vmatpush1.bf16.msra.mxu0 %v3492_v61 }
  0xb9   : > { %2957 = vmatprep.subr.bf16.mxu1 %v3184_v0  ;;  %2283 = vmatprep.subr.bf16.mxu0 %v3497_v62 }
  0xbb   : > { %2954 = vmatmul.mubr.msk.bf16.vlgmr.msra.gmra.mxu1 %vm311_vm1, %v3529_v52  ;;  %2743 = vmatmul.mubr.msk.bf16.vlgmr.msra.gmra.mxu0 %vm311_vm1, %v3529_v52 }
  0xbc   : > { %2958 = vmatpush3.bf16.msra.mxu1 %v3501_v63  ;;  %2284 = vmatpush1.bf16.msra.mxu0 %v3894_v4 }
  0xbd   : > { %2959 = vmatprep.subr.bf16.mxu1 %v3184_v0  ;;  %2285 = vmatprep.subr.bf16.mxu0 %v3895_v5 }
  0xbe   : > { %2961 = vmatprep.mubr.msk.bf16.mxu1 %vm3185_vm0, %v3184_v0  ;;  %2303 = vmatprep.mubr.bf16.mxu0 %v3186_v1 }
  0xc0   : > { %2960 = vmatpush3.bf16.msra.mxu1 %v3517_v20  ;;  %2286 = vmatpush1.bf16.msra.mxu0 %v3521_v36 }
  0xc1   : > { %2965 = vmatprep.subr.bf16.mxu1 %v3184_v0  ;;  %2373 = vmatprep.subr.bf16.mxu0 %v3526_v37 }
  0xc3   : > { %2962 = vmatmul.mubr.msk.bf16.vlgmr.msra.gmra.mxu1 %vm311_vm1, %v2267_v6  ;;  %2745 = vmatmul.mubr.msk.bf16.vlgmr.msra.gmra.mxu0 %vm311_vm1, %v2267_v6 }
  0xc4   : > { %2966 = vmatpush3.bf16.msra.mxu1 %v3532_v53  ;;  %2374 = vmatpush1.bf16.msra.mxu0 %v3536_v8 }
  0xc5   : > { %2967 = vmatprep.subr.bf16.mxu1 %v3184_v0  ;;  %2375 = vmatprep.subr.bf16.mxu0 %v3539_v9 }
  0xc6   : > { %2969 = vmatprep.mubr.msk.bf16.mxu1 %vm3185_vm0, %v3184_v0  ;;  %2393 = vmatprep.mubr.bf16.mxu0 %v3186_v1 }
  0xc8   : > { %2968 = vmatpush3.bf16.msra.mxu1 %v3546_v16  ;;  %2376 = vmatpush1.bf16.msra.mxu0 %v3550_v17 }
  0xcb   : > { %2970 = vmatmul.mubr.msk.bf16.vlgmr.msra.gmra.mxu1 %vm311_vm1, %v2267_v6  ;;  %2747 = vmatmul.mubr.msk.bf16.vlgmr.msra.gmra.mxu0 %vm311_vm1, %v2267_v6 }
  0xf3   : > { %v392_v7 = vpop.f32.mrf.mxu1  ;;  %v349_v10 = vpop.f32.mrf.mxu0 }
  0xf5   : > { %v2819_v11 = vpop.f32.mrf.mxu1  ;;  %v351_v12 = vpop.f32.mrf.mxu0 }
  0xf7   : > { %v395_v13 = vpop.f32.mrf.mxu1  ;;  %v353_v14 = vpop.f32.mrf.mxu0 }
  0xf9   : > { %v2820_v15 = vpop.f32.mrf.mxu1  ;;  %v355_v18 = vpop.f32.mrf.mxu0 }
  0xfb   : > { %v511_v19 = vpop.f32.mrf.mxu1  ;;  %v468_v21 = vpop.f32.mrf.mxu0 }
  0xfc   : > { %v512_v0 = vadd.f32 %v511_v19, %v392_v7  ;;  %v469_v1 = vadd.f32 %v468_v21, %v349_v10 }
  0xfd   : > { %v2827_v22 = vpop.f32.mrf.mxu1  ;;  %v470_v23 = vpop.f32.mrf.mxu0 }
  0xfe   : > { %v471_v24 = vadd.f32 %v470_v23, %v351_v12 }
  0xff   : > { %v514_v25 = vpop.f32.mrf.mxu1  ;;  %v472_v27 = vpop.f32.mrf.mxu0 }
 0x100   : > { %v515_v26 = vadd.f32 %v514_v25, %v395_v13  ;;  %v473_v28 = vadd.f32 %v472_v27, %v353_v14 }
 0x101   : > { %v2828_v29 = vpop.f32.mrf.mxu1  ;;  %v474_v30 = vpop.f32.mrf.mxu0 }
 0x102   : > { %v475_v31 = vadd.f32 %v474_v30, %v355_v18 }
 0x103   : > { %v636_v32 = vpop.f32.mrf.mxu1  ;;  %v593_v33 = vpop.f32.mrf.mxu0 }
 0x105   : > { %v2835_v34 = vpop.f32.mrf.mxu1  ;;  %v595_v35 = vpop.f32.mrf.mxu0 }
 0x107   : > { %v639_v38 = vpop.f32.mrf.mxu1  ;;  %v597_v39 = vpop.f32.mrf.mxu0 }
 0x109   : > { %v2836_v40 = vpop.f32.mrf.mxu1  ;;  %v599_v41 = vpop.f32.mrf.mxu0 }
 0x10b   : > { %v752_v42 = vpop.f32.mrf.mxu1  ;;  %v709_v44 = vpop.f32.mrf.mxu0 }
 0x10c   : > { %v753_v43 = vadd.f32 %v752_v42, %v636_v32  ;;  %v710_v45 = vadd.f32 %v709_v44, %v593_v33 }
 0x10d   : > { %v2843_v46 = vpop.f32.mrf.mxu1  ;;  %v711_v47 = vpop.f32.mrf.mxu0 }
 0x10e   : > { %v712_v48 = vadd.f32 %v711_v47, %v595_v35 }
 0x10f   : > { %v755_v49 = vpop.f32.mrf.mxu1  ;;  %v713_v51 = vpop.f32.mrf.mxu0 }
 0x110   : > { %v756_v50 = vadd.f32 %v755_v49, %v639_v38  ;;  %v714_v54 = vadd.f32 %v713_v51, %v597_v39 }
 0x111   : > { %v2844_v55 = vpop.f32.mrf.mxu1  ;;  %v715_v56 = vpop.f32.mrf.mxu0 }
 0x112   : > { %v716_v57 = vadd.f32 %v715_v56, %v599_v41 }
 0x113   : > { %v883_v58 = vpop.f32.mrf.mxu1  ;;  %v840_v60 = vpop.f32.mrf.mxu0 }
 0x114   : > { %v892_v59 = vadd.f32 %v883_v58, %v512_v0  ;;  %v890_v61 = vadd.f32 %v840_v60, %v469_v1 }
 0x115   : > { %v2851_v62 = vpop.f32.mrf.mxu1  ;;  %v842_v63 = vpop.f32.mrf.mxu0 }
 0x116   : > { %v891_v8 = vadd.f32 %v842_v63, %v471_v24 }
 0x117   : > { %v886_v9 = vpop.f32.mrf.mxu1  ;;  %v844_v36 = vpop.f32.mrf.mxu0 }
 0x118   : > { %v895_v20 = vadd.f32 %v886_v9, %v515_v26  ;;  %v893_v37 = vadd.f32 %v844_v36, %v473_v28 }
 0x119   : > { %v2852_v52 = vpop.f32.mrf.mxu1  ;;  %v846_v53 = vpop.f32.mrf.mxu0 }
 0x11a   : > { %v894_v16 = vadd.f32 %v846_v53, %v475_v31 }
 0x11b   : > { %v1014_v17 = vpop.f32.mrf.mxu1  ;;  %v971_v3 = vpop.f32.mrf.mxu0 }
 0x11c   : > { %v1023_v2 = vadd.f32 %v1014_v17, %v753_v43  ;;  %v1021_v4 = vadd.f32 %v971_v3, %v710_v45 }
 0x11d   : > { %v2859_v5 = vpop.f32.mrf.mxu1  ;;  %v973_v6 = vpop.f32.mrf.mxu0 }
 0x11e   : > { %v1022_v7 = vadd.f32 %v973_v6, %v712_v48 }
 0x11f   : > { %v1017_v10 = vpop.f32.mrf.mxu1  ;;  %v975_v12 = vpop.f32.mrf.mxu0 }
 0x120   : > { %v1026_v11 = vadd.f32 %v1017_v10, %v756_v50  ;;  %v1024_v13 = vadd.f32 %v975_v12, %v714_v54 }
 0x121   : > { %v2860_v14 = vpop.f32.mrf.mxu1  ;;  %v977_v15 = vpop.f32.mrf.mxu0 }
 0x122   : > { %v1025_v18 = vadd.f32 %v977_v15, %v716_v57 }
 0x123   : > { %v1151_v19 = vpop.f32.mrf.mxu1  ;;  %v1108_v21 = vpop.f32.mrf.mxu0 }
 0x124   : > { %v1160_v0 = vadd.f32 %v1151_v19, %v892_v59  ;;  %v1158_v1 = vadd.f32 %v1108_v21, %v890_v61 }
 0x125   : > { %v2867_v22 = vpop.f32.mrf.mxu1  ;;  %v1110_v23 = vpop.f32.mrf.mxu0 }
 0x126   : > { %v1159_v24 = vadd.f32 %v1110_v23, %v891_v8 }
 0x127   : > { %v1154_v25 = vpop.f32.mrf.mxu1  ;;  %v1112_v27 = vpop.f32.mrf.mxu0 }
 0x128   : > { %v1163_v26 = vadd.f32 %v1154_v25, %v895_v20  ;;  %v1161_v28 = vadd.f32 %v1112_v27, %v893_v37 }
 0x129   : > { %v2868_v29 = vpop.f32.mrf.mxu1  ;;  %v1114_v30 = vpop.f32.mrf.mxu0 }
 0x12a   : > { %v1162_v31 = vadd.f32 %v1114_v30, %v894_v16 }
 0x12b   : > { %v1282_v32 = vpop.f32.mrf.mxu1  ;;  %v1239_v34 = vpop.f32.mrf.mxu0 }
 0x12c   : > { %v1291_v33 = vadd.f32 %v1282_v32, %v1023_v2  ;;  %v1289_v35 = vadd.f32 %v1239_v34, %v1021_v4 }
 0x12d   : > { %v2875_v38 = vpop.f32.mrf.mxu1  ;;  %v1241_v39 = vpop.f32.mrf.mxu0 }
 0x12e   : > { %v1290_v40 = vadd.f32 %v1241_v39, %v1022_v7 }
 0x12f   : > { %v1285_v41 = vpop.f32.mrf.mxu1  ;;  %v1243_v43 = vpop.f32.mrf.mxu0 }
 0x130   : > { %v1294_v42 = vadd.f32 %v1285_v41, %v1026_v11  ;;  %v1292_v44 = vadd.f32 %v1243_v43, %v1024_v13 }
 0x131   : > { %v2876_v45 = vpop.f32.mrf.mxu1  ;;  %v1245_v46 = vpop.f32.mrf.mxu0 }
 0x132   : > { %v1293_v47 = vadd.f32 %v1245_v46, %v1025_v18 }
 0x133   : > { %v1419_v48 = vpop.f32.mrf.mxu1  ;;  %v1376_v50 = vpop.f32.mrf.mxu0 }
 0x134   : > { %v3710_v49 = vadd.f32 %v1419_v48, %v1160_v0  ;;  %v3712_v51 = vadd.f32 %v1376_v50, %v1158_v1 }
 0x135   : > { %v2883_v54 = vpop.f32.mrf.mxu1  ;;  %v1378_v55 = vpop.f32.mrf.mxu0 }
 0x136   : > { %v3714_v56 = vadd.f32 %v1378_v55, %v1159_v24 }
 0x137   : > { %v1422_v57 = vpop.f32.mrf.mxu1  ;;  %v1380_v59 = vpop.f32.mrf.mxu0 }
 0x138   : > { %3896 = vst [vmem:[#allocation8_spill] sm:$0xff] %v3714_v56  ;;  %v3716_v58 = vadd.f32 %v1422_v57, %v1163_v26  ;;  %v3718_v60 = vadd.f32 %v1380_v59, %v1161_v28 }
 0x139   : > { %v2884_v61 = vpop.f32.mrf.mxu1  ;;  %v1382_v62 = vpop.f32.mrf.mxu0 }
 0x13a   : > { %3897 = vst [vmem:[#allocation9_spill] sm:$0xff] %v3716_v58  ;;  %3898 = vst [vmem:[#allocation10_spill] sm:$0xff] %v3718_v60  ;;  %v3720_v63 = vadd.f32 %v1382_v62, %v1162_v31 }
 0x13b   : > { %v1550_v8 = vpop.f32.mrf.mxu1  ;;  %v1507_v20 = vpop.f32.mrf.mxu0 }
 0x13c   : > { %3899 = vst [vmem:[#allocation11_spill] sm:$0xff] %v3720_v63  ;;  %v3722_v9 = vadd.f32 %v1550_v8, %v1291_v33  ;;  %v3724_v36 = vadd.f32 %v1507_v20, %v1289_v35 }
 0x13d   : > { %v2891_v37 = vpop.f32.mrf.mxu1  ;;  %v1509_v53 = vpop.f32.mrf.mxu0 }
 0x13e   : > { %3900 = vst [vmem:[#allocation12_spill] sm:$0xff] %v3724_v36  ;;  %v3730_v17 = vadd.f32 %v1509_v53, %v1290_v40 }
 0x13f   : > { %v1553_v2 = vpop.f32.mrf.mxu1  ;;  %v1511_v4 = vpop.f32.mrf.mxu0 }
 0x140   : > { %3901 = vst [vmem:[#allocation13_spill] sm:$0xff] %v3730_v17  ;;  %v3732_v3 = vadd.f32 %v1553_v2, %v1294_v42  ;;  %v3736_v6 = vadd.f32 %v1511_v4, %v1292_v44 }
 0x141   : > { %v2892_v7 = vpop.f32.mrf.mxu1  ;;  %v1513_v11 = vpop.f32.mrf.mxu0 }
 0x142   : > { %3902 = vst [vmem:[#allocation14_spill] sm:$0xff] %v3732_v3  ;;  %3903 = vst [vmem:[#allocation15_spill] sm:$0xff] %v3736_v6  ;;  %v3742_v13 = vadd.f32 %v1513_v11, %v1293_v47  ;;  %v2463_v6 = vld [vmem:[#allocation4] sm:$0x7] }
 0x143   : > { %v3744_v14 = vpop.f32.mrf.mxu1  ;;  %v3746_v15 = vpop.f32.mrf.mxu0 }
 0x144   : > { %3904 = vst [vmem:[#allocation16_spill] sm:$0xff] %v3742_v13 }
 0x145   : > { %v2899_v19 = vpop.f32.mrf.mxu1  ;;  %v3750_v0 = vpop.f32.mrf.mxu0 }
 0x147   : > { %v3752_v21 = vpop.f32.mrf.mxu1  ;;  %v3754_v1 = vpop.f32.mrf.mxu0 }
 0x149   : > { %v2900_v22 = vpop.f32.mrf.mxu1  ;;  %v3756_v23 = vpop.f32.mrf.mxu0 }
 0x14b   : > { %v3758_v24 = vpop.f32.mrf.mxu1  ;;  %v3760_v25 = vpop.f32.mrf.mxu0 }
 0x14d   : > { %v2907_v26 = vpop.f32.mrf.mxu1  ;;  %v3762_v27 = vpop.f32.mrf.mxu0 }
 0x14f   : > { %v3764_v28 = vpop.f32.mrf.mxu1  ;;  %v3766_v29 = vpop.f32.mrf.mxu0 }
 0x151   : > { %v2908_v30 = vpop.f32.mrf.mxu1  ;;  %v3768_v31 = vpop.f32.mrf.mxu0 }
 0x153   : > { %v3770_v32 = vpop.f32.mrf.mxu1  ;;  %v3772_v33 = vpop.f32.mrf.mxu0 }
 0x155   : > { %v2915_v34 = vpop.f32.mrf.mxu1  ;;  %v3774_v35 = vpop.f32.mrf.mxu0 }
 0x157   : > { %v3776_v38 = vpop.f32.mrf.mxu1  ;;  %v3778_v39 = vpop.f32.mrf.mxu0 }
 0x159   : > { %v2916_v40 = vpop.f32.mrf.mxu1  ;;  %v3780_v41 = vpop.f32.mrf.mxu0 }
 0x15b   : > { %v1898_v42 = vpop.f32.mrf.mxu1  ;;  %v1855_v43 = vpop.f32.mrf.mxu0 }
 0x15d   : > { %v2923_v44 = vpop.f32.mrf.mxu1  ;;  %v1857_v45 = vpop.f32.mrf.mxu0 }
 0x15f   : > { %v1901_v46 = vpop.f32.mrf.mxu1  ;;  %v1859_v47 = vpop.f32.mrf.mxu0 }
 0x161   : > { %v2924_v48 = vpop.f32.mrf.mxu1  ;;  %v1861_v50 = vpop.f32.mrf.mxu0 }
 0x163   : > { %v1982_v54 = vpop.f32.mrf.mxu1  ;;  %v1939_v55 = vpop.f32.mrf.mxu0 }
 0x165   : > { %v2931_v57 = vpop.f32.mrf.mxu1  ;;  %v1941_v59 = vpop.f32.mrf.mxu0 }
 0x166   : > { %v2465_v57 = vlaneseq }
 0x167   : > { %v1985_v61 = vpop.f32.mrf.mxu1  ;;  %v1943_v62 = vpop.f32.mrf.mxu0 }
 0x168   : > { %v2466_v10 = vshrl.u32 %v2465_v57, 7  ;;  %v1688_v57 = vadd.f32 %v3760_v25, %v3746_v15  ;;  %v1694_v15 = vadd.f32 %v3768_v31, %v3756_v23 }
 0x169   : > { %v2932_v8 = vpop.f32.mrf.mxu1  ;;  %v1945_v20 = vpop.f32.mrf.mxu0 }
 0x16a   : > { %v2475_v13 = vsub.s32 2, %v2466_v10  ;;  %v2471_v60 = vsub.s32 1, %v2466_v10  ;;  %v1993_v31 = vadd.f32 %v1945_v20, %v1694_v15 }
 0x16b   : > { %v2072_v37 = vpop.f32.mrf.mxu1  ;;  %v2029_v53 = vpop.f32.mrf.mxu0 }
 0x16c   : > { %v3790_v56 = vrot.slane %v2463_v6, %v2475_v13  ;;  %v3798_v36 = vrot.slane %v2463_v6, %v2471_v60  ;;  %v1692_v13 = vadd.f32 %v3766_v29, %v3754_v1  ;;  %v1858_v60 = vadd.f32 %v1857_v45, %v3774_v35 }
 0x16d   : > { %v2939_v2 = vpop.f32.mrf.mxu1  ;;  %v2031_v4 = vpop.f32.mrf.mxu0  ;;  %v1989_v29 = vadd.f32 %v1939_v55, %v1688_v57 }
 0x16e   : > { %3906 = vst [vmem:[#allocation18_spill] sm:$0xff] %v3790_v56  ;;  %3907 = vst [vmem:[#allocation19_spill] sm:$0xff] %v3798_v36  ;;  %v1899_v56 = vadd.f32 %v1898_v42, %v3770_v32  ;;  %v1992_v23 = vadd.f32 %v1943_v62, %v1692_v13  ;;  %v2080_v45 = vadd.f32 %v2031_v4, %v1858_v60 }
 0x16f   : > { %v2075_v7 = vpop.f32.mrf.mxu1  ;;  %v3782_v11 = vpop.f32.mrf.mxu0 }
 0x171   : > { %v2940_v19 = vpop.f32.mrf.mxu1  ;;  %v2035_v22 = vpop.f32.mrf.mxu0 }
 0x173   : > { %v2162_v26 = vpop.f32.mrf.mxu1  ;;  %v2119_v30 = vpop.f32.mrf.mxu0 }
 0x175   : > { %v2947_v34 = vpop.f32.mrf.mxu1  ;;  %v2121_v40 = vpop.f32.mrf.mxu0  ;;  %v3912_v15 = vld [vmem:[#allocation18_spill] sm:$0xff] }
 0x176   : > { %v2467_v34 = vsub.s32 0, %v2466_v10  ;;  %v1734_v10 = vadd.f32 %v3764_v28, %v3752_v21  ;;  %v1862_v21 = vadd.f32 %v1861_v50, %v3780_v41  ;;  %v2081_v28 = vadd.f32 %v2072_v37, %v1899_v56 }
 0x177   : > { %v3784_v44 = vpop.f32.mrf.mxu1  ;;  %v3786_v48 = vpop.f32.mrf.mxu0 }
 0x178   : > { %v1994_v42 = vadd.f32 %v1985_v61, %v1734_v10 }
 0x179   : > { %v2948_v8 = vpop.f32.mrf.mxu1  ;;  %v3788_v18 = vpop.f32.mrf.mxu0 }
 0x17a   : > { %3905 = vst [vmem:[#allocation17_spill] sm:$0xff] %v3788_v18  ;;  %v1731_v8 = vadd.f32 %v3758_v24, %v3744_v14  ;;  %v3796_v18 = vrot.slane %v2463_v6, %v2467_v34  ;;  %v1856_v24 = vadd.f32 %v1855_v43, %v3772_v33  ;;  %v1902_v6 = vadd.f32 %v1901_v46, %v3776_v38 }
 0x17b   : > { %v2252_v12 = vpop.f32.mrf.mxu1  ;;  %v2209_v2 = vpop.f32.mrf.mxu0  ;;  %v2169_v46 = vadd.f32 %v2119_v30, %v1989_v29  ;;  %v2174_v20 = vadd.f32 %v3784_v44, %v1994_v42  ;;  %v3909_v44 = vld [vmem:[#allocation12_spill] sm:$0xff]  ;;  %v3917_v29 = vld [vmem:[#allocation14_spill] sm:$0xff] }
 0x17c   : > { %v2079_v34 = vadd.f32 %v2029_v53, %v1856_v24  ;;  %v2261_v43 = vadd.f32 %v2252_v12, %v2081_v28  ;;  %v2084_v38 = vadd.f32 %v2075_v7, %v1902_v6  ;;  %v2172_v12 = vadd.f32 %v3786_v48, %v1992_v23 }
 0x17d   : > { %v2955_v5 = vpop.f32.mrf.mxu1  ;;  %v2211_v16 = vpop.f32.mrf.mxu0  ;;  %v3910_v48 = vmax.f32 %v3712_v51, %v3909_v44 }
 0x17e   : > { %v2259_v36 = vadd.f32 %v2209_v2, %v2079_v34 }
 0x17f   : > { %v2255_v52 = vpop.f32.mrf.mxu1  ;;  %v2213_v19 = vpop.f32.mrf.mxu0 }
 0x180   : > { %v2264_v53 = vadd.f32 %v2255_v52, %v2084_v38 }
 0x181   : > { %v2956_v63 = vpop.f32.mrf.mxu1  ;;  %v2215_v3 = vpop.f32.mrf.mxu0  ;;  %v3911_v13 = vld [vmem:[#allocation17_spill] sm:$0xff] }
 0x182   : > { %v1690_v63 = vadd.f32 %v3762_v27, %v3750_v0  ;;  %v1860_v0 = vadd.f32 %v1859_v47, %v3778_v39  ;;  %v1991_v27 = vadd.f32 %v1982_v54, %v1731_v8  ;;  %v2083_v47 = vadd.f32 %v2035_v22, %v1862_v21 }
 0x183   : > { %v2348_v58 = vpop.f32.mrf.mxu1  ;;  %v2305_v17 = vpop.f32.mrf.mxu0 }
 0x184   : > { %v1990_v32 = vadd.f32 %v1941_v59, %v1690_v63  ;;  %v2171_v33 = vadd.f32 %v2162_v26, %v1991_v27  ;;  %v2082_v41 = vadd.f32 %v3782_v11, %v1860_v0  ;;  %v2260_v59 = vadd.f32 %v2211_v16, %v2080_v45 }
 0x185   : > { %v2963_v5 = vpop.f32.mrf.mxu1  ;;  %v2307_v14 = vpop.f32.mrf.mxu0  ;;  %v2355_v61 = vadd.f32 %v2305_v17, %v2169_v46  ;;  %v3908_v16 = vmax.f32 %v3710_v49, %v3722_v9  ;;  %v3913_v49 = vld [vmem:[#allocation8_spill] sm:$0xff]  ;;  %v3914_v9 = vld [vmem:[#allocation13_spill] sm:$0xff] }
 0x186   : > { %v2357_v56 = vadd.f32 %v2348_v58, %v2171_v33  ;;  %v2170_v55 = vadd.f32 %v2121_v40, %v1990_v32  ;;  %v2262_v26 = vadd.f32 %v2213_v19, %v2082_v41  ;;  %v2263_v58 = vadd.f32 %v2215_v3, %v2083_v47  ;;  %v3921_v33 = vld [vmem:[#allocation15_spill] sm:$0xff] }
 0x187   : > { %v2351_v25 = vpop.f32.mrf.mxu1  ;;  %v2309_v1 = vpop.f32.mrf.mxu0 }
 0x188   : > { %v2356_v30 = vadd.f32 %v2307_v14, %v2170_v55  ;;  %v2360_v8 = vadd.f32 %v2351_v25, %v2174_v20  ;;  %v2358_v57 = vadd.f32 %v2309_v1, %v2172_v12  ;;  %v2173_v14 = vadd.f32 %v3911_v13, %v1993_v31  ;;  %v3916_v1 = vld [vmem:[#allocation9_spill] sm:$0xff]  ;;  %v3920_v31 = vld [vmem:[#allocation10_spill] sm:$0xff] }
 0x189   : > { %v2964_v5 = vpop.f32.mrf.mxu1  ;;  %v2311_v35 = vpop.f32.mrf.mxu0  ;;  %v3915_v25 = vmax.f32 %v3913_v49, %v3914_v9  ;;  %v3918_v32 = vmax.f32 %v3916_v1, %v3917_v29 }
 0x18a   : > { %v2359_v51 = vadd.f32 %v2311_v35, %v2173_v14  ;;  %v3919_v5 = vld [vmem:[#allocation19_spill] sm:$0xff] }
 0x18b   : > { %v2438_v39 = vpop.f32.mrf.mxu1  ;;  %v2395_v54 = vpop.f32.mrf.mxu0 }
 0x18c   : > { %v2447_v50 = vadd.f32 %v2438_v39, %v2261_v43  ;;  %v2445_v37 = vadd.f32 %v2395_v54, %v2259_v36  ;;  %v3922_v43 = vmax.f32 %v3920_v31, %v3921_v33 }
 0x18d   : > { %v2971_v62 = vpop.f32.mrf.mxu1  ;;  %v2397_v7 = vpop.f32.mrf.mxu0 }
 0x18e   : > { %v2453_v4 = vmax.f32 %v2357_v56, %v2447_v50  ;;  %v2451_v2 = vmax.f32 %v2355_v61, %v2445_v37  ;;  %v2446_v11 = vadd.f32 %v2397_v7, %v2260_v59  ;;  %v3923_v59 = vld [vmem:[#allocation11_spill] sm:$0xff]  ;;  %v3924_v61 = vld [vmem:[#allocation16_spill] sm:$0xff] }
 0x18f   : > { %v2441_v22 = vpop.f32.mrf.mxu1  ;;  %v2399_v40 = vpop.f32.mrf.mxu0  ;;  %v3925_v37 = vmax.f32 %v3923_v59, %v3924_v61 }
 0x190   : > { %v2459_v17 = vmax.f32 %v3908_v16, %v2453_v4  ;;  %v2450_v36 = vadd.f32 %v2441_v22, %v2264_v53  ;;  %v2457_v52 = vmax.f32 %v3910_v48, %v2451_v2  ;;  %v2452_v63 = vmax.f32 %v2356_v30, %v2446_v11 }
 0x191   : > { %v2448_v10 = vadd.f32 %v2399_v40, %v2262_v26  ;;  %v2972_v19 = vpop.f32.mrf.mxu1  ;;  %v2401_v60 = vpop.f32.mrf.mxu0 }
 0x192   : > { %v2482_v24 = vadd.f32 %v3912_v15, %v2459_v17  ;;  %v2456_v3 = vmax.f32 %v2360_v8, %v2450_v36  ;;  %v3826_v6 = vadd.f32 %v3796_v18, %v2457_v52  ;;  %v2458_v0 = vmax.f32 %v3915_v25, %v2452_v63 }
 0x193   : > { %v2454_v21 = vmax.f32 %v2358_v57, %v2448_v10  ;;  %v2449_v27 = vadd.f32 %v2401_v60, %v2263_v58 }
 0x194   : > { %v2488_v28 = vmin.f32 %v2482_v24, 0.0  ;;  %v2462_v42 = vmax.f32 %v3918_v32, %v2456_v3  ;;  %v2486_v34 = vmin.f32 %v3826_v6, 0.0  ;;  %v2481_v23 = vadd.f32 %v3919_v5, %v2458_v0 }
 0x195   : > { %v2460_v45 = vmax.f32 %v3922_v43, %v2454_v21  ;;  %v2455_v41 = vmax.f32 %v2359_v51, %v2449_v27  ;;  %vm2530_vm2 = vcmp.gt.f32.partialorder %v2482_v24, 0.0  ;;  %vm2528_vm3 = vcmp.gt.f32.partialorder %v3826_v6, 0.0 }
 0x196   : > { %v2494_v38 = vmul.f32 0.5, %v2488_v28  ;;  %v2508_v46 = vmul.f32 1.442695, %v2488_v28  ;;  %v3840_v39 = vadd.f32 %v3912_v15, %v2462_v42  ;;  %v2504_v35 = vmul.f32 1.442695, %v2486_v34 }
 0x197   : > { %v2487_v47 = vmin.f32 %v2481_v23, 0.0  ;;  %v2492_v56 = vmul.f32 0.5, %v2486_v34  ;;  %v3844_v54 = vadd.f32 %v3796_v18, %v2460_v45  ;;  %v2461_v62 = vmax.f32 %v3925_v37, %v2455_v41 }
 0x198   : > { %v2491_v50 = vmin.f32 %v3840_v39, 0.0  ;;  %3088 = vpow2.f32 %v2508_v46  ;;  %vm2529_vm4 = vcmp.gt.f32.partialorder %v2481_v23, 0.0  ;;  %vm2533_vm5 = vcmp.gt.f32.partialorder %v3840_v39, 0.0 }
 0x199   : > { %v2506_v55 = vmul.f32 1.442695, %v2487_v47  ;;  %3090 = vtanh.f32 %v2494_v38  ;;  %v2493_v20 = vmul.f32 0.5, %v2487_v47  ;;  %v2489_v12 = vmin.f32 %v3844_v54, 0.0 }
 0x19a   : > { %3092 = vpow2.f32 %v2504_v35  ;;  %v2514_v53 = vmul.f32 1.442695, %v2491_v50  ;;  %v2484_v4 = vadd.f32 %v3919_v5, %v2461_v62  ;;  %v2497_v7 = vmul.f32 0.5, %v2491_v50 }
 0x19b   : > { %3094 = vtanh.f32 %v2492_v56  ;;  %v2510_v18 = vmul.f32 1.442695, %v2489_v12  ;;  %v2495_v30 = vmul.f32 0.5, %v2489_v12  ;;  %vm2531_vm6 = vcmp.gt.f32.partialorder %v3844_v54, 0.0 }
 0x19c   : > { %3096 = vpow2.f32 %v2506_v55  ;;  %v2490_v26 = vmin.f32 %v2484_v4, 0.0  ;;  %vm2532_vm7 = vcmp.gt.f32.partialorder %v2484_v4, 0.0 }
 0x19d   : > { %3098 = vtanh.f32 %v2493_v20 }
 0x19e   : > { %3100 = vpow2.f32 %v2514_v53  ;;  %v2512_v2 = vmul.f32 1.442695, %v2490_v26  ;;  %v2496_v11 = vmul.f32 0.5, %v2490_v26 }
 0x19f   : > { %3102 = vtanh.f32 %v2497_v7 }
 0x1a0   : > { %3104 = vpow2.f32 %v2510_v18 }
 0x1a1   : > { %3106 = vtanh.f32 %v2495_v30 }
 0x1a2   : > { %3108 = vpow2.f32 %v2512_v2 }
 0x1a3   : > { %3110 = vtanh.f32 %v2496_v11 }
 0x1a5   : > { %v3089_v22 = vpop.eup %3088 }
 0x1a6   : > { %v3091_v58 = vpop.eup %3090  ;;  %v2518_v8 = vadd.f32 1.0, %v3089_v22 }
 0x1a7   : > { %v3093_v16 = vpop.eup %3092 }
 0x1a8   : > { %v3095_v17 = vpop.eup %3094  ;;  %v2524_v36 = vmul.f32 %v3091_v58, %v2518_v8  ;;  %v2516_v40 = vadd.f32 1.0, %v3093_v16 }
 0x1a9   : > { %v3097_v57 = vpop.eup %3096 }
 0x1aa   : > { %v3099_v44 = vpop.eup %3098  ;;  %v2536_v48 = vsel %vm2530_vm2, %v2482_v24, %v2524_v36  ;;  %v2522_v52 = vmul.f32 %v3095_v17, %v2516_v40  ;;  %v2517_v63 = vadd.f32 1.0, %v3097_v57 }
 0x1ab   : > { %v3101_v10 = vpop.eup %3100  ;;  %2542 = vst [vmem:[%s3855_s18 + $0x10] sm:$0xff] %v2536_v48 }
 0x1ac   : > { %v3103_v19 = vpop.eup %3102  ;;  %v2534_v13 = vsel %vm2528_vm3, %v3826_v6, %v2522_v52  ;;  %v2523_v14 = vmul.f32 %v3099_v44, %v2517_v63  ;;  %v2521_v15 = vadd.f32 1.0, %v3101_v10 }
 0x1ad   : > { %v3105_v3 = vpop.eup %3104  ;;  %2540 = vst [vmem:[%s3855_s18] sm:$0xff] %v2534_v13 }
 0x1ae   : > { %v3107_v60 = vpop.eup %3106  ;;  %v2535_v49 = vsel %vm2529_vm4, %v2481_v23, %v2523_v14  ;;  %v2527_v24 = vmul.f32 %v3103_v19, %v2521_v15  ;;  %v2519_v9 = vadd.f32 1.0, %v3105_v3 }
 0x1af   : > { %v3109_v25 = vpop.eup %3108  ;;  %2541 = vst [vmem:[%s3855_s18 + $0x8] sm:$0xff] %v2535_v49 }
 0x1b0   : > { %v2539_v0 = vsel %vm2533_vm5, %v3840_v39, %v2527_v24  ;;  %v2525_v21 = vmul.f32 %v3107_v60, %v2519_v9  ;;  %v2520_v6 = vadd.f32 1.0, %v3109_v25  ;;  %v3111_v27 = vpop.eup %3110 }
 0x1b1   : > { %2545 = vst [vmem:[%s3855_s18 + $0x28] sm:$0xf] %v2539_v0 }
 0x1b2   : > { %v2537_v51 = vsel %vm2531_vm6, %v3844_v54, %v2525_v21  ;;  %v2526_v28 = vmul.f32 %v3111_v27, %v2520_v6 }
 0x1b3   : > { %2543 = vst [vmem:[%s3855_s18 + $0x18] sm:$0xf] %v2537_v51 }
 0x1b4   : > { %v2538_v1 = vsel %vm2532_vm7, %v2484_v4, %v2526_v28 }
 0x1b5   : > { %2544 = vst [vmem:[%s3855_s18 + $0x20] sm:$0xf] %v2538_v1 }
 0x1b6 PF: > { %s16_s15 = sadd.s32 1, %s3178_s15  }
 0x1b7   : > { %p13_p2 = scmp.ge.s32.totalorder %s16_s15, 4  }
 0x1b9   :  { %15 = sbr.rel (!%p13_p2) target bundleno = 2 (0x2), region = 87 }
 0x1be   :  { %2567 = vsyncpa [#allocation3], 1 }
 0x1bf   :  { %2569 = vsyncpa [#allocation3 + $0x1], 1 }
 0x1c0   :  { %2570 = vsyncpa [#allocation5], 1 }

// kernel: autoencoder_forward.6
= control target key start
LH: loop header
LB: loop body
LE: loop exit
PB: predicated region body
PF: predicated region fallthrough
CT: control target
= control target key end

     0   :  { %9 = vsyncpa [#allocation3], 0  ;;  %s6394_s0 = inlined_call_operand.vmem [shape: f32[2,6,384], index: 0, kind: input, shape index: {}]   ;;  %s6395_s1 = inlined_call_operand.vmem [shape: f32[2,6,384], index: 1, kind: input, shape index: {}]   ;;  %s6396_s2 = inlined_call_operand.hbm [shape: bf16[10,384,128], index: 2, kind: input, shape index: {}]   ;;  %s6397_s3 = inlined_call_operand.hbm [shape: f32[1,128], index: 3, kind: input, shape index: {}]   ;;  %s6398_s4 = inlined_call_operand.vmem [shape: f32[2,4,128], index: 4, kind: output, shape index: {}]  }
   0x1   :  { %10 = vsyncpa [#allocation5], 0  ;;  %s5860_s15 = smov 0  }
   0x2 LB: > { %s5866_s16 = sadd.s32 4294967295, %s5827_s15   ;;  %p3998_p0 = scmp.ge.s32.totalorder %s5827_s15, 1  ;;  %s5827_s15 = sphi %s5860_s15, %s16_s15  }
   0x3   : > { %p141_p1 = scmp.lt.s32.totalorder %s5827_s15, 3  ;;  %s5829_s17 = smov [#allocation2]  }
   0x4   : > { %s153_s18 = sshll.u32 %s5829_s17, 4  ;;  %p5287_p3 = scmp.eq.s32.totalorder %s5866_s16, 0  ;;  %s154_s18 = int_to_ptr.vmem [resolvable:$true] %s153_s18 }
   0x5   : > { %p5870_p2 = pnand %p3998_p0, %p141_p1  ;;  %s5830_s20 = smov [#allocation4]  }
   0x6   : > { %s167_s21 = sshll.u32 %s5830_s20, 4  ;;  %s5772_s23 = scalar_lea.vmem %s154_s18, 30720  ;;  %s168_s21 = int_to_ptr.vmem [resolvable:$true] %s167_s21 }
   0x7   : > { %p5280_p4 = pneg %p5870_p2  ;;  %p5773_p7 = scmp.ne.s32.totalorder %s154_s18, %s5772_s23 }
   0x8   : > { %p5780_p10 = scmp.lt.s32.totalorder %s154_s18, %s154_s18  ;;  %p5781_p11 = scmp.lt.s32.totalorder %s5772_s23, %s5772_s23 }
   0x9   : > { %p5879_p5 = pnand %p5287_p3, %p5280_p4 }
   0xa   : > { %p5782_p12 = por %p5781_p11, %p5780_p10 }
   0xb   : > { %p5763_p6 = pneg %p5879_p5 }
   0xd   : > { %p5775_p8 = pnand %p5773_p7, %p5763_p6 }
   0xf   : > { %p5776_p9 = pneg %p5775_p8 }
  0x11   : > { %p5783_p13 = pnand %p5782_p12, %p5776_p9 }
  0x13   : > { %5786 = shalt.err (!%p5783_p13)
}
  0x14   : > { %s5831_s24 = smov 64   ;;  %s5832_s25 = smov 4  }
  0x15   : > { %5283 = dma.hbm_to_vmem [thread:$0]  (!%p5879_p5), %s6396_s2, 30720, %s154_s18, [#allocation3], %s5831_s24, %s5831_s24, %s5832_s25  }
  0x16   : > { %s5798_s28 = scalar_lea.vmem %s168_s21, 16  ;;  %s5805_s29 = scalar_lea.vmem %s168_s21, 32 }
  0x17   : > { %p5799_p0 = scmp.ne.s32.totalorder %s168_s21, %s5798_s28  ;;  %p5806_p7 = scmp.lt.s32.totalorder %s168_s21, %s168_s21 }
  0x18   : > { %p5807_p8 = scmp.lt.s32.totalorder %s5805_s29, %s5798_s28 }
  0x19   : > { %p5801_p1 = pnand %p5799_p0, %p5763_p6 }
  0x1a   : > { %p5808_p9 = por %p5807_p8, %p5806_p7 }
  0x1b   : > { %p5802_p4 = pneg %p5801_p1 }
  0x1d   : > { %p5809_p10 = pnand %p5808_p9, %p5802_p4 }
  0x1f   : > { %5812 = shalt.err (!%p5809_p10)
}
  0x20   : > { %5286 = dma.hbm_to_vmem [thread:$0]  (!%p5879_p5), %s6397_s3, 16, %s168_s21, [#allocation5]  }
  0x21   : > { %196 = sbr.rel (%p5870_p2) target bundleno = 914 (0x392), region = 36 }
  0x26   : > { %5818 = dma.done.wait (%p5287_p3), [#allocation3], 30720  }
  0x27   : > { %5820 = vsyncadd (%p5287_p3), [#allocation3], 4294936576 }
  0x28   : > { %5822 = dma.done.wait (%p5287_p3), [#allocation5], 16  }
  0x29   : > { %5824 = vsyncadd (%p5287_p3), [#allocation5], 4294967280  ;;  %v5833_v0 = vmov 0.0   ;;  %vm5834_vm0 = vmmov 0   ;;  %v5305_v1 = vld [vmem:[#allocation2 + $0x138] sm:$0xff]   ;;  %v5308_v4 = vld [vmem:[#allocation2 + $0x130] sm:$0xff]  }
  0x2a   : > { %4871 = vmatprep.subr.bf16.mxu1 %v5833_v0  ;;  %4887 = vmatprep.mubr.msk.bf16.mxu1 %vm5834_vm0, %v5833_v0  ;;  %v5306_v2 = vld [vmem:[#allocation2 + $0x178] sm:$0xff]   ;;  %v5309_v5 = vld [vmem:[#allocation2 + $0x170] sm:$0xff]   ;;  %v5311_v7 = vld [vmem:[#allocation2 + $0x128] sm:$0xff]   ;;  %p230_p2 = scmp.lt.s32.totalorder %s5866_s16, 1 }
  0x2b   : > { %4251 = vmatprep.subr.bf16.mxu0 %v5305_v1  ;;  %v5307_v3 = vld [vmem:[#allocation2 + $0xf8] sm:$0xff]   ;;  %4872 = vmatpush3.bf16.msra.mxu1 %v5306_v2  ;;  %v5310_v6 = vld [vmem:[#allocation2 + $0xf0] sm:$0xff]   ;;  %v5312_v8 = vld [vmem:[#allocation2 + $0x168] sm:$0xff]  }
  0x2c   : > { %4252 = vmatpush3.bf16.msra.mxu0 %v5307_v3  ;;  %4873 = vmatprep.subr.bf16.mxu1 %v5833_v0  ;;  %v5313_v9 = vld [vmem:[#allocation2 + $0xe8] sm:$0xff]   ;;  %v5314_v10 = vld [vmem:[#allocation2 + $0x120] sm:$0xff]   ;;  %v5317_v13 = vld [vmem:[#allocation2 + $0x118] sm:$0xff]   ;;  %s6402_s16 = smov (!%p230_p2, %s5866_s16), 1 }
  0x2d   : > { %4253 = vmatprep.subr.bf16.mxu0 %v5308_v4  ;;  %v5315_v11 = vld [vmem:[#allocation2 + $0x160] sm:$0xff]   ;;  %v5318_v14 = vld [vmem:[#allocation2 + $0x158] sm:$0xff]   ;;  %v5320_v16 = vld [vmem:[#allocation2 + $0x110] sm:$0xff]   ;;  %s5271_s6 = smul.u32 24, %s6402_s16  ;;  %s4007_s13 = sshll.u32 %s6402_s16, 2 }
  0x2e   : > { %v5316_v12 = vld [vmem:[#allocation2 + $0xe0] sm:$0xff]   ;;  %v5319_v15 = vld [vmem:[#allocation2 + $0xd8] sm:$0xff]   ;;  %v5321_v17 = vld [vmem:[#allocation2 + $0x150] sm:$0xff]   ;;  %s243_s18 = scalar_lea.vmem %s6398_s4, %s4007_s13 }
  0x2f   : > { %4874 = vmatpush3.bf16.msra.mxu1 %v5309_v5  ;;  %v5322_v18 = vld [vmem:[#allocation2 + $0xd0] sm:$0xff]   ;;  %v5323_v19 = vld [vmem:[#allocation2 + $0x108] sm:$0xff]   ;;  %s5929_s9 = scalar_lea.vmem %s6395_s1, %s5271_s6  ;;  %v5326_v22 = vld [vmem:[#allocation2 + $0x100] sm:$0xff]   ;;  %s5956_s12 = scalar_lea.vmem %s6394_s0, %s5271_s6 }
  0x30   : > { %4254 = vmatpush3.bf16.msra.mxu0 %v5310_v6  ;;  %4875 = vmatprep.subr.bf16.mxu1 %v5833_v0  ;;  %v5324_v20 = vld [vmem:[#allocation2 + $0x148] sm:$0xff]   ;;  %v5327_v24 = vld [vmem:[#allocation2 + $0x140] sm:$0xff]   ;;  %v350_v27 = vld [vmem:[%s5929_s9 + $0x10] sm:$0xf] }
  0x31   : > { %4255 = vmatprep.subr.bf16.mxu0 %v5311_v7  ;;  %v5325_v21 = vld [vmem:[#allocation2 + $0xc8] sm:$0xff]   ;;  %v5328_v26 = vld [vmem:[#allocation2 + $0xc0] sm:$0xff]   ;;  %v5329_v29 = vld [vmem:[#allocation2 + $0x78] sm:$0xff]   ;;  %v5939_v30 = vpack.c.bf16 %v350_v27, %v350_v27 }
  0x32   : > { %v349_v23 = vld [vmem:[%s5929_s9 + $0x8] sm:$0xf]  ;;  %v348_v28 = vld [vmem:[%s5929_s9] sm:$0xf]  ;;  %v5330_v32 = vld [vmem:[#allocation2 + $0xb8] sm:$0xff]  }
  0x33   : > { %4876 = vmatpush3.bf16.msra.mxu1 %v5312_v8  ;;  %v5933_v25 = vpack.c.bf16 %v349_v23, %v349_v23  ;;  %v5941_v31 = vpack.c.bf16 %v348_v28, %v348_v28  ;;  %v5331_v33 = vld [vmem:[#allocation2 + $0x38] sm:$0xff]   ;;  %v5332_v34 = vld [vmem:[#allocation2 + $0x70] sm:$0xff]   ;;  %v5335_v37 = vld [vmem:[#allocation2 + $0x68] sm:$0xff]  }
  0x34   : > { %4256 = vmatpush3.bf16.msra.mxu0 %v5313_v9  ;;  %4877 = vmatprep.subr.bf16.mxu1 %v5833_v0  ;;  %v5333_v35 = vld [vmem:[#allocation2 + $0xb0] sm:$0xff]   ;;  %v5336_v38 = vld [vmem:[#allocation2 + $0xa8] sm:$0xff]   ;;  %v5338_v40 = vld [vmem:[#allocation2 + $0x60] sm:$0xff]  }
  0x35   : > { %4257 = vmatprep.subr.bf16.mxu0 %v5314_v10  ;;  %579 = vmatprep.mubr.bf16.mxu0 %v5933_v25  ;;  %v5334_v36 = vld [vmem:[#allocation2 + $0x30] sm:$0xff]   ;;  %v5337_v39 = vld [vmem:[#allocation2 + $0x28] sm:$0xff]   ;;  %v5339_v41 = vld [vmem:[#allocation2 + $0xa0] sm:$0xff]  }
  0x36   : > { %v5340_v42 = vld [vmem:[#allocation2 + $0x20] sm:$0xff]   ;;  %v5341_v43 = vld [vmem:[#allocation2 + $0x58] sm:$0xff]   ;;  %v5344_v46 = vld [vmem:[#allocation2 + $0x50] sm:$0xff]  }
  0x37   : > { %4878 = vmatpush3.bf16.msra.mxu1 %v5315_v11  ;;  %v5342_v44 = vld [vmem:[#allocation2 + $0x98] sm:$0xff]   ;;  %v246_v47 = vld [vmem:[%s5956_s12 + $0x8] sm:$0xf]  ;;  %v5345_v49 = vld [vmem:[#allocation2 + $0x90] sm:$0xff]  }
  0x38   : > { %4258 = vmatpush3.bf16.msra.mxu0 %v5316_v12  ;;  %4879 = vmatprep.subr.bf16.mxu1 %v5833_v0  ;;  %v5343_v45 = vld [vmem:[#allocation2 + $0x18] sm:$0xff]   ;;  %v5960_v48 = vpack.c.bf16 %v246_v47, %v246_v47  ;;  %v5346_v50 = vld [vmem:[#allocation2 + $0x10] sm:$0xff]   ;;  %v5347_v51 = vld [vmem:[#allocation2 + $0x48] sm:$0xff]  }
  0x39   : > { %4259 = vmatprep.subr.bf16.mxu0 %v5317_v13  ;;  %v5348_v52 = vld [vmem:[#allocation2 + $0x88] sm:$0xff]   ;;  %v5350_v54 = vld [vmem:[#allocation2 + $0x40] sm:$0xff]   ;;  %v247_v57 = vld [vmem:[%s5956_s12 + $0x10] sm:$0xf] }
  0x3a   : > { %v5349_v53 = vld [vmem:[#allocation2 + $0x8] sm:$0xff]   ;;  %v5351_v55 = vld [vmem:[#allocation2 + $0x80] sm:$0xff]   ;;  %v5353_v59 = vld [vmem:[#allocation2 + $0x4f8] sm:$0xff]   ;;  %v5968_v60 = vpack.c.bf16 %v247_v57, %v247_v57 }
  0x3b   : > { %4880 = vmatpush3.bf16.msra.mxu1 %v5318_v14  ;;  %v5352_v56 = vld [vmem:[#allocation2] sm:$0xff]   ;;  %v5354_v62 = vld [vmem:[#allocation2 + $0x538] sm:$0xff]   ;;  %v5356_v1 = vld [vmem:[#allocation2 + $0x4f0] sm:$0xff]  }
  0x3c   : > { %4260 = vmatpush3.bf16.msra.mxu0 %v5319_v15  ;;  %4881 = vmatprep.subr.bf16.mxu1 %v5833_v0  ;;  %v245_v58 = vld [vmem:[%s5956_s12] sm:$0xf]  ;;  %v5355_v63 = vld [vmem:[#allocation2 + $0x4b8] sm:$0xff]   ;;  %v5357_v2 = vld [vmem:[#allocation2 + $0x530] sm:$0xff]  }
  0x3d   : > { %4261 = vmatprep.subr.bf16.mxu0 %v5320_v16  ;;  %v5970_v61 = vpack.c.bf16 %v245_v58, %v245_v58  ;;  %v5358_v3 = vld [vmem:[#allocation2 + $0x4b0] sm:$0xff]   ;;  %v5359_v4 = vld [vmem:[#allocation2 + $0x4e8] sm:$0xff]   ;;  %v5362_v7 = vld [vmem:[#allocation2 + $0x4e0] sm:$0xff]  }
  0x3e   : > { %v5360_v5 = vld [vmem:[#allocation2 + $0x528] sm:$0xff]   ;;  %v5363_v8 = vld [vmem:[#allocation2 + $0x520] sm:$0xff]   ;;  %v5365_v10 = vld [vmem:[#allocation2 + $0x4d8] sm:$0xff]  }
  0x3f   : > { %4882 = vmatpush3.bf16.msra.mxu1 %v5321_v17  ;;  %v5361_v6 = vld [vmem:[#allocation2 + $0x4a8] sm:$0xff]   ;;  %v5364_v9 = vld [vmem:[#allocation2 + $0x4a0] sm:$0xff]   ;;  %v5366_v11 = vld [vmem:[#allocation2 + $0x518] sm:$0xff]  }
  0x40   : > { %4262 = vmatpush3.bf16.msra.mxu0 %v5322_v18  ;;  %4883 = vmatprep.subr.bf16.mxu1 %v5833_v0  ;;  %v5367_v12 = vld [vmem:[#allocation2 + $0x498] sm:$0xff]   ;;  %v5368_v13 = vld [vmem:[#allocation2 + $0x4d0] sm:$0xff]   ;;  %v5371_v16 = vld [vmem:[#allocation2 + $0x4c8] sm:$0xff]  }
  0x41   : > { %4263 = vmatprep.subr.bf16.mxu0 %v5323_v19  ;;  %v5369_v14 = vld [vmem:[#allocation2 + $0x510] sm:$0xff]   ;;  %v5372_v17 = vld [vmem:[#allocation2 + $0x508] sm:$0xff]   ;;  %v5374_v19 = vld [vmem:[#allocation2 + $0x4c0] sm:$0xff]  }
  0x42   : > { %v5370_v15 = vld [vmem:[#allocation2 + $0x490] sm:$0xff]   ;;  %v5373_v18 = vld [vmem:[#allocation2 + $0x488] sm:$0xff]   ;;  %v5378_v23 = vld [vmem:[#allocation2 + $0x478] sm:$0xff]  }
  0x43   : > { %4884 = vmatpush3.bf16.msra.mxu1 %v5324_v20  ;;  %v5375_v20 = vld [vmem:[#allocation2 + $0x500] sm:$0xff]   ;;  %v5381_v27 = vld [vmem:[#allocation2 + $0x470] sm:$0xff]   ;;  %v1349_v47 = vld [vmem:[%s5956_s12 + $0x8] sm:$0x1e] }
  0x44   : > { %4264 = vmatpush3.bf16.msra.mxu0 %v5325_v21  ;;  %4885 = vmatprep.subr.bf16.mxu1 %v5833_v0  ;;  %v5376_v21 = vld [vmem:[#allocation2 + $0x480] sm:$0xff]   ;;  %v5382_v28 = vld [vmem:[#allocation2 + $0x3f0] sm:$0xff]  }
  0x45   : > { %4265 = vmatprep.subr.bf16.mxu0 %v5326_v22  ;;  %v5377_v22 = vld [vmem:[#allocation2 + $0x438] sm:$0xff]   ;;  %v5404_v57 = vld [vmem:[#allocation2 + $0x1f0] sm:$0xff]  }
  0x47   : > { %4886 = vmatpush3.bf16.msra.mxu1 %v5327_v24  ;;  %v5379_v24 = vld [vmem:[#allocation2 + $0x3f8] sm:$0xff]  }
  0x48   : > { %4266 = vmatpush3.bf16.msra.mxu0 %v5328_v26  ;;  %4891 = vmatprep.subr.bf16.mxu1 %v5833_v0  ;;  %v5380_v26 = vld [vmem:[#allocation2 + $0x430] sm:$0xff]  }
  0x49   : > { %4282 = vmatprep.subr.bf16.mxu0 %v5329_v29  ;;  %v5383_v29 = vld [vmem:[#allocation2 + $0x428] sm:$0xff]  }
  0x4a   : > { %4888 = vmatmul.mubr.bf16.vlgmr.msra.gmra.mxu1 %v5939_v30 }
  0x4b   : > { %580 = vmatmul.mubr.bf16.vlgmr.msra.gmra.mxu0 %v5941_v31  ;;  %4892 = vmatpush3.bf16.msra.mxu1 %v5330_v32  ;;  %v5384_v32 = vld [vmem:[#allocation2 + $0x468] sm:$0xff]  }
  0x4c   : > { %4283 = vmatpush3.bf16.msra.mxu0 %v5331_v33  ;;  %4893 = vmatprep.subr.bf16.mxu1 %v5833_v0  ;;  %v5385_v33 = vld [vmem:[#allocation2 + $0x3e8] sm:$0xff]  }
  0x4d   : > { %4284 = vmatprep.subr.bf16.mxu0 %v5332_v34  ;;  %4907 = vmatprep.mubr.msk.bf16.mxu1 %vm5834_vm0, %v5833_v0  ;;  %v5386_v34 = vld [vmem:[#allocation2 + $0x420] sm:$0xff]  }
  0x4e   : > { %803 = vmatprep.mubr.bf16.mxu0 %v5960_v48 }
  0x4f   : > { %4894 = vmatpush3.bf16.msra.mxu1 %v5333_v35  ;;  %v5387_v35 = vld [vmem:[#allocation2 + $0x460] sm:$0xff]  }
  0x50   : > { %4285 = vmatpush3.bf16.msra.mxu0 %v5334_v36  ;;  %4895 = vmatprep.subr.bf16.mxu1 %v5833_v0  ;;  %v5388_v36 = vld [vmem:[#allocation2 + $0x3e0] sm:$0xff]  }
  0x51   : > { %4286 = vmatprep.subr.bf16.mxu0 %v5335_v37  ;;  %v5389_v37 = vld [vmem:[#allocation2 + $0x418] sm:$0xff]  }
  0x53   : > { %4896 = vmatpush3.bf16.msra.mxu1 %v5336_v38  ;;  %v5390_v38 = vld [vmem:[#allocation2 + $0x458] sm:$0xff]  }
  0x54   : > { %4287 = vmatpush3.bf16.msra.mxu0 %v5337_v39  ;;  %4897 = vmatprep.subr.bf16.mxu1 %v5833_v0  ;;  %v5391_v39 = vld [vmem:[#allocation2 + $0x3d8] sm:$0xff]  }
  0x55   : > { %4288 = vmatprep.subr.bf16.mxu0 %v5338_v40  ;;  %v5392_v40 = vld [vmem:[#allocation2 + $0x410] sm:$0xff]  }
  0x57   : > { %4898 = vmatpush3.bf16.msra.mxu1 %v5339_v41  ;;  %v5393_v41 = vld [vmem:[#allocation2 + $0x450] sm:$0xff]  }
  0x58   : > { %4289 = vmatpush3.bf16.msra.mxu0 %v5340_v42  ;;  %4899 = vmatprep.subr.bf16.mxu1 %v5833_v0  ;;  %v5394_v42 = vld [vmem:[#allocation2 + $0x3d0] sm:$0xff]  }
  0x59   : > { %4290 = vmatprep.subr.bf16.mxu0 %v5341_v43  ;;  %v5395_v43 = vld [vmem:[#allocation2 + $0x408] sm:$0xff]  }
  0x5b   : > { %4900 = vmatpush3.bf16.msra.mxu1 %v5342_v44  ;;  %v5396_v44 = vld [vmem:[#allocation2 + $0x448] sm:$0xff]  }
  0x5c   : > { %4291 = vmatpush3.bf16.msra.mxu0 %v5343_v45  ;;  %4901 = vmatprep.subr.bf16.mxu1 %v5833_v0  ;;  %v5397_v45 = vld [vmem:[#allocation2 + $0x3c8] sm:$0xff]  }
  0x5d   : > { %4292 = vmatprep.subr.bf16.mxu0 %v5344_v46  ;;  %v5398_v46 = vld [vmem:[#allocation2 + $0x400] sm:$0xff]  }
  0x5f   : > { %4902 = vmatpush3.bf16.msra.mxu1 %v5345_v49  ;;  %v1352_v49 = vpack.c.bf16 %v1349_v47, %v1349_v47  ;;  %v5441_v47 = vld [vmem:[#allocation2 + $0x5d0] sm:$0xff]  }
  0x60   : > { %4293 = vmatpush3.bf16.msra.mxu0 %v5346_v50  ;;  %4903 = vmatprep.subr.bf16.mxu1 %v5833_v0  ;;  %v5400_v50 = vld [vmem:[#allocation2 + $0x3c0] sm:$0xff]  }
  0x61   : > { %4294 = vmatprep.subr.bf16.mxu0 %v5347_v51  ;;  %v5401_v51 = vld [vmem:[#allocation2 + $0x1f8] sm:$0xff]  }
  0x63   : > { %4904 = vmatpush3.bf16.msra.mxu1 %v5348_v52  ;;  %v1413_v52 = vshll.u32 %v1352_v49, 16 }
  0x64   : > { %4295 = vmatpush3.bf16.msra.mxu0 %v5349_v53  ;;  %4905 = vmatprep.subr.bf16.mxu1 %v5833_v0  ;;  %v1411_v53 = vshrl.u32 %v1352_v49, 16  ;;  %v5442_v49 = vld [vmem:[#allocation2 + $0x550] sm:$0xff]  }
  0x65   : > { %4296 = vmatprep.subr.bf16.mxu0 %v5350_v54  ;;  %v5402_v54 = vld [vmem:[#allocation2 + $0x238] sm:$0xff]  }
  0x67   : > { %4906 = vmatpush3.bf16.msra.mxu1 %v5351_v55  ;;  %v1415_v55 = vrot.slane %v1413_v52, 1  ;;  %v5444_v52 = vld [vmem:[#allocation2 + $0x5c8] sm:$0xff]  }
  0x68   : > { %4297 = vmatpush3.bf16.msra.mxu0 %v5352_v56  ;;  %4911 = vmatprep.subr.bf16.mxu1 %v5833_v0  ;;  %v5403_v56 = vld [vmem:[#allocation2 + $0x1b8] sm:$0xff]  }
  0x69   : > { %4313 = vmatprep.subr.bf16.mxu0 %v5353_v59  ;;  %v6001_v58 = vor.u32 %v1415_v55, %v1411_v53  ;;  %v5405_v59 = vld [vmem:[#allocation2 + $0x230] sm:$0xff]   ;;  %v5445_v53 = vld [vmem:[#allocation2 + $0x548] sm:$0xff]  }
  0x6a   : > { %4908 = vmatmul.mubr.bf16.vlgmr.msra.gmra.mxu1 %v5968_v60 }
  0x6b   : > { %804 = vmatmul.mubr.bf16.vlgmr.msra.gmra.mxu0 %v5970_v61  ;;  %4912 = vmatpush3.bf16.msra.mxu1 %v5354_v62  ;;  %v5406_v62 = vld [vmem:[#allocation2 + $0x1b0] sm:$0xff]  }
  0x6c   : > { %4314 = vmatpush3.bf16.msra.mxu0 %v5355_v63  ;;  %4913 = vmatprep.subr.bf16.mxu1 %v5833_v0  ;;  %v5407_v63 = vld [vmem:[#allocation2 + $0x1e8] sm:$0xff]  }
  0x6d   : > { %4315 = vmatprep.subr.bf16.mxu0 %v5356_v1  ;;  %4927 = vmatprep.mubr.msk.bf16.mxu1 %vm5834_vm0, %v5833_v0  ;;  %v5408_v1 = vld [vmem:[#allocation2 + $0x228] sm:$0xff]  }
  0x6e   : > { %1076 = vmatprep.mubr.bf16.mxu0 %v5933_v25 }
  0x6f   : > { %4914 = vmatpush3.bf16.msra.mxu1 %v5357_v2  ;;  %v5411_v2 = vld [vmem:[#allocation2 + $0x220] sm:$0xff]  }
  0x70   : > { %4316 = vmatpush3.bf16.msra.mxu0 %v5358_v3  ;;  %4915 = vmatprep.subr.bf16.mxu1 %v5833_v0  ;;  %v5412_v3 = vld [vmem:[#allocation2 + $0x1a0] sm:$0xff]  }
  0x71   : > { %4317 = vmatprep.subr.bf16.mxu0 %v5359_v4  ;;  %v5413_v4 = vld [vmem:[#allocation2 + $0x1d8] sm:$0xff]  }
  0x73   : > { %4916 = vmatpush3.bf16.msra.mxu1 %v5360_v5  ;;  %v5414_v5 = vld [vmem:[#allocation2 + $0x218] sm:$0xff]  }
  0x74   : > { %4318 = vmatpush3.bf16.msra.mxu0 %v5361_v6  ;;  %4917 = vmatprep.subr.bf16.mxu1 %v5833_v0  ;;  %v5415_v6 = vld [vmem:[#allocation2 + $0x198] sm:$0xff]  }
  0x75   : > { %4319 = vmatprep.subr.bf16.mxu0 %v5362_v7  ;;  %v1350_v7 = vld [vmem:[%s5956_s12 + $0x10] sm:$0x1e] }
  0x77   : > { %4918 = vmatpush3.bf16.msra.mxu1 %v5363_v8  ;;  %v1348_v8 = vld [vmem:[%s5956_s12] sm:$0x1e] }
  0x78   : > { %4320 = vmatpush3.bf16.msra.mxu0 %v5364_v9  ;;  %4919 = vmatprep.subr.bf16.mxu1 %v5833_v0  ;;  %v5416_v9 = vld [vmem:[#allocation2 + $0x1d0] sm:$0xff]  }
  0x79   : > { %4321 = vmatprep.subr.bf16.mxu0 %v5365_v10  ;;  %v1353_v10 = vpack.c.bf16 %v1350_v7, %v1350_v7  ;;  %v5457_v7 = vld [vmem:[#allocation2 + $0x268] sm:$0xff]  }
  0x7b   : > { %4920 = vmatpush3.bf16.msra.mxu1 %v5366_v11  ;;  %v5417_v11 = vld [vmem:[#allocation2 + $0x210] sm:$0xff]  }
  0x7c   : > { %4322 = vmatpush3.bf16.msra.mxu0 %v5367_v12  ;;  %4921 = vmatprep.subr.bf16.mxu1 %v5833_v0  ;;  %v1351_v12 = vpack.c.bf16 %v1348_v8, %v1348_v8  ;;  %v5458_v8 = vld [vmem:[#allocation2 + $0x2a0] sm:$0xff]  }
  0x7d   : > { %4323 = vmatprep.subr.bf16.mxu0 %v5368_v13  ;;  %v5418_v13 = vld [vmem:[#allocation2 + $0x190] sm:$0xff]  }
  0x7f   : > { %4922 = vmatpush3.bf16.msra.mxu1 %v5369_v14  ;;  %v5419_v14 = vld [vmem:[#allocation2 + $0x1c8] sm:$0xff]  }
  0x80   : > { %4324 = vmatpush3.bf16.msra.mxu0 %v5370_v15  ;;  %4923 = vmatprep.subr.bf16.mxu1 %v5833_v0  ;;  %v5420_v15 = vld [vmem:[#allocation2 + $0x208] sm:$0xff]  }
  0x81   : > { %4325 = vmatprep.subr.bf16.mxu0 %v5371_v16  ;;  %v1420_v16 = vshll.u32 %v1353_v10, 16 }
  0x83   : > { %4924 = vmatpush3.bf16.msra.mxu1 %v5372_v17  ;;  %v5421_v17 = vld [vmem:[#allocation2 + $0x188] sm:$0xff]  }
  0x84   : > { %4326 = vmatpush3.bf16.msra.mxu0 %v5373_v18  ;;  %4925 = vmatprep.subr.bf16.mxu1 %v5833_v0  ;;  %v1406_v18 = vshll.u32 %v1351_v12, 16 }
  0x85   : > { %4327 = vmatprep.subr.bf16.mxu0 %v5374_v19  ;;  %v5422_v19 = vld [vmem:[#allocation2 + $0x1c0] sm:$0xff]  }
  0x87   : > { %4926 = vmatpush3.bf16.msra.mxu1 %v5375_v20  ;;  %v5423_v20 = vld [vmem:[#allocation2 + $0x200] sm:$0xff]  }
  0x88   : > { %4328 = vmatpush3.bf16.msra.mxu0 %v5376_v21  ;;  %4931 = vmatprep.subr.bf16.mxu1 %v5833_v0  ;;  %v1418_v21 = vshrl.u32 %v1353_v10, 16  ;;  %v5460_v10 = vld [vmem:[#allocation2 + $0x260] sm:$0xff]  }
  0x89   : > { %4344 = vmatprep.subr.bf16.mxu0 %v5377_v22  ;;  %v1422_v22 = vrot.slane %v1420_v16, 1  ;;  %v5464_v16 = vld [vmem:[#allocation2 + $0x290] sm:$0xff]  }
  0x8a   : > { %4928 = vmatmul.mubr.bf16.vlgmr.msra.gmra.mxu1 %v5939_v30 }
  0x8b   : > { %1077 = vmatmul.mubr.bf16.vlgmr.msra.gmra.mxu0 %v5941_v31  ;;  %4932 = vmatpush3.bf16.msra.mxu1 %v5378_v23  ;;  %v1404_v23 = vshrl.u32 %v1351_v12, 16  ;;  %v5462_v12 = vld [vmem:[#allocation2 + $0x2d8] sm:$0xff]  }
  0x8c   : > { %4345 = vmatpush3.bf16.msra.mxu0 %v5379_v24  ;;  %4933 = vmatprep.subr.bf16.mxu1 %v5833_v0  ;;  %v1408_v24 = vrot.slane %v1406_v18, 1  ;;  %v5465_v18 = vld [vmem:[#allocation2 + $0x2d0] sm:$0xff]  }
  0x8d   : > { %4346 = vmatprep.subr.bf16.mxu0 %v5380_v26  ;;  %4947 = vmatprep.mubr.msk.bf16.mxu1 %vm5834_vm0, %v5833_v0  ;;  %v5424_v26 = vld [vmem:[#allocation2 + $0x180] sm:$0xff]  }
  0x8e   : > { %1300 = vmatprep.mubr.bf16.mxu0 %v5960_v48  ;;  %v5399_v48 = vld [vmem:[#allocation2 + $0x440] sm:$0xff]  }
  0x8f   : > { %4934 = vmatpush3.bf16.msra.mxu1 %v5381_v27  ;;  %v5425_v27 = vld [vmem:[#allocation2 + $0x5b8] sm:$0xff]  }
  0x90   : > { %4347 = vmatpush3.bf16.msra.mxu0 %v5382_v28  ;;  %4935 = vmatprep.subr.bf16.mxu1 %v5833_v0  ;;  %v6016_v28 = vor.u32 %v1422_v22, %v1418_v21  ;;  %v5467_v21 = vld [vmem:[#allocation2 + $0x288] sm:$0xff]  }
  0x91   : > { %4348 = vmatprep.subr.bf16.mxu0 %v5383_v29  ;;  %v6018_v29 = vor.u32 %v1408_v24, %v1404_v23  ;;  %v5468_v22 = vld [vmem:[#allocation2 + $0x2c8] sm:$0xff]  }
  0x92   : > { %v5469_v24 = vld [vmem:[#allocation2 + $0x248] sm:$0xff]  }
  0x93   : > { %4936 = vmatpush3.bf16.msra.mxu1 %v5384_v32  ;;  %v5426_v32 = vld [vmem:[#allocation2 + $0x5f8] sm:$0xff]  }
  0x94   : > { %4349 = vmatpush3.bf16.msra.mxu0 %v5385_v33  ;;  %4937 = vmatprep.subr.bf16.mxu1 %v5833_v0  ;;  %v5427_v33 = vld [vmem:[#allocation2 + $0x578] sm:$0xff]  }
  0x95   : > { %4350 = vmatprep.subr.bf16.mxu0 %v5386_v34  ;;  %v5428_v34 = vld [vmem:[#allocation2 + $0x5b0] sm:$0xff]  }
  0x97   : > { %4938 = vmatpush3.bf16.msra.mxu1 %v5387_v35  ;;  %v5429_v35 = vld [vmem:[#allocation2 + $0x5f0] sm:$0xff]  }
  0x98   : > { %4351 = vmatpush3.bf16.msra.mxu0 %v5388_v36  ;;  %4939 = vmatprep.subr.bf16.mxu1 %v5833_v0  ;;  %v5430_v36 = vld [vmem:[#allocation2 + $0x570] sm:$0xff]  }
  0x99   : > { %4352 = vmatprep.subr.bf16.mxu0 %v5389_v37  ;;  %v5431_v37 = vld [vmem:[#allocation2 + $0x5a8] sm:$0xff]  }
  0x9b   : > { %4940 = vmatpush3.bf16.msra.mxu1 %v5390_v38  ;;  %v5432_v38 = vld [vmem:[#allocation2 + $0x5e8] sm:$0xff]  }
  0x9c   : > { %4353 = vmatpush3.bf16.msra.mxu0 %v5391_v39  ;;  %4941 = vmatprep.subr.bf16.mxu1 %v5833_v0  ;;  %v5433_v39 = vld [vmem:[#allocation2 + $0x568] sm:$0xff]  }
  0x9d   : > { %4354 = vmatprep.subr.bf16.mxu0 %v5392_v40  ;;  %v5434_v40 = vld [vmem:[#allocation2 + $0x5a0] sm:$0xff]  }
  0x9f   : > { %4942 = vmatpush3.bf16.msra.mxu1 %v5393_v41  ;;  %v5435_v41 = vld [vmem:[#allocation2 + $0x5e0] sm:$0xff]  }
  0xa0   : > { %4355 = vmatpush3.bf16.msra.mxu0 %v5394_v42  ;;  %4943 = vmatprep.subr.bf16.mxu1 %v5833_v0  ;;  %v5436_v42 = vld [vmem:[#allocation2 + $0x560] sm:$0xff]  }
  0xa1   : > { %4356 = vmatprep.subr.bf16.mxu0 %v5395_v43  ;;  %v5437_v43 = vld [vmem:[#allocation2 + $0x598] sm:$0xff]  }
  0xa3   : > { %4944 = vmatpush3.bf16.msra.mxu1 %v5396_v44  ;;  %v5438_v44 = vld [vmem:[#allocation2 + $0x5d8] sm:$0xff]  }
  0xa4   : > { %4357 = vmatpush3.bf16.msra.mxu0 %v5397_v45  ;;  %4945 = vmatprep.subr.bf16.mxu1 %v5833_v0  ;;  %v5439_v45 = vld [vmem:[#allocation2 + $0x558] sm:$0xff]  }
  0xa5   : > { %4358 = vmatprep.subr.bf16.mxu0 %v5398_v46  ;;  %v5440_v46 = vld [vmem:[#allocation2 + $0x590] sm:$0xff]  }
  0xa7   : > { %4946 = vmatpush3.bf16.msra.mxu1 %v5399_v48  ;;  %v1927_v48 = vld [vmem:[%s5929_s9 + $0x8] sm:$0x1e] }
  0xa8   : > { %4359 = vmatpush3.bf16.msra.mxu0 %v5400_v50  ;;  %4951 = vmatprep.subr.bf16.mxu1 %v5833_v0  ;;  %v5443_v50 = vld [vmem:[#allocation2 + $0x588] sm:$0xff]  }
  0xa9   : > { %4375 = vmatprep.subr.bf16.mxu0 %v5401_v51  ;;  %v1930_v51 = vpack.c.bf16 %v1927_v48, %v1927_v48  ;;  %v5478_v48 = vld [vmem:[#allocation2 + $0x630] sm:$0xff]  }
  0xaa   : > { %4948 = vmatmul.mubr.bf16.vlgmr.msra.gmra.mxu1 %v5968_v60  ;;  %v5409_v60 = vld [vmem:[#allocation2 + $0x1a8] sm:$0xff]  }
  0xab   : > { %1301 = vmatmul.mubr.bf16.vlgmr.msra.gmra.mxu0 %v5970_v61  ;;  %4952 = vmatpush3.bf16.msra.mxu1 %v5402_v54  ;;  %v5410_v61 = vld [vmem:[#allocation2 + $0x1e0] sm:$0xff]   ;;  %v1991_v55 = vshll.u32 %v1930_v51, 16 }
  0xac   : > { %4376 = vmatpush3.bf16.msra.mxu0 %v5403_v56  ;;  %4953 = vmatprep.subr.bf16.mxu1 %v5833_v0  ;;  %v5446_v54 = vld [vmem:[#allocation2 + $0x580] sm:$0xff]  }
  0xad   : > { %4377 = vmatprep.subr.bf16.mxu0 %v5404_v57  ;;  %4967 = vmatprep.mubr.msk.bf16.mxu1 %vm5834_vm0, %v5833_v0  ;;  %v5447_v56 = vld [vmem:[#allocation2 + $0x5c0] sm:$0xff]  }
  0xae   : > { %1603 = vmatprep.mubr.bf16.mxu0 %v6001_v58  ;;  %v5448_v57 = vld [vmem:[#allocation2 + $0x540] sm:$0xff]  }
  0xaf   : > { %4954 = vmatpush3.bf16.msra.mxu1 %v5405_v59  ;;  %v5449_v59 = vld [vmem:[#allocation2 + $0x2b8] sm:$0xff]  }
  0xb0   : > { %4378 = vmatpush3.bf16.msra.mxu0 %v5406_v62  ;;  %4955 = vmatprep.subr.bf16.mxu1 %v5833_v0  ;;  %v1989_v62 = vshrl.u32 %v1930_v51, 16 }
  0xb1   : > { %4379 = vmatprep.subr.bf16.mxu0 %v5407_v63  ;;  %v1993_v63 = vrot.slane %v1991_v55, 1 }
  0xb3   : > { %4956 = vmatpush3.bf16.msra.mxu1 %v5408_v1  ;;  %v5450_v1 = vld [vmem:[#allocation2 + $0x2f8] sm:$0xff]  }
  0xb4   : > { %4380 = vmatpush3.bf16.msra.mxu0 %v5409_v60  ;;  %4957 = vmatprep.subr.bf16.mxu1 %v5833_v0  ;;  %v5451_v60 = vld [vmem:[#allocation2 + $0x278] sm:$0xff]  }
  0xb5   : > { %4381 = vmatprep.subr.bf16.mxu0 %v5410_v61  ;;  %v5452_v61 = vld [vmem:[#allocation2 + $0x2b0] sm:$0xff]  }
  0xb7   : > { %4958 = vmatpush3.bf16.msra.mxu1 %v5411_v2  ;;  %v6036_v2 = vor.u32 %v1993_v63, %v1989_v62  ;;  %v5482_v62 = vld [vmem:[#allocation2 + $0x660] sm:$0xff]  }
  0xb8   : > { %4382 = vmatpush3.bf16.msra.mxu0 %v5412_v3  ;;  %4959 = vmatprep.subr.bf16.mxu1 %v5833_v0  ;;  %v5453_v3 = vld [vmem:[#allocation2 + $0x2f0] sm:$0xff]   ;;  %v5483_v63 = vld [vmem:[#allocation2 + $0x6a0] sm:$0xff]  }
  0xb9   : > { %4383 = vmatprep.subr.bf16.mxu0 %v5413_v4  ;;  %v5454_v4 = vld [vmem:[#allocation2 + $0x270] sm:$0xff]  }
  0xbb   : > { %4960 = vmatpush3.bf16.msra.mxu1 %v5414_v5  ;;  %v5455_v5 = vld [vmem:[#allocation2 + $0x2a8] sm:$0xff]  }
  0xbc   : > { %4384 = vmatpush3.bf16.msra.mxu0 %v5415_v6  ;;  %4961 = vmatprep.subr.bf16.mxu1 %v5833_v0  ;;  %v5456_v6 = vld [vmem:[#allocation2 + $0x2e8] sm:$0xff]  }
  0xbd   : > { %4385 = vmatprep.subr.bf16.mxu0 %v5416_v9  ;;  %v5459_v9 = vld [vmem:[#allocation2 + $0x2e0] sm:$0xff]  }
  0xbf   : > { %4962 = vmatpush3.bf16.msra.mxu1 %v5417_v11  ;;  %v5461_v11 = vld [vmem:[#allocation2 + $0x298] sm:$0xff]  }
  0xc0   : > { %4386 = vmatpush3.bf16.msra.mxu0 %v5418_v13  ;;  %4963 = vmatprep.subr.bf16.mxu1 %v5833_v0  ;;  %v5463_v13 = vld [vmem:[#allocation2 + $0x258] sm:$0xff]  }
  0xc1   : > { %4387 = vmatprep.subr.bf16.mxu0 %v5419_v14  ;;  %v1928_v14 = vld [vmem:[%s5929_s9 + $0x10] sm:$0x1e] }
  0xc3   : > { %4964 = vmatpush3.bf16.msra.mxu1 %v5420_v15  ;;  %v1926_v15 = vld [vmem:[%s5929_s9] sm:$0x1e] }
  0xc4   : > { %4388 = vmatpush3.bf16.msra.mxu0 %v5421_v17  ;;  %4965 = vmatprep.subr.bf16.mxu1 %v5833_v0  ;;  %v1931_v17 = vpack.c.bf16 %v1928_v14, %v1928_v14  ;;  %v5497_v14 = vld [vmem:[#allocation2 + $0x378] sm:$0xff]  }
  0xc5   : > { %4389 = vmatprep.subr.bf16.mxu0 %v5422_v19  ;;  %v1929_v19 = vpack.c.bf16 %v1926_v15, %v1926_v15 }
  0xc6   : > { %v1998_v23 = vshll.u32 %v1931_v17, 16 }
  0xc7   : > { %4966 = vmatpush3.bf16.msra.mxu1 %v5423_v20  ;;  %v5466_v20 = vld [vmem:[#allocation2 + $0x250] sm:$0xff]  }
  0xc8   : > { %4390 = vmatpush3.bf16.msra.mxu0 %v5424_v26  ;;  %4971 = vmatprep.subr.bf16.mxu1 %v5833_v0  ;;  %v1984_v26 = vshll.u32 %v1929_v19, 16 }
  0xc9   : > { %4406 = vmatprep.subr.bf16.mxu0 %v5425_v27  ;;  %v5470_v27 = vld [vmem:[#allocation2 + $0x280] sm:$0xff]  }
  0xca   : > { %4968 = vmatmul.mubr.bf16.vlgmr.msra.gmra.mxu1 %v6016_v28 }
  0xcb   : > { %1604 = vmatmul.mubr.bf16.vlgmr.msra.gmra.mxu0 %v6018_v29  ;;  %4972 = vmatpush3.bf16.msra.mxu1 %v5426_v32  ;;  %v5471_v32 = vld [vmem:[#allocation2 + $0x2c0] sm:$0xff]  }
  0xcc   : > { %4407 = vmatpush3.bf16.msra.mxu0 %v5427_v33  ;;  %4973 = vmatprep.subr.bf16.mxu1 %v5833_v0  ;;  %v1996_v33 = vshrl.u32 %v1931_v17, 16  ;;  %v5499_v17 = vld [vmem:[#allocation2 + $0x338] sm:$0xff]  }
  0xcd   : > { %4408 = vmatprep.subr.bf16.mxu0 %v5428_v34  ;;  %4987 = vmatprep.mubr.msk.bf16.mxu1 %vm5834_vm0, %v5833_v0  ;;  %v2000_v34 = vrot.slane %v1998_v23, 1 }
  0xce   : > { %1877 = vmatprep.mubr.bf16.mxu0 %v6001_v58 }
  0xcf   : > { %4974 = vmatpush3.bf16.msra.mxu1 %v5429_v35  ;;  %v1982_v35 = vshrl.u32 %v1929_v19, 16 }
  0xd0   : > { %4409 = vmatpush3.bf16.msra.mxu0 %v5430_v36  ;;  %4975 = vmatprep.subr.bf16.mxu1 %v5833_v0  ;;  %v1986_v36 = vrot.slane %v1984_v26, 1 }
  0xd1   : > { %4410 = vmatprep.subr.bf16.mxu0 %v5431_v37  ;;  %v5472_v37 = vld [vmem:[#allocation2 + $0x240] sm:$0xff]  }
  0xd3   : > { %4976 = vmatpush3.bf16.msra.mxu1 %v5432_v38  ;;  %v5473_v38 = vld [vmem:[#allocation2 + $0x678] sm:$0xff]  }
  0xd4   : > { %4411 = vmatpush3.bf16.msra.mxu0 %v5433_v39  ;;  %4977 = vmatprep.subr.bf16.mxu1 %v5833_v0  ;;  %v6051_v39 = vor.u32 %v2000_v34, %v1996_v33 }
  0xd5   : > { %4412 = vmatprep.subr.bf16.mxu0 %v5434_v40  ;;  %v6053_v40 = vor.u32 %v1986_v36, %v1982_v35  ;;  %v5504_v35 = vld [vmem:[#allocation2 + $0x3a8] sm:$0xff]  }
  0xd7   : > { %4978 = vmatpush3.bf16.msra.mxu1 %v5435_v41  ;;  %v5474_v41 = vld [vmem:[#allocation2 + $0x6b8] sm:$0xff]  }
  0xd8   : > { %4413 = vmatpush3.bf16.msra.mxu0 %v5436_v42  ;;  %4979 = vmatprep.subr.bf16.mxu1 %v5833_v0  ;;  %v5475_v42 = vld [vmem:[#allocation2 + $0x638] sm:$0xff]  }
  0xd9   : > { %4414 = vmatprep.subr.bf16.mxu0 %v5437_v43  ;;  %v5476_v43 = vld [vmem:[#allocation2 + $0x670] sm:$0xff]  }
  0xdb   : > { %4980 = vmatpush3.bf16.msra.mxu1 %v5438_v44 }
  0xdc   : > { %4415 = vmatpush3.bf16.msra.mxu0 %v5439_v45  ;;  %4981 = vmatprep.subr.bf16.mxu1 %v5833_v0 }
  0xdd   : > { %4416 = vmatprep.subr.bf16.mxu0 %v5440_v46  ;;  %v5477_v46 = vld [vmem:[#allocation2 + $0x6b0] sm:$0xff]  }
  0xdf   : > { %4982 = vmatpush3.bf16.msra.mxu1 %v5441_v47 }
  0xe0   : > { %4417 = vmatpush3.bf16.msra.mxu0 %v5442_v49  ;;  %4983 = vmatprep.subr.bf16.mxu1 %v5833_v0 }
  0xe1   : > { %4418 = vmatprep.subr.bf16.mxu0 %v5443_v50  ;;  %v5479_v50 = vld [vmem:[#allocation2 + $0x668] sm:$0xff]  }
  0xe3   : > { %4984 = vmatpush3.bf16.msra.mxu1 %v5444_v52 }
  0xe4   : > { %4419 = vmatpush3.bf16.msra.mxu0 %v5445_v53  ;;  %4985 = vmatprep.subr.bf16.mxu1 %v5833_v0 }
  0xe5   : > { %4420 = vmatprep.subr.bf16.mxu0 %v5446_v54  ;;  %v5480_v54 = vld [vmem:[#allocation2 + $0x6a8] sm:$0xff]  }
  0xe7   : > { %4986 = vmatpush3.bf16.msra.mxu1 %v5447_v56 }
  0xe8   : > { %4421 = vmatpush3.bf16.msra.mxu0 %v5448_v57  ;;  %4991 = vmatprep.subr.bf16.mxu1 %v5833_v0  ;;  %v5481_v57 = vld [vmem:[#allocation2 + $0x628] sm:$0xff]  }
  0xe9   : > { %4437 = vmatprep.subr.bf16.mxu0 %v5449_v59 }
  0xea   : > { %4988 = vmatmul.mubr.bf16.vlgmr.msra.gmra.mxu1 %v6016_v28 }
  0xeb   : > { %1878 = vmatmul.mubr.bf16.vlgmr.msra.gmra.mxu0 %v6018_v29  ;;  %4992 = vmatpush3.bf16.msra.mxu1 %v5450_v1  ;;  %v5484_v1 = vld [vmem:[#allocation2 + $0x620] sm:$0xff]  }
  0xec   : > { %4438 = vmatpush3.bf16.msra.mxu0 %v5451_v60  ;;  %4993 = vmatprep.subr.bf16.mxu1 %v5833_v0  ;;  %v5485_v60 = vld [vmem:[#allocation2 + $0x658] sm:$0xff]  }
  0xed   : > { %4439 = vmatprep.subr.bf16.mxu0 %v5452_v61  ;;  %5007 = vmatprep.mubr.msk.bf16.mxu1 %vm5834_vm0, %v5833_v0  ;;  %v5486_v61 = vld [vmem:[#allocation2 + $0x698] sm:$0xff]  }
  0xee   : > { %2181 = vmatprep.mubr.bf16.mxu0 %v6036_v2 }
  0xef   : > { %4994 = vmatpush3.bf16.msra.mxu1 %v5453_v3  ;;  %v5487_v3 = vld [vmem:[#allocation2 + $0x618] sm:$0xff]  }
  0xf0   : > { %4440 = vmatpush3.bf16.msra.mxu0 %v5454_v4  ;;  %4995 = vmatprep.subr.bf16.mxu1 %v5833_v0  ;;  %v5488_v4 = vld [vmem:[#allocation2 + $0x650] sm:$0xff]  }
  0xf1   : > { %4441 = vmatprep.subr.bf16.mxu0 %v5455_v5  ;;  %v5489_v5 = vld [vmem:[#allocation2 + $0x690] sm:$0xff]  }
  0xf3   : > { %4996 = vmatpush3.bf16.msra.mxu1 %v5456_v6  ;;  %v5490_v6 = vld [vmem:[#allocation2 + $0x610] sm:$0xff]  }
  0xf4   : > { %4442 = vmatpush3.bf16.msra.mxu0 %v5457_v7  ;;  %4997 = vmatprep.subr.bf16.mxu1 %v5833_v0  ;;  %v5491_v7 = vld [vmem:[#allocation2 + $0x648] sm:$0xff]  }
  0xf5   : > { %4443 = vmatprep.subr.bf16.mxu0 %v5458_v8  ;;  %v5492_v8 = vld [vmem:[#allocation2 + $0x688] sm:$0xff]  }
  0xf7   : > { %4998 = vmatpush3.bf16.msra.mxu1 %v5459_v9  ;;  %v5493_v9 = vld [vmem:[#allocation2 + $0x608] sm:$0xff]  }
  0xf8   : > { %4444 = vmatpush3.bf16.msra.mxu0 %v5460_v10  ;;  %4999 = vmatprep.subr.bf16.mxu1 %v5833_v0  ;;  %v5494_v10 = vld [vmem:[#allocation2 + $0x640] sm:$0xff]  }
  0xf9   : > { %4445 = vmatprep.subr.bf16.mxu0 %v5461_v11  ;;  %v5495_v11 = vld [vmem:[#allocation2 + $0x680] sm:$0xff]  }
  0xfb   : > { %5000 = vmatpush3.bf16.msra.mxu1 %v5462_v12  ;;  %v2505_v12 = vld [vmem:[%s5956_s12 + $0x8] sm:$0x3c] }
  0xfc   : > { %4446 = vmatpush3.bf16.msra.mxu0 %v5463_v13  ;;  %5001 = vmatprep.subr.bf16.mxu1 %v5833_v0  ;;  %v5496_v13 = vld [vmem:[#allocation2 + $0x600] sm:$0xff]   ;;  %v2508_v15 = vpack.c.bf16 %v2505_v12, %v2505_v12 }
  0xfd   : > { %4447 = vmatprep.subr.bf16.mxu0 %v5464_v16  ;;  %v5498_v16 = vld [vmem:[#allocation2 + $0x3b8] sm:$0xff]  }
  0xff   : > { %5002 = vmatpush3.bf16.msra.mxu1 %v5465_v18  ;;  %v5500_v18 = vld [vmem:[#allocation2 + $0x370] sm:$0xff]  }
 0x100   : > { %4448 = vmatpush3.bf16.msra.mxu0 %v5466_v20  ;;  %5003 = vmatprep.subr.bf16.mxu1 %v5833_v0  ;;  %v6073_v20 = vrot.slane %v2508_v15, 1 }
 0x101   : > { %4449 = vmatprep.subr.bf16.mxu0 %v5467_v21 }
 0x103   : > { %5004 = vmatpush3.bf16.msra.mxu1 %v5468_v22  ;;  %v5501_v22 = vld [vmem:[#allocation2 + $0x3b0] sm:$0xff]  }
 0x104   : > { %4450 = vmatpush3.bf16.msra.mxu0 %v5469_v24  ;;  %5005 = vmatprep.subr.bf16.mxu1 %v5833_v0  ;;  %v5502_v24 = vld [vmem:[#allocation2 + $0x330] sm:$0xff]  }
 0x105   : > { %4451 = vmatprep.subr.bf16.mxu0 %v5470_v27  ;;  %v5503_v27 = vld [vmem:[#allocation2 + $0x368] sm:$0xff]  }
 0x107   : > { %5006 = vmatpush3.bf16.msra.mxu1 %v5471_v32 }
 0x108   : > { %4452 = vmatpush3.bf16.msra.mxu0 %v5472_v37  ;;  %5011 = vmatprep.subr.bf16.mxu1 %v5833_v0 }
 0x109   : > { %4468 = vmatprep.subr.bf16.mxu0 %v5473_v38  ;;  %v5505_v38 = vld [vmem:[#allocation2 + $0x328] sm:$0xff]  }
 0x10a   : > { %v621_v44 = vpop.f32.mrf.mxu1  ;;  %5008 = vmatmul.mubr.bf16.vlgmr.msra.gmra.mxu1 %v6051_v39 }
 0x10b   : > { %v4267_v45 = vpop.f32.mrf.mxu0  ;;  %2182 = vmatmul.mubr.bf16.vlgmr.msra.gmra.mxu0 %v6053_v40  ;;  %5012 = vmatpush3.bf16.msra.mxu1 %v5474_v41 }
 0x10c   : > { %v4889_v47 = vpop.f32.mrf.mxu1  ;;  %4469 = vmatpush3.bf16.msra.mxu0 %v5475_v42  ;;  %5013 = vmatprep.subr.bf16.mxu1 %v5833_v0  ;;  %v5506_v42 = vld [vmem:[#allocation2 + $0x360] sm:$0xff]  }
 0x10d   : > { %v4268_v49 = vpop.f32.mrf.mxu0  ;;  %4470 = vmatprep.subr.bf16.mxu0 %v5476_v43  ;;  %5027 = vmatprep.mubr.msk.bf16.mxu1 %vm5834_vm0, %v5833_v0  ;;  %v5510_v47 = vld [vmem:[#allocation2 + $0x398] sm:$0xff]  }
 0x10e   : > { %v4269_v51 = vadd.f32 %v4268_v49, %v4267_v45  ;;  %v624_v52 = vpop.f32.mrf.mxu1  ;;  %2455 = vmatprep.mubr.bf16.mxu0 %v6036_v2  ;;  %v5508_v45 = vld [vmem:[#allocation2 + $0x320] sm:$0xff]   ;;  %v5512_v49 = vld [vmem:[#allocation2 + $0x350] sm:$0xff]  }
 0x10f   : > { %v4270_v53 = vpop.f32.mrf.mxu0  ;;  %5014 = vmatpush3.bf16.msra.mxu1 %v5477_v46  ;;  %v5509_v46 = vld [vmem:[#allocation2 + $0x358] sm:$0xff]   ;;  %v5515_v52 = vld [vmem:[#allocation2 + $0x348] sm:$0xff]  }
 0x110   : > { %v6062_v55 = vadd.f32 %v4269_v51, %v621_v44  ;;  %v4890_v56 = vpop.f32.mrf.mxu1  ;;  %4471 = vmatpush3.bf16.msra.mxu0 %v5478_v48  ;;  %5015 = vmatprep.subr.bf16.mxu1 %v5833_v0  ;;  %v5507_v44 = vld [vmem:[#allocation2 + $0x3a0] sm:$0xff]   ;;  %v5511_v48 = vld [vmem:[#allocation2 + $0x318] sm:$0xff]   ;;  %v5514_v51 = vld [vmem:[#allocation2 + $0x310] sm:$0xff]  }
 0x111   : > { %v4271_v59 = vpop.f32.mrf.mxu0  ;;  %4472 = vmatprep.subr.bf16.mxu0 %v5479_v50  ;;  %v5513_v50 = vld [vmem:[#allocation2 + $0x390] sm:$0xff]   ;;  %v5516_v53 = vld [vmem:[#allocation2 + $0x388] sm:$0xff]   ;;  %v2504_v56 = vld [vmem:[%s5956_s12] sm:$0x3c] }
 0x113   : > { %5016 = vmatpush3.bf16.msra.mxu1 %v5480_v54  ;;  %v2506_v54 = vld [vmem:[%s5956_s12 + $0x10] sm:$0x3c] }
 0x114   : > { %4473 = vmatpush3.bf16.msra.mxu0 %v5481_v57  ;;  %5017 = vmatprep.subr.bf16.mxu1 %v5833_v0  ;;  %v6092_v57 = vld [vmem:[#allocation2 + $0x340] sm:$0xff]   ;;  %v2509_v59 = vpack.c.bf16 %v2506_v54, %v2506_v54 }
 0x115   : > { %4474 = vmatprep.subr.bf16.mxu0 %v5482_v62  ;;  %v6094_v62 = vld [vmem:[#allocation2 + $0x380] sm:$0xff]  }
 0x117   : > { %5018 = vmatpush3.bf16.msra.mxu1 %v5483_v63  ;;  %v2507_v63 = vpack.c.bf16 %v2504_v56, %v2504_v56 }
 0x118   : > { %4475 = vmatpush3.bf16.msra.mxu0 %v5484_v1  ;;  %5019 = vmatprep.subr.bf16.mxu1 %v5833_v0  ;;  %v6098_v1 = vld [vmem:[#allocation2 + $0x300] sm:$0xff]  }
 0x119   : > { %4476 = vmatprep.subr.bf16.mxu0 %v5485_v60  ;;  %v6101_v60 = vld [vmem:[#allocation2 + $0x738] sm:$0xff]  }
 0x11b   : > { %5020 = vmatpush3.bf16.msra.mxu1 %v5486_v61  ;;  %v6103_v61 = vrot.slane %v2509_v59, 1 }
 0x11c   : > { %4477 = vmatpush3.bf16.msra.mxu0 %v5487_v3  ;;  %5021 = vmatprep.subr.bf16.mxu1 %v5833_v0  ;;  %v6106_v3 = vrot.slane %v2507_v63, 1  ;;  %v5553_v63 = vld [vmem:[#allocation2 + $0x170] sm:$0xff]  }
 0x11d   : > { %4478 = vmatprep.subr.bf16.mxu0 %v5488_v4  ;;  %v6108_v4 = vld [vmem:[#allocation2 + $0x778] sm:$0xff]  }
 0x11f   : > { %5022 = vmatpush3.bf16.msra.mxu1 %v5489_v5  ;;  %v6112_v5 = vld [vmem:[#allocation2 + $0x6f8] sm:$0xff]  }
 0x120   : > { %4479 = vmatpush3.bf16.msra.mxu0 %v5490_v6  ;;  %5023 = vmatprep.subr.bf16.mxu1 %v5833_v0  ;;  %v6115_v6 = vld [vmem:[#allocation2 + $0x730] sm:$0xff]  }
 0x121   : > { %4480 = vmatprep.subr.bf16.mxu0 %v5491_v7 }
 0x123   : > { %5024 = vmatpush3.bf16.msra.mxu1 %v5492_v8 }
 0x124   : > { %4481 = vmatpush3.bf16.msra.mxu0 %v5493_v9  ;;  %5025 = vmatprep.subr.bf16.mxu1 %v5833_v0  ;;  %v6120_v9 = vld [vmem:[#allocation2 + $0x770] sm:$0xff]  }
 0x125   : > { %4482 = vmatprep.subr.bf16.mxu0 %v5494_v10 }
 0x127   : > { %5026 = vmatpush3.bf16.msra.mxu1 %v5495_v11  ;;  %v6124_v11 = vld [vmem:[#allocation2 + $0x6f0] sm:$0xff]  }
 0x128   : > { %4483 = vmatpush3.bf16.msra.mxu0 %v5496_v13  ;;  %5031 = vmatprep.subr.bf16.mxu1 %v5833_v0  ;;  %v6127_v13 = vld [vmem:[#allocation2 + $0x728] sm:$0xff]  }
 0x129   : > { %4499 = vmatprep.subr.bf16.mxu0 %v5497_v14 }
 0x12a   : > { %v845_v19 = vpop.f32.mrf.mxu1  ;;  %5028 = vmatmul.mubr.bf16.vlgmr.msra.gmra.mxu1 %v6051_v39 }
 0x12b   : > { %v4298_v21 = vpop.f32.mrf.mxu0  ;;  %2456 = vmatmul.mubr.bf16.vlgmr.msra.gmra.mxu0 %v6053_v40  ;;  %5032 = vmatpush3.bf16.msra.mxu1 %v5498_v16 }
 0x12c   : > { %v4909_v23 = vpop.f32.mrf.mxu1  ;;  %4500 = vmatpush3.bf16.msra.mxu0 %v5499_v17  ;;  %5033 = vmatprep.subr.bf16.mxu1 %v5833_v0  ;;  %v6133_v17 = vld [vmem:[#allocation2 + $0x768] sm:$0xff]  }
 0x12d   : > { %v4299_v26 = vpop.f32.mrf.mxu0  ;;  %4501 = vmatprep.subr.bf16.mxu0 %v5500_v18  ;;  %5047 = vmatprep.mubr.msk.bf16.mxu1 %vm5834_vm0, %v5833_v0  ;;  %v6142_v23 = vld [vmem:[#allocation2 + $0x720] sm:$0xff]  }
 0x12e   : > { %v4300_v32 = vadd.f32 %v4299_v26, %v4298_v21  ;;  %v848_v33 = vpop.f32.mrf.mxu1  ;;  %2744 = vmatprep.mubr.bf16.mxu0 %v6073_v20  ;;  %v6139_v21 = vld [vmem:[#allocation2 + $0x6e8] sm:$0xff]   ;;  %v6149_v26 = vld [vmem:[#allocation2 + $0x6e0] sm:$0xff]  }
 0x12f   : > { %v4301_v34 = vpop.f32.mrf.mxu0  ;;  %5034 = vmatpush3.bf16.msra.mxu1 %v5501_v22  ;;  %v6159_v33 = vld [vmem:[#allocation2 + $0x6d8] sm:$0xff]  }
 0x130   : > { %v806_v36 = vadd.f32 %v4300_v32, %v6062_v55  ;;  %v4910_v37 = vpop.f32.mrf.mxu1  ;;  %4502 = vmatpush3.bf16.msra.mxu0 %v5502_v24  ;;  %5035 = vmatprep.subr.bf16.mxu1 %v5833_v0  ;;  %v6089_v55 = vld [vmem:[#allocation2 + $0x308] sm:$0xff]   ;;  %v6145_v24 = vld [vmem:[#allocation2 + $0x760] sm:$0xff]   ;;  %v6155_v32 = vld [vmem:[#allocation2 + $0x758] sm:$0xff]  }
 0x131   : > { %v4302_v41 = vpop.f32.mrf.mxu0  ;;  %4503 = vmatprep.subr.bf16.mxu0 %v5503_v27  ;;  %v6152_v27 = vld [vmem:[#allocation2 + $0x718] sm:$0xff]   ;;  %v6162_v34 = vld [vmem:[#allocation2 + $0x710] sm:$0xff]   ;;  %v6172_v37 = vld [vmem:[#allocation2 + $0x708] sm:$0xff]  }
 0x132   : > { %v6082_v43 = vadd.f32 %v845_v19, %v806_v36  ;;  %v6169_v36 = vld [vmem:[#allocation2 + $0x6d0] sm:$0xff]   ;;  %v6179_v41 = vld [vmem:[#allocation2 + $0x6c8] sm:$0xff]  }
 0x133   : > { %5036 = vmatpush3.bf16.msra.mxu1 %v5504_v35  ;;  %v6165_v35 = vld [vmem:[#allocation2 + $0x750] sm:$0xff]  }
 0x134   : > { %4504 = vmatpush3.bf16.msra.mxu0 %v5505_v38  ;;  %5037 = vmatprep.subr.bf16.mxu1 %v5833_v0  ;;  %v6175_v38 = vld [vmem:[#allocation2 + $0x748] sm:$0xff]  }
 0x135   : > { %4505 = vmatprep.subr.bf16.mxu0 %v5506_v42  ;;  %v6182_v42 = vld [vmem:[#allocation2 + $0x700] sm:$0xff]  }
 0x137   : > { %5038 = vmatpush3.bf16.msra.mxu1 %v5507_v44  ;;  %v6185_v44 = vld [vmem:[#allocation2 + $0x740] sm:$0xff]  }
 0x138   : > { %4506 = vmatpush3.bf16.msra.mxu0 %v5508_v45  ;;  %5039 = vmatprep.subr.bf16.mxu1 %v5833_v0  ;;  %v6189_v45 = vld [vmem:[#allocation2 + $0x6c0] sm:$0xff]  }
 0x139   : > { %4507 = vmatprep.subr.bf16.mxu0 %v5509_v46  ;;  %v5549_v46 = vld [vmem:[#allocation2 + $0x138] sm:$0xff]  }
 0x13b   : > { %5040 = vmatpush3.bf16.msra.mxu1 %v5510_v47 }
 0x13c   : > { %4508 = vmatpush3.bf16.msra.mxu0 %v5511_v48  ;;  %5041 = vmatprep.subr.bf16.mxu1 %v5833_v0 }
 0x13d   : > { %4509 = vmatprep.subr.bf16.mxu0 %v5512_v49  ;;  %v5550_v49 = vld [vmem:[#allocation2 + $0x178] sm:$0xff]  }
 0x13f   : > { %5042 = vmatpush3.bf16.msra.mxu1 %v5513_v50 }
 0x140   : > { %4510 = vmatpush3.bf16.msra.mxu0 %v5514_v51  ;;  %5043 = vmatprep.subr.bf16.mxu1 %v5833_v0  ;;  %v5551_v51 = vld [vmem:[#allocation2 + $0xf8] sm:$0xff]  }
 0x141   : > { %4511 = vmatprep.subr.bf16.mxu0 %v5515_v52 }
 0x143   : > { %5044 = vmatpush3.bf16.msra.mxu1 %v5516_v53  ;;  %v5552_v53 = vld [vmem:[#allocation2 + $0x130] sm:$0xff]  }
 0x144   : > { %4512 = vmatpush3.bf16.msra.mxu0 %v6089_v55  ;;  %5045 = vmatprep.subr.bf16.mxu1 %v5833_v0 }
 0x145   : > { %4513 = vmatprep.subr.bf16.mxu0 %v6092_v57 }
 0x147   : > { %5046 = vmatpush3.bf16.msra.mxu1 %v6094_v62 }
 0x148   : > { %4514 = vmatpush3.bf16.msra.mxu0 %v6098_v1  ;;  %5051 = vmatprep.subr.bf16.mxu1 %v5833_v0 }
 0x149   : > { %4530 = vmatprep.subr.bf16.mxu0 %v6101_v60 }
 0x14a   : > { %v1118_v7 = vpop.f32.mrf.mxu1  ;;  %5048 = vmatmul.mubr.bf16.vlgmr.msra.gmra.mxu1 %v6103_v61 }
 0x14b   : > { %v4329_v8 = vpop.f32.mrf.mxu0  ;;  %2745 = vmatmul.mubr.bf16.vlgmr.msra.gmra.mxu0 %v6106_v3  ;;  %5052 = vmatpush3.bf16.msra.mxu1 %v6108_v4 }
 0x14c   : > { %v4929_v10 = vpop.f32.mrf.mxu1  ;;  %4531 = vmatpush3.bf16.msra.mxu0 %v6112_v5  ;;  %5053 = vmatprep.subr.bf16.mxu1 %v5833_v0 }
 0x14d   : > { %v4330_v12 = vpop.f32.mrf.mxu0  ;;  %4532 = vmatprep.subr.bf16.mxu0 %v6115_v6  ;;  %5067 = vmatprep.mubr.msk.bf16.mxu1 %vm5834_vm0, %v5833_v0  ;;  %v5554_v10 = vld [vmem:[#allocation2 + $0xf0] sm:$0xff]  }
 0x14e   : > { %v4331_v14 = vadd.f32 %v4330_v12, %v4329_v8  ;;  %v1121_v15 = vpop.f32.mrf.mxu1  ;;  %3018 = vmatprep.mubr.bf16.mxu0 %v6073_v20 }
 0x14f   : > { %v4332_v16 = vpop.f32.mrf.mxu0  ;;  %5054 = vmatpush3.bf16.msra.mxu1 %v6120_v9 }
 0x150   : > { %v6135_v18 = vadd.f32 %v4331_v14, %v1118_v7  ;;  %v4930_v19 = vpop.f32.mrf.mxu1  ;;  %4533 = vmatpush3.bf16.msra.mxu0 %v6124_v11  ;;  %5055 = vmatprep.subr.bf16.mxu1 %v5833_v0  ;;  %v5555_v14 = vld [vmem:[#allocation2 + $0x128] sm:$0xff]  }
 0x151   : > { %v4333_v22 = vpop.f32.mrf.mxu0  ;;  %4534 = vmatprep.subr.bf16.mxu0 %v6127_v13  ;;  %v5556_v16 = vld [vmem:[#allocation2 + $0x168] sm:$0xff]  }
 0x152   : > { %v5557_v19 = vld [vmem:[#allocation2 + $0xe8] sm:$0xff]   ;;  %v5558_v22 = vld [vmem:[#allocation2 + $0x120] sm:$0xff]  }
 0x153   : > { %5056 = vmatpush3.bf16.msra.mxu1 %v6133_v17 }
 0x154   : > { %4535 = vmatpush3.bf16.msra.mxu0 %v6139_v21  ;;  %5057 = vmatprep.subr.bf16.mxu1 %v5833_v0 }
 0x155   : > { %4536 = vmatprep.subr.bf16.mxu0 %v6142_v23 }
 0x157   : > { %5058 = vmatpush3.bf16.msra.mxu1 %v6145_v24 }
 0x158   : > { %4537 = vmatpush3.bf16.msra.mxu0 %v6149_v26  ;;  %5059 = vmatprep.subr.bf16.mxu1 %v5833_v0 }
 0x159   : > { %4538 = vmatprep.subr.bf16.mxu0 %v6152_v27 }
 0x15b   : > { %5060 = vmatpush3.bf16.msra.mxu1 %v6155_v32 }
 0x15c   : > { %4539 = vmatpush3.bf16.msra.mxu0 %v6159_v33  ;;  %5061 = vmatprep.subr.bf16.mxu1 %v5833_v0 }
 0x15d   : > { %4540 = vmatprep.subr.bf16.mxu0 %v6162_v34 }
 0x15f   : > { %5062 = vmatpush3.bf16.msra.mxu1 %v6165_v35 }
 0x160   : > { %4541 = vmatpush3.bf16.msra.mxu0 %v6169_v36  ;;  %5063 = vmatprep.subr.bf16.mxu1 %v5833_v0 }
 0x161   : > { %4542 = vmatprep.subr.bf16.mxu0 %v6172_v37 }
 0x163   : > { %5064 = vmatpush3.bf16.msra.mxu1 %v6175_v38 }
 0x164   : > { %4543 = vmatpush3.bf16.msra.mxu0 %v6179_v41  ;;  %5065 = vmatprep.subr.bf16.mxu1 %v5833_v0 }
 0x165   : > { %4544 = vmatprep.subr.bf16.mxu0 %v6182_v42 }
 0x167   : > { %5066 = vmatpush3.bf16.msra.mxu1 %v6185_v44 }
 0x168   : > { %4545 = vmatpush3.bf16.msra.mxu0 %v6189_v45  ;;  %5071 = vmatprep.subr.bf16.mxu1 %v5833_v0 }
 0x169   : > { %4561 = vmatprep.subr.bf16.mxu0 %v5549_v46  ;;  %v5559_v46 = vld [vmem:[#allocation2 + $0x160] sm:$0xff]  }
 0x16a   : > { %v1342_v47 = vpop.f32.mrf.mxu1  ;;  %5068 = vmatmul.mubr.bf16.vlgmr.msra.gmra.mxu1 %v6103_v61 }
 0x16b   : > { %v4360_v48 = vpop.f32.mrf.mxu0  ;;  %3019 = vmatmul.mubr.bf16.vlgmr.msra.gmra.mxu0 %v6106_v3  ;;  %5072 = vmatpush3.bf16.msra.mxu1 %v5550_v49  ;;  %v5562_v49 = vld [vmem:[#allocation2 + $0x158] sm:$0xff]  }
 0x16c   : > { %v4949_v50 = vpop.f32.mrf.mxu1  ;;  %4562 = vmatpush3.bf16.msra.mxu0 %v5551_v51  ;;  %5073 = vmatprep.subr.bf16.mxu1 %v5833_v0  ;;  %v5565_v51 = vld [vmem:[#allocation2 + $0x150] sm:$0xff]  }
 0x16d   : > { %v4361_v52 = vpop.f32.mrf.mxu0  ;;  %4563 = vmatprep.subr.bf16.mxu0 %v5552_v53  ;;  %5087 = vmatprep.mubr.msk.bf16.mxu1 %vm5834_vm0, %v5833_v0  ;;  %v5564_v50 = vld [vmem:[#allocation2 + $0x110] sm:$0xff]   ;;  %v5567_v53 = vld [vmem:[#allocation2 + $0x108] sm:$0xff]  }
 0x16e   : > { %v4362_v54 = vadd.f32 %v4361_v52, %v4360_v48  ;;  %v1345_v56 = vpop.f32.mrf.mxu1  ;;  %3100 = vmatprep.mubr.bf16.mxu0 %v6001_v58  ;;  %v5561_v48 = vld [vmem:[#allocation2 + $0x118] sm:$0xff]   ;;  %v5566_v52 = vld [vmem:[#allocation2 + $0xd0] sm:$0xff]  }
 0x16f   : > { %v4363_v59 = vpop.f32.mrf.mxu0  ;;  %5074 = vmatpush3.bf16.msra.mxu1 %v5553_v63  ;;  %v5569_v56 = vld [vmem:[#allocation2 + $0xc8] sm:$0xff]   ;;  %v5571_v63 = vld [vmem:[#allocation2 + $0x140] sm:$0xff]  }
 0x170   : > { %v1303_v7 = vadd.f32 %v4362_v54, %v6135_v18  ;;  %v4950_v8 = vpop.f32.mrf.mxu1  ;;  %4564 = vmatpush3.bf16.msra.mxu0 %v5554_v10  ;;  %5075 = vmatprep.subr.bf16.mxu1 %v5833_v0  ;;  %v5560_v18 = vld [vmem:[#allocation2 + $0xe0] sm:$0xff]   ;;  %v5568_v54 = vld [vmem:[#allocation2 + $0x148] sm:$0xff]  }
 0x171   : > { %v4364_v12 = vpop.f32.mrf.mxu0  ;;  %4565 = vmatprep.subr.bf16.mxu0 %v5555_v14  ;;  %v5570_v59 = vld [vmem:[#allocation2 + $0x100] sm:$0xff]   ;;  %v5573_v8 = vld [vmem:[#allocation2 + $0x78] sm:$0xff]  }
 0x172   : > { %v6203_v15 = vadd.f32 %v1342_v47, %v1303_v7  ;;  %v5563_v47 = vld [vmem:[#allocation2 + $0xd8] sm:$0xff]   ;;  %v5572_v7 = vld [vmem:[#allocation2 + $0xc0] sm:$0xff]  }
 0x173   : > { %5076 = vmatpush3.bf16.msra.mxu1 %v5556_v16  ;;  %v5574_v14 = vld [vmem:[#allocation2 + $0xb8] sm:$0xff]  }
 0x174   : > { %4566 = vmatpush3.bf16.msra.mxu0 %v5557_v19  ;;  %5077 = vmatprep.subr.bf16.mxu1 %v5833_v0  ;;  %v5575_v19 = vld [vmem:[#allocation2 + $0x38] sm:$0xff]  }
 0x175   : > { %4567 = vmatprep.subr.bf16.mxu0 %v5558_v22 }
 0x177   : > { %5078 = vmatpush3.bf16.msra.mxu1 %v5559_v46  ;;  %v5576_v46 = vld [vmem:[#allocation2 + $0x70] sm:$0xff]  }
 0x178   : > { %4568 = vmatpush3.bf16.msra.mxu0 %v5560_v18  ;;  %5079 = vmatprep.subr.bf16.mxu1 %v5833_v0 }
 0x179   : > { %4569 = vmatprep.subr.bf16.mxu0 %v5561_v48 }
 0x17b   : > { %5080 = vmatpush3.bf16.msra.mxu1 %v5562_v49 }
 0x17c   : > { %4570 = vmatpush3.bf16.msra.mxu0 %v5563_v47  ;;  %5081 = vmatprep.subr.bf16.mxu1 %v5833_v0  ;;  %v5577_v47 = vld [vmem:[#allocation2 + $0xb0] sm:$0xff]  }
 0x17d   : > { %4571 = vmatprep.subr.bf16.mxu0 %v5564_v50 }
 0x17f   : > { %5082 = vmatpush3.bf16.msra.mxu1 %v5565_v51 }
 0x180   : > { %4572 = vmatpush3.bf16.msra.mxu0 %v5566_v52  ;;  %5083 = vmatprep.subr.bf16.mxu1 %v5833_v0  ;;  %v5578_v52 = vld [vmem:[#allocation2 + $0x30] sm:$0xff]  }
 0x181   : > { %4573 = vmatprep.subr.bf16.mxu0 %v5567_v53 }
 0x183   : > { %5084 = vmatpush3.bf16.msra.mxu1 %v5568_v54  ;;  %v5579_v54 = vld [vmem:[#allocation2 + $0x68] sm:$0xff]  }
 0x184   : > { %4574 = vmatpush3.bf16.msra.mxu0 %v5569_v56  ;;  %5085 = vmatprep.subr.bf16.mxu1 %v5833_v0 }
 0x185   : > { %4575 = vmatprep.subr.bf16.mxu0 %v5570_v59  ;;  %v5580_v59 = vld [vmem:[#allocation2 + $0xa8] sm:$0xff]  }
 0x187   : > { %5086 = vmatpush3.bf16.msra.mxu1 %v5571_v63  ;;  %v5581_v63 = vld [vmem:[#allocation2 + $0x28] sm:$0xff]  }
 0x188   : > { %4576 = vmatpush3.bf16.msra.mxu0 %v5572_v7  ;;  %5091 = vmatprep.subr.bf16.mxu1 %v5833_v0  ;;  %v5582_v7 = vld [vmem:[#allocation2 + $0x60] sm:$0xff]  }
 0x189   : > { %4592 = vmatprep.subr.bf16.mxu0 %v5573_v8  ;;  %v5583_v8 = vld [vmem:[#allocation2 + $0xa0] sm:$0xff]  }
 0x18a   : > { %v1645_v10 = vpop.f32.mrf.mxu1  ;;  %5088 = vmatmul.mubr.bf16.vlgmr.msra.gmra.mxu1 %v6016_v28 }
 0x18b   : > { %v4391_v12 = vpop.f32.mrf.mxu0  ;;  %3101 = vmatmul.mubr.bf16.vlgmr.msra.gmra.mxu0 %v6018_v29  ;;  %5092 = vmatpush3.bf16.msra.mxu1 %v5574_v14  ;;  %v5586_v14 = vld [vmem:[#allocation2 + $0x98] sm:$0xff]  }
 0x18c   : > { %v4969_v16 = vpop.f32.mrf.mxu1  ;;  %4593 = vmatpush3.bf16.msra.mxu0 %v5575_v19  ;;  %5093 = vmatprep.subr.bf16.mxu1 %v5833_v0  ;;  %v5589_v19 = vld [vmem:[#allocation2 + $0x90] sm:$0xff]  }
 0x18d   : > { %v4392_v22 = vpop.f32.mrf.mxu0  ;;  %4594 = vmatprep.subr.bf16.mxu0 %v5576_v46  ;;  %5107 = vmatprep.mubr.msk.bf16.mxu1 %vm5834_vm0, %v5833_v0  ;;  %v5588_v16 = vld [vmem:[#allocation2 + $0x50] sm:$0xff]   ;;  %v5591_v46 = vld [vmem:[#allocation2 + $0x48] sm:$0xff]  }
 0x18e   : > { %v4393_v18 = vadd.f32 %v4392_v22, %v4391_v12  ;;  %v1648_v48 = vpop.f32.mrf.mxu1  ;;  %3180 = vmatprep.mubr.bf16.mxu0 %v5933_v25  ;;  %v5585_v12 = vld [vmem:[#allocation2 + $0x58] sm:$0xff]   ;;  %v5590_v22 = vld [vmem:[#allocation2 + $0x10] sm:$0xff]  }
 0x18f   : > { %v4394_v49 = vpop.f32.mrf.mxu0  ;;  %5094 = vmatpush3.bf16.msra.mxu1 %v5577_v47  ;;  %v5593_v48 = vld [vmem:[#allocation2 + $0x8] sm:$0xff]   ;;  %v5595_v47 = vld [vmem:[#allocation2 + $0x80] sm:$0xff]  }
 0x190   : > { %v1646_v50 = vadd.f32 %v4393_v18, %v1645_v10  ;;  %v4970_v51 = vpop.f32.mrf.mxu1  ;;  %4595 = vmatpush3.bf16.msra.mxu0 %v5578_v52  ;;  %5095 = vmatprep.subr.bf16.mxu1 %v5833_v0  ;;  %v5584_v10 = vld [vmem:[#allocation2 + $0x20] sm:$0xff]   ;;  %v5592_v18 = vld [vmem:[#allocation2 + $0x88] sm:$0xff]  }
 0x191   : > { %v4395_v53 = vpop.f32.mrf.mxu0  ;;  %4596 = vmatprep.subr.bf16.mxu0 %v5579_v54  ;;  %v5594_v49 = vld [vmem:[#allocation2 + $0x40] sm:$0xff]   ;;  %v5597_v51 = vld [vmem:[#allocation2 + $0x4f8] sm:$0xff]  }
 0x192   : > { %v6219_v56 = vadd.f32 %v1646_v50, %v6082_v43  ;;  %v5587_v43 = vld [vmem:[#allocation2 + $0x18] sm:$0xff]   ;;  %v5596_v50 = vld [vmem:[#allocation2] sm:$0xff]  }
 0x193   : > { %5096 = vmatpush3.bf16.msra.mxu1 %v5580_v59  ;;  %v5598_v54 = vld [vmem:[#allocation2 + $0x538] sm:$0xff]  }
 0x194   : > { %4597 = vmatpush3.bf16.msra.mxu0 %v5581_v63  ;;  %5097 = vmatprep.subr.bf16.mxu1 %v5833_v0  ;;  %v5599_v63 = vld [vmem:[#allocation2 + $0x4b8] sm:$0xff]  }
 0x195   : > { %4598 = vmatprep.subr.bf16.mxu0 %v5582_v7 }
 0x197   : > { %5098 = vmatpush3.bf16.msra.mxu1 %v5583_v8  ;;  %v5600_v8 = vld [vmem:[#allocation2 + $0x4f0] sm:$0xff]  }
 0x198   : > { %4599 = vmatpush3.bf16.msra.mxu0 %v5584_v10  ;;  %5099 = vmatprep.subr.bf16.mxu1 %v5833_v0 }
 0x199   : > { %4600 = vmatprep.subr.bf16.mxu0 %v5585_v12 }
 0x19b   : > { %5100 = vmatpush3.bf16.msra.mxu1 %v5586_v14 }
 0x19c   : > { %4601 = vmatpush3.bf16.msra.mxu0 %v5587_v43  ;;  %5101 = vmatprep.subr.bf16.mxu1 %v5833_v0  ;;  %v5601_v43 = vld [vmem:[#allocation2 + $0x530] sm:$0xff]  }
 0x19d   : > { %4602 = vmatprep.subr.bf16.mxu0 %v5588_v16 }
 0x19f   : > { %5102 = vmatpush3.bf16.msra.mxu1 %v5589_v19 }
 0x1a0   : > { %4603 = vmatpush3.bf16.msra.mxu0 %v5590_v22  ;;  %5103 = vmatprep.subr.bf16.mxu1 %v5833_v0  ;;  %v5602_v22 = vld [vmem:[#allocation2 + $0x4b0] sm:$0xff]  }
 0x1a1   : > { %4604 = vmatprep.subr.bf16.mxu0 %v5591_v46 }
 0x1a3   : > { %5104 = vmatpush3.bf16.msra.mxu1 %v5592_v18  ;;  %v5603_v18 = vld [vmem:[#allocation2 + $0x4e8] sm:$0xff]  }
 0x1a4   : > { %4605 = vmatpush3.bf16.msra.mxu0 %v5593_v48  ;;  %5105 = vmatprep.subr.bf16.mxu1 %v5833_v0 }
 0x1a5   : > { %4606 = vmatprep.subr.bf16.mxu0 %v5594_v49  ;;  %v5604_v49 = vld [vmem:[#allocation2 + $0x528] sm:$0xff]  }
 0x1a7   : > { %5106 = vmatpush3.bf16.msra.mxu1 %v5595_v47  ;;  %v5605_v47 = vld [vmem:[#allocation2 + $0x4a8] sm:$0xff]  }
 0x1a8   : > { %4607 = vmatpush3.bf16.msra.mxu0 %v5596_v50  ;;  %5111 = vmatprep.subr.bf16.mxu1 %v5833_v0  ;;  %v5607_v50 = vld [vmem:[#allocation2 + $0x520] sm:$0xff]  }
 0x1a9   : > { %4623 = vmatprep.subr.bf16.mxu0 %v5597_v51  ;;  %v5608_v51 = vld [vmem:[#allocation2 + $0x4a0] sm:$0xff]  }
 0x1aa   : > { %v1919_v52 = vpop.f32.mrf.mxu1  ;;  %5108 = vmatmul.mubr.bf16.vlgmr.msra.gmra.mxu1 %v5939_v30 }
 0x1ab   : > { %v4422_v53 = vpop.f32.mrf.mxu0  ;;  %3181 = vmatmul.mubr.bf16.vlgmr.msra.gmra.mxu0 %v5941_v31  ;;  %5112 = vmatpush3.bf16.msra.mxu1 %v5598_v54  ;;  %v5612_v54 = vld [vmem:[#allocation2 + $0x4d0] sm:$0xff]  }
 0x1ac   : > { %v4989_v59 = vpop.f32.mrf.mxu1  ;;  %4624 = vmatpush3.bf16.msra.mxu0 %v5599_v63  ;;  %5113 = vmatprep.subr.bf16.mxu1 %v5833_v0  ;;  %v5614_v63 = vld [vmem:[#allocation2 + $0x490] sm:$0xff]  }
 0x1ad   : > { %v4423_v7 = vpop.f32.mrf.mxu0  ;;  %4625 = vmatprep.subr.bf16.mxu0 %v5600_v8  ;;  %5127 = vmatprep.mubr.msk.bf16.mxu1 %vm5834_vm0, %v5833_v0  ;;  %v5613_v59 = vld [vmem:[#allocation2 + $0x510] sm:$0xff]   ;;  %v5616_v8 = vld [vmem:[#allocation2 + $0x508] sm:$0xff]  }
 0x1ae   : > { %v4424_v10 = vadd.f32 %v4423_v7, %v4422_v53  ;;  %v1922_v12 = vpop.f32.mrf.mxu1  ;;  %3260 = vmatprep.mubr.bf16.mxu0 %v6001_v58  ;;  %v5606_v58 = vld [vmem:[#allocation2 + $0x4e0] sm:$0xff]   ;;  %v5610_v53 = vld [vmem:[#allocation2 + $0x518] sm:$0xff]   ;;  %v5615_v7 = vld [vmem:[#allocation2 + $0x4c8] sm:$0xff]  }
 0x1af   : > { %v4425_v14 = vpop.f32.mrf.mxu0  ;;  %5114 = vmatpush3.bf16.msra.mxu1 %v5601_v43  ;;  %v5618_v12 = vld [vmem:[#allocation2 + $0x4c0] sm:$0xff]  }
 0x1b0   : > { %v1920_v16 = vadd.f32 %v4424_v10, %v1919_v52  ;;  %v4990_v19 = vpop.f32.mrf.mxu1  ;;  %4626 = vmatpush3.bf16.msra.mxu0 %v5602_v22  ;;  %5115 = vmatprep.subr.bf16.mxu1 %v5833_v0  ;;  %v5609_v52 = vld [vmem:[#allocation2 + $0x4d8] sm:$0xff]   ;;  %v5617_v10 = vld [vmem:[#allocation2 + $0x488] sm:$0xff]   ;;  %v5619_v14 = vld [vmem:[#allocation2 + $0x500] sm:$0xff]  }
 0x1b1   : > { %v4426_v46 = vpop.f32.mrf.mxu0  ;;  %4627 = vmatprep.subr.bf16.mxu0 %v5603_v18  ;;  %v5620_v43 = vld [vmem:[#allocation2 + $0x480] sm:$0xff]  }
 0x1b2   : > { %v6235_v48 = vadd.f32 %v1920_v16, %v6203_v15  ;;  %v5611_v15 = vld [vmem:[#allocation2 + $0x498] sm:$0xff]  }
 0x1b3   : > { %5116 = vmatpush3.bf16.msra.mxu1 %v5604_v49  ;;  %v5621_v16 = vld [vmem:[#allocation2 + $0x438] sm:$0xff]  }
 0x1b4   : > { %4628 = vmatpush3.bf16.msra.mxu0 %v5605_v47  ;;  %5117 = vmatprep.subr.bf16.mxu1 %v5833_v0  ;;  %v5622_v46 = vld [vmem:[#allocation2 + $0x478] sm:$0xff]  }
 0x1b5   : > { %4629 = vmatprep.subr.bf16.mxu0 %v5606_v58  ;;  %v5623_v49 = vld [vmem:[#allocation2 + $0x3f8] sm:$0xff]   ;;  %v5624_v58 = vld [vmem:[#allocation2 + $0x430] sm:$0xff]  }
 0x1b7   : > { %5118 = vmatpush3.bf16.msra.mxu1 %v5607_v50 }
 0x1b8   : > { %4630 = vmatpush3.bf16.msra.mxu0 %v5608_v51  ;;  %5119 = vmatprep.subr.bf16.mxu1 %v5833_v0 }
 0x1b9   : > { %4631 = vmatprep.subr.bf16.mxu0 %v5609_v52  ;;  %v5625_v52 = vld [vmem:[#allocation2 + $0x470] sm:$0xff]  }
 0x1bb   : > { %5120 = vmatpush3.bf16.msra.mxu1 %v5610_v53 }
 0x1bc   : > { %4632 = vmatpush3.bf16.msra.mxu0 %v5611_v15  ;;  %5121 = vmatprep.subr.bf16.mxu1 %v5833_v0  ;;  %v5626_v15 = vld [vmem:[#allocation2 + $0x3f0] sm:$0xff]  }
 0x1bd   : > { %4633 = vmatprep.subr.bf16.mxu0 %v5612_v54 }
 0x1bf   : > { %5122 = vmatpush3.bf16.msra.mxu1 %v5613_v59  ;;  %v5627_v59 = vld [vmem:[#allocation2 + $0x428] sm:$0xff]  }
 0x1c0   : > { %4634 = vmatpush3.bf16.msra.mxu0 %v5614_v63  ;;  %5123 = vmatprep.subr.bf16.mxu1 %v5833_v0 }
 0x1c1   : > { %4635 = vmatprep.subr.bf16.mxu0 %v5615_v7  ;;  %v5628_v7 = vld [vmem:[#allocation2 + $0x468] sm:$0xff]  }
 0x1c3   : > { %5124 = vmatpush3.bf16.msra.mxu1 %v5616_v8  ;;  %v5629_v8 = vld [vmem:[#allocation2 + $0x3e8] sm:$0xff]  }
 0x1c4   : > { %4636 = vmatpush3.bf16.msra.mxu0 %v5617_v10  ;;  %5125 = vmatprep.subr.bf16.mxu1 %v5833_v0  ;;  %v5631_v10 = vld [vmem:[#allocation2 + $0x460] sm:$0xff]  }
 0x1c5   : > { %4637 = vmatprep.subr.bf16.mxu0 %v5618_v12  ;;  %v5632_v12 = vld [vmem:[#allocation2 + $0x3e0] sm:$0xff]  }
 0x1c7   : > { %5126 = vmatpush3.bf16.msra.mxu1 %v5619_v14  ;;  %v5633_v14 = vld [vmem:[#allocation2 + $0x418] sm:$0xff]  }
 0x1c8   : > { %4638 = vmatpush3.bf16.msra.mxu0 %v5620_v43  ;;  %5131 = vmatprep.subr.bf16.mxu1 %v5833_v0  ;;  %v5634_v43 = vld [vmem:[#allocation2 + $0x458] sm:$0xff]  }
 0x1c9   : > { %4654 = vmatprep.subr.bf16.mxu0 %v5621_v16  ;;  %v5636_v16 = vld [vmem:[#allocation2 + $0x410] sm:$0xff]  }
 0x1ca   : > { %v2223_v19 = vpop.f32.mrf.mxu1  ;;  %5128 = vmatmul.mubr.bf16.vlgmr.msra.gmra.mxu1 %v6016_v28 }
 0x1cb   : > { %v4453_v22 = vpop.f32.mrf.mxu0  ;;  %3261 = vmatmul.mubr.bf16.vlgmr.msra.gmra.mxu0 %v6018_v29  ;;  %5132 = vmatpush3.bf16.msra.mxu1 %v5622_v46  ;;  %v5639_v46 = vld [vmem:[#allocation2 + $0x408] sm:$0xff]  }
 0x1cc   : > { %v5009_v18 = vpop.f32.mrf.mxu1  ;;  %4655 = vmatpush3.bf16.msra.mxu0 %v5623_v49  ;;  %5133 = vmatprep.subr.bf16.mxu1 %v5833_v0  ;;  %v5641_v49 = vld [vmem:[#allocation2 + $0x3c8] sm:$0xff]  }
 0x1cd   : > { %v4454_v47 = vpop.f32.mrf.mxu0  ;;  %4656 = vmatprep.subr.bf16.mxu0 %v5624_v58  ;;  %5147 = vmatprep.mubr.msk.bf16.mxu1 %vm5834_vm0, %v5833_v0  ;;  %v5640_v18 = vld [vmem:[#allocation2 + $0x448] sm:$0xff]   ;;  %v5643_v58 = vld [vmem:[#allocation2 + $0x440] sm:$0xff]  }
 0x1ce   : > { %v4455_v50 = vadd.f32 %v4454_v47, %v4453_v22  ;;  %v2226_v51 = vpop.f32.mrf.mxu1  ;;  %3340 = vmatprep.mubr.bf16.mxu0 %v5933_v25  ;;  %v5630_v25 = vld [vmem:[#allocation2 + $0x420] sm:$0xff]   ;;  %v5638_v22 = vld [vmem:[#allocation2 + $0x3d0] sm:$0xff]  }
 0x1cf   : > { %v4456_v28 = vpop.f32.mrf.mxu0  ;;  %5134 = vmatpush3.bf16.msra.mxu1 %v5625_v52  ;;  %v5642_v47 = vld [vmem:[#allocation2 + $0x400] sm:$0xff]   ;;  %v5645_v51 = vld [vmem:[#allocation2 + $0x1f8] sm:$0xff]  }
 0x1d0   : > { %v2224_v29 = vadd.f32 %v4455_v50, %v2223_v19  ;;  %v5010_v53 = vpop.f32.mrf.mxu1  ;;  %4657 = vmatpush3.bf16.msra.mxu0 %v5626_v15  ;;  %5135 = vmatprep.subr.bf16.mxu1 %v5833_v0  ;;  %v5637_v19 = vld [vmem:[#allocation2 + $0x450] sm:$0xff]   ;;  %v5644_v50 = vld [vmem:[#allocation2 + $0x3c0] sm:$0xff]   ;;  %v5647_v15 = vld [vmem:[#allocation2 + $0x1b8] sm:$0xff]  }
 0x1d1   : > { %v4457_v54 = vpop.f32.mrf.mxu0  ;;  %4658 = vmatprep.subr.bf16.mxu0 %v5627_v59  ;;  %v5648_v59 = vld [vmem:[#allocation2 + $0x1f0] sm:$0xff]  }
 0x1d2   : > { %v6251_v63 = vadd.f32 %v2224_v29, %v6219_v56  ;;  %v5635_v56 = vld [vmem:[#allocation2 + $0x3d8] sm:$0xff]  }
 0x1d3   : > { %5136 = vmatpush3.bf16.msra.mxu1 %v5628_v7  ;;  %v5646_v29 = vld [vmem:[#allocation2 + $0x238] sm:$0xff]  }
 0x1d4   : > { %4659 = vmatpush3.bf16.msra.mxu0 %v5629_v8  ;;  %5137 = vmatprep.subr.bf16.mxu1 %v5833_v0 }
 0x1d5   : > { %4660 = vmatprep.subr.bf16.mxu0 %v5630_v25  ;;  %v5649_v25 = vld [vmem:[#allocation2 + $0x230] sm:$0xff]  }
 0x1d7   : > { %5138 = vmatpush3.bf16.msra.mxu1 %v5631_v10 }
 0x1d8   : > { %4661 = vmatpush3.bf16.msra.mxu0 %v5632_v12  ;;  %5139 = vmatprep.subr.bf16.mxu1 %v5833_v0  ;;  %v5650_v12 = vld [vmem:[#allocation2 + $0x1b0] sm:$0xff]  }
 0x1d9   : > { %4662 = vmatprep.subr.bf16.mxu0 %v5633_v14 }
 0x1db   : > { %5140 = vmatpush3.bf16.msra.mxu1 %v5634_v43  ;;  %v5651_v43 = vld [vmem:[#allocation2 + $0x1e8] sm:$0xff]  }
 0x1dc   : > { %4663 = vmatpush3.bf16.msra.mxu0 %v5635_v56  ;;  %5141 = vmatprep.subr.bf16.mxu1 %v5833_v0 }
 0x1dd   : > { %4664 = vmatprep.subr.bf16.mxu0 %v5636_v16  ;;  %v5652_v16 = vld [vmem:[#allocation2 + $0x228] sm:$0xff]  }
 0x1df   : > { %5142 = vmatpush3.bf16.msra.mxu1 %v5637_v19  ;;  %v5653_v19 = vld [vmem:[#allocation2 + $0x1a8] sm:$0xff]  }
 0x1e0   : > { %4665 = vmatpush3.bf16.msra.mxu0 %v5638_v22  ;;  %5143 = vmatprep.subr.bf16.mxu1 %v5833_v0  ;;  %v5654_v22 = vld [vmem:[#allocation2 + $0x1e0] sm:$0xff]  }
 0x1e1   : > { %4666 = vmatprep.subr.bf16.mxu0 %v5639_v46  ;;  %v5655_v46 = vld [vmem:[#allocation2 + $0x220] sm:$0xff]  }
 0x1e3   : > { %5144 = vmatpush3.bf16.msra.mxu1 %v5640_v18  ;;  %v5656_v18 = vld [vmem:[#allocation2 + $0x1a0] sm:$0xff]  }
 0x1e4   : > { %4667 = vmatpush3.bf16.msra.mxu0 %v5641_v49  ;;  %5145 = vmatprep.subr.bf16.mxu1 %v5833_v0  ;;  %v5657_v49 = vld [vmem:[#allocation2 + $0x1d8] sm:$0xff]  }
 0x1e5   : > { %4668 = vmatprep.subr.bf16.mxu0 %v5642_v47  ;;  %v5658_v47 = vld [vmem:[#allocation2 + $0x218] sm:$0xff]  }
 0x1e7   : > { %5146 = vmatpush3.bf16.msra.mxu1 %v5643_v58  ;;  %v5660_v58 = vld [vmem:[#allocation2 + $0x1d0] sm:$0xff]  }
 0x1e8   : > { %4669 = vmatpush3.bf16.msra.mxu0 %v5644_v50  ;;  %5151 = vmatprep.subr.bf16.mxu1 %v5833_v0  ;;  %v5661_v50 = vld [vmem:[#allocation2 + $0x210] sm:$0xff]  }
 0x1e9   : > { %4685 = vmatprep.subr.bf16.mxu0 %v5645_v51  ;;  %v5662_v51 = vld [vmem:[#allocation2 + $0x190] sm:$0xff]  }
 0x1ea   : > { %v2497_v28 = vpop.f32.mrf.mxu1  ;;  %5148 = vmatmul.mubr.bf16.vlgmr.msra.gmra.mxu1 %v5939_v30 }
 0x1eb   : > { %v4484_v52 = vpop.f32.mrf.mxu0  ;;  %3341 = vmatmul.mubr.bf16.vlgmr.msra.gmra.mxu0 %v5941_v31  ;;  %5152 = vmatpush3.bf16.msra.mxu1 %v5646_v29  ;;  %v5665_v29 = vld [vmem:[#allocation2 + $0x188] sm:$0xff]  }
 0x1ec   : > { %v5029_v53 = vpop.f32.mrf.mxu1  ;;  %4686 = vmatpush3.bf16.msra.mxu0 %v5647_v15  ;;  %5153 = vmatprep.subr.bf16.mxu1 %v5833_v0  ;;  %v5667_v15 = vld [vmem:[#allocation2 + $0x200] sm:$0xff]  }
 0x1ed   : > { %v4485_v54 = vpop.f32.mrf.mxu0  ;;  %4687 = vmatprep.subr.bf16.mxu0 %v5648_v59  ;;  %5167 = vmatprep.mubr.msk.bf16.mxu1 %vm5834_vm0, %v5833_v0  ;;  %v5666_v53 = vld [vmem:[#allocation2 + $0x1c0] sm:$0xff]   ;;  %v5669_v59 = vld [vmem:[#allocation2 + $0x5b8] sm:$0xff]  }
 0x1ee   : > { %v4486_v7 = vadd.f32 %v4485_v54, %v4484_v52  ;;  %v2500_v8 = vpop.f32.mrf.mxu1  ;;  %3420 = vmatprep.mubr.bf16.mxu0 %v6036_v2  ;;  %v5664_v52 = vld [vmem:[#allocation2 + $0x208] sm:$0xff]   ;;  %v5668_v54 = vld [vmem:[#allocation2 + $0x180] sm:$0xff]  }
 0x1ef   : > { %v4487_v30 = vpop.f32.mrf.mxu0  ;;  %5154 = vmatpush3.bf16.msra.mxu1 %v5649_v25 }
 0x1f0   : > { %v2498_v31 = vadd.f32 %v4486_v7, %v2497_v28  ;;  %v5030_v10 = vpop.f32.mrf.mxu1  ;;  %4688 = vmatpush3.bf16.msra.mxu0 %v5650_v12  ;;  %5155 = vmatprep.subr.bf16.mxu1 %v5833_v0  ;;  %v5663_v28 = vld [vmem:[#allocation2 + $0x1c8] sm:$0xff]   ;;  %v5670_v30 = vld [vmem:[#allocation2 + $0x5f8] sm:$0xff]   ;;  %v5672_v12 = vld [vmem:[#allocation2 + $0x5b0] sm:$0xff]  }
 0x1f1   : > { %v4488_v14 = vpop.f32.mrf.mxu0  ;;  %4689 = vmatprep.subr.bf16.mxu0 %v5651_v43 }
 0x1f2   : > { %v6267_v56 = vadd.f32 %v2498_v31, %v6235_v48  ;;  %v5659_v48 = vld [vmem:[#allocation2 + $0x198] sm:$0xff]  }
 0x1f3   : > { %5156 = vmatpush3.bf16.msra.mxu1 %v5652_v16  ;;  %v5671_v31 = vld [vmem:[#allocation2 + $0x578] sm:$0xff]  }
 0x1f4   : > { %4690 = vmatpush3.bf16.msra.mxu0 %v5653_v19  ;;  %5157 = vmatprep.subr.bf16.mxu1 %v5833_v0  ;;  %v5673_v19 = vld [vmem:[#allocation2 + $0x5f0] sm:$0xff]  }
 0x1f5   : > { %4691 = vmatprep.subr.bf16.mxu0 %v5654_v22 }
 0x1f7   : > { %5158 = vmatpush3.bf16.msra.mxu1 %v5655_v46 }
 0x1f8   : > { %4692 = vmatpush3.bf16.msra.mxu0 %v5656_v18  ;;  %5159 = vmatprep.subr.bf16.mxu1 %v5833_v0  ;;  %v5674_v18 = vld [vmem:[#allocation2 + $0x570] sm:$0xff]  }
 0x1f9   : > { %4693 = vmatprep.subr.bf16.mxu0 %v5657_v49 }
 0x1fb   : > { %5160 = vmatpush3.bf16.msra.mxu1 %v5658_v47  ;;  %v5675_v47 = vld [vmem:[#allocation2 + $0x5a8] sm:$0xff]  }
 0x1fc   : > { %4694 = vmatpush3.bf16.msra.mxu0 %v5659_v48  ;;  %5161 = vmatprep.subr.bf16.mxu1 %v5833_v0 }
 0x1fd   : > { %4695 = vmatprep.subr.bf16.mxu0 %v5660_v58  ;;  %v5676_v58 = vld [vmem:[#allocation2 + $0x5e8] sm:$0xff]  }
 0x1ff   : > { %5162 = vmatpush3.bf16.msra.mxu1 %v5661_v50  ;;  %v5677_v50 = vld [vmem:[#allocation2 + $0x568] sm:$0xff]  }
 0x200   : > { %4696 = vmatpush3.bf16.msra.mxu0 %v5662_v51  ;;  %5163 = vmatprep.subr.bf16.mxu1 %v5833_v0  ;;  %v5679_v51 = vld [vmem:[#allocation2 + $0x5e0] sm:$0xff]  }
 0x201   : > { %4697 = vmatprep.subr.bf16.mxu0 %v5663_v28  ;;  %v5680_v28 = vld [vmem:[#allocation2 + $0x560] sm:$0xff]  }
 0x203   : > { %5164 = vmatpush3.bf16.msra.mxu1 %v5664_v52  ;;  %v5681_v52 = vld [vmem:[#allocation2 + $0x598] sm:$0xff]  }
 0x204   : > { %4698 = vmatpush3.bf16.msra.mxu0 %v5665_v29  ;;  %5165 = vmatprep.subr.bf16.mxu1 %v5833_v0  ;;  %v5682_v29 = vld [vmem:[#allocation2 + $0x5d8] sm:$0xff]  }
 0x205   : > { %4699 = vmatprep.subr.bf16.mxu0 %v5666_v53  ;;  %v5684_v53 = vld [vmem:[#allocation2 + $0x590] sm:$0xff]  }
 0x207   : > { %5166 = vmatpush3.bf16.msra.mxu1 %v5667_v15  ;;  %v5685_v15 = vld [vmem:[#allocation2 + $0x5d0] sm:$0xff]  }
 0x208   : > { %4700 = vmatpush3.bf16.msra.mxu0 %v5668_v54  ;;  %5171 = vmatprep.subr.bf16.mxu1 %v5833_v0  ;;  %v5686_v54 = vld [vmem:[#allocation2 + $0x550] sm:$0xff]  }
 0x209   : > { %4716 = vmatprep.subr.bf16.mxu0 %v5669_v59  ;;  %v5687_v59 = vld [vmem:[#allocation2 + $0x588] sm:$0xff]  }
 0x20a   : > { %v2786_v7 = vpop.f32.mrf.mxu1  ;;  %5168 = vmatmul.mubr.bf16.vlgmr.msra.gmra.mxu1 %v6051_v39 }
 0x20b   : > { %v4515_v8 = vpop.f32.mrf.mxu0  ;;  %3421 = vmatmul.mubr.bf16.vlgmr.msra.gmra.mxu0 %v6053_v40  ;;  %5172 = vmatpush3.bf16.msra.mxu1 %v5670_v30  ;;  %v5690_v30 = vld [vmem:[#allocation2 + $0x580] sm:$0xff]  }
 0x20c   : > { %v5049_v25 = vpop.f32.mrf.mxu1  ;;  %4717 = vmatpush3.bf16.msra.mxu0 %v5671_v31  ;;  %5173 = vmatprep.subr.bf16.mxu1 %v5833_v0  ;;  %v5692_v31 = vld [vmem:[#allocation2 + $0x540] sm:$0xff]  }
 0x20d   : > { %v4516_v10 = vpop.f32.mrf.mxu0  ;;  %4718 = vmatprep.subr.bf16.mxu0 %v5672_v12  ;;  %5187 = vmatprep.mubr.msk.bf16.mxu1 %vm5834_vm0, %v5833_v0  ;;  %v5691_v25 = vld [vmem:[#allocation2 + $0x5c0] sm:$0xff]  }
 0x20e   : > { %v4517_v14 = vadd.f32 %v4516_v10, %v4515_v8  ;;  %v2789_v43 = vpop.f32.mrf.mxu1  ;;  %3501 = vmatprep.mubr.bf16.mxu0 %v6036_v2  ;;  %v5678_v2 = vld [vmem:[#allocation2 + $0x5a0] sm:$0xff]   ;;  %v5689_v8 = vld [vmem:[#allocation2 + $0x548] sm:$0xff]   ;;  %v5693_v10 = vld [vmem:[#allocation2 + $0x2b8] sm:$0xff]  }
 0x20f   : > { %v4518_v16 = vpop.f32.mrf.mxu0  ;;  %5174 = vmatpush3.bf16.msra.mxu1 %v5673_v19  ;;  %v5694_v43 = vld [vmem:[#allocation2 + $0x2f8] sm:$0xff]  }
 0x210   : > { %v2787_v22 = vadd.f32 %v4517_v14, %v2786_v7  ;;  %v5050_v46 = vpop.f32.mrf.mxu1  ;;  %4719 = vmatpush3.bf16.msra.mxu0 %v5674_v18  ;;  %5175 = vmatprep.subr.bf16.mxu1 %v5833_v0  ;;  %v5688_v7 = vld [vmem:[#allocation2 + $0x5c8] sm:$0xff]   ;;  %v5695_v19 = vld [vmem:[#allocation2 + $0x278] sm:$0xff]  }
 0x211   : > { %v4519_v49 = vpop.f32.mrf.mxu0  ;;  %4720 = vmatprep.subr.bf16.mxu0 %v5675_v47  ;;  %v5696_v46 = vld [vmem:[#allocation2 + $0x2b0] sm:$0xff]  }
 0x212   : > { %v6283_v48 = vadd.f32 %v2787_v22, %v6251_v63  ;;  %v5683_v63 = vld [vmem:[#allocation2 + $0x558] sm:$0xff]   ;;  %v5697_v47 = vld [vmem:[#allocation2 + $0x2f0] sm:$0xff]  }
 0x213   : > { %5176 = vmatpush3.bf16.msra.mxu1 %v5676_v58 }
 0x214   : > { %4721 = vmatpush3.bf16.msra.mxu0 %v5677_v50  ;;  %5177 = vmatprep.subr.bf16.mxu1 %v5833_v0  ;;  %v5698_v50 = vld [vmem:[#allocation2 + $0x270] sm:$0xff]  }
 0x215   : > { %4722 = vmatprep.subr.bf16.mxu0 %v5678_v2 }
 0x217   : > { %5178 = vmatpush3.bf16.msra.mxu1 %v5679_v51  ;;  %v5699_v51 = vld [vmem:[#allocation2 + $0x2a8] sm:$0xff]  }
 0x218   : > { %4723 = vmatpush3.bf16.msra.mxu0 %v5680_v28  ;;  %5179 = vmatprep.subr.bf16.mxu1 %v5833_v0 }
 0x219   : > { %4724 = vmatprep.subr.bf16.mxu0 %v5681_v52  ;;  %v5700_v52 = vld [vmem:[#allocation2 + $0x2e8] sm:$0xff]  }
 0x21b   : > { %5180 = vmatpush3.bf16.msra.mxu1 %v5682_v29 }
 0x21c   : > { %4725 = vmatpush3.bf16.msra.mxu0 %v5683_v63  ;;  %5181 = vmatprep.subr.bf16.mxu1 %v5833_v0  ;;  %v5701_v63 = vld [vmem:[#allocation2 + $0x268] sm:$0xff]  }
 0x21d   : > { %4726 = vmatprep.subr.bf16.mxu0 %v5684_v53  ;;  %v5702_v53 = vld [vmem:[#allocation2 + $0x2a0] sm:$0xff]  }
 0x21f   : > { %5182 = vmatpush3.bf16.msra.mxu1 %v5685_v15  ;;  %v5703_v15 = vld [vmem:[#allocation2 + $0x2e0] sm:$0xff]  }
 0x220   : > { %4727 = vmatpush3.bf16.msra.mxu0 %v5686_v54  ;;  %5183 = vmatprep.subr.bf16.mxu1 %v5833_v0  ;;  %v5704_v54 = vld [vmem:[#allocation2 + $0x260] sm:$0xff]  }
 0x221   : > { %4728 = vmatprep.subr.bf16.mxu0 %v5687_v59  ;;  %v5705_v59 = vld [vmem:[#allocation2 + $0x298] sm:$0xff]  }
 0x223   : > { %5184 = vmatpush3.bf16.msra.mxu1 %v5688_v7  ;;  %v5707_v7 = vld [vmem:[#allocation2 + $0x258] sm:$0xff]  }
 0x224   : > { %4729 = vmatpush3.bf16.msra.mxu0 %v5689_v8  ;;  %5185 = vmatprep.subr.bf16.mxu1 %v5833_v0  ;;  %v5708_v8 = vld [vmem:[#allocation2 + $0x290] sm:$0xff]  }
 0x225   : > { %4730 = vmatprep.subr.bf16.mxu0 %v5690_v30  ;;  %v5709_v30 = vld [vmem:[#allocation2 + $0x2d0] sm:$0xff]  }
 0x227   : > { %5186 = vmatpush3.bf16.msra.mxu1 %v5691_v25  ;;  %v5710_v25 = vld [vmem:[#allocation2 + $0x250] sm:$0xff]  }
 0x228   : > { %4731 = vmatpush3.bf16.msra.mxu0 %v5692_v31  ;;  %5191 = vmatprep.subr.bf16.mxu1 %v5833_v0  ;;  %v5711_v31 = vld [vmem:[#allocation2 + $0x288] sm:$0xff]  }
 0x229   : > { %4747 = vmatprep.subr.bf16.mxu0 %v5693_v10  ;;  %v5712_v10 = vld [vmem:[#allocation2 + $0x2c8] sm:$0xff]  }
 0x22a   : > { %v3060_v12 = vpop.f32.mrf.mxu1  ;;  %5188 = vmatmul.mubr.bf16.vlgmr.msra.gmra.mxu1 %v6051_v39 }
 0x22b   : > { %v4546_v14 = vpop.f32.mrf.mxu0  ;;  %3502 = vmatmul.mubr.bf16.vlgmr.msra.gmra.mxu0 %v6053_v40  ;;  %5192 = vmatpush3.bf16.msra.mxu1 %v5694_v43  ;;  %v5715_v43 = vld [vmem:[#allocation2 + $0x2c0] sm:$0xff]  }
 0x22c   : > { %v5069_v16 = vpop.f32.mrf.mxu1  ;;  %4748 = vmatpush3.bf16.msra.mxu0 %v5695_v19  ;;  %5193 = vmatprep.subr.bf16.mxu1 %v5833_v0  ;;  %v5717_v19 = vld [vmem:[#allocation2 + $0x678] sm:$0xff]  }
 0x22d   : > { %v4547_v22 = vpop.f32.mrf.mxu0  ;;  %4749 = vmatprep.subr.bf16.mxu0 %v5696_v46  ;;  %5207 = vmatprep.mubr.msk.bf16.mxu1 %vm5834_vm0, %v5833_v0  ;;  %v5716_v16 = vld [vmem:[#allocation2 + $0x240] sm:$0xff]  }
 0x22e   : > { %v4548_v18 = vadd.f32 %v4547_v22, %v4546_v14  ;;  %v3063_v49 = vpop.f32.mrf.mxu1  ;;  %3582 = vmatprep.mubr.bf16.mxu0 %v6073_v20  ;;  %v5714_v14 = vld [vmem:[#allocation2 + $0x280] sm:$0xff]  }
 0x22f   : > { %v4549_v39 = vpop.f32.mrf.mxu0  ;;  %5194 = vmatpush3.bf16.msra.mxu1 %v5697_v47 }
 0x230   : > { %v3061_v40 = vadd.f32 %v4548_v18, %v3060_v12  ;;  %v5070_v58 = vpop.f32.mrf.mxu1  ;;  %4750 = vmatpush3.bf16.msra.mxu0 %v5698_v50  ;;  %5195 = vmatprep.subr.bf16.mxu1 %v5833_v0  ;;  %v5713_v12 = vld [vmem:[#allocation2 + $0x248] sm:$0xff]   ;;  %v5718_v18 = vld [vmem:[#allocation2 + $0x6b8] sm:$0xff]  }
 0x231   : > { %v4550_v2 = vpop.f32.mrf.mxu0  ;;  %4751 = vmatprep.subr.bf16.mxu0 %v5699_v51  ;;  %v5719_v39 = vld [vmem:[#allocation2 + $0x638] sm:$0xff]   ;;  %v5721_v51 = vld [vmem:[#allocation2 + $0x6b0] sm:$0xff]  }
 0x232   : > { %v6299_v28 = vadd.f32 %v3061_v40, %v6267_v56  ;;  %v5706_v56 = vld [vmem:[#allocation2 + $0x2d8] sm:$0xff]   ;;  %v5720_v40 = vld [vmem:[#allocation2 + $0x670] sm:$0xff]  }
 0x233   : > { %5196 = vmatpush3.bf16.msra.mxu1 %v5700_v52 }
 0x234   : > { %v3067_v29 = vmax.f32 %v6283_v48, %v6299_v28  ;;  %4752 = vmatpush3.bf16.msra.mxu0 %v5701_v63  ;;  %5197 = vmatprep.subr.bf16.mxu1 %v5833_v0 }
 0x235   : > { %4753 = vmatprep.subr.bf16.mxu0 %v5702_v53  ;;  %v5722_v53 = vld [vmem:[#allocation2 + $0x630] sm:$0xff]  }
 0x237   : > { %5198 = vmatpush3.bf16.msra.mxu1 %v5703_v15 }
 0x238   : > { %4754 = vmatpush3.bf16.msra.mxu0 %v5704_v54  ;;  %5199 = vmatprep.subr.bf16.mxu1 %v5833_v0  ;;  %v5723_v54 = vld [vmem:[#allocation2 + $0x668] sm:$0xff]  }
 0x239   : > { %4755 = vmatprep.subr.bf16.mxu0 %v5705_v59  ;;  %v5724_v59 = vld [vmem:[#allocation2 + $0x6a8] sm:$0xff]  }
 0x23b   : > { %5200 = vmatpush3.bf16.msra.mxu1 %v5706_v56  ;;  %v5725_v56 = vld [vmem:[#allocation2 + $0x628] sm:$0xff]  }
 0x23c   : > { %4756 = vmatpush3.bf16.msra.mxu0 %v5707_v7  ;;  %5201 = vmatprep.subr.bf16.mxu1 %v5833_v0  ;;  %v5727_v7 = vld [vmem:[#allocation2 + $0x6a0] sm:$0xff]  }
 0x23d   : > { %4757 = vmatprep.subr.bf16.mxu0 %v5708_v8  ;;  %v5728_v8 = vld [vmem:[#allocation2 + $0x620] sm:$0xff]  }
 0x23f   : > { %5202 = vmatpush3.bf16.msra.mxu1 %v5709_v30  ;;  %v5729_v30 = vld [vmem:[#allocation2 + $0x658] sm:$0xff]  }
 0x240   : > { %4758 = vmatpush3.bf16.msra.mxu0 %v5710_v25  ;;  %5203 = vmatprep.subr.bf16.mxu1 %v5833_v0  ;;  %v5730_v25 = vld [vmem:[#allocation2 + $0x698] sm:$0xff]  }
 0x241   : > { %4759 = vmatprep.subr.bf16.mxu0 %v5711_v31  ;;  %v5731_v31 = vld [vmem:[#allocation2 + $0x618] sm:$0xff]  }
 0x243   : > { %5204 = vmatpush3.bf16.msra.mxu1 %v5712_v10  ;;  %v5732_v10 = vld [vmem:[#allocation2 + $0x650] sm:$0xff]  }
 0x244   : > { %4760 = vmatpush3.bf16.msra.mxu0 %v5713_v12  ;;  %5205 = vmatprep.subr.bf16.mxu1 %v5833_v0  ;;  %v5733_v12 = vld [vmem:[#allocation2 + $0x690] sm:$0xff]  }
 0x245   : > { %4761 = vmatprep.subr.bf16.mxu0 %v5714_v14  ;;  %v5734_v14 = vld [vmem:[#allocation2 + $0x610] sm:$0xff]  }
 0x247   : > { %5206 = vmatpush3.bf16.msra.mxu1 %v5715_v43  ;;  %v5735_v43 = vld [vmem:[#allocation2 + $0x648] sm:$0xff]  }
 0x248   : > { %4762 = vmatpush3.bf16.msra.mxu0 %v5716_v16  ;;  %5211 = vmatprep.subr.bf16.mxu1 %v5833_v0  ;;  %v5736_v16 = vld [vmem:[#allocation2 + $0x688] sm:$0xff]  }
 0x249   : > { %4778 = vmatprep.subr.bf16.mxu0 %v5717_v19  ;;  %v3713_v19 = vld [vmem:[%s5929_s9 + $0x8] sm:$0x3c] }
 0x24a   : > { %v3142_v22 = vpop.f32.mrf.mxu1  ;;  %5208 = vmatmul.mubr.bf16.vlgmr.msra.gmra.mxu1 %v6103_v61 }
 0x24b   : > { %v4577_v46 = vpop.f32.mrf.mxu0  ;;  %3583 = vmatmul.mubr.bf16.vlgmr.msra.gmra.mxu0 %v6106_v3  ;;  %5212 = vmatpush3.bf16.msra.mxu1 %v5718_v18  ;;  %v3716_v18 = vpack.c.bf16 %v3713_v19, %v3713_v19  ;;  %v5755_v19 = vld [vmem:[#allocation2 + $0x318] sm:$0xff]  }
 0x24c   : > { %v5089_v49 = vpop.f32.mrf.mxu1  ;;  %4779 = vmatpush3.bf16.msra.mxu0 %v5719_v39  ;;  %5213 = vmatprep.subr.bf16.mxu1 %v5833_v0  ;;  %v5740_v39 = vld [vmem:[#allocation2 + $0x600] sm:$0xff]  }
 0x24d   : > { %v4578_v47 = vpop.f32.mrf.mxu0  ;;  %4780 = vmatprep.subr.bf16.mxu0 %v5720_v40  ;;  %5227 = vmatprep.mubr.msk.bf16.mxu1 %vm5834_vm0, %v5833_v0  ;;  %v5739_v49 = vld [vmem:[#allocation2 + $0x680] sm:$0xff]  }
 0x24e   : > { %v4579_v58 = vadd.f32 %v4578_v47, %v4577_v46  ;;  %v3145_v50 = vpop.f32.mrf.mxu1  ;;  %3663 = vmatprep.mubr.bf16.mxu0 %v6073_v20  ;;  %v5726_v20 = vld [vmem:[#allocation2 + $0x660] sm:$0xff]   ;;  %v5741_v47 = vld [vmem:[#allocation2 + $0x378] sm:$0xff]  }
 0x24f   : > { %v4580_v2 = vpop.f32.mrf.mxu0  ;;  %5214 = vmatpush3.bf16.msra.mxu1 %v5721_v51  ;;  %v5738_v46 = vld [vmem:[#allocation2 + $0x640] sm:$0xff]  }
 0x250   : > { %v6315_v52 = vadd.f32 %v4579_v58, %v3142_v22  ;;  %v5090_v63 = vpop.f32.mrf.mxu1  ;;  %4781 = vmatpush3.bf16.msra.mxu0 %v5722_v53  ;;  %5215 = vmatprep.subr.bf16.mxu1 %v5833_v0  ;;  %v5737_v22 = vld [vmem:[#allocation2 + $0x608] sm:$0xff]   ;;  %v6326_v58 = vrot.slane %v3716_v18, 1  ;;  %v5742_v2 = vld [vmem:[#allocation2 + $0x3b8] sm:$0xff]   ;;  %v3714_v18 = vld [vmem:[%s5929_s9 + $0x10] sm:$0x3c] }
 0x251   : > { %v4581_v15 = vpop.f32.mrf.mxu0  ;;  %4782 = vmatprep.subr.bf16.mxu0 %v5723_v54  ;;  %v5743_v63 = vld [vmem:[#allocation2 + $0x338] sm:$0xff]  }
 0x252   : > { %v5744_v15 = vld [vmem:[#allocation2 + $0x370] sm:$0xff]  }
 0x253   : > { %5216 = vmatpush3.bf16.msra.mxu1 %v5724_v59 }
 0x254   : > { %4783 = vmatpush3.bf16.msra.mxu0 %v5725_v56  ;;  %5217 = vmatprep.subr.bf16.mxu1 %v5833_v0  ;;  %v5745_v56 = vld [vmem:[#allocation2 + $0x3b0] sm:$0xff]  }
 0x255   : > { %4784 = vmatprep.subr.bf16.mxu0 %v5726_v20 }
 0x257   : > { %5218 = vmatpush3.bf16.msra.mxu1 %v5727_v7  ;;  %v5746_v7 = vld [vmem:[#allocation2 + $0x330] sm:$0xff]  }
 0x258   : > { %4785 = vmatpush3.bf16.msra.mxu0 %v5728_v8  ;;  %5219 = vmatprep.subr.bf16.mxu1 %v5833_v0 }
 0x259   : > { %4786 = vmatprep.subr.bf16.mxu0 %v5729_v30  ;;  %v5747_v30 = vld [vmem:[#allocation2 + $0x368] sm:$0xff]  }
 0x25b   : > { %5220 = vmatpush3.bf16.msra.mxu1 %v5730_v25 }
 0x25c   : > { %4787 = vmatpush3.bf16.msra.mxu0 %v5731_v31  ;;  %5221 = vmatprep.subr.bf16.mxu1 %v5833_v0  ;;  %v5748_v31 = vld [vmem:[#allocation2 + $0x3a8] sm:$0xff]  }
 0x25d   : > { %4788 = vmatprep.subr.bf16.mxu0 %v5732_v10  ;;  %v5749_v10 = vld [vmem:[#allocation2 + $0x328] sm:$0xff]  }
 0x25f   : > { %5222 = vmatpush3.bf16.msra.mxu1 %v5733_v12  ;;  %v5750_v12 = vld [vmem:[#allocation2 + $0x360] sm:$0xff]  }
 0x260   : > { %4789 = vmatpush3.bf16.msra.mxu0 %v5734_v14  ;;  %5223 = vmatprep.subr.bf16.mxu1 %v5833_v0  ;;  %v5751_v14 = vld [vmem:[#allocation2 + $0x3a0] sm:$0xff]  }
 0x261   : > { %4790 = vmatprep.subr.bf16.mxu0 %v5735_v43  ;;  %v5753_v43 = vld [vmem:[#allocation2 + $0x358] sm:$0xff]  }
 0x263   : > { %5224 = vmatpush3.bf16.msra.mxu1 %v5736_v16  ;;  %v5754_v16 = vld [vmem:[#allocation2 + $0x398] sm:$0xff]  }
 0x264   : > { %4791 = vmatpush3.bf16.msra.mxu0 %v5737_v22  ;;  %5225 = vmatprep.subr.bf16.mxu1 %v5833_v0  ;;  %v5756_v22 = vld [vmem:[#allocation2 + $0x350] sm:$0xff]  }
 0x265   : > { %4792 = vmatprep.subr.bf16.mxu0 %v5738_v46  ;;  %v5757_v46 = vld [vmem:[#allocation2 + $0x390] sm:$0xff]  }
 0x267   : > { %5226 = vmatpush3.bf16.msra.mxu1 %v5739_v49  ;;  %v5758_v49 = vld [vmem:[#allocation2 + $0x310] sm:$0xff]  }
 0x268   : > { %4793 = vmatpush3.bf16.msra.mxu0 %v5740_v39  ;;  %5231 = vmatprep.subr.bf16.mxu1 %v5833_v0  ;;  %v3712_v39 = vld [vmem:[%s5929_s9] sm:$0x3c] }
 0x269   : > { %4809 = vmatprep.subr.bf16.mxu0 %v5741_v47  ;;  %v5759_v47 = vld [vmem:[#allocation2 + $0x348] sm:$0xff]  }
 0x26a   : > { %v3222_v40 = vpop.f32.mrf.mxu1  ;;  %5228 = vmatmul.mubr.bf16.vlgmr.msra.gmra.mxu1 %v6103_v61 }
 0x26b   : > { %v4608_v50 = vpop.f32.mrf.mxu0  ;;  %3664 = vmatmul.mubr.bf16.vlgmr.msra.gmra.mxu0 %v6106_v3  ;;  %5232 = vmatpush3.bf16.msra.mxu1 %v5742_v2  ;;  %v3715_v2 = vpack.c.bf16 %v3712_v39, %v3712_v39 }
 0x26c   : > { %v5109_v51 = vpop.f32.mrf.mxu1  ;;  %4810 = vmatpush3.bf16.msra.mxu0 %v5743_v63  ;;  %5233 = vmatprep.subr.bf16.mxu1 %v5833_v0 }
 0x26d   : > { %v4609_v53 = vpop.f32.mrf.mxu0  ;;  %4811 = vmatprep.subr.bf16.mxu0 %v5744_v15  ;;  %5247 = vmatprep.mubr.msk.bf16.mxu1 %vm5834_vm0, %v5833_v0  ;;  %v3721_v63 = vrot.slane %v3715_v2, 1 }
 0x26e   : > { %v4610_v54 = vadd.f32 %v4609_v53, %v4608_v50  ;;  %v3225_v61 = vpop.f32.mrf.mxu1  ;;  %3759 = vmatprep.mubr.bf16.mxu0 %v6326_v58  ;;  %v5760_v50 = vld [vmem:[#allocation2 + $0x388] sm:$0xff]  }
 0x26f   : > { %v4611_v59 = vpop.f32.mrf.mxu0  ;;  %5234 = vmatpush3.bf16.msra.mxu1 %v5745_v56 }
 0x270   : > { %v3183_v3 = vadd.f32 %v4610_v54, %v6315_v52  ;;  %v5110_v20 = vpop.f32.mrf.mxu1  ;;  %4812 = vmatpush3.bf16.msra.mxu0 %v5746_v7  ;;  %5235 = vmatprep.subr.bf16.mxu1 %v5833_v0  ;;  %v5752_v52 = vld [vmem:[#allocation2 + $0x320] sm:$0xff]  }
 0x271   : > { %v4612_v8 = vpop.f32.mrf.mxu0  ;;  %4813 = vmatprep.subr.bf16.mxu0 %v5747_v30 }
 0x272   : > { %v6335_v25 = vadd.f32 %v3222_v40, %v3183_v3  ;;  %v3717_v40 = vpack.c.bf16 %v3714_v18, %v3714_v18 }
 0x273   : > { %5236 = vmatpush3.bf16.msra.mxu1 %v5748_v31 }
 0x274   : > { %4814 = vmatpush3.bf16.msra.mxu0 %v5749_v10  ;;  %5237 = vmatprep.subr.bf16.mxu1 %v5833_v0  ;;  %v3723_v51 = vrot.slane %v3717_v40, 1 }
 0x275   : > { %4815 = vmatprep.subr.bf16.mxu0 %v5750_v12 }
 0x277   : > { %5238 = vmatpush3.bf16.msra.mxu1 %v5751_v14 }
 0x278   : > { %4816 = vmatpush3.bf16.msra.mxu0 %v5752_v52  ;;  %5239 = vmatprep.subr.bf16.mxu1 %v5833_v0 }
 0x279   : > { %4817 = vmatprep.subr.bf16.mxu0 %v5753_v43 }
 0x27b   : > { %5240 = vmatpush3.bf16.msra.mxu1 %v5754_v16 }
 0x27c   : > { %4818 = vmatpush3.bf16.msra.mxu0 %v5755_v19  ;;  %5241 = vmatprep.subr.bf16.mxu1 %v5833_v0 }
 0x27d   : > { %4819 = vmatprep.subr.bf16.mxu0 %v5756_v22 }
 0x27f   : > { %5242 = vmatpush3.bf16.msra.mxu1 %v5757_v46 }
 0x280   : > { %4820 = vmatpush3.bf16.msra.mxu0 %v5758_v49  ;;  %5243 = vmatprep.subr.bf16.mxu1 %v5833_v0 }
 0x281   : > { %4821 = vmatprep.subr.bf16.mxu0 %v5759_v47 }
 0x283   : > { %5244 = vmatpush3.bf16.msra.mxu1 %v5760_v50 }
 0x284   : > { %4822 = vmatpush3.bf16.msra.mxu0 %v6089_v55  ;;  %5245 = vmatprep.subr.bf16.mxu1 %v5833_v0 }
 0x285   : > { %4823 = vmatprep.subr.bf16.mxu0 %v6092_v57 }
 0x287   : > { %5246 = vmatpush3.bf16.msra.mxu1 %v6094_v62 }
 0x288   : > { %4824 = vmatpush3.bf16.msra.mxu0 %v6098_v1  ;;  %5251 = vmatprep.subr.bf16.mxu1 %v5833_v0 }
 0x289   : > { %4840 = vmatprep.subr.bf16.mxu0 %v6101_v60 }
 0x28a   : > { %v3302_v53 = vpop.f32.mrf.mxu1  ;;  %5248 = vmatmul.mubr.bf16.vlgmr.msra.gmra.mxu1 %v3723_v51 }
 0x28b   : > { %v4639_v15 = vpop.f32.mrf.mxu0  ;;  %3760 = vmatmul.mubr.bf16.vlgmr.msra.gmra.mxu0 %v3721_v63  ;;  %5252 = vmatpush3.bf16.msra.mxu1 %v6108_v4 }
 0x28c   : > { %v5129_v55 = vpop.f32.mrf.mxu1  ;;  %4841 = vmatpush3.bf16.msra.mxu0 %v6112_v5  ;;  %5253 = vmatprep.subr.bf16.mxu1 %v5833_v0 }
 0x28d   : > { %v4640_v57 = vpop.f32.mrf.mxu0  ;;  %4842 = vmatprep.subr.bf16.mxu0 %v6115_v6  ;;  %5267 = vmatprep.mubr.msk.bf16.mxu1 %vm5834_vm0, %v5833_v0 }
 0x28e   : > { %v4641_v62 = vadd.f32 %v4640_v57, %v4639_v15  ;;  %v3305_v1 = vpop.f32.mrf.mxu1  ;;  %3840 = vmatprep.mubr.bf16.mxu0 %v6326_v58 }
 0x28f   : > { %v4642_v60 = vpop.f32.mrf.mxu0  ;;  %5254 = vmatpush3.bf16.msra.mxu1 %v6120_v9 }
 0x290   : > { %v3303_v54 = vadd.f32 %v4641_v62, %v3302_v53  ;;  %v5130_v4 = vpop.f32.mrf.mxu1  ;;  %4843 = vmatpush3.bf16.msra.mxu0 %v6124_v11  ;;  %5255 = vmatprep.subr.bf16.mxu1 %v5833_v0 }
 0x291   : > { %v4643_v5 = vpop.f32.mrf.mxu0  ;;  %4844 = vmatprep.subr.bf16.mxu0 %v6127_v13 }
 0x293   : > { %5256 = vmatpush3.bf16.msra.mxu1 %v6133_v17 }
 0x294   : > { %4845 = vmatpush3.bf16.msra.mxu0 %v6139_v21  ;;  %5257 = vmatprep.subr.bf16.mxu1 %v5833_v0 }
 0x295   : > { %4846 = vmatprep.subr.bf16.mxu0 %v6142_v23 }
 0x297   : > { %5258 = vmatpush3.bf16.msra.mxu1 %v6145_v24 }
 0x298   : > { %4847 = vmatpush3.bf16.msra.mxu0 %v6149_v26  ;;  %5259 = vmatprep.subr.bf16.mxu1 %v5833_v0 }
 0x299   : > { %4848 = vmatprep.subr.bf16.mxu0 %v6152_v27 }
 0x29b   : > { %5260 = vmatpush3.bf16.msra.mxu1 %v6155_v32 }
 0x29c   : > { %4849 = vmatpush3.bf16.msra.mxu0 %v6159_v33  ;;  %5261 = vmatprep.subr.bf16.mxu1 %v5833_v0 }
 0x29d   : > { %4850 = vmatprep.subr.bf16.mxu0 %v6162_v34 }
 0x29f   : > { %5262 = vmatpush3.bf16.msra.mxu1 %v6165_v35 }
 0x2a0   : > { %4851 = vmatpush3.bf16.msra.mxu0 %v6169_v36  ;;  %5263 = vmatprep.subr.bf16.mxu1 %v5833_v0 }
 0x2a1   : > { %4852 = vmatprep.subr.bf16.mxu0 %v6172_v37 }
 0x2a3   : > { %5264 = vmatpush3.bf16.msra.mxu1 %v6175_v38 }
 0x2a4   : > { %4853 = vmatpush3.bf16.msra.mxu0 %v6179_v41  ;;  %5265 = vmatprep.subr.bf16.mxu1 %v5833_v0 }
 0x2a5   : > { %4854 = vmatprep.subr.bf16.mxu0 %v6182_v42 }
 0x2a7   : > { %5266 = vmatpush3.bf16.msra.mxu1 %v6185_v44 }
 0x2a8   : > { %4855 = vmatpush3.bf16.msra.mxu0 %v6189_v45 }
 0x2aa   : > { %v3382_v6 = vpop.f32.mrf.mxu1  ;;  %5268 = vmatmul.mubr.bf16.vlgmr.msra.gmra.mxu1 %v3723_v51 }
 0x2ab   : > { %v4670_v9 = vpop.f32.mrf.mxu0  ;;  %3841 = vmatmul.mubr.bf16.vlgmr.msra.gmra.mxu0 %v3721_v63 }
 0x2ac   : > { %v5149_v11 = vpop.f32.mrf.mxu1 }
 0x2ad   : > { %v4671_v13 = vpop.f32.mrf.mxu0 }
 0x2ae   : > { %v4672_v17 = vadd.f32 %v4671_v13, %v4670_v9  ;;  %v3385_v21 = vpop.f32.mrf.mxu1 }
 0x2af   : > { %v4673_v23 = vpop.f32.mrf.mxu0 }
 0x2b0   : > { %v3343_v24 = vadd.f32 %v4672_v17, %v3303_v54  ;;  %v5150_v26 = vpop.f32.mrf.mxu1 }
 0x2b1   : > { %v4674_v27 = vpop.f32.mrf.mxu0 }
 0x2b2   : > { %v3383_v32 = vadd.f32 %v3382_v6, %v3343_v24 }
 0x2ca   : > { %v3462_v0 = vpop.f32.mrf.mxu1 }
 0x2cb   : > { %v4701_v33 = vpop.f32.mrf.mxu0 }
 0x2cc   : > { %v5169_v34 = vpop.f32.mrf.mxu1 }
 0x2cd   : > { %v4702_v35 = vpop.f32.mrf.mxu0 }
 0x2ce   : > { %v4703_v36 = vadd.f32 %v4702_v35, %v4701_v33  ;;  %v3465_v37 = vpop.f32.mrf.mxu1 }
 0x2cf   : > { %v4704_v38 = vpop.f32.mrf.mxu0 }
 0x2d0   : > { %v3463_v41 = vadd.f32 %v4703_v36, %v3462_v0  ;;  %v5170_v42 = vpop.f32.mrf.mxu1  ;;  %v4248_v38 = vld [vmem:[#allocation4] ss:$0 sm:$0xff] }
 0x2d1   : > { %v4705_v44 = vpop.f32.mrf.mxu0 }
 0x2d2   : > { %v3468_v45 = vadd.f32 %v3463_v41, %v6335_v25 }
 0x2ea   : > { %v3543_v58 = vpop.f32.mrf.mxu1 }
 0x2eb   : > { %v4732_v61 = vpop.f32.mrf.mxu0 }
 0x2ec   : > { %v5189_v59 = vpop.f32.mrf.mxu1 }
 0x2ed   : > { %v4733_v56 = vpop.f32.mrf.mxu0 }
 0x2ee   : > { %v4734_v3 = vadd.f32 %v4733_v56, %v4732_v61  ;;  %v3546_v20 = vpop.f32.mrf.mxu1 }
 0x2ef   : > { %v4735_v7 = vpop.f32.mrf.mxu0 }
 0x2f0   : > { %v3544_v8 = vadd.f32 %v4734_v3, %v3543_v58  ;;  %v5190_v30 = vpop.f32.mrf.mxu1 }
 0x2f1   : > { %v4736_v31 = vpop.f32.mrf.mxu0 }
 0x2f2   : > { %v3549_v10 = vadd.f32 %v3544_v8, %v3383_v32 }
 0x30a   : > { %v3624_v12 = vpop.f32.mrf.mxu1 }
 0x30b   : > { %v4763_v14 = vpop.f32.mrf.mxu0 }
 0x30c   : > { %v5209_v52 = vpop.f32.mrf.mxu1 }
 0x30d   : > { %v4764_v43 = vpop.f32.mrf.mxu0 }
 0x30e   : > { %v4765_v16 = vadd.f32 %v4764_v43, %v4763_v14  ;;  %v3627_v19 = vpop.f32.mrf.mxu1 }
 0x30f   : > { %v4766_v22 = vpop.f32.mrf.mxu0 }
 0x310   : > { %v3625_v46 = vadd.f32 %v4765_v16, %v3624_v12  ;;  %v5210_v25 = vpop.f32.mrf.mxu1 }
 0x311   : > { %v4767_v18 = vpop.f32.mrf.mxu0 }
 0x312   : > { %v3630_v49 = vadd.f32 %v3625_v46, %v3468_v45 }
 0x32a   : > { %v3705_v39 = vpop.f32.mrf.mxu1 }
 0x32b   : > { %v4794_v47 = vpop.f32.mrf.mxu0 }
 0x32c   : > { %v5229_v40 = vpop.f32.mrf.mxu1 }
 0x32d   : > { %v4795_v50 = vpop.f32.mrf.mxu0 }
 0x32e   : > { %v4796_v2 = vadd.f32 %v4795_v50, %v4794_v47  ;;  %v3708_v51 = vpop.f32.mrf.mxu1 }
 0x32f   : > { %v4797_v63 = vpop.f32.mrf.mxu0 }
 0x330   : > { %v3706_v53 = vadd.f32 %v4796_v2, %v3705_v39  ;;  %v5230_v15 = vpop.f32.mrf.mxu1 }
 0x331   : > { %v4798_v55 = vpop.f32.mrf.mxu0 }
 0x332   : > { %v3711_v57 = vadd.f32 %v3706_v53, %v3549_v10 }
 0x34a   : > { %v3801_v62 = vpop.f32.mrf.mxu1 }
 0x34b   : > { %v4825_v1 = vpop.f32.mrf.mxu0 }
 0x34c   : > { %v5249_v60 = vpop.f32.mrf.mxu1 }
 0x34d   : > { %v4826_v54 = vpop.f32.mrf.mxu0 }
 0x34e   : > { %v3804_v4 = vpop.f32.mrf.mxu1  ;;  %v4827_v11 = vadd.f32 %v4826_v54, %v4825_v1 }
 0x34f   : > { %v4828_v5 = vpop.f32.mrf.mxu0 }
 0x350   : > { %v5250_v6 = vpop.f32.mrf.mxu1  ;;  %v3802_v24 = vadd.f32 %v4827_v11, %v3801_v62 }
 0x351   : > { %v4829_v9 = vpop.f32.mrf.mxu0 }
 0x352   : > { %v3807_v35 = vadd.f32 %v3802_v24, %v3630_v49 }
 0x36a   : > { %v3882_v13 = vpop.f32.mrf.mxu1 }
 0x36b   : > { %v4856_v17 = vpop.f32.mrf.mxu0 }
 0x36c   : > { %v5269_v21 = vpop.f32.mrf.mxu1 }
 0x36d   : > { %v4857_v23 = vpop.f32.mrf.mxu0 }
 0x36e   : > { %v4858_v26 = vadd.f32 %v4857_v23, %v4856_v17  ;;  %v3885_v27 = vpop.f32.mrf.mxu1 }
 0x36f   : > { %v4859_v32 = vpop.f32.mrf.mxu0 }
 0x370   : > { %v3883_v0 = vadd.f32 %v4858_v26, %v3882_v13  ;;  %v5270_v33 = vpop.f32.mrf.mxu1 }
 0x371   : > { %v4860_v34 = vpop.f32.mrf.mxu0 }
 0x372   : > { %v3888_v36 = vadd.f32 %v3883_v0, %v3711_v57 }
 0x374   : > { %v3889_v37 = vmax.f32 %v3807_v35, %v3888_v36 }
 0x376   : > { %v3890_v41 = vmax.f32 %v3067_v29, %v3889_v37 }
 0x378   : > { %v3898_v42 = vadd.f32 %v4248_v38, %v3890_v41 }
 0x37a   : > { %v3899_v44 = vmin.f32 %v3898_v42, 0.0  ;;  %vm3906_vm1 = vcmp.gt.f32.partialorder %v3898_v42, 0.0 }
 0x37c   : > { %v3902_v45 = vmul.f32 1.442695, %v3899_v44  ;;  %v3900_v58 = vmul.f32 0.5, %v3899_v44 }
 0x37e   : > { %5545 = vpow2.f32 %v3902_v45 }
 0x37f   : > { %5547 = vtanh.f32 %v3900_v58 }
 0x38b   : > { %v5546_v61 = vpop.eup %5545 }
 0x38c   : > { %v3904_v59 = vadd.f32 1.0, %v5546_v61  ;;  %v5548_v56 = vpop.eup %5547 }
 0x38e   : > { %v3905_v3 = vmul.f32 %v5548_v56, %v3904_v59 }
 0x390   : > { %v3907_v20 = vsel %vm3906_vm1, %v3898_v42, %v3905_v3 }
 0x391   : > { %3908 = vst [vmem:[%s243_s18] sm:$0xf] %v3907_v20 }
 0x392 PF: > { %s16_s15 = sadd.s32 1, %s5827_s15  }
 0x393   : > { %p13_p3 = scmp.ge.s32.totalorder %s16_s15, 4  }
 0x395   :  { %15 = sbr.rel (!%p13_p3) target bundleno = 2 (0x2), region = 87 }
 0x39a   :  { %3928 = vsyncpa [#allocation3], 1 }
 0x39b   :  { %3930 = vsyncpa [#allocation3 + $0x1], 1 }
 0x39c   :  { %3931 = vsyncpa [#allocation5], 1 }

// kernel: autoencoder_forward.8
= control target key start
LH: loop header
LB: loop body
LE: loop exit
PB: predicated region body
PF: predicated region fallthrough
CT: control target
= control target key end

     0   :  { %s4599_s12 = smov 0   ;;  %s5663_s0 = inlined_call_operand.vmem [shape: f32[2,16,320], index: 0, kind: input, shape index: {}]   ;;  %s5664_s1 = inlined_call_operand.vmem [shape: bf16[5,320,384], index: 1, kind: input, shape index: {}]   ;;  %s5665_s2 = inlined_call_operand.vmem [shape: f32[1,384], index: 2, kind: input, shape index: {}]   ;;  %s5666_s3 = inlined_call_operand.vmem [shape: f32[2,12,384], index: 3, kind: output, shape index: {}]  }
   0x1 LB: > { %s3298_s13 = sadd.s32 4294967295, %s4574_s12   ;;  %p3302_p0 = scmp.ge.s32.totalorder %s4574_s12, 1  ;;  %s4574_s12 = sphi %s4599_s12, %s13_s12  }
   0x2   : > { %p137_p1 = scmp.lt.s32.totalorder %s4574_s12, 3 }
   0x4   : > { %p138_p2 = pnand %p3302_p0, %p137_p1 }
   0x5   : > { %p161_p3 = scmp.lt.s32.totalorder (!%p138_p2), %s3298_s13, 1 }
   0x6   : > { %141 = sbr.rel (%p138_p2) target bundleno = 565 (0x235), region = 32 }
   0xb   : > { %v4144_v0 = vld [vmem:[%s5664_s1 + $0x28c] ss:$12 sps:$4 sm:$0xff]   ;;  %v4576_v2 = vmov 0   ;;  %v4148_v3 = vld [vmem:[%s5664_s1 + $0x288] ss:$12 sps:$4 sm:$0xff]   ;;  %s5668_s13 = smov (!%p161_p3, %s3298_s13), 1 }
   0xc   : > { %v4146_v1 = vld [vmem:[%s5664_s1 + $0x3ac] ss:$12 sps:$4 sm:$0xff]   ;;  %773 = vmatprep.mubr.bf16.mxu1 %v4576_v2  ;;  %698 = vmatprep.subr.bf16.mxu0 %v4144_v0  ;;  %v4149_v4 = vld [vmem:[%s5664_s1 + $0x3a8] ss:$12 sps:$4 sm:$0xff]   ;;  %v4154_v7 = vld [vmem:[%s5664_s1 + $0x270] ss:$12 sps:$4 sm:$0xff]  }
   0xd   : > { %749 = vmatprep.subr.bf16.mxu1 %v4146_v1  ;;  %v4150_v5 = vld [vmem:[%s5664_s1 + $0x274] ss:$12 sps:$4 sm:$0xff]   ;;  %699 = vmatpush1.bf16.msra.mxu0 %v4148_v3  ;;  %s4132_s28 = smul.u32 48, %s5668_s13  ;;  %v4155_v8 = vld [vmem:[%s5664_s1 + $0x390] ss:$12 sps:$4 sm:$0xff]   ;;  %vm694_vm0 = vcmask 523264  }
   0xe   : > { %750 = vmatpush1.bf16.msra.mxu1 %v4149_v4  ;;  %v4152_v6 = vld [vmem:[%s5664_s1 + $0x394] ss:$12 sps:$4 sm:$0xff]   ;;  %700 = vmatprep.subr.bf16.mxu0 %v4150_v5  ;;  %v4156_v9 = vld [vmem:[%s5664_s1 + $0x25c] ss:$12 sps:$4 sm:$0xff]   ;;  %v4160_v11 = vld [vmem:[%s5664_s1 + $0x258] ss:$12 sps:$4 sm:$0xff]  }
   0xf   : > { %751 = vmatprep.subr.bf16.mxu1 %v4152_v6  ;;  %v4158_v10 = vld [vmem:[%s5664_s1 + $0x37c] ss:$12 sps:$4 sm:$0xff]   ;;  %v4161_v12 = vld [vmem:[%s5664_s1 + $0x378] ss:$12 sps:$4 sm:$0xff]   ;;  %s4655_s18 = scalar_lea.vmem %s5663_s0, %s4132_s28  ;;  %v4166_v15 = vld [vmem:[%s5664_s1 + $0x240] ss:$12 sps:$4 sm:$0xff]   ;;  %s5650_s20 = scalar_lea.vmem %s5666_s3, %s4132_s28 }
  0x10   : > { %v4162_v13 = vld [vmem:[%s5664_s1 + $0x244] ss:$12 sps:$4 sm:$0xff]   ;;  %v4167_v16 = vld [vmem:[%s5664_s1 + $0x360] ss:$12 sps:$4 sm:$0xff]   ;;  %v4171_v24 = vld [vmem:[%s5664_s1 + $0x228] ss:$12 sps:$4 sm:$0xff]  }
  0x11   : > { %701 = vmatpush1.bf16.msra.mxu0 %v4154_v7  ;;  %v4164_v14 = vld [vmem:[%s5664_s1 + $0x364] ss:$12 sps:$4 sm:$0xff]   ;;  %v266_v18 = vld [vmem:[%s4655_s18 + $0x28] sm:$0x1f]  ;;  %v4173_v26 = vld [vmem:[%s5664_s1 + $0x214] ss:$12 sps:$4 sm:$0xff]  }
  0x12   : > { %752 = vmatpush1.bf16.msra.mxu1 %v4155_v8  ;;  %702 = vmatprep.subr.bf16.mxu0 %v4156_v9  ;;  %v263_v17 = vld [vmem:[%s4655_s18 + $0x10] sm:$0xfe]  ;;  %v4168_v19 = vld [vmem:[%s5664_s1 + $0x22c] ss:$12 sps:$4 sm:$0xff]   ;;  %v4178_v31 = vld [vmem:[%s5664_s1 + $0x1fc] ss:$12 sps:$4 sm:$0xff]  }
  0x13   : > { %753 = vmatprep.subr.bf16.mxu1 %v4158_v10  ;;  %v269_v20 = vpack.c.bf16 %v266_v18, %v263_v17  ;;  %v4170_v21 = vld [vmem:[%s5664_s1 + $0x350] ss:$12 sps:$4 sm:$0xff]   ;;  %v4175_v29 = vld [vmem:[%s5664_s1 + $0x338] ss:$12 sps:$4 sm:$0xff]   ;;  %v4180_v33 = vld [vmem:[%s5664_s1 + $0x320] ss:$12 sps:$4 sm:$0xff]  }
  0x14   : > { %v4172_v27 = vld [vmem:[%s5664_s1 + $0x290] ss:$12 sps:$4 sm:$0xff]   ;;  %v4177_v32 = vld [vmem:[%s5664_s1 + $0x278] ss:$12 sps:$4 sm:$0xff]   ;;  %v4182_v36 = vld [vmem:[%s5664_s1 + $0x260] ss:$12 sps:$4 sm:$0xff]  }
  0x15   : > { %703 = vmatpush1.bf16.msra.mxu0 %v4160_v11  ;;  %v366_v22 = vshrl.u32 %v269_v20, 16  ;;  %v368_v23 = vshll.u32 %v269_v20, 16  ;;  %v4176_v30 = vld [vmem:[%s5664_s1 + $0x210] ss:$12 sps:$4 sm:$0xff]   ;;  %v4181_v34 = vld [vmem:[%s5664_s1 + $0x1f8] ss:$12 sps:$4 sm:$0xff]  }
  0x16   : > { %754 = vmatpush1.bf16.msra.mxu1 %v4161_v12  ;;  %704 = vmatprep.subr.bf16.mxu0 %v4162_v13  ;;  %v4183_v35 = vld [vmem:[%s5664_s1 + $0x1e4] ss:$12 sps:$4 sm:$0xff]   ;;  %v4185_v37 = vld [vmem:[%s5664_s1 + $0x308] ss:$12 sps:$4 sm:$0xff]   ;;  %v4186_v38 = vld [vmem:[%s5664_s1 + $0x1e0] ss:$12 sps:$4 sm:$0xff]  }
  0x17   : > { %755 = vmatprep.subr.bf16.mxu1 %v4164_v14  ;;  %v370_v25 = vrot.slane %v368_v23, 1  ;;  %v4188_v39 = vld [vmem:[%s5664_s1 + $0x34c] ss:$12 sps:$4 sm:$0xff]   ;;  %v4187_v40 = vld [vmem:[%s5664_s1 + $0x248] ss:$12 sps:$4 sm:$0xff]   ;;  %v4577_v11 = vmov 0.0  }
  0x18   : > { %v4190_v41 = vld [vmem:[%s5664_s1 + $0x2f0] ss:$12 sps:$4 sm:$0xff]   ;;  %v4191_v42 = vld [vmem:[%s5664_s1 + $0x348] ss:$12 sps:$4 sm:$0xff]   ;;  %v4195_v45 = vld [vmem:[%s5664_s1 + $0x2d8] ss:$12 sps:$4 sm:$0xff]  }
  0x19   : > { %705 = vmatpush1.bf16.msra.mxu0 %v4166_v15  ;;  %v4683_v28 = vor.u32 %v370_v25, %v366_v22  ;;  %v4193_v43 = vld [vmem:[%s5664_s1 + $0x334] ss:$12 sps:$4 sm:$0xff]   ;;  %v4192_v44 = vld [vmem:[%s5664_s1 + $0x230] ss:$12 sps:$4 sm:$0xff]   ;;  %v4197_v47 = vld [vmem:[%s5664_s1 + $0x218] ss:$12 sps:$4 sm:$0xff]  }
  0x1a   : > { %756 = vmatpush1.bf16.msra.mxu1 %v4167_v16  ;;  %706 = vmatprep.subr.bf16.mxu0 %v4168_v19  ;;  %v4196_v46 = vld [vmem:[%s5664_s1 + $0x330] ss:$12 sps:$4 sm:$0xff]   ;;  %v262_v49 = vld [vmem:[%s4655_s18 + $0x8] sm:$0xfe]  ;;  %v265_v50 = vld [vmem:[%s4655_s18 + $0x20] sm:$0x1f] }
  0x1b   : > { %3937 = vmatprep.subr.bf16.mxu1 %v4170_v21  ;;  %v4198_v48 = vld [vmem:[%s5664_s1 + $0x31c] ss:$12 sps:$4 sm:$0xff]   ;;  %v4200_v51 = vld [vmem:[%s5664_s1 + $0x2c0] ss:$12 sps:$4 sm:$0xff]   ;;  %v268_v52 = vpack.c.bf16 %v265_v50, %v262_v49  ;;  %v4201_v54 = vld [vmem:[%s5664_s1 + $0x318] ss:$12 sps:$4 sm:$0xff]  }
  0x1c   : > { %v261_v53 = vld [vmem:[%s4655_s18] sm:$0xfe]  ;;  %v264_v55 = vld [vmem:[%s4655_s18 + $0x18] sm:$0x1f]  ;;  %v4205_v61 = vld [vmem:[%s5664_s1 + $0x2a8] ss:$12 sps:$4 sm:$0xff]  }
  0x1d   : > { %707 = vmatpush1.bf16.msra.mxu0 %v4171_v24  ;;  %3445 = vmatmul.mubr.msk.bf16.vlgmr.msra.gmra.mxu1 %vm694_vm0, %v4683_v28  ;;  %v4203_v56 = vld [vmem:[%s5664_s1 + $0x304] ss:$12 sps:$4 sm:$0xff]   ;;  %v359_v57 = vshrl.u32 %v268_v52, 16  ;;  %v361_v58 = vshll.u32 %v268_v52, 16  ;;  %v267_v59 = vpack.c.bf16 %v264_v55, %v261_v53  ;;  %v4202_v60 = vld [vmem:[%s5664_s1 + $0x200] ss:$12 sps:$4 sm:$0xff]  }
  0x1e   : > { %708 = vmatprep.subr.bf16.mxu0 %v4173_v26  ;;  %3938 = vmatpush3.bf16.msra.mxu1 %v4172_v27  ;;  %v4206_v0 = vld [vmem:[%s5664_s1 + $0x300] ss:$12 sps:$4 sm:$0xff]   ;;  %v4207_v6 = vld [vmem:[%s5664_s1 + $0x1e8] ss:$12 sps:$4 sm:$0xff]   ;;  %v4211_v10 = vld [vmem:[%s5664_s1 + $0x3b0] ss:$12 sps:$4 sm:$0xff]  }
  0x1f   : > { %3939 = vmatprep.subr.bf16.mxu1 %v4175_v29  ;;  %v363_v62 = vrot.slane %v361_v58, 1  ;;  %v354_v63 = vshll.u32 %v267_v59, 16  ;;  %v4208_v3 = vld [vmem:[%s5664_s1 + $0x2ec] ss:$12 sps:$4 sm:$0xff]   ;;  %v352_v4 = vshrl.u32 %v267_v59, 16  ;;  %vm4578_vm1 = vmmov 0  }
  0x20   : > { %v4210_v7 = vld [vmem:[%s5664_s1 + $0x2e8] ss:$12 sps:$4 sm:$0xff]   ;;  %v4214_v12 = vld [vmem:[%s5664_s1 + $0x2d0] ss:$12 sps:$4 sm:$0xff]   ;;  %v4215_v14 = vld [vmem:[%s5664_s1 + $0x398] ss:$12 sps:$4 sm:$0xff]  }
  0x21   : > { %709 = vmatpush1.bf16.msra.mxu0 %v4176_v30  ;;  %v364_v1 = vor.u32 %v363_v62, %v359_v57  ;;  %v356_v5 = vrot.slane %v354_v63, 1  ;;  %v4212_v9 = vld [vmem:[%s5664_s1 + $0x2d4] ss:$12 sps:$4 sm:$0xff]   ;;  %v4216_v13 = vld [vmem:[%s5664_s1 + $0x2bc] ss:$12 sps:$4 sm:$0xff]  }
  0x22   : > { %710 = vmatprep.subr.bf16.mxu0 %v4178_v31  ;;  %3940 = vmatpush3.bf16.msra.mxu1 %v4177_v32  ;;  %v4218_v15 = vld [vmem:[%s5664_s1 + $0x2b8] ss:$12 sps:$4 sm:$0xff]   ;;  %v4219_v17 = vld [vmem:[%s5664_s1 + $0x380] ss:$12 sps:$4 sm:$0xff]   ;;  %v4223_v20 = vld [vmem:[%s5664_s1 + $0x368] ss:$12 sps:$4 sm:$0xff]  }
  0x23   : > { %3941 = vmatprep.subr.bf16.mxu1 %v4180_v33  ;;  %816 = vmatprep.mubr.bf16.mxu1 %v364_v1  ;;  %v357_v8 = vor.u32 %v356_v5, %v352_v4  ;;  %v4220_v16 = vld [vmem:[%s5664_s1 + $0x2a4] ss:$12 sps:$4 sm:$0xff]   ;;  %v4222_v18 = vld [vmem:[%s5664_s1 + $0x2a0] ss:$12 sps:$4 sm:$0xff]   ;;  %v4224_v22 = vld [vmem:[%s5664_s1 + $0xa8] ss:$12 sps:$4 sm:$0xff]  }
  0x24   : > { %730 = vmatprep.mubr.bf16.mxu0 %v364_v1  ;;  %v4226_v19 = vld [vmem:[%s5664_s1 + $0xac] ss:$12 sps:$4 sm:$0xff]   ;;  %v4232_v23 = vld [vmem:[%s5664_s1 + $0x94] ss:$12 sps:$4 sm:$0xff]   ;;  %v4230_v26 = vld [vmem:[%s5664_s1 + $0x90] ss:$12 sps:$4 sm:$0xff]  }
  0x25   : > { %711 = vmatpush1.bf16.msra.mxu0 %v4181_v34  ;;  %v4229_v21 = vld [vmem:[%s5664_s1 + $0x1cc] ss:$12 sps:$4 sm:$0xff]   ;;  %v4227_v24 = vld [vmem:[%s5664_s1 + $0x1c8] ss:$12 sps:$4 sm:$0xff]   ;;  %v4233_v29 = vld [vmem:[%s5664_s1 + $0x1b0] ss:$12 sps:$4 sm:$0xff]  }
  0x26   : > { %712 = vmatprep.subr.bf16.mxu0 %v4183_v35  ;;  %3942 = vmatpush3.bf16.msra.mxu1 %v4182_v36  ;;  %v4235_v25 = vld [vmem:[%s5664_s1 + $0x1b4] ss:$12 sps:$4 sm:$0xff]   ;;  %v4238_v27 = vld [vmem:[%s5664_s1 + $0x7c] ss:$12 sps:$4 sm:$0xff]   ;;  %v4236_v30 = vld [vmem:[%s5664_s1 + $0x78] ss:$12 sps:$4 sm:$0xff]  }
  0x27   : > { %3943 = vmatprep.subr.bf16.mxu1 %v4185_v37  ;;  %v4239_v31 = vld [vmem:[%s5664_s1 + $0x198] ss:$12 sps:$4 sm:$0xff]   ;;  %v4242_v33 = vld [vmem:[%s5664_s1 + $0x60] ss:$12 sps:$4 sm:$0xff]   ;;  %v174_v37 = vld [vmem:[%s4655_s18 + $0x10] sm:$0xff] }
  0x28   : > { %v4244_v32 = vld [vmem:[%s5664_s1 + $0x64] ss:$12 sps:$4 sm:$0xff]   ;;  %v4245_v35 = vld [vmem:[%s5664_s1 + $0x180] ss:$12 sps:$4 sm:$0xff]   ;;  %v4266_v55 = vld [vmem:[%s5664_s1 + $0x128] ss:$12 sps:$4 sm:$0xff]  }
  0x29   : > { %713 = vmatpush1.bf16.msra.mxu0 %v4186_v38  ;;  %v4247_v34 = vld [vmem:[%s5664_s1 + $0x184] ss:$12 sps:$4 sm:$0xff]   ;;  %v4250_v36 = vld [vmem:[%s5664_s1 + $0x4c] ss:$12 sps:$4 sm:$0xff]   ;;  %v177_v38 = vld [vmem:[%s4655_s18 + $0x28] sm:$0xf] }
  0x2a   : > { %714 = vmatprep.subr.bf16.mxu0 %v4188_v39  ;;  %3944 = vmatpush3.bf16.msra.mxu1 %v4187_v40  ;;  %v4251_v39 = vld [vmem:[%s5664_s1 + $0x170] ss:$12 sps:$4 sm:$0xff]   ;;  %v4248_v40 = vld [vmem:[%s5664_s1 + $0x48] ss:$12 sps:$4 sm:$0xff]   ;;  %v176_v50 = vld [vmem:[%s4655_s18 + $0x20] sm:$0xf] }
  0x2b   : > { %3945 = vmatprep.subr.bf16.mxu1 %v4190_v41  ;;  %v4876_v41 = vpack.c.bf16 %v177_v38, %v174_v37  ;;  %v173_v49 = vld [vmem:[%s4655_s18 + $0x8] sm:$0xff]  ;;  %v4265_v53 = vld [vmem:[%s5664_s1 + $0x4] ss:$12 sps:$4 sm:$0xff]  }
  0x2c   : > { %v179_v52 = vpack.c.bf16 %v176_v50, %v173_v49  ;;  %v4270_v57 = vld [vmem:[%s5664_s1 + $0x16c] ss:$12 sps:$4 sm:$0xff]   ;;  %v4267_v58 = vld [vmem:[%s5664_s1 + $0x68] ss:$12 sps:$4 sm:$0xff]   ;;  %v4271_v59 = vld [vmem:[%s5664_s1 + $0x110] ss:$12 sps:$4 sm:$0xff]  }
  0x2d   : > { %715 = vmatpush2.bf16.msra.mxu0 %v4191_v42  ;;  %v4255_v42 = vld [vmem:[%s5664_s1 + $0x34] ss:$12 sps:$4 sm:$0xff]   ;;  %v4272_v62 = vld [vmem:[%s5664_s1 + $0x50] ss:$12 sps:$4 sm:$0xff]   ;;  %v4276_v63 = vld [vmem:[%s5664_s1 + $0xf8] ss:$12 sps:$4 sm:$0xff]  }
  0x2e   : > { %716 = vmatprep.subr.bf16.mxu0 %v4193_v43  ;;  %3946 = vmatpush3.bf16.msra.mxu1 %v4192_v44  ;;  %v4252_v43 = vld [vmem:[%s5664_s1 + $0xb0] ss:$12 sps:$4 sm:$0xff]   ;;  %v4256_v44 = vld [vmem:[%s5664_s1 + $0x158] ss:$12 sps:$4 sm:$0xff]   ;;  %v4281_v4 = vld [vmem:[%s5664_s1 + $0xe0] ss:$12 sps:$4 sm:$0xff]  }
  0x2f   : > { %3947 = vmatprep.subr.bf16.mxu1 %v4195_v45  ;;  %v4253_v45 = vld [vmem:[%s5664_s1 + $0x30] ss:$12 sps:$4 sm:$0xff]   ;;  %v4278_v5 = vld [vmem:[%s5664_s1 + $0x138] ss:$12 sps:$4 sm:$0xff]   ;;  %v1358_v38 = vld [vmem:[%s4655_s18 + $0x8] sm:$0xfc] }
  0x30   : > { %v4280_v1 = vld [vmem:[%s5664_s1 + $0x13c] ss:$12 sps:$4 sm:$0xff]   ;;  %v4325_v50 = vld [vmem:[%s5664_s1 + $0x540] ss:$12 sps:$4 sm:$0xff]  }
  0x31   : > { %717 = vmatpush2.bf16.msra.mxu0 %v4196_v46  ;;  %v4260_v46 = vld [vmem:[%s5664_s1 + $0x1c] ss:$12 sps:$4 sm:$0xff]  }
  0x32   : > { %718 = vmatprep.subr.bf16.mxu0 %v4198_v48  ;;  %3948 = vmatpush3.bf16.msra.mxu1 %v4197_v47  ;;  %v4257_v47 = vld [vmem:[%s5664_s1 + $0x98] ss:$12 sps:$4 sm:$0xff]   ;;  %v4261_v48 = vld [vmem:[%s5664_s1 + $0x140] ss:$12 sps:$4 sm:$0xff]   ;;  %v4321_v37 = vld [vmem:[%s5664_s1 + $0x55c] ss:$12 sps:$4 sm:$0xff]  }
  0x33   : > { %3949 = vmatprep.subr.bf16.mxu1 %v4200_v51  ;;  %v4258_v51 = vld [vmem:[%s5664_s1 + $0x18] ss:$12 sps:$4 sm:$0xff]  }
  0x35   : > { %719 = vmatpush2.bf16.msra.mxu0 %v4201_v54  ;;  %v4262_v54 = vld [vmem:[%s5664_s1 + $0x80] ss:$12 sps:$4 sm:$0xff]  }
  0x36   : > { %720 = vmatprep.subr.bf16.mxu0 %v4203_v56  ;;  %3950 = vmatpush3.bf16.msra.mxu1 %v4202_v60  ;;  %v4263_v56 = vld [vmem:[%s5664_s1] ss:$12 sps:$4 sm:$0xff]   ;;  %v4268_v60 = vld [vmem:[%s5664_s1 + $0x168] ss:$12 sps:$4 sm:$0xff]  }
  0x37   : > { %3951 = vmatprep.subr.bf16.mxu1 %v4205_v61  ;;  %v4275_v61 = vld [vmem:[%s5664_s1 + $0x154] ss:$12 sps:$4 sm:$0xff]  }
  0x39   : > { %721 = vmatpush2.bf16.msra.mxu0 %v4206_v0  ;;  %v4273_v0 = vld [vmem:[%s5664_s1 + $0x150] ss:$12 sps:$4 sm:$0xff]  }
  0x3a   : > { %722 = vmatprep.subr.bf16.mxu0 %v4208_v3  ;;  %3952 = vmatpush3.bf16.msra.mxu1 %v4207_v6  ;;  %v4277_v3 = vld [vmem:[%s5664_s1 + $0x38] ss:$12 sps:$4 sm:$0xff]  }
  0x3b   : > { %4072 = vmatprep.subr.bf16.mxu1 %v4577_v11  ;;  %v4285_v6 = vld [vmem:[%s5664_s1 + $0x124] ss:$12 sps:$4 sm:$0xff]  }
  0x3d   : > { %723 = vmatpush2.bf16.msra.mxu0 %v4210_v7  ;;  %817 = vmatmul.mubr.bf16.vlgmr.msra.gmra.mxu1 %v357_v8  ;;  %v4282_v7 = vld [vmem:[%s5664_s1 + $0x20] ss:$12 sps:$4 sm:$0xff]  }
  0x3e   : > { %724 = vmatprep.subr.bf16.mxu0 %v4212_v9  ;;  %4073 = vmatpush3.bf16.msra.mxu1 %v4211_v10  ;;  %v4283_v9 = vld [vmem:[%s5664_s1 + $0x120] ss:$12 sps:$4 sm:$0xff]   ;;  %v4287_v10 = vld [vmem:[%s5664_s1 + $0x8] ss:$12 sps:$4 sm:$0xff]  }
  0x3f   : > { %4080 = vmatprep.mubr.msk.bf16.mxu1 %vm4578_vm1, %v4577_v11  ;;  %4074 = vmatprep.subr.bf16.mxu1 %v4577_v11 }
  0x41   : > { %725 = vmatpush2.bf16.msra.mxu0 %v4214_v12  ;;  %v4290_v12 = vld [vmem:[%s5664_s1 + $0x10c] ss:$12 sps:$4 sm:$0xff]  }
  0x42   : > { %726 = vmatprep.subr.bf16.mxu0 %v4216_v13  ;;  %4075 = vmatpush3.bf16.msra.mxu1 %v4215_v14  ;;  %v172_v13 = vld [vmem:[%s4655_s18] sm:$0xff]  ;;  %v175_v14 = vld [vmem:[%s4655_s18 + $0x18] sm:$0xf] }
  0x43   : > { %4076 = vmatprep.subr.bf16.mxu1 %v4577_v11 }
  0x45   : > { %727 = vmatpush2.bf16.msra.mxu0 %v4218_v15  ;;  %v4288_v15 = vld [vmem:[%s5664_s1 + $0x108] ss:$12 sps:$4 sm:$0xff]  }
  0x46   : > { %728 = vmatprep.subr.bf16.mxu0 %v4220_v16  ;;  %4077 = vmatpush3.bf16.msra.mxu1 %v4219_v17  ;;  %v178_v16 = vpack.c.bf16 %v175_v14, %v172_v13  ;;  %v4294_v17 = vld [vmem:[%s5664_s1 + $0xf4] ss:$12 sps:$4 sm:$0xff]   ;;  %v4357_v13 = vld [vmem:[%s5664_s1 + $0x3f8] ss:$12 sps:$4 sm:$0xff]  }
  0x47   : > { %4078 = vmatprep.subr.bf16.mxu1 %v4577_v11  ;;  %v4358_v14 = vld [vmem:[%s5664_s1 + $0x4f8] ss:$12 sps:$4 sm:$0xff]  }
  0x49   : > { %729 = vmatpush2.bf16.msra.mxu0 %v4222_v18  ;;  %v4291_v18 = vld [vmem:[%s5664_s1 + $0x1d0] ss:$12 sps:$4 sm:$0xff]  }
  0x4a   : > { %1189 = vmatprep.subr.bf16.mxu0 %v4226_v19  ;;  %4079 = vmatpush3.bf16.msra.mxu1 %v4223_v20  ;;  %v4292_v19 = vld [vmem:[%s5664_s1 + $0xf0] ss:$12 sps:$4 sm:$0xff]  }
  0x4b   : > { %1240 = vmatprep.subr.bf16.mxu1 %v4229_v21  ;;  %v4298_v20 = vld [vmem:[%s5664_s1 + $0xdc] ss:$12 sps:$4 sm:$0xff]   ;;  %v4295_v21 = vld [vmem:[%s5664_s1 + $0x1b8] ss:$12 sps:$4 sm:$0xff]  }
  0x4c   : > { %731 = vmatmul.mubr.bf16.vlgmr.msra.gmra.mxu0 %v357_v8  ;;  %v4286_v8 = vld [vmem:[%s5664_s1 + $0xc8] ss:$12 sps:$4 sm:$0xff]  }
  0x4d   : > { %1190 = vmatpush1.bf16.msra.mxu0 %v4224_v22  ;;  %4081 = vmatmul.mubr.msk.bf16.vlgmr.msra.gmra.mxu1 %vm694_vm0, %v4683_v28  ;;  %v4241_v28 = vld [vmem:[%s5664_s1 + $0x19c] ss:$12 sps:$4 sm:$0xff]   ;;  %v4296_v22 = vld [vmem:[%s5664_s1 + $0xd8] ss:$12 sps:$4 sm:$0xff]  }
  0x4e   : > { %1191 = vmatprep.subr.bf16.mxu0 %v4232_v23  ;;  %1241 = vmatpush1.bf16.msra.mxu1 %v4227_v24  ;;  %v4302_v23 = vld [vmem:[%s5664_s1 + $0xc4] ss:$12 sps:$4 sm:$0xff]   ;;  %v4299_v24 = vld [vmem:[%s5664_s1 + $0x1a0] ss:$12 sps:$4 sm:$0xff]  }
  0x4f   : > { %1264 = vmatprep.mubr.bf16.mxu1 %v4576_v2  ;;  %1242 = vmatprep.subr.bf16.mxu1 %v4235_v25  ;;  %v4300_v25 = vld [vmem:[%s5664_s1 + $0xc0] ss:$12 sps:$4 sm:$0xff]  }
  0x50   : > { %1221 = vmatprep.mubr.bf16.mxu0 %v179_v52 }
  0x51   : > { %1192 = vmatpush1.bf16.msra.mxu0 %v4230_v26  ;;  %v4306_v26 = vld [vmem:[%s5664_s1 + $0x46c] ss:$12 sps:$4 sm:$0xff]  }
  0x52   : > { %1193 = vmatprep.subr.bf16.mxu0 %v4238_v27  ;;  %1243 = vmatpush1.bf16.msra.mxu1 %v4233_v29  ;;  %v4303_v27 = vld [vmem:[%s5664_s1 + $0x188] ss:$12 sps:$4 sm:$0xff]   ;;  %v4309_v29 = vld [vmem:[%s5664_s1 + $0x58c] ss:$12 sps:$4 sm:$0xff]  }
  0x53   : > { %1244 = vmatprep.subr.bf16.mxu1 %v4241_v28  ;;  %v4312_v28 = vld [vmem:[%s5664_s1 + $0x454] ss:$12 sps:$4 sm:$0xff]  }
  0x55   : > { %1194 = vmatpush1.bf16.msra.mxu0 %v4236_v30  ;;  %v4304_v30 = vld [vmem:[%s5664_s1 + $0x468] ss:$12 sps:$4 sm:$0xff]  }
  0x56   : > { %1195 = vmatprep.subr.bf16.mxu0 %v4244_v32  ;;  %1245 = vmatpush1.bf16.msra.mxu1 %v4239_v31  ;;  %v4307_v31 = vld [vmem:[%s5664_s1 + $0x588] ss:$12 sps:$4 sm:$0xff]  }
  0x57   : > { %1246 = vmatprep.subr.bf16.mxu1 %v4247_v34  ;;  %v4315_v32 = vld [vmem:[%s5664_s1 + $0x574] ss:$12 sps:$4 sm:$0xff]   ;;  %v4313_v34 = vld [vmem:[%s5664_s1 + $0x570] ss:$12 sps:$4 sm:$0xff]  }
  0x59   : > { %1196 = vmatpush1.bf16.msra.mxu0 %v4242_v33  ;;  %v4310_v33 = vld [vmem:[%s5664_s1 + $0x450] ss:$12 sps:$4 sm:$0xff]  }
  0x5a   : > { %1197 = vmatprep.subr.bf16.mxu0 %v4250_v36  ;;  %1247 = vmatpush1.bf16.msra.mxu1 %v4245_v35  ;;  %v4318_v35 = vld [vmem:[%s5664_s1 + $0x43c] ss:$12 sps:$4 sm:$0xff]   ;;  %v4316_v36 = vld [vmem:[%s5664_s1 + $0x438] ss:$12 sps:$4 sm:$0xff]  }
  0x5b   : > { %3964 = vmatprep.subr.bf16.mxu1 %v4251_v39  ;;  %v1361_v39 = vld [vmem:[%s4655_s18 + $0x20] sm:$0x3f] }
  0x5d   : > { %1198 = vmatpush1.bf16.msra.mxu0 %v4248_v40  ;;  %3507 = vmatmul.mubr.msk.bf16.vlgmr.msra.gmra.mxu1 %vm694_vm0, %v4876_v41  ;;  %v4319_v40 = vld [vmem:[%s5664_s1 + $0x558] ss:$12 sps:$4 sm:$0xff]  }
  0x5e   : > { %1199 = vmatprep.subr.bf16.mxu0 %v4255_v42  ;;  %3965 = vmatpush3.bf16.msra.mxu1 %v4252_v43  ;;  %v1364_v42 = vpack.c.bf16 %v1361_v39, %v1358_v38  ;;  %v1359_v43 = vld [vmem:[%s4655_s18 + $0x10] sm:$0xfc]  ;;  %v4380_v38 = vld [vmem:[%s5664_s1 + $0x480] ss:$12 sps:$4 sm:$0xff]  }
  0x5f   : > { %3966 = vmatprep.subr.bf16.mxu1 %v4256_v44  ;;  %1307 = vmatprep.mubr.bf16.mxu1 %v179_v52  ;;  %v1362_v44 = vld [vmem:[%s4655_s18 + $0x28] sm:$0x3f] }
  0x60   : > { %v1365_v49 = vpack.c.bf16 %v1362_v44, %v1359_v43  ;;  %v4328_v52 = vld [vmem:[%s5664_s1 + $0x408] ss:$12 sps:$4 sm:$0xff]  }
  0x61   : > { %1200 = vmatpush1.bf16.msra.mxu0 %v4253_v45  ;;  %v4327_v45 = vld [vmem:[%s5664_s1 + $0x544] ss:$12 sps:$4 sm:$0xff]   ;;  %v4384_v43 = vld [vmem:[%s5664_s1 + $0x648] ss:$12 sps:$4 sm:$0xff]  }
  0x62   : > { %1201 = vmatprep.subr.bf16.mxu0 %v4260_v46  ;;  %3967 = vmatpush3.bf16.msra.mxu1 %v4257_v47  ;;  %v1451_v46 = vrot.slane %v1364_v42, 1  ;;  %v4322_v47 = vld [vmem:[%s5664_s1 + $0x420] ss:$12 sps:$4 sm:$0xff]   ;;  %v4383_v42 = vld [vmem:[%s5664_s1 + $0x548] ss:$12 sps:$4 sm:$0xff]  }
  0x63   : > { %3968 = vmatprep.subr.bf16.mxu1 %v4261_v48  ;;  %v4330_v48 = vld [vmem:[%s5664_s1 + $0x40c] ss:$12 sps:$4 sm:$0xff]  }
  0x65   : > { %1202 = vmatpush1.bf16.msra.mxu0 %v4258_v51  ;;  %v4331_v51 = vld [vmem:[%s5664_s1 + $0x530] ss:$12 sps:$4 sm:$0xff]  }
  0x66   : > { %1203 = vmatprep.subr.bf16.mxu0 %v4265_v53  ;;  %3969 = vmatpush3.bf16.msra.mxu1 %v4262_v54  ;;  %v5077_v53 = vrot.slane %v1365_v49, 1  ;;  %v4335_v54 = vld [vmem:[%s5664_s1 + $0x3f4] ss:$12 sps:$4 sm:$0xff]  }
  0x67   : > { %3970 = vmatprep.subr.bf16.mxu1 %v4266_v55  ;;  %v4332_v55 = vld [vmem:[%s5664_s1 + $0x470] ss:$12 sps:$4 sm:$0xff]  }
  0x68   : > { %v1954_v49 = vld [vmem:[%s4655_s18 + $0x10] sm:$0xf8] }
  0x69   : > { %1204 = vmatpush1.bf16.msra.mxu0 %v4263_v56  ;;  %v4336_v56 = vld [vmem:[%s5664_s1 + $0x518] ss:$12 sps:$4 sm:$0xff]  }
  0x6a   : > { %1205 = vmatprep.subr.bf16.mxu0 %v4270_v57  ;;  %3971 = vmatpush3.bf16.msra.mxu1 %v4267_v58  ;;  %v4333_v57 = vld [vmem:[%s5664_s1 + $0x3f0] ss:$12 sps:$4 sm:$0xff]  }
  0x6b   : > { %3972 = vmatprep.subr.bf16.mxu1 %v4271_v59  ;;  %v4340_v58 = vld [vmem:[%s5664_s1 + $0x3dc] ss:$12 sps:$4 sm:$0xff]   ;;  %v4337_v59 = vld [vmem:[%s5664_s1 + $0x458] ss:$12 sps:$4 sm:$0xff]  }
  0x6d   : > { %1206 = vmatpush2.bf16.msra.mxu0 %v4268_v60  ;;  %v4341_v60 = vld [vmem:[%s5664_s1 + $0x500] ss:$12 sps:$4 sm:$0xff]  }
  0x6e   : > { %1207 = vmatprep.subr.bf16.mxu0 %v4275_v61  ;;  %3973 = vmatpush3.bf16.msra.mxu1 %v4272_v62  ;;  %v4338_v61 = vld [vmem:[%s5664_s1 + $0x3d8] ss:$12 sps:$4 sm:$0xff]  }
  0x6f   : > { %3974 = vmatprep.subr.bf16.mxu1 %v4276_v63  ;;  %v4345_v62 = vld [vmem:[%s5664_s1 + $0x3c4] ss:$12 sps:$4 sm:$0xff]   ;;  %v4342_v63 = vld [vmem:[%s5664_s1 + $0x440] ss:$12 sps:$4 sm:$0xff]  }
  0x71   : > { %1208 = vmatpush2.bf16.msra.mxu0 %v4273_v0  ;;  %v4346_v0 = vld [vmem:[%s5664_s1 + $0x4e8] ss:$12 sps:$4 sm:$0xff]  }
  0x72   : > { %1209 = vmatprep.subr.bf16.mxu0 %v4280_v1  ;;  %3975 = vmatpush3.bf16.msra.mxu1 %v4277_v3  ;;  %v4343_v1 = vld [vmem:[%s5664_s1 + $0x3c0] ss:$12 sps:$4 sm:$0xff]  }
  0x73   : > { %3976 = vmatprep.subr.bf16.mxu1 %v4281_v4  ;;  %v4350_v3 = vld [vmem:[%s5664_s1 + $0x52c] ss:$12 sps:$4 sm:$0xff]   ;;  %v4347_v4 = vld [vmem:[%s5664_s1 + $0x428] ss:$12 sps:$4 sm:$0xff]  }
  0x75   : > { %1210 = vmatpush2.bf16.msra.mxu0 %v4278_v5  ;;  %v4351_v5 = vld [vmem:[%s5664_s1 + $0x4d0] ss:$12 sps:$4 sm:$0xff]  }
  0x76   : > { %1211 = vmatprep.subr.bf16.mxu0 %v4285_v6  ;;  %3977 = vmatpush3.bf16.msra.mxu1 %v4282_v7  ;;  %v4348_v6 = vld [vmem:[%s5664_s1 + $0x528] ss:$12 sps:$4 sm:$0xff]  }
  0x77   : > { %3978 = vmatprep.subr.bf16.mxu1 %v4286_v8  ;;  %v4355_v7 = vld [vmem:[%s5664_s1 + $0x514] ss:$12 sps:$4 sm:$0xff]   ;;  %v4352_v8 = vld [vmem:[%s5664_s1 + $0x410] ss:$12 sps:$4 sm:$0xff]  }
  0x79   : > { %1212 = vmatpush2.bf16.msra.mxu0 %v4283_v9  ;;  %v4356_v9 = vld [vmem:[%s5664_s1 + $0x4b8] ss:$12 sps:$4 sm:$0xff]  }
  0x7a   : > { %1213 = vmatprep.subr.bf16.mxu0 %v4290_v12  ;;  %3979 = vmatpush3.bf16.msra.mxu1 %v4287_v10  ;;  %v4353_v10 = vld [vmem:[%s5664_s1 + $0x510] ss:$12 sps:$4 sm:$0xff]  }
  0x7b   : > { %4084 = vmatprep.subr.bf16.mxu1 %v4577_v11  ;;  %v4360_v12 = vld [vmem:[%s5664_s1 + $0x4fc] ss:$12 sps:$4 sm:$0xff]  }
  0x7d   : > { %1214 = vmatpush2.bf16.msra.mxu0 %v4288_v15  ;;  %1308 = vmatmul.mubr.bf16.vlgmr.msra.gmra.mxu1 %v178_v16  ;;  %v4361_v15 = vld [vmem:[%s5664_s1 + $0x4a0] ss:$12 sps:$4 sm:$0xff]  }
  0x7e   : > { %1215 = vmatprep.subr.bf16.mxu0 %v4294_v17  ;;  %4085 = vmatpush3.bf16.msra.mxu1 %v4291_v18  ;;  %v4365_v17 = vld [vmem:[%s5664_s1 + $0x4e4] ss:$12 sps:$4 sm:$0xff]  }
  0x7f   : > { %4092 = vmatprep.mubr.msk.bf16.mxu1 %vm4578_vm1, %v4577_v11  ;;  %4086 = vmatprep.subr.bf16.mxu1 %v4577_v11  ;;  %v1357_v18 = vld [vmem:[%s4655_s18] sm:$0xfc] }
  0x81   : > { %1216 = vmatpush2.bf16.msra.mxu0 %v4292_v19  ;;  %v1360_v19 = vld [vmem:[%s4655_s18 + $0x18] sm:$0x3f] }
  0x82   : > { %1217 = vmatprep.subr.bf16.mxu0 %v4298_v20  ;;  %4087 = vmatpush3.bf16.msra.mxu1 %v4295_v21  ;;  %v4366_v20 = vld [vmem:[%s5664_s1 + $0x488] ss:$12 sps:$4 sm:$0xff]   ;;  %v4363_v21 = vld [vmem:[%s5664_s1 + $0x4e0] ss:$12 sps:$4 sm:$0xff]  }
  0x83   : > { %4088 = vmatprep.subr.bf16.mxu1 %v4577_v11 }
  0x85   : > { %1218 = vmatpush2.bf16.msra.mxu0 %v4296_v22  ;;  %v4370_v22 = vld [vmem:[%s5664_s1 + $0x4cc] ss:$12 sps:$4 sm:$0xff]  }
  0x86   : > { %1219 = vmatprep.subr.bf16.mxu0 %v4302_v23  ;;  %4089 = vmatpush3.bf16.msra.mxu1 %v4299_v24  ;;  %v1363_v23 = vpack.c.bf16 %v1360_v19, %v1357_v18  ;;  %v4367_v24 = vld [vmem:[%s5664_s1 + $0x3c8] ss:$12 sps:$4 sm:$0xff]   ;;  %v4425_v18 = vld [vmem:[%s5664_s1 + $0x5a4] ss:$12 sps:$4 sm:$0xff]   ;;  %v4422_v19 = vld [vmem:[%s5664_s1 + $0x620] ss:$12 sps:$4 sm:$0xff]  }
  0x87   : > { %4090 = vmatprep.subr.bf16.mxu1 %v4577_v11 }
  0x89   : > { %1220 = vmatpush2.bf16.msra.mxu0 %v4300_v25  ;;  %v4368_v25 = vld [vmem:[%s5664_s1 + $0x4c8] ss:$12 sps:$4 sm:$0xff]  }
  0x8a   : > { %1778 = vmatprep.subr.bf16.mxu0 %v4306_v26  ;;  %4091 = vmatpush3.bf16.msra.mxu1 %v4303_v27  ;;  %v4374_v26 = vld [vmem:[%s5664_s1 + $0x4b4] ss:$12 sps:$4 sm:$0xff]   ;;  %v1450_v27 = vrot.slane %v1363_v23, 1 }
  0x8b   : > { %1829 = vmatprep.subr.bf16.mxu1 %v4309_v29  ;;  %v4371_v29 = vld [vmem:[%s5664_s1 + $0x590] ss:$12 sps:$4 sm:$0xff]   ;;  %v4427_v23 = vld [vmem:[%s5664_s1 + $0x608] ss:$12 sps:$4 sm:$0xff]  }
  0x8c   : > { %1222 = vmatmul.mubr.bf16.vlgmr.msra.gmra.mxu0 %v178_v16  ;;  %v4362_v16 = vld [vmem:[%s5664_s1 + $0x3e0] ss:$12 sps:$4 sm:$0xff]  }
  0x8d   : > { %1779 = vmatpush1.bf16.msra.mxu0 %v4304_v30  ;;  %4093 = vmatmul.mubr.msk.bf16.vlgmr.msra.gmra.mxu1 %vm694_vm0, %v4876_v41  ;;  %v4324_v41 = vld [vmem:[%s5664_s1 + $0x424] ss:$12 sps:$4 sm:$0xff]  }
  0x8e   : > { %1780 = vmatprep.subr.bf16.mxu0 %v4312_v28  ;;  %1830 = vmatpush1.bf16.msra.mxu1 %v4307_v31  ;;  %v4372_v30 = vld [vmem:[%s5664_s1 + $0x4b0] ss:$12 sps:$4 sm:$0xff]   ;;  %v4375_v31 = vld [vmem:[%s5664_s1 + $0x578] ss:$12 sps:$4 sm:$0xff]  }
  0x8f   : > { %1853 = vmatprep.mubr.bf16.mxu1 %v4576_v2  ;;  %1831 = vmatprep.subr.bf16.mxu1 %v4315_v32  ;;  %v4378_v28 = vld [vmem:[%s5664_s1 + $0x49c] ss:$12 sps:$4 sm:$0xff]   ;;  %v4376_v32 = vld [vmem:[%s5664_s1 + $0x498] ss:$12 sps:$4 sm:$0xff]  }
  0x90   : > { %1810 = vmatprep.mubr.bf16.mxu0 %v1451_v46 }
  0x91   : > { %1781 = vmatpush1.bf16.msra.mxu0 %v4310_v33  ;;  %v4382_v33 = vld [vmem:[%s5664_s1 + $0x484] ss:$12 sps:$4 sm:$0xff]  }
  0x92   : > { %1782 = vmatprep.subr.bf16.mxu0 %v4318_v35  ;;  %1832 = vmatpush1.bf16.msra.mxu1 %v4313_v34  ;;  %v1953_v34 = vld [vmem:[%s4655_s18 + $0x8] sm:$0xf8]  ;;  %v1956_v35 = vld [vmem:[%s4655_s18 + $0x20] sm:$0x7f] }
  0x93   : > { %1833 = vmatprep.subr.bf16.mxu1 %v4321_v37  ;;  %v1959_v37 = vpack.c.bf16 %v1956_v35, %v1953_v34  ;;  %v4437_v34 = vld [vmem:[%s5664_s1 + $0x5d8] ss:$12 sps:$4 sm:$0xff]  }
  0x95   : > { %1783 = vmatpush1.bf16.msra.mxu0 %v4316_v36  ;;  %v4379_v36 = vld [vmem:[%s5664_s1 + $0x560] ss:$12 sps:$4 sm:$0xff]   ;;  %v2051_v39 = vshrl.u32 %v1959_v37, 16 }
  0x96   : > { %1784 = vmatprep.subr.bf16.mxu0 %v4324_v41  ;;  %1834 = vmatpush1.bf16.msra.mxu1 %v4319_v40  ;;  %v2054_v40 = vshll.u32 %v1959_v37, 16  ;;  %v4386_v41 = vld [vmem:[%s5664_s1 + $0x64c] ss:$12 sps:$4 sm:$0xff]  }
  0x97   : > { %1835 = vmatprep.subr.bf16.mxu1 %v4327_v45  ;;  %v2053_v44 = vrot.slane %v2051_v39, 1  ;;  %v4438_v37 = vld [vmem:[%s5664_s1 + $0x6d8] ss:$12 sps:$4 sm:$0xff]  }
  0x98   : > { %v2056_v45 = vrot.slane %v2054_v40, 2 }
  0x99   : > { %1785 = vmatpush1.bf16.msra.mxu0 %v4322_v47  ;;  %v4387_v47 = vld [vmem:[%s5664_s1 + $0x768] ss:$12 sps:$4 sm:$0xff]  }
  0x9a   : > { %1786 = vmatprep.subr.bf16.mxu0 %v4330_v48  ;;  %1836 = vmatpush1.bf16.msra.mxu1 %v4325_v50  ;;  %v4392_v48 = vld [vmem:[%s5664_s1 + $0x634] ss:$12 sps:$4 sm:$0xff]   ;;  %v1957_v50 = vld [vmem:[%s4655_s18 + $0x28] sm:$0x7f] }
  0x9b   : > { %3991 = vmatprep.subr.bf16.mxu1 %v4331_v51  ;;  %v2057_v51 = vor.u32 %v2056_v45, %v2053_v44  ;;  %v4443_v44 = vld [vmem:[%s5664_s1 + $0x6c0] ss:$12 sps:$4 sm:$0xff]  }
  0x9c   : > { %v4450_v45 = vld [vmem:[%s5664_s1 + $0x6ac] ss:$12 sps:$4 sm:$0xff]  }
  0x9d   : > { %1787 = vmatpush1.bf16.msra.mxu0 %v4328_v52  ;;  %3649 = vmatmul.mubr.msk.bf16.vlgmr.msra.gmra.mxu1 %vm694_vm0, %v5077_v53  ;;  %v4395_v52 = vld [vmem:[%s5664_s1 + $0x754] ss:$12 sps:$4 sm:$0xff]  }
  0x9e   : > { %1788 = vmatprep.subr.bf16.mxu0 %v4335_v54  ;;  %3992 = vmatpush3.bf16.msra.mxu1 %v4332_v55  ;;  %v4390_v54 = vld [vmem:[%s5664_s1 + $0x630] ss:$12 sps:$4 sm:$0xff]  }
  0x9f   : > { %1896 = vmatprep.mubr.bf16.mxu1 %v1451_v46  ;;  %3993 = vmatprep.subr.bf16.mxu1 %v4336_v56  ;;  %v4389_v46 = vld [vmem:[%s5664_s1 + $0x76c] ss:$12 sps:$4 sm:$0xff]   ;;  %v4398_v55 = vld [vmem:[%s5664_s1 + $0x61c] ss:$12 sps:$4 sm:$0xff]   ;;  %v1960_v56 = vpack.c.bf16 %v1957_v50, %v1954_v49 }
  0xa0   : > { %v4448_v50 = vld [vmem:[%s5664_s1 + $0x6a8] ss:$12 sps:$4 sm:$0xff]  }
  0xa1   : > { %1789 = vmatpush1.bf16.msra.mxu0 %v4333_v57  ;;  %v4393_v57 = vld [vmem:[%s5664_s1 + $0x750] ss:$12 sps:$4 sm:$0xff]  }
  0xa2   : > { %1790 = vmatprep.subr.bf16.mxu0 %v4340_v58  ;;  %3994 = vmatpush3.bf16.msra.mxu1 %v4337_v59  ;;  %v4401_v58 = vld [vmem:[%s5664_s1 + $0x73c] ss:$12 sps:$4 sm:$0xff]   ;;  %v4404_v59 = vld [vmem:[%s5664_s1 + $0x604] ss:$12 sps:$4 sm:$0xff]  }
  0xa3   : > { %3995 = vmatprep.subr.bf16.mxu1 %v4341_v60  ;;  %v2059_v60 = vshrl.u32 %v1960_v56, 16 }
  0xa5   : > { %1791 = vmatpush1.bf16.msra.mxu0 %v4338_v61  ;;  %v2062_v61 = vshll.u32 %v1960_v56, 16  ;;  %v4452_v56 = vld [vmem:[%s5664_s1 + $0x690] ss:$12 sps:$4 sm:$0xff]  }
  0xa6   : > { %1792 = vmatprep.subr.bf16.mxu0 %v4345_v62  ;;  %3996 = vmatpush3.bf16.msra.mxu1 %v4342_v63  ;;  %v4399_v62 = vld [vmem:[%s5664_s1 + $0x738] ss:$12 sps:$4 sm:$0xff]  }
  0xa7   : > { %3997 = vmatprep.subr.bf16.mxu1 %v4346_v0  ;;  %v4407_v63 = vld [vmem:[%s5664_s1 + $0x724] ss:$12 sps:$4 sm:$0xff]   ;;  %v4402_v0 = vld [vmem:[%s5664_s1 + $0x600] ss:$12 sps:$4 sm:$0xff]  }
  0xa9   : > { %1793 = vmatpush1.bf16.msra.mxu0 %v4343_v1  ;;  %v4410_v1 = vld [vmem:[%s5664_s1 + $0x5ec] ss:$12 sps:$4 sm:$0xff]  }
  0xaa   : > { %1794 = vmatprep.subr.bf16.mxu0 %v4350_v3  ;;  %3998 = vmatpush3.bf16.msra.mxu1 %v4347_v4  ;;  %v2061_v3 = vrot.slane %v2059_v60, 1  ;;  %v2064_v4 = vrot.slane %v2062_v61, 2  ;;  %v4456_v61 = vld [vmem:[%s5664_s1 + $0x678] ss:$12 sps:$4 sm:$0xff]  }
  0xab   : > { %3999 = vmatprep.subr.bf16.mxu1 %v4351_v5  ;;  %v4405_v5 = vld [vmem:[%s5664_s1 + $0x720] ss:$12 sps:$4 sm:$0xff]  }
  0xad   : > { %1795 = vmatpush2.bf16.msra.mxu0 %v4348_v6  ;;  %v4411_v6 = vld [vmem:[%s5664_s1 + $0x710] ss:$12 sps:$4 sm:$0xff]  }
  0xae   : > { %1796 = vmatprep.subr.bf16.mxu0 %v4355_v7  ;;  %4000 = vmatpush3.bf16.msra.mxu1 %v4352_v8  ;;  %v4408_v7 = vld [vmem:[%s5664_s1 + $0x5e8] ss:$12 sps:$4 sm:$0xff]   ;;  %v5276_v8 = vor.u32 %v2064_v4, %v2061_v3  ;;  %v2566_v3 = vld [vmem:[%s4655_s18 + $0x8] sm:$0xf0]  ;;  %v2569_v4 = vld [vmem:[%s4655_s18 + $0x20] sm:$0xff] }
  0xaf   : > { %4001 = vmatprep.subr.bf16.mxu1 %v4356_v9  ;;  %v4415_v9 = vld [vmem:[%s5664_s1 + $0x5d4] ss:$12 sps:$4 sm:$0xff]  }
  0xb1   : > { %1797 = vmatpush2.bf16.msra.mxu0 %v4353_v10  ;;  %v4412_v10 = vld [vmem:[%s5664_s1 + $0x650] ss:$12 sps:$4 sm:$0xff]  }
  0xb2   : > { %1798 = vmatprep.subr.bf16.mxu0 %v4360_v12  ;;  %4002 = vmatpush3.bf16.msra.mxu1 %v4357_v13  ;;  %v4416_v12 = vld [vmem:[%s5664_s1 + $0x6f8] ss:$12 sps:$4 sm:$0xff]   ;;  %v4413_v13 = vld [vmem:[%s5664_s1 + $0x5d0] ss:$12 sps:$4 sm:$0xff]  }
  0xb3   : > { %4003 = vmatprep.subr.bf16.mxu1 %v4361_v15  ;;  %v4417_v15 = vld [vmem:[%s5664_s1 + $0x638] ss:$12 sps:$4 sm:$0xff]  }
  0xb5   : > { %1799 = vmatpush2.bf16.msra.mxu0 %v4358_v14  ;;  %v4420_v14 = vld [vmem:[%s5664_s1 + $0x5bc] ss:$12 sps:$4 sm:$0xff]  }
  0xb6   : > { %1800 = vmatprep.subr.bf16.mxu0 %v4365_v17  ;;  %4004 = vmatpush3.bf16.msra.mxu1 %v4362_v16  ;;  %v4421_v16 = vld [vmem:[%s5664_s1 + $0x6e0] ss:$12 sps:$4 sm:$0xff]   ;;  %v4418_v17 = vld [vmem:[%s5664_s1 + $0x5b8] ss:$12 sps:$4 sm:$0xff]  }
  0xb7   : > { %4005 = vmatprep.subr.bf16.mxu1 %v4366_v20  ;;  %v4426_v20 = vld [vmem:[%s5664_s1 + $0x6c8] ss:$12 sps:$4 sm:$0xff]  }
  0xb9   : > { %1801 = vmatpush2.bf16.msra.mxu0 %v4363_v21  ;;  %v4423_v21 = vld [vmem:[%s5664_s1 + $0x5a0] ss:$12 sps:$4 sm:$0xff]  }
  0xba   : > { %1802 = vmatprep.subr.bf16.mxu0 %v4370_v22  ;;  %4006 = vmatpush3.bf16.msra.mxu1 %v4367_v24  ;;  %v4430_v22 = vld [vmem:[%s5664_s1 + $0x70c] ss:$12 sps:$4 sm:$0xff]   ;;  %v4428_v24 = vld [vmem:[%s5664_s1 + $0x708] ss:$12 sps:$4 sm:$0xff]  }
  0xbb   : > { %4096 = vmatprep.subr.bf16.mxu1 %v4577_v11 }
  0xbd   : > { %1803 = vmatpush2.bf16.msra.mxu0 %v4368_v25  ;;  %1897 = vmatmul.mubr.bf16.vlgmr.msra.gmra.mxu1 %v1450_v27  ;;  %v4431_v25 = vld [vmem:[%s5664_s1 + $0x6b0] ss:$12 sps:$4 sm:$0xff]  }
  0xbe   : > { %1804 = vmatprep.subr.bf16.mxu0 %v4374_v26  ;;  %4097 = vmatpush3.bf16.msra.mxu1 %v4371_v29  ;;  %v4432_v26 = vld [vmem:[%s5664_s1 + $0x5f0] ss:$12 sps:$4 sm:$0xff]   ;;  %v1952_v29 = vld [vmem:[%s4655_s18] sm:$0xf8] }
  0xbf   : > { %4104 = vmatprep.mubr.msk.bf16.mxu1 %vm4578_vm1, %v4577_v11  ;;  %4098 = vmatprep.subr.bf16.mxu1 %v4577_v11 }
  0xc1   : > { %1805 = vmatpush2.bf16.msra.mxu0 %v4372_v30  ;;  %v1955_v30 = vld [vmem:[%s4655_s18 + $0x18] sm:$0x7f] }
  0xc2   : > { %1806 = vmatprep.subr.bf16.mxu0 %v4378_v28  ;;  %4099 = vmatpush3.bf16.msra.mxu1 %v4375_v31  ;;  %v4436_v28 = vld [vmem:[%s5664_s1 + $0x698] ss:$12 sps:$4 sm:$0xff]   ;;  %v4433_v31 = vld [vmem:[%s5664_s1 + $0x6f0] ss:$12 sps:$4 sm:$0xff]  }
  0xc3   : > { %4100 = vmatprep.subr.bf16.mxu1 %v4577_v11 }
  0xc5   : > { %1807 = vmatpush2.bf16.msra.mxu0 %v4376_v32  ;;  %v4440_v32 = vld [vmem:[%s5664_s1 + $0x6dc] ss:$12 sps:$4 sm:$0xff]  }
  0xc6   : > { %1808 = vmatprep.subr.bf16.mxu0 %v4382_v33  ;;  %4101 = vmatpush3.bf16.msra.mxu1 %v4379_v36  ;;  %v1958_v33 = vpack.c.bf16 %v1955_v30, %v1952_v29  ;;  %v4441_v36 = vld [vmem:[%s5664_s1 + $0x680] ss:$12 sps:$4 sm:$0xff]   ;;  %v2567_v29 = vld [vmem:[%s4655_s18 + $0x10] sm:$0xf0] }
  0xc7   : > { %4102 = vmatprep.subr.bf16.mxu1 %v4577_v11  ;;  %v2570_v30 = vld [vmem:[%s4655_s18 + $0x28] sm:$0xff] }
  0xc8   : > { %v2043_v39 = vshrl.u32 %v1958_v33, 16  ;;  %v2046_v40 = vshll.u32 %v1958_v33, 16  ;;  %v4490_v33 = vld [vmem:[%s5664_s1 + $0x7cc] ss:$12 sps:$4 sm:$0xff]  }
  0xc9   : > { %1809 = vmatpush2.bf16.msra.mxu0 %v4380_v38  ;;  %v4445_v38 = vld [vmem:[%s5664_s1 + $0x6c4] ss:$12 sps:$4 sm:$0xff]  }
  0xca   : > { %2391 = vmatprep.subr.bf16.mxu0 %v4386_v41  ;;  %4103 = vmatpush3.bf16.msra.mxu1 %v4383_v42  ;;  %v4442_v41 = vld [vmem:[%s5664_s1 + $0x5c0] ss:$12 sps:$4 sm:$0xff]  }
  0xcb   : > { %2442 = vmatprep.subr.bf16.mxu1 %v4389_v46  ;;  %v2045_v46 = vrot.slane %v2043_v39, 1 }
  0xcc   : > { %1811 = vmatmul.mubr.bf16.vlgmr.msra.gmra.mxu0 %v1450_v27  ;;  %v4435_v27 = vld [vmem:[%s5664_s1 + $0x6f4] ss:$12 sps:$4 sm:$0xff]  }
  0xcd   : > { %2392 = vmatpush1.bf16.msra.mxu0 %v4384_v43  ;;  %2423 = vmatprep.mubr.bf16.mxu0 %v2057_v51  ;;  %v4446_v43 = vld [vmem:[%s5664_s1 + $0x668] ss:$12 sps:$4 sm:$0xff]  }
  0xce   : > { %4105 = vmatmul.mubr.msk.bf16.vlgmr.msra.gmra.mxu1 %vm694_vm0, %v5077_v53  ;;  %2393 = vmatprep.subr.bf16.mxu0 %v4392_v48  ;;  %v4396_v53 = vld [vmem:[%s5664_s1 + $0x618] ss:$12 sps:$4 sm:$0xff]   ;;  %v4447_v48 = vld [vmem:[%s5664_s1 + $0x5a8] ss:$12 sps:$4 sm:$0xff]  }
  0xcf   : > { %2443 = vmatpush1.bf16.msra.mxu1 %v4387_v47  ;;  %2466 = vmatprep.mubr.bf16.mxu1 %v4576_v2  ;;  %v2048_v47 = vrot.slane %v2046_v40, 2  ;;  %v4495_v40 = vld [vmem:[%s5664_s1 + $0x7b4] ss:$12 sps:$4 sm:$0xff]  }
  0xd0   : > { %2444 = vmatprep.subr.bf16.mxu1 %v4395_v52  ;;  %v4454_v52 = vld [vmem:[%s5664_s1 + $0x694] ss:$12 sps:$4 sm:$0xff]  }
  0xd1   : > { %2394 = vmatpush1.bf16.msra.mxu0 %v4390_v54  ;;  %v4451_v54 = vld [vmem:[%s5664_s1 + $0x770] ss:$12 sps:$4 sm:$0xff]  }
  0xd2   : > { %2395 = vmatprep.subr.bf16.mxu0 %v4398_v55 }
  0xd3   : > { %2445 = vmatpush1.bf16.msra.mxu1 %v4393_v57 }
  0xd4   : > { %2446 = vmatprep.subr.bf16.mxu1 %v4401_v58  ;;  %v4458_v58 = vld [vmem:[%s5664_s1 + $0x67c] ss:$12 sps:$4 sm:$0xff]  }
  0xd5   : > { %2396 = vmatpush1.bf16.msra.mxu0 %v4396_v53  ;;  %v4455_v53 = vld [vmem:[%s5664_s1 + $0x758] ss:$12 sps:$4 sm:$0xff]  }
  0xd6   : > { %2397 = vmatprep.subr.bf16.mxu0 %v4404_v59 }
  0xd7   : > { %2447 = vmatpush1.bf16.msra.mxu1 %v4399_v62 }
  0xd8   : > { %2448 = vmatprep.subr.bf16.mxu1 %v4407_v63  ;;  %v4462_v63 = vld [vmem:[%s5664_s1 + $0x664] ss:$12 sps:$4 sm:$0xff]  }
  0xd9   : > { %2398 = vmatpush1.bf16.msra.mxu0 %v4402_v0  ;;  %v4459_v0 = vld [vmem:[%s5664_s1 + $0x740] ss:$12 sps:$4 sm:$0xff]  }
  0xda   : > { %2399 = vmatprep.subr.bf16.mxu0 %v4410_v1 }
  0xdb   : > { %2449 = vmatpush1.bf16.msra.mxu1 %v4405_v5 }
  0xdc   : > { %4018 = vmatprep.subr.bf16.mxu1 %v4411_v6  ;;  %v4460_v6 = vld [vmem:[%s5664_s1 + $0x660] ss:$12 sps:$4 sm:$0xff]  }
  0xdd   : > { %2400 = vmatpush1.bf16.msra.mxu0 %v4408_v7  ;;  %v5348_v35 = vpop.f32.mrf.mxu1  ;;  %v4466_v7 = vld [vmem:[%s5664_s1 + $0x82c] ss:$12 sps:$4 sm:$0xff]  }
  0xde   : > { %3791 = vmatmul.mubr.msk.bf16.vlgmr.msra.gmra.mxu1 %vm694_vm0, %v5276_v8  ;;  %2401 = vmatprep.subr.bf16.mxu0 %v4415_v9  ;;  %v4463_v9 = vld [vmem:[%s5664_s1 + $0x728] ss:$12 sps:$4 sm:$0xff]  }
  0xdf   : > { %4019 = vmatpush3.bf16.msra.mxu1 %v4412_v10  ;;  %2509 = vmatprep.mubr.bf16.mxu1 %v2057_v51  ;;  %v5362_v42 = vpop.f32.mrf.mxu1  ;;  %v2049_v51 = vor.u32 %v2048_v47, %v2045_v46  ;;  %v2572_v10 = vpack.c.bf16 %v2569_v4, %v2566_v3  ;;  %v4497_v46 = vld [vmem:[%s5664_s1 + $0x818] ss:$12 sps:$4 sm:$0xff]   ;;  %v4501_v47 = vld [vmem:[%s5664_s1 + $0x8c0] ss:$12 sps:$4 sm:$0xff]  }
  0xe0   : > { %4020 = vmatprep.subr.bf16.mxu1 %v4416_v12  ;;  %v4469_v12 = vld [vmem:[%s5664_s1 + $0x94c] ss:$12 sps:$4 sm:$0xff]  }
  0xe1   : > { %2402 = vmatpush1.bf16.msra.mxu0 %v4413_v13  ;;  %v5376_v49 = vpop.f32.mrf.mxu1  ;;  %v4464_v13 = vld [vmem:[%s5664_s1 + $0x828] ss:$12 sps:$4 sm:$0xff]   ;;  %v4521_v3 = vld [vmem:[%s5664_s1 + $0x860] ss:$12 sps:$4 sm:$0xff]   ;;  %v4518_v4 = vld [vmem:[%s5664_s1 + $0x8b8] ss:$12 sps:$4 sm:$0xff]  }
  0xe2   : > { %2403 = vmatprep.subr.bf16.mxu0 %v4420_v14  ;;  %v4472_v14 = vld [vmem:[%s5664_s1 + $0x814] ss:$12 sps:$4 sm:$0xff]  }
  0xe3   : > { %4021 = vmatpush3.bf16.msra.mxu1 %v4417_v15  ;;  %v5387_v55 = vpop.f32.mrf.mxu1  ;;  %v4467_v15 = vld [vmem:[%s5664_s1 + $0x948] ss:$12 sps:$4 sm:$0xff]  }
  0xe4   : > { %4022 = vmatprep.subr.bf16.mxu1 %v4421_v16  ;;  %v2659_v16 = vrot.slane %v2572_v10, 2 }
  0xe5   : > { %2404 = vmatpush1.bf16.msra.mxu0 %v4418_v17  ;;  %v4475_v17 = vld [vmem:[%s5664_s1 + $0x934] ss:$12 sps:$4 sm:$0xff]  }
  0xe6   : > { %2405 = vmatprep.subr.bf16.mxu0 %v4425_v18  ;;  %v4470_v18 = vld [vmem:[%s5664_s1 + $0x810] ss:$12 sps:$4 sm:$0xff]  }
  0xe7   : > { %4023 = vmatpush3.bf16.msra.mxu1 %v4422_v19 }
  0xe8   : > { %4024 = vmatprep.subr.bf16.mxu1 %v4426_v20  ;;  %v4478_v20 = vld [vmem:[%s5664_s1 + $0x7fc] ss:$12 sps:$4 sm:$0xff]  }
  0xe9   : > { %2406 = vmatpush1.bf16.msra.mxu0 %v4423_v21 }
  0xea   : > { %2407 = vmatprep.subr.bf16.mxu0 %v4430_v22  ;;  %v4473_v22 = vld [vmem:[%s5664_s1 + $0x930] ss:$12 sps:$4 sm:$0xff]  }
  0xeb   : > { %4025 = vmatpush3.bf16.msra.mxu1 %v4427_v23 }
  0xec   : > { %4026 = vmatprep.subr.bf16.mxu1 %v4431_v25 }
  0xed   : > { %2408 = vmatpush2.bf16.msra.mxu0 %v4428_v24  ;;  %v4476_v24 = vld [vmem:[%s5664_s1 + $0x7f8] ss:$12 sps:$4 sm:$0xff]  }
  0xee   : > { %2409 = vmatprep.subr.bf16.mxu0 %v4435_v27 }
  0xef   : > { %4027 = vmatpush3.bf16.msra.mxu1 %v4432_v26  ;;  %v4484_v26 = vld [vmem:[%s5664_s1 + $0x7e4] ss:$12 sps:$4 sm:$0xff]  }
  0xf0   : > { %4028 = vmatprep.subr.bf16.mxu1 %v4436_v28 }
  0xf1   : > { %2410 = vmatpush2.bf16.msra.mxu0 %v4433_v31  ;;  %v4487_v31 = vld [vmem:[%s5664_s1 + $0x904] ss:$12 sps:$4 sm:$0xff]  }
  0xf2   : > { %2411 = vmatprep.subr.bf16.mxu0 %v4440_v32  ;;  %v4482_v32 = vld [vmem:[%s5664_s1 + $0x7e0] ss:$12 sps:$4 sm:$0xff]  }
  0xf3   : > { %4029 = vmatpush3.bf16.msra.mxu1 %v4437_v34  ;;  %v2573_v34 = vpack.c.bf16 %v2570_v30, %v2567_v29 }
  0xf4   : > { %4030 = vmatprep.subr.bf16.mxu1 %v4441_v36  ;;  %v4485_v36 = vld [vmem:[%s5664_s1 + $0x900] ss:$12 sps:$4 sm:$0xff]  }
  0xf5   : > { %2412 = vmatpush2.bf16.msra.mxu0 %v4438_v37  ;;  %v4491_v37 = vld [vmem:[%s5664_s1 + $0x8f0] ss:$12 sps:$4 sm:$0xff]   ;;  %v5487_v39 = vrot.slane %v2573_v34, 2  ;;  %v4539_v34 = vld [vmem:[%s5664_s1 + $0x920] ss:$12 sps:$4 sm:$0xff]  }
  0xf6   : > { %2413 = vmatprep.subr.bf16.mxu0 %v4445_v38  ;;  %v4488_v38 = vld [vmem:[%s5664_s1 + $0x7c8] ss:$12 sps:$4 sm:$0xff]  }
  0xf7   : > { %4031 = vmatpush3.bf16.msra.mxu1 %v4442_v41  ;;  %v4492_v41 = vld [vmem:[%s5664_s1 + $0x830] ss:$12 sps:$4 sm:$0xff]  }
  0xf8   : > { %4032 = vmatprep.subr.bf16.mxu1 %v4446_v43  ;;  %v4496_v43 = vld [vmem:[%s5664_s1 + $0x8d8] ss:$12 sps:$4 sm:$0xff]  }
  0xf9   : > { %2414 = vmatpush2.bf16.msra.mxu0 %v4443_v44  ;;  %v4493_v44 = vld [vmem:[%s5664_s1 + $0x7b0] ss:$12 sps:$4 sm:$0xff]  }
  0xfa   : > { %2415 = vmatprep.subr.bf16.mxu0 %v4450_v45  ;;  %v4500_v45 = vld [vmem:[%s5664_s1 + $0x79c] ss:$12 sps:$4 sm:$0xff]  }
  0xfb   : > { %4033 = vmatpush3.bf16.msra.mxu1 %v4447_v48  ;;  %v4498_v48 = vld [vmem:[%s5664_s1 + $0x798] ss:$12 sps:$4 sm:$0xff]  }
  0xfc   : > { %4108 = vmatprep.subr.bf16.mxu1 %v4577_v11 }
  0xfd   : > { %2416 = vmatpush2.bf16.msra.mxu0 %v4448_v50  ;;  %v3953_v57 = vpop.f32.mrf.mxu1  ;;  %v4505_v50 = vld [vmem:[%s5664_s1 + $0x784] ss:$12 sps:$4 sm:$0xff]  }
  0xfe   : > { %2510 = vmatmul.mubr.bf16.vlgmr.msra.gmra.mxu1 %v2049_v51  ;;  %2417 = vmatprep.subr.bf16.mxu0 %v4454_v52  ;;  %v4506_v52 = vld [vmem:[%s5664_s1 + $0x8a8] ss:$12 sps:$4 sm:$0xff]  }
  0xff   : > { %4109 = vmatpush3.bf16.msra.mxu1 %v4451_v54  ;;  %4116 = vmatprep.mubr.msk.bf16.mxu1 %vm4578_vm1, %v4577_v11  ;;  %v3954_v59 = vpop.f32.mrf.mxu1  ;;  %v4503_v54 = vld [vmem:[%s5664_s1 + $0x780] ss:$12 sps:$4 sm:$0xff]  }
 0x100   : > { %4110 = vmatprep.subr.bf16.mxu1 %v4577_v11  ;;  %v3955_v60 = vadd.f32 %v3954_v59, %v3953_v57  ;;  %v4507_v57 = vld [vmem:[%s5664_s1 + $0x7e8] ss:$12 sps:$4 sm:$0xff]  }
 0x101   : > { %2418 = vmatpush2.bf16.msra.mxu0 %v4452_v56  ;;  %v3956_v62 = vpop.f32.mrf.mxu1  ;;  %v4510_v56 = vld [vmem:[%s5664_s1 + $0x8ec] ss:$12 sps:$4 sm:$0xff]   ;;  %v4515_v59 = vld [vmem:[%s5664_s1 + $0x8d4] ss:$12 sps:$4 sm:$0xff]  }
 0x102   : > { %2419 = vmatprep.subr.bf16.mxu0 %v4458_v58  ;;  %v4511_v58 = vld [vmem:[%s5664_s1 + $0x890] ss:$12 sps:$4 sm:$0xff]  }
 0x103   : > { %4111 = vmatpush3.bf16.msra.mxu1 %v4455_v53  ;;  %v3957_v1 = vpop.f32.mrf.mxu1  ;;  %v4508_v53 = vld [vmem:[%s5664_s1 + $0x8e8] ss:$12 sps:$4 sm:$0xff]  }
 0x104   : > { %4112 = vmatprep.subr.bf16.mxu1 %v4577_v11  ;;  %v3958_v5 = vadd.f32 %v3957_v1, %v3956_v62  ;;  %v4513_v62 = vld [vmem:[%s5664_s1 + $0x8d0] ss:$12 sps:$4 sm:$0xff]  }
 0x105   : > { %2420 = vmatpush2.bf16.msra.mxu0 %v4456_v61  ;;  %v4516_v61 = vld [vmem:[%s5664_s1 + $0x878] ss:$12 sps:$4 sm:$0xff]  }
 0x106   : > { %2421 = vmatprep.subr.bf16.mxu0 %v4462_v63  ;;  %v4520_v63 = vld [vmem:[%s5664_s1 + $0x8bc] ss:$12 sps:$4 sm:$0xff]  }
 0x107   : > { %4113 = vmatpush3.bf16.msra.mxu1 %v4459_v0  ;;  %v4517_v0 = vld [vmem:[%s5664_s1 + $0x7b8] ss:$12 sps:$4 sm:$0xff]  }
 0x108   : > { %4114 = vmatprep.subr.bf16.mxu1 %v4577_v11 }
 0x109   : > { %2422 = vmatpush2.bf16.msra.mxu0 %v4460_v6  ;;  %v4522_v6 = vld [vmem:[%s5664_s1 + $0x7a0] ss:$12 sps:$4 sm:$0xff]  }
 0x10a   : > { %2986 = vmatprep.subr.bf16.mxu0 %v4466_v7  ;;  %v2565_v7 = vld [vmem:[%s4655_s18] sm:$0xf0] }
 0x10b   : > { %4115 = vmatpush3.bf16.msra.mxu1 %v4463_v9  ;;  %v2568_v9 = vld [vmem:[%s4655_s18 + $0x18] sm:$0xff] }
 0x10c   : > { %2424 = vmatmul.mubr.bf16.vlgmr.msra.gmra.mxu0 %v2049_v51  ;;  %3037 = vmatprep.subr.bf16.mxu1 %v4469_v12  ;;  %v4502_v51 = vld [vmem:[%s5664_s1 + $0x800] ss:$12 sps:$4 sm:$0xff]   ;;  %v4526_v12 = vld [vmem:[%s5664_s1 + $0x848] ss:$12 sps:$4 sm:$0xff]  }
 0x10d   : > { %2987 = vmatpush1.bf16.msra.mxu0 %v4464_v13  ;;  %3018 = vmatprep.mubr.bf16.mxu0 %v2659_v16  ;;  %v859_v19 = vpop.f32.mrf.mxu1  ;;  %v4523_v13 = vld [vmem:[%s5664_s1 + $0x8a0] ss:$12 sps:$4 sm:$0xff]  }
 0x10e   : > { %4117 = vmatmul.mubr.msk.bf16.vlgmr.msra.gmra.mxu1 %vm694_vm0, %v5276_v8  ;;  %2988 = vmatprep.subr.bf16.mxu0 %v4472_v14  ;;  %v5447_v21 = vadd.f32 %v3955_v60, %v859_v19  ;;  %v4481_v8 = vld [vmem:[%s5664_s1 + $0x91c] ss:$12 sps:$4 sm:$0xff]   ;;  %v4530_v14 = vld [vmem:[%s5664_s1 + $0x88c] ss:$12 sps:$4 sm:$0xff]  }
 0x10f   : > { %3038 = vmatpush1.bf16.msra.mxu1 %v4467_v15  ;;  %3061 = vmatprep.mubr.bf16.mxu1 %v4576_v2  ;;  %v4082_v23 = vpop.f32.mrf.mxu1  ;;  %v4479_v2 = vld [vmem:[%s5664_s1 + $0x918] ss:$12 sps:$4 sm:$0xff]   ;;  %v4512_v60 = vld [vmem:[%s5664_s1 + $0x7d0] ss:$12 sps:$4 sm:$0xff]   ;;  %v2571_v15 = vpack.c.bf16 %v2568_v9, %v2565_v7 }
 0x110   : > { %3039 = vmatprep.subr.bf16.mxu1 %v4475_v17 }
 0x111   : > { %2989 = vmatpush1.bf16.msra.mxu0 %v4470_v18  ;;  %v862_v25 = vpop.f32.mrf.mxu1  ;;  %v4528_v18 = vld [vmem:[%s5664_s1 + $0x888] ss:$12 sps:$4 sm:$0xff]   ;;  %v2658_v19 = vrot.slane %v2571_v15, 2 }
 0x112   : > { %2990 = vmatprep.subr.bf16.mxu0 %v4478_v20  ;;  %v5462_v27 = vadd.f32 %v3958_v5, %v862_v25  ;;  %v4525_v5 = vld [vmem:[%s5664_s1 + $0x8a4] ss:$12 sps:$4 sm:$0xff]   ;;  %v4534_v20 = vld [vmem:[%s5664_s1 + $0x874] ss:$12 sps:$4 sm:$0xff]  }
 0x113   : > { %3040 = vmatpush1.bf16.msra.mxu1 %v4473_v22  ;;  %v4083_v28 = vpop.f32.mrf.mxu1  ;;  %v4531_v22 = vld [vmem:[%s5664_s1 + $0x950] ss:$12 sps:$4 sm:$0xff]  }
 0x114   : > { %3041 = vmatprep.subr.bf16.mxu1 %v4481_v8  ;;  %v4532_v8 = vld [vmem:[%s5664_s1 + $0x870] ss:$12 sps:$4 sm:$0xff]   ;;  %v4536_v28 = vld [vmem:[%s5664_s1 + $0x858] ss:$12 sps:$4 sm:$0xff]  }
 0x115   : > { %2991 = vmatpush1.bf16.msra.mxu0 %v4476_v24  ;;  %v732_v24 = vpop.f32.mrf.mxu0 }
 0x116   : > { %2992 = vmatprep.subr.bf16.mxu0 %v4484_v26  ;;  %v4538_v26 = vld [vmem:[%s5664_s1 + $0x85c] ss:$12 sps:$4 sm:$0xff]  }
 0x117   : > { %3042 = vmatpush1.bf16.msra.mxu1 %v4479_v2  ;;  %v4535_v2 = vld [vmem:[%s5664_s1 + $0x938] ss:$12 sps:$4 sm:$0xff]  }
 0x118   : > { %3043 = vmatprep.subr.bf16.mxu1 %v4487_v31  ;;  %v734_v31 = vpop.f32.mrf.mxu0 }
 0x119   : > { %2993 = vmatpush1.bf16.msra.mxu0 %v4482_v32 }
 0x11a   : > { %2994 = vmatprep.subr.bf16.mxu0 %v4490_v33  ;;  %v4542_v33 = vld [vmem:[%s5664_s1 + $0x844] ss:$12 sps:$4 sm:$0xff]  }
 0x11b   : > { %3044 = vmatpush1.bf16.msra.mxu1 %v4485_v36 }
 0x11c   : > { %4045 = vmatprep.subr.bf16.mxu1 %v4491_v37 }
 0x11d   : > { %2995 = vmatpush1.bf16.msra.mxu0 %v4488_v38  ;;  %v5557_v1 = vpop.f32.mrf.mxu1 }
 0x11e   : > { %3933 = vmatmul.mubr.msk.bf16.vlgmr.msra.gmra.mxu1 %vm694_vm0, %v5487_v39  ;;  %2996 = vmatprep.subr.bf16.mxu0 %v4495_v40  ;;  %v4540_v40 = vld [vmem:[%s5664_s1 + $0x840] ss:$12 sps:$4 sm:$0xff]  }
 0x11f   : > { %4046 = vmatpush3.bf16.msra.mxu1 %v4492_v41  ;;  %3104 = vmatprep.mubr.bf16.mxu1 %v2659_v16  ;;  %v5573_v10 = vpop.f32.mrf.mxu1  ;;  %v4527_v16 = vld [vmem:[%s5664_s1 + $0x788] ss:$12 sps:$4 sm:$0xff]   ;;  %v736_v41 = vpop.f32.mrf.mxu0 }
 0x120   : > { %4047 = vmatprep.subr.bf16.mxu1 %v4496_v43  ;;  %v4543_v43 = vld [vmem:[%s5664_s1 + $0x908] ss:$12 sps:$4 sm:$0xff]  }
 0x121   : > { %2997 = vmatpush1.bf16.msra.mxu0 %v4493_v44  ;;  %v5587_v17 = vpop.f32.mrf.mxu1 }
 0x122   : > { %2998 = vmatprep.subr.bf16.mxu0 %v4500_v45  ;;  %v776_v45 = vadd.f32 %v5348_v35, %v732_v24 }
 0x123   : > { %4048 = vmatpush3.bf16.msra.mxu1 %v4497_v46  ;;  %v1272_v23 = vpop.f32.mrf.mxu1 }
 0x124   : > { %4049 = vmatprep.subr.bf16.mxu1 %v4501_v47  ;;  %v778_v47 = vadd.f32 %v5362_v42, %v734_v31 }
 0x125   : > { %2999 = vmatpush1.bf16.msra.mxu0 %v4498_v48 }
 0x126   : > { %3000 = vmatprep.subr.bf16.mxu0 %v4505_v50 }
 0x127   : > { %4050 = vmatpush3.bf16.msra.mxu1 %v4502_v51 }
 0x128   : > { %4051 = vmatprep.subr.bf16.mxu1 %v4506_v52  ;;  %v780_v52 = vadd.f32 %v5376_v49, %v736_v41 }
 0x129   : > { %3001 = vmatpush1.bf16.msra.mxu0 %v4503_v54 }
 0x12a   : > { %3002 = vmatprep.subr.bf16.mxu0 %v4510_v56 }
 0x12b   : > { %4052 = vmatpush3.bf16.msra.mxu1 %v4507_v57 }
 0x12c   : > { %4053 = vmatprep.subr.bf16.mxu1 %v4511_v58 }
 0x12d   : > { %3003 = vmatpush2.bf16.msra.mxu0 %v4508_v53 }
 0x12e   : > { %3004 = vmatprep.subr.bf16.mxu0 %v4515_v59 }
 0x12f   : > { %4054 = vmatpush3.bf16.msra.mxu1 %v4512_v60 }
 0x130   : > { %4055 = vmatprep.subr.bf16.mxu1 %v4516_v61 }
 0x131   : > { %3005 = vmatpush2.bf16.msra.mxu0 %v4513_v62 }
 0x132   : > { %3006 = vmatprep.subr.bf16.mxu0 %v4520_v63 }
 0x133   : > { %4056 = vmatpush3.bf16.msra.mxu1 %v4517_v0 }
 0x134   : > { %4057 = vmatprep.subr.bf16.mxu1 %v4521_v3 }
 0x135   : > { %3007 = vmatpush2.bf16.msra.mxu0 %v4518_v4 }
 0x136   : > { %3008 = vmatprep.subr.bf16.mxu0 %v4525_v5 }
 0x137   : > { %4058 = vmatpush3.bf16.msra.mxu1 %v4522_v6 }
 0x138   : > { %4059 = vmatprep.subr.bf16.mxu1 %v4526_v12 }
 0x139   : > { %3009 = vmatpush2.bf16.msra.mxu0 %v4523_v13 }
 0x13a   : > { %3010 = vmatprep.subr.bf16.mxu0 %v4530_v14 }
 0x13b   : > { %4060 = vmatpush3.bf16.msra.mxu1 %v4527_v16 }
 0x13c   : > { %4120 = vmatprep.subr.bf16.mxu1 %v4577_v11 }
 0x13d   : > { %3011 = vmatpush2.bf16.msra.mxu0 %v4528_v18  ;;  %v3980_v25 = vpop.f32.mrf.mxu1 }
 0x13e   : > { %3105 = vmatmul.mubr.bf16.vlgmr.msra.gmra.mxu1 %v2658_v19  ;;  %3012 = vmatprep.subr.bf16.mxu0 %v4534_v20 }
 0x13f   : > { %4121 = vmatpush3.bf16.msra.mxu1 %v4531_v22  ;;  %4128 = vmatprep.mubr.msk.bf16.mxu1 %vm4578_vm1, %v4577_v11  ;;  %v3981_v29 = vpop.f32.mrf.mxu1 }
 0x140   : > { %4122 = vmatprep.subr.bf16.mxu1 %v4577_v11  ;;  %v3982_v30 = vadd.f32 %v3981_v29, %v3980_v25 }
 0x141   : > { %3013 = vmatpush2.bf16.msra.mxu0 %v4532_v8  ;;  %v3983_v32 = vpop.f32.mrf.mxu1 }
 0x142   : > { %3014 = vmatprep.subr.bf16.mxu0 %v4538_v26  ;;  %v1310_v36 = vadd.f32 %v3982_v30, %v5447_v21  ;;  %v738_v21 = vpop.f32.mrf.mxu0 }
 0x143   : > { %4123 = vmatpush3.bf16.msra.mxu1 %v4535_v2  ;;  %v3984_v37 = vpop.f32.mrf.mxu1  ;;  %v782_v35 = vadd.f32 %v5387_v55, %v738_v21 }
 0x144   : > { %4124 = vmatprep.subr.bf16.mxu1 %v4577_v11  ;;  %v3985_v38 = vadd.f32 %v3984_v37, %v3983_v32 }
 0x145   : > { %3015 = vmatpush2.bf16.msra.mxu0 %v4536_v28 }
 0x146   : > { %3016 = vmatprep.subr.bf16.mxu0 %v4542_v33  ;;  %v1313_v44 = vadd.f32 %v3985_v38, %v5462_v27 }
 0x147   : > { %4125 = vmatpush3.bf16.msra.mxu1 %v4539_v34 }
 0x148   : > { %4126 = vmatprep.subr.bf16.mxu1 %v4577_v11 }
 0x149   : > { %3017 = vmatpush2.bf16.msra.mxu0 %v4540_v40 }
 0x14b   : > { %4127 = vmatpush3.bf16.msra.mxu1 %v4543_v43 }
 0x14c   : > { %v1223_v46 = vpop.f32.mrf.mxu0  ;;  %3019 = vmatmul.mubr.bf16.vlgmr.msra.gmra.mxu0 %v2658_v19 }
 0x14d   : > { %v1224_v48 = vadd.f32 %v1223_v46, %v776_v45  ;;  %v1350_v50 = vpop.f32.mrf.mxu1 }
 0x14e   : > { %4129 = vmatmul.mubr.msk.bf16.vlgmr.msra.gmra.mxu1 %vm694_vm0, %v5487_v39  ;;  %v1225_v51 = vpop.f32.mrf.mxu0  ;;  %v1351_v11 = vadd.f32 %v1350_v50, %v1310_v36 }
 0x14f   : > { %v1267_v27 = vadd.f32 %v5557_v1, %v1224_v48  ;;  %v1226_v54 = vadd.f32 %v1225_v51, %v778_v47  ;;  %v4094_v56 = vpop.f32.mrf.mxu1 }
 0x150   : > { %v1227_v57 = vpop.f32.mrf.mxu0 }
 0x151   : > { %v1269_v58 = vadd.f32 %v5573_v10, %v1226_v54  ;;  %v1228_v53 = vadd.f32 %v1227_v57, %v780_v52  ;;  %v1353_v42 = vpop.f32.mrf.mxu1 }
 0x152   : > { %v1229_v59 = vpop.f32.mrf.mxu0  ;;  %v1354_v61 = vadd.f32 %v1353_v42, %v1313_v44 }
 0x153   : > { %v1271_v60 = vadd.f32 %v5587_v17, %v1228_v53  ;;  %v1230_v39 = vadd.f32 %v1229_v59, %v782_v35  ;;  %v4095_v62 = vpop.f32.mrf.mxu1 }
 0x155   : > { %v1273_v63 = vadd.f32 %v1272_v23, %v1230_v39 }
 0x15d   : > { %v1855_v49 = vpop.f32.mrf.mxu1 }
 0x15f   : > { %v1857_v0 = vpop.f32.mrf.mxu1 }
 0x161   : > { %v1859_v1 = vpop.f32.mrf.mxu1 }
 0x163   : > { %v1861_v3 = vpop.f32.mrf.mxu1 }
 0x17d   : > { %v4007_v4 = vpop.f32.mrf.mxu1 }
 0x17f   : > { %v4008_v5 = vpop.f32.mrf.mxu1 }
 0x180   : > { %v4009_v6 = vadd.f32 %v4008_v5, %v4007_v4 }
 0x181   : > { %v4010_v7 = vpop.f32.mrf.mxu1 }
 0x183   : > { %v4011_v55 = vpop.f32.mrf.mxu1 }
 0x184   : > { %v4012_v9 = vadd.f32 %v4011_v55, %v4010_v7 }
 0x18c   : > { %v1812_v10 = vpop.f32.mrf.mxu0 }
 0x18d   : > { %v1856_v12 = vadd.f32 %v1855_v49, %v1812_v10 }
 0x18e   : > { %v1939_v13 = vpop.f32.mrf.mxu1  ;;  %v1814_v14 = vpop.f32.mrf.mxu0 }
 0x18f   : > { %v1946_v15 = vadd.f32 %v1856_v12, %v1267_v27  ;;  %v1940_v16 = vadd.f32 %v4009_v6, %v1939_v13  ;;  %v1858_v17 = vadd.f32 %v1857_v0, %v1814_v14  ;;  %v3162_v0 = vlaneseq  ;;  %v3160_v6 = vld [vmem:[%s5665_s2] sm:$0x7] }
 0x190   : > { %v4106_v18 = vpop.f32.mrf.mxu1  ;;  %v1816_v19 = vpop.f32.mrf.mxu0 }
 0x191   : > { %v1948_v20 = vadd.f32 %v1940_v16, %v1351_v11  ;;  %v1947_v22 = vadd.f32 %v1858_v17, %v1269_v58  ;;  %v1860_v23 = vadd.f32 %v1859_v1, %v1816_v19 }
 0x192   : > { %v1942_v8 = vpop.f32.mrf.mxu1  ;;  %v1818_v24 = vpop.f32.mrf.mxu0 }
 0x193   : > { %v1949_v25 = vadd.f32 %v1860_v23, %v1271_v60  ;;  %v1943_v26 = vadd.f32 %v4012_v9, %v1942_v8  ;;  %v1862_v2 = vadd.f32 %v1861_v3, %v1818_v24  ;;  %v3163_v3 = vshrl.u32 %v3162_v0, 7 }
 0x194   : > { %v4107_v29 = vpop.f32.mrf.mxu1 }
 0x195   : > { %v1951_v30 = vadd.f32 %v1943_v26, %v1354_v61  ;;  %v1950_v28 = vadd.f32 %v1862_v2, %v1273_v63  ;;  %v3164_v5 = vsub.s32 0, %v3163_v3  ;;  %v3172_v7 = vsub.s32 2, %v3163_v3 }
 0x196   : > { %v3168_v55 = vsub.s32 1, %v3163_v3 }
 0x197   : > { %v3165_v14 = vrot.slane %v3160_v6, %v3164_v5  ;;  %v3173_v16 = vrot.slane %v3160_v6, %v3172_v7 }
 0x19e   : > { %v2468_v31 = vpop.f32.mrf.mxu1 }
 0x1a0   : > { %v2470_v32 = vpop.f32.mrf.mxu1 }
 0x1a2   : > { %v2472_v33 = vpop.f32.mrf.mxu1 }
 0x1a4   : > { %v2474_v34 = vpop.f32.mrf.mxu1 }
 0x1be   : > { %v4034_v36 = vpop.f32.mrf.mxu1 }
 0x1c0   : > { %v4035_v37 = vpop.f32.mrf.mxu1 }
 0x1c1   : > { %v4036_v38 = vadd.f32 %v4035_v37, %v4034_v36 }
 0x1c2   : > { %v4037_v40 = vpop.f32.mrf.mxu1 }
 0x1c4   : > { %v4038_v41 = vpop.f32.mrf.mxu1 }
 0x1c5   : > { %v4039_v43 = vadd.f32 %v4038_v41, %v4037_v40 }
 0x1cc   : > { %v2425_v44 = vpop.f32.mrf.mxu0 }
 0x1cd   : > { %v2469_v21 = vadd.f32 %v2468_v31, %v2425_v44 }
 0x1ce   : > { %v2552_v45 = vpop.f32.mrf.mxu1  ;;  %v2427_v46 = vpop.f32.mrf.mxu0 }
 0x1cf   : > { %v2559_v47 = vadd.f32 %v2469_v21, %v1946_v15  ;;  %v2553_v48 = vadd.f32 %v4036_v38, %v2552_v45  ;;  %v2471_v50 = vadd.f32 %v2470_v32, %v2427_v46 }
 0x1d0   : > { %v4118_v51 = vpop.f32.mrf.mxu1  ;;  %v2429_v52 = vpop.f32.mrf.mxu0 }
 0x1d1   : > { %v2561_v27 = vadd.f32 %v2553_v48, %v1948_v20  ;;  %v2560_v11 = vadd.f32 %v2471_v50, %v1947_v22  ;;  %v2473_v54 = vadd.f32 %v2472_v33, %v2429_v52  ;;  %v3169_v22 = vrot.slane %v3160_v6, %v3168_v55 }
 0x1d2   : > { %v2555_v56 = vpop.f32.mrf.mxu1  ;;  %v2431_v57 = vpop.f32.mrf.mxu0 }
 0x1d3   : > { %v2562_v35 = vadd.f32 %v2473_v54, %v1949_v25  ;;  %v2556_v58 = vadd.f32 %v4039_v43, %v2555_v56  ;;  %v2475_v53 = vadd.f32 %v2474_v34, %v2431_v57 }
 0x1d4   : > { %v4119_v42 = vpop.f32.mrf.mxu1 }
 0x1d5   : > { %v2564_v59 = vadd.f32 %v2556_v58, %v1951_v30  ;;  %v2563_v60 = vadd.f32 %v2475_v53, %v1950_v28 }
 0x1de   : > { %v3063_v61 = vpop.f32.mrf.mxu1 }
 0x1e0   : > { %v3065_v39 = vpop.f32.mrf.mxu1 }
 0x1e2   : > { %v3067_v62 = vpop.f32.mrf.mxu1 }
 0x1e4   : > { %v3069_v63 = vpop.f32.mrf.mxu1 }
 0x1fe   : > { %v4061_v49 = vpop.f32.mrf.mxu1 }
 0x200   : > { %v4062_v1 = vpop.f32.mrf.mxu1 }
 0x201   : > { %v4063_v12 = vadd.f32 %v4062_v1, %v4061_v49 }
 0x202   : > { %v4064_v4 = vpop.f32.mrf.mxu1 }
 0x204   : > { %v4065_v9 = vpop.f32.mrf.mxu1 }
 0x205   : > { %v4066_v29 = vadd.f32 %v4065_v9, %v4064_v4 }
 0x20c   : > { %v3020_v10 = vpop.f32.mrf.mxu0 }
 0x20d   : > { %v3064_v13 = vadd.f32 %v3063_v61, %v3020_v10 }
 0x20e   : > { %v3147_v15 = vpop.f32.mrf.mxu1  ;;  %v3022_v17 = vpop.f32.mrf.mxu0 }
 0x20f   : > { %v3154_v18 = vadd.f32 %v3064_v13, %v2559_v47  ;;  %v3148_v19 = vadd.f32 %v4063_v12, %v3147_v15  ;;  %v3066_v20 = vadd.f32 %v3065_v39, %v3022_v17 }
 0x210   : > { %v4130_v23 = vpop.f32.mrf.mxu1  ;;  %v3024_v8 = vpop.f32.mrf.mxu0 }
 0x211   : > { %v3177_v24 = vadd.f32 %v3165_v14, %v3154_v18  ;;  %v3156_v25 = vadd.f32 %v3148_v19, %v2561_v27  ;;  %v3155_v26 = vadd.f32 %v3066_v20, %v2560_v11  ;;  %v3068_v2 = vadd.f32 %v3067_v62, %v3024_v8 }
 0x212   : > { %v3150_v30 = vpop.f32.mrf.mxu1  ;;  %v3026_v28 = vpop.f32.mrf.mxu0 }
 0x213   : > { %v3183_v31 = vmin.f32 %v3177_v24, 0.0  ;;  %v3179_v32 = vadd.f32 %v3173_v16, %v3156_v25  ;;  %v5642_v33 = vadd.f32 %v3169_v22, %v3155_v26  ;;  %v3157_v34 = vadd.f32 %v3068_v2, %v2562_v35 }
 0x214   : > { %v3151_v36 = vadd.f32 %v4066_v29, %v3150_v30  ;;  %v3070_v37 = vadd.f32 %v3069_v63, %v3026_v28  ;;  %v4131_v38 = vpop.f32.mrf.mxu1  ;;  %vm3225_vm2 = vcmp.gt.f32.partialorder %v3177_v24, 0.0 }
 0x215   : > { %v3189_v40 = vmul.f32 0.5, %v3183_v31  ;;  %v3201_v41 = vmul.f32 1.442695, %v3183_v31  ;;  %v3185_v43 = vmin.f32 %v3179_v32, 0.0  ;;  %v3184_v44 = vmin.f32 %v5642_v33, 0.0 }
 0x216   : > { %v3180_v21 = vadd.f32 %v3165_v14, %v3157_v34  ;;  %v3159_v45 = vadd.f32 %v3151_v36, %v2564_v59  ;;  %v3158_v48 = vadd.f32 %v3070_v37, %v2563_v60  ;;  %vm3227_vm3 = vcmp.gt.f32.partialorder %v3179_v32, 0.0 }
 0x217   : > { %v3191_v46 = vmul.f32 0.5, %v3185_v43  ;;  %v3205_v47 = vmul.f32 1.442695, %v3185_v43  ;;  %4544 = vpow2.f32 %v3201_v41  ;;  %v3203_v50 = vmul.f32 1.442695, %v3184_v44 }
 0x218   : > { %v3186_v51 = vmin.f32 %v3180_v21, 0.0  ;;  %4546 = vtanh.f32 %v3189_v40  ;;  %v3190_v52 = vmul.f32 0.5, %v3184_v44  ;;  %v3182_v27 = vadd.f32 %v3173_v16, %v3159_v45 }
 0x219   : > { %v3181_v11 = vadd.f32 %v3169_v22, %v3158_v48  ;;  %4548 = vpow2.f32 %v3205_v47  ;;  %vm3226_vm4 = vcmp.gt.f32.partialorder %v5642_v33, 0.0  ;;  %vm3228_vm5 = vcmp.gt.f32.partialorder %v3180_v21, 0.0 }
 0x21a   : > { %v3207_v54 = vmul.f32 1.442695, %v3186_v51  ;;  %4550 = vtanh.f32 %v3191_v46  ;;  %v3192_v56 = vmul.f32 0.5, %v3186_v51  ;;  %v3188_v57 = vmin.f32 %v3182_v27, 0.0 }
 0x21b   : > { %v3187_v35 = vmin.f32 %v3181_v11, 0.0  ;;  %4552 = vpow2.f32 %v3203_v50  ;;  %vm3230_vm6 = vcmp.gt.f32.partialorder %v3182_v27, 0.0  ;;  %vm3229_vm7 = vcmp.gt.f32.partialorder %v3181_v11, 0.0 }
 0x21c   : > { %4554 = vtanh.f32 %v3190_v52  ;;  %v3194_v58 = vmul.f32 0.5, %v3188_v57  ;;  %v3211_v53 = vmul.f32 1.442695, %v3188_v57 }
 0x21d   : > { %4556 = vpow2.f32 %v3207_v54  ;;  %v3209_v42 = vmul.f32 1.442695, %v3187_v35  ;;  %v3193_v59 = vmul.f32 0.5, %v3187_v35 }
 0x21e   : > { %4558 = vtanh.f32 %v3192_v56 }
 0x21f   : > { %4560 = vpow2.f32 %v3211_v53 }
 0x220   : > { %4562 = vtanh.f32 %v3194_v58 }
 0x221   : > { %4564 = vpow2.f32 %v3209_v42 }
 0x222   : > { %4566 = vtanh.f32 %v3193_v59 }
 0x224   : > { %v4545_v60 = vpop.eup %4544 }
 0x225   : > { %v4547_v61 = vpop.eup %4546  ;;  %v3213_v39 = vadd.f32 1.0, %v4545_v60 }
 0x226   : > { %v4549_v62 = vpop.eup %4548 }
 0x227   : > { %v4551_v63 = vpop.eup %4550  ;;  %v3219_v49 = vmul.f32 %v4547_v61, %v3213_v39  ;;  %v3215_v0 = vadd.f32 1.0, %v4549_v62 }
 0x228   : > { %v4553_v1 = vpop.eup %4552 }
 0x229   : > { %v4555_v3 = vpop.eup %4554  ;;  %v3231_v4 = vsel %vm3225_vm2, %v3177_v24, %v3219_v49  ;;  %v3221_v5 = vmul.f32 %v4551_v63, %v3215_v0  ;;  %v3214_v6 = vadd.f32 1.0, %v4553_v1 }
 0x22a   : > { %v4557_v7 = vpop.eup %4556  ;;  %3237 = vst [vmem:[%s5650_s20] sm:$0xff] %v3231_v4 }
 0x22b   : > { %v4559_v55 = vpop.eup %4558  ;;  %v3233_v9 = vsel %vm3227_vm3, %v3179_v32, %v3221_v5  ;;  %v3220_v10 = vmul.f32 %v4555_v3, %v3214_v6  ;;  %v3216_v12 = vadd.f32 1.0, %v4557_v7 }
 0x22c   : > { %v4561_v13 = vpop.eup %4560  ;;  %3239 = vst [vmem:[%s5650_s20 + $0x10] sm:$0xff] %v3233_v9 }
 0x22d   : > { %v4563_v14 = vpop.eup %4562  ;;  %v3232_v15 = vsel %vm3226_vm4, %v5642_v33, %v3220_v10  ;;  %v3222_v16 = vmul.f32 %v4559_v55, %v3216_v12  ;;  %v3218_v17 = vadd.f32 1.0, %v4561_v13 }
 0x22e   : > { %v4565_v18 = vpop.eup %4564  ;;  %3238 = vst [vmem:[%s5650_s20 + $0x8] sm:$0xff] %v3232_v15 }
 0x22f   : > { %v3234_v19 = vsel %vm3228_vm5, %v3180_v21, %v3222_v16  ;;  %v3224_v20 = vmul.f32 %v4563_v14, %v3218_v17  ;;  %v3217_v22 = vadd.f32 1.0, %v4565_v18  ;;  %v4567_v23 = vpop.eup %4566 }
 0x230   : > { %3240 = vst [vmem:[%s5650_s20 + $0x18] sm:$0xf] %v3234_v19 }
 0x231   : > { %v3236_v8 = vsel %vm3230_vm6, %v3182_v27, %v3224_v20  ;;  %v3223_v24 = vmul.f32 %v4567_v23, %v3217_v22 }
 0x232   : > { %3242 = vst [vmem:[%s5650_s20 + $0x28] sm:$0xf] %v3236_v8 }
 0x233   : > { %v3235_v25 = vsel %vm3229_vm7, %v3181_v11, %v3223_v24 }
 0x234   : > { %3241 = vst [vmem:[%s5650_s20 + $0x20] sm:$0xf] %v3235_v25 }
 0x235 PF: > { %s13_s12 = sadd.s32 1, %s4574_s12  }
 0x236   : > { %p10_p4 = scmp.ge.s32.totalorder %s13_s12, 4  }
 0x238   :  { %12 = sbr.rel (!%p10_p4) target bundleno = 1 (0x1), region = 66 }

// kernel: autoencoder_forward.9
= control target key start
LH: loop header
LB: loop body
LE: loop exit
PB: predicated region body
PF: predicated region fallthrough
CT: control target
= control target key end

     0   :  { %s2496_s12 = smov 0   ;;  %s2946_s0 = inlined_call_operand.vmem [shape: f32[2,32,320], index: 0, kind: input, shape index: {}]   ;;  %s2947_s1 = inlined_call_operand.vmem [shape: bf16[5,320,112], index: 1, kind: input, shape index: {}]   ;;  %s2948_s2 = inlined_call_operand.vmem [shape: f32[1,112], index: 2, kind: input, shape index: {}]   ;;  %s2949_s3 = inlined_call_operand.vmem [shape: f32[2,28,112], index: 3, kind: output, shape index: {}]  }
   0x1 LB: > { %s1829_s13 = sadd.s32 4294967295, %s2474_s12   ;;  %p1833_p0 = scmp.ge.s32.totalorder %s2474_s12, 1  ;;  %s2474_s12 = sphi %s2496_s12, %s13_s12  }
   0x2   : > { %p137_p1 = scmp.lt.s32.totalorder %s2474_s12, 3 }
   0x4   : > { %p138_p2 = pnand %p1833_p0, %p137_p1 }
   0x6   : > { %141 = sbr.rel (%p138_p2) target bundleno = 371 (0x173), region = 32 }
   0xb   : > { %v2350_v0 = vld [vmem:[%s2947_s1 + $0x118] sm:$0xff]   ;;  %p161_p3 = scmp.lt.s32.totalorder %s1829_s13, 1  ;;  %v2353_v3 = vld [vmem:[%s2947_s1 + $0x110] sm:$0xff]   ;;  %v2356_v6 = vld [vmem:[%s2947_s1 + $0x108] sm:$0xff]   ;;  %vm283_vm0 = vsmask.f32 7424 }
   0xc   : > { %v2351_v1 = vld [vmem:[%s2947_s1 + $0x138] sm:$0xff]   ;;  %2111 = vmatprep.subr.bf16.mxu0 %v2350_v0  ;;  %v2354_v4 = vld [vmem:[%s2947_s1 + $0x130] sm:$0xff]   ;;  %v2357_v7 = vld [vmem:[%s2947_s1 + $0x128] sm:$0xff]   ;;  %vm453_vm1 = vcmask 523264   ;;  %vm841_vm2 = vcmask 1046528   ;;  %vm1479_vm4 = vcmask 1045504  }
   0xd   : > { %v2352_v2 = vld [vmem:[%s2947_s1 + $0xd8] sm:$0xff]   ;;  %s2953_s13 = smov (!%p161_p3, %s1829_s13), 1  ;;  %2281 = vmatprep.subr.bf16.mxu1 %v2351_v1  ;;  %v2355_v5 = vld [vmem:[%s2947_s1 + $0xd0] sm:$0xff]   ;;  %v2358_v8 = vld [vmem:[%s2947_s1 + $0xc8] sm:$0xff]   ;;  %vm1136_vm3 = vsmask.f32 6400 }
   0xe   : > { %2112 = vmatpush3.bf16.msra.mxu0 %v2352_v2  ;;  %2282 = vmatpush3.bf16.msra.mxu1 %v2351_v1  ;;  %s2341_s26 = smul.u32 96, %s2953_s13  ;;  %v2359_v9 = vld [vmem:[%s2947_s1 + $0x100] sm:$0xff]   ;;  %v2362_v18 = vld [vmem:[%s2947_s1 + $0xf8] sm:$0xff]   ;;  %v2366_v27 = vld [vmem:[%s2947_s1 + $0xf0] sm:$0xff]   ;;  %vm1768_vm5 = vcmask 916480   ;;  %vm1772_vm8 = vcmask 912384  }
   0xf   : > { %2113 = vmatprep.subr.bf16.mxu0 %v2353_v3  ;;  %2283 = vmatprep.subr.bf16.mxu1 %v2354_v4  ;;  %v2360_v10 = vld [vmem:[%s2947_s1 + $0x120] sm:$0xff]   ;;  %v2363_v21 = vld [vmem:[%s2947_s1 + $0x78] sm:$0xff]   ;;  %v2368_v31 = vld [vmem:[%s2947_s1 + $0xb0] sm:$0xff]  }
  0x10   : > { %s2540_s10 = scalar_lea.vmem %s2946_s0, %s2341_s26  ;;  %v2361_v11 = vld [vmem:[%s2947_s1 + $0xc0] sm:$0xff]   ;;  %v2364_v22 = vld [vmem:[%s2947_s1 + $0xb8] sm:$0xff]   ;;  %v2367_v33 = vld [vmem:[%s2947_s1 + $0x70] sm:$0xff]   ;;  %s2110_s26 = sshll.u32 %s2953_s13, 5 }
  0x11   : > { %v2549_v12 = vld [vmem:[%s2540_s10 + $0x28] sm:$0xff]  ;;  %v2552_v13 = vld [vmem:[%s2540_s10 + $0x40] sm:$0xff]  ;;  %v232_v14 = vld [vmem:[%s2540_s10 + $0x10] sm:$0xfe]  ;;  %s170_s29 = scalar_lea.vmem %s2949_s3, %s2110_s26 }
  0x12   : > { %2114 = vmatpush3.bf16.msra.mxu0 %v2355_v5  ;;  %2284 = vmatpush3.bf16.msra.mxu1 %v2354_v4  ;;  %v235_v15 = vld [vmem:[%s2540_s10 + $0x58] sm:$0x1f]  ;;  %v238_v16 = vpack.c.bf16 %v2549_v12, %v232_v14  ;;  %v2370_v34 = vld [vmem:[%s2947_s1 + $0xe8] sm:$0xff]   ;;  %v2369_v35 = vld [vmem:[%s2947_s1 + $0x30] sm:$0xff]  }
  0x13   : > { %2115 = vmatprep.subr.bf16.mxu0 %v2356_v6  ;;  %2285 = vmatprep.subr.bf16.mxu1 %v2357_v7  ;;  %v241_v17 = vpack.c.bf16 %v235_v15, %v2552_v13  ;;  %v2365_v29 = vld [vmem:[%s2947_s1 + $0x38] sm:$0xff]   ;;  %v2372_v36 = vld [vmem:[%s2947_s1 + $0xa8] sm:$0xff]   ;;  %v2374_v38 = vld [vmem:[%s2947_s1 + $0xe0] sm:$0xff]  }
  0x14   : > { %v309_v19 = vshrl.u32 %v238_v16, 16  ;;  %v311_v20 = vshll.u32 %v238_v16, 16  ;;  %v2371_v37 = vld [vmem:[%s2947_s1 + $0x68] sm:$0xff]   ;;  %v2376_v40 = vld [vmem:[%s2947_s1 + $0xa0] sm:$0xff]   ;;  %v2613_v44 = vld [vmem:[%s2540_s10 + $0x38] sm:$0xff] }
  0x15   : > { %v316_v23 = vshll.u32 %v241_v17, 16  ;;  %v326_v24 = vshrl.u32 %v241_v17, 16  ;;  %v2373_v39 = vld [vmem:[%s2947_s1 + $0x28] sm:$0xff]   ;;  %v2375_v41 = vld [vmem:[%s2947_s1 + $0x60] sm:$0xff]   ;;  %v234_v46 = vld [vmem:[%s2540_s10 + $0x50] sm:$0x1f] }
  0x16   : > { %2116 = vmatpush3.bf16.msra.mxu0 %v2358_v8  ;;  %2286 = vmatpush3.bf16.msra.mxu1 %v2357_v7  ;;  %v313_v25 = vrot.slane %v311_v20, 1  ;;  %v2607_v42 = vld [vmem:[%s2540_s10 + $0x20] sm:$0xff]  ;;  %v231_v45 = vld [vmem:[%s2540_s10 + $0x8] sm:$0xfe]  ;;  %v240_v48 = vpack.c.bf16 %v234_v46, %v2613_v44  ;;  %v2620_v49 = vld [vmem:[%s2540_s10 + $0x18] sm:$0xff] }
  0x17   : > { %2117 = vmatprep.subr.bf16.mxu0 %v2359_v9  ;;  %2287 = vmatprep.subr.bf16.mxu1 %v2360_v10  ;;  %v318_v26 = vrot.slane %v316_v23, 1  ;;  %v2377_v43 = vld [vmem:[%s2947_s1 + $0x20] sm:$0xff]   ;;  %v237_v47 = vpack.c.bf16 %v2607_v42, %v231_v45  ;;  %v2623_v50 = vld [vmem:[%s2540_s10 + $0x30] sm:$0xff]  ;;  %v233_v52 = vld [vmem:[%s2540_s10 + $0x48] sm:$0x1f] }
  0x18   : > { %v314_v28 = vor.u32 %v313_v25, %v309_v19  ;;  %v230_v51 = vld [vmem:[%s2540_s10] sm:$0xfe]  ;;  %v304_v56 = vshll.u32 %v240_v48, 16  ;;  %v239_v57 = vpack.c.bf16 %v233_v52, %v2623_v50  ;;  %v2378_v58 = vld [vmem:[%s2947_s1 + $0x58] sm:$0xff]   ;;  %v2382_v6 = vld [vmem:[%s2947_s1 + $0x50] sm:$0xff]  }
  0x19   : > { %v328_v30 = vor.u32 %v326_v24, %v318_v26  ;;  %v236_v53 = vpack.c.bf16 %v2620_v49, %v230_v51  ;;  %v297_v54 = vshrl.u32 %v237_v47, 16  ;;  %v299_v55 = vshll.u32 %v237_v47, 16  ;;  %v2380_v61 = vld [vmem:[%s2947_s1 + $0x1b8] sm:$0xff]   ;;  %v2383_v8 = vld [vmem:[%s2947_s1 + $0x10] sm:$0xff]   ;;  %v2387_v19 = vld [vmem:[%s2947_s1 + $0x8] sm:$0xff]  }
  0x1a   : > { %2118 = vmatpush3.bf16.msra.mxu0 %v2361_v11  ;;  %2288 = vmatpush3.bf16.msra.mxu1 %v2360_v10  ;;  %v319_v32 = vsel %vm283_vm0, %v314_v28, %v318_v26  ;;  %v306_v63 = vrot.slane %v304_v56, 1  ;;  %v292_v0 = vshll.u32 %v239_v57, 16  ;;  %v2379_v1 = vld [vmem:[%s2947_s1 + $0x18] sm:$0xff]   ;;  %v2384_v10 = vld [vmem:[%s2947_s1 + $0x1b0] sm:$0xff]   ;;  %v323_v11 = vshrl.u32 %v240_v48, 16  ;;  %v2388_v20 = vld [vmem:[%s2947_s1 + $0x1a8] sm:$0xff]  }
  0x1b   : > { %2119 = vmatprep.subr.bf16.mxu0 %v2362_v18  ;;  %2145 = vmatprep.subr.bf16.mxu1 %v2363_v21  ;;  %v285_v59 = vshrl.u32 %v236_v53, 16  ;;  %v287_v60 = vshll.u32 %v236_v53, 16  ;;  %v301_v62 = vrot.slane %v299_v55, 1  ;;  %v2381_v3 = vld [vmem:[%s2947_s1 + $0x178] sm:$0xff]   ;;  %v2385_v15 = vld [vmem:[%s2947_s1 + $0x170] sm:$0xff]   ;;  %v320_v17 = vshrl.u32 %v239_v57, 16 }
  0x1c   : > { %2289 = vmatprep.mubr.msk.bf16.mxu1 %vm453_vm1, %v319_v32  ;;  %v294_v5 = vrot.slane %v292_v0, 1  ;;  %v325_v16 = vor.u32 %v323_v11, %v306_v63  ;;  %v2386_v18 = vld [vmem:[%s2947_s1 + $0x48] sm:$0xff]   ;;  %v2390_v23 = vld [vmem:[%s2947_s1 + $0x40] sm:$0xff]   ;;  %v2395_v32 = vld [vmem:[%s2947_s1 + $0x198] sm:$0xff]  }
  0x1d   : > { %2290 = vmatmul.mubr.msk.bf16.vlgmr.msra.gmra.mxu1 %vm453_vm1, %v328_v30  ;;  %v289_v2 = vrot.slane %v287_v60, 1  ;;  %v302_v4 = vor.u32 %v301_v62, %v297_v54  ;;  %v2389_v21 = vld [vmem:[%s2947_s1 + $0x168] sm:$0xff]   ;;  %v2391_v24 = vld [vmem:[%s2947_s1] sm:$0xff]   ;;  %v2394_v30 = vld [vmem:[%s2947_s1 + $0x98] sm:$0xff]  }
  0x1e   : > { %2120 = vmatpush3.bf16.msra.mxu0 %v2364_v22  ;;  %2146 = vmatpush3.bf16.msra.mxu1 %v2365_v29  ;;  %v322_v22 = vor.u32 %v320_v17, %v294_v5  ;;  %v2392_v25 = vld [vmem:[%s2947_s1 + $0x1a0] sm:$0xff]   ;;  %v2402_v46 = vld [vmem:[%s2947_s1 + $0x148] sm:$0xff]   ;;  %v174_v48 = vld [vmem:[%s2540_s10 + $0x10] sm:$0xff] }
  0x1f   : > { %2121 = vmatprep.subr.bf16.mxu0 %v2366_v27  ;;  %2147 = vmatprep.subr.bf16.mxu1 %v2367_v33  ;;  %v290_v7 = vor.u32 %v289_v2, %v285_v59  ;;  %v307_v9 = vsel %vm283_vm0, %v302_v4, %v306_v63  ;;  %v2393_v26 = vld [vmem:[%s2947_s1 + $0x160] sm:$0xff]   ;;  %v173_v27 = vld [vmem:[%s2540_s10 + $0x8] sm:$0xff]  ;;  %v2397_v33 = vld [vmem:[%s2947_s1 + $0x90] sm:$0xff]   ;;  %v186_v51 = vpack.c.bf16 %v2549_v12, %v174_v48 }
  0x20   : > { %492 = vmatprep.mubr.bf16.mxu0 %v307_v9  ;;  %v172_v28 = vld [vmem:[%s2540_s10] sm:$0xff]  ;;  %v185_v29 = vpack.c.bf16 %v2607_v42, %v173_v27  ;;  %v183_v52 = vld [vmem:[%s2540_s10 + $0x58] sm:$0xf]  ;;  %v783_v54 = vld [vmem:[%s2540_s10 + $0x8] sm:$0xfc] }
  0x21   : > { %v295_v14 = vsel %vm283_vm0, %v290_v7, %v294_v5  ;;  %v2403_v45 = vld [vmem:[%s2947_s1 + $0x80] sm:$0xff]   ;;  %v786_v55 = vld [vmem:[%s2540_s10 + $0x50] sm:$0x3f]  ;;  %v2406_v56 = vld [vmem:[%s2947_s1 + $0x1d8] sm:$0xff]   ;;  %v789_v57 = vpack.c.bf16 %v2607_v42, %v783_v54  ;;  %v189_v62 = vpack.c.bf16 %v183_v52, %v2552_v13 }
  0x22   : > { %2122 = vmatpush3.bf16.msra.mxu0 %v2368_v31  ;;  %2148 = vmatpush3.bf16.msra.mxu1 %v2369_v35  ;;  %v184_v31 = vpack.c.bf16 %v2620_v49, %v172_v28  ;;  %v2398_v35 = vld [vmem:[%s2947_s1 + $0x190] sm:$0xff]   ;;  %v2404_v47 = vld [vmem:[%s2947_s1 + $0x180] sm:$0xff]   ;;  %v785_v60 = vld [vmem:[%s2540_s10 + $0x48] sm:$0x3f] }
  0x23   : > { %2123 = vmatprep.subr.bf16.mxu0 %v2370_v34  ;;  %2149 = vmatprep.subr.bf16.mxu1 %v2371_v37  ;;  %v2396_v34 = vld [vmem:[%s2947_s1 + $0x158] sm:$0xff]   ;;  %v2405_v53 = vld [vmem:[%s2947_s1 + $0x140] sm:$0xff]   ;;  %v845_v63 = vrot.slane %v789_v57, 1  ;;  %v791_v2 = vpack.c.bf16 %v785_v60, %v2623_v50  ;;  %v784_v9 = vld [vmem:[%s2540_s10 + $0x10] sm:$0xfc] }
  0x24   : > { %716 = vmatprep.mubr.bf16.mxu1 %v185_v29  ;;  %v782_v59 = vld [vmem:[%s2540_s10] sm:$0xfc]  ;;  %v2410_v11 = vld [vmem:[%s2947_s1 + $0x1c8] sm:$0xff]   ;;  %v2432_v57 = vld [vmem:[%s2947_s1 + $0x2d8] sm:$0xff]  }
  0x25   : > { %v843_v5 = vrot.slane %v791_v2, 1  ;;  %v2425_v48 = vld [vmem:[%s2947_s1 + $0x2a8] sm:$0xff]   ;;  %v2427_v52 = vld [vmem:[%s2947_s1 + $0x200] sm:$0xff]   ;;  %v2435_v60 = vld [vmem:[%s2947_s1 + $0x1f0] sm:$0xff]  }
  0x26   : > { %2124 = vmatpush3.bf16.msra.mxu0 %v2372_v36  ;;  %2150 = vmatpush3.bf16.msra.mxu1 %v2373_v39  ;;  %v182_v36 = vld [vmem:[%s2540_s10 + $0x50] sm:$0xf]  ;;  %v2400_v39 = vld [vmem:[%s2947_s1 + $0x88] sm:$0xff]   ;;  %v2429_v54 = vld [vmem:[%s2947_s1 + $0x2a0] sm:$0xff]  }
  0x27   : > { %2125 = vmatprep.subr.bf16.mxu0 %v2374_v38  ;;  %2151 = vmatprep.subr.bf16.mxu1 %v2375_v41  ;;  %v188_v37 = vpack.c.bf16 %v182_v36, %v2613_v44  ;;  %v181_v38 = vld [vmem:[%s2540_s10 + $0x48] sm:$0xf]  ;;  %v2416_v36 = vld [vmem:[%s2947_s1 + $0x2f8] sm:$0xff]   ;;  %v2442_v2 = vld [vmem:[%s2947_s1 + $0x220] sm:$0xff]  }
  0x28   : > { %v187_v41 = vpack.c.bf16 %v181_v38, %v2623_v50  ;;  %v2417_v38 = vld [vmem:[%s2947_s1 + $0x2b8] sm:$0xff]  }
  0x2a   : > { %2126 = vmatpush3.bf16.msra.mxu0 %v2376_v40  ;;  %2152 = vmatpush3.bf16.msra.mxu1 %v2377_v43  ;;  %v2399_v40 = vld [vmem:[%s2947_s1 + $0x150] sm:$0xff]   ;;  %v2401_v43 = vld [vmem:[%s2947_s1 + $0x188] sm:$0xff]  }
  0x2b   : > { %2179 = vmatprep.subr.bf16.mxu0 %v2380_v61  ;;  %2153 = vmatprep.subr.bf16.mxu1 %v2378_v58  ;;  %v792_v58 = vpack.c.bf16 %v786_v55, %v2613_v44  ;;  %v788_v61 = vpack.c.bf16 %v2620_v49, %v782_v59  ;;  %v2430_v55 = vld [vmem:[%s2947_s1 + $0x238] sm:$0xff]   ;;  %v2434_v59 = vld [vmem:[%s2947_s1 + $0x230] sm:$0xff]  }
  0x2d   : > { %493 = vmatmul.mubr.bf16.vlgmr.msra.gmra.mxu0 %v295_v14  ;;  %v846_v0 = vrot.slane %v792_v58, 1  ;;  %v790_v14 = vpack.c.bf16 %v2549_v12, %v784_v9  ;;  %v2433_v58 = vld [vmem:[%s2947_s1 + $0x298] sm:$0xff]   ;;  %v1086_v9 = vld [vmem:[%s2540_s10 + $0x48] sm:$0x7f] }
  0x2e   : > { %2154 = vmatpush3.bf16.msra.mxu1 %v2379_v1  ;;  %2180 = vmatpush3.bf16.msra.mxu0 %v2381_v3  ;;  %v2407_v1 = vld [vmem:[%s2947_s1 + $0x278] sm:$0xff]   ;;  %v842_v3 = vrot.slane %v788_v61, 1  ;;  %v2436_v61 = vld [vmem:[%s2947_s1 + $0x2d0] sm:$0xff]  }
  0x2f   : > { %2155 = vmatprep.subr.bf16.mxu1 %v2382_v6  ;;  %2181 = vmatprep.subr.bf16.mxu0 %v2384_v10  ;;  %v847_v4 = vsel %vm841_vm2, %v845_v63, %v846_v0  ;;  %v2408_v6 = vld [vmem:[%s2947_s1 + $0x1d0] sm:$0xff]   ;;  %v787_v10 = vld [vmem:[%s2540_s10 + $0x58] sm:$0x3f]  ;;  %v848_v17 = vrot.slane %v790_v14, 1  ;;  %v2438_v63 = vld [vmem:[%s2947_s1 + $0x228] sm:$0xff]  }
  0x30   : > { %500 = vmatprep.mubr.bf16.mxu0 %v325_v16  ;;  %v844_v7 = vsel %vm841_vm2, %v842_v3, %v843_v5  ;;  %v2411_v16 = vld [vmem:[%s2947_s1 + $0x268] sm:$0xff]  }
  0x31   : > { %v1084_v3 = vld [vmem:[%s2540_s10 + $0x8] sm:$0xf8] }
  0x32   : > { %2156 = vmatpush3.bf16.msra.mxu1 %v2383_v8  ;;  %2182 = vmatpush3.bf16.msra.mxu0 %v2385_v15  ;;  %v2409_v8 = vld [vmem:[%s2947_s1 + $0x270] sm:$0xff]   ;;  %v793_v15 = vpack.c.bf16 %v787_v10, %v2552_v13  ;;  %v1421_v10 = vld [vmem:[%s2540_s10 + $0x8] sm:$0xf0] }
  0x33   : > { %2157 = vmatprep.subr.bf16.mxu1 %v2386_v18  ;;  %2183 = vmatprep.subr.bf16.mxu0 %v2388_v20  ;;  %v1088_v20 = vld [vmem:[%s2540_s10 + $0x58] sm:$0x7f] }
  0x34   : > { %v849_v18 = vrot.slane %v793_v15, 1  ;;  %v1092_v15 = vpack.c.bf16 %v1086_v9, %v2623_v50 }
  0x35   : > { %501 = vmatmul.mubr.bf16.gmra.mxu0 %v322_v22  ;;  %v1094_v22 = vpack.c.bf16 %v1088_v20, %v2552_v13 }
  0x36   : > { %2158 = vmatpush3.bf16.msra.mxu1 %v2387_v19  ;;  %2184 = vmatpush3.bf16.msra.mxu0 %v2389_v21  ;;  %v1085_v19 = vld [vmem:[%s2540_s10 + $0x10] sm:$0xf8] }
  0x37   : > { %2159 = vmatprep.subr.bf16.mxu1 %v2390_v23  ;;  %2185 = vmatprep.subr.bf16.mxu0 %v2392_v25  ;;  %v1091_v21 = vpack.c.bf16 %v2549_v12, %v1085_v19  ;;  %v2412_v23 = vld [vmem:[%s2947_s1 + $0x1c0] sm:$0xff]   ;;  %v1180_v27 = vshrl.u32 %v1094_v22, 16  ;;  %v1183_v28 = vshll.u32 %v1094_v22, 16  ;;  %v1424_v22 = vld [vmem:[%s2540_s10 + $0x50] sm:$0xff] }
  0x38   : > { %1013 = vmatprep.mubr.bf16.mxu0 %v847_v4  ;;  %v2413_v12 = vld [vmem:[%s2947_s1 + $0x260] sm:$0xff]   ;;  %v1087_v4 = vld [vmem:[%s2540_s10 + $0x50] sm:$0x7f] }
  0x39   : > { %v1172_v25 = vshrl.u32 %v1091_v21, 16 }
  0x3a   : > { %2160 = vmatpush3.bf16.msra.mxu1 %v2391_v24  ;;  %2186 = vmatpush3.bf16.msra.mxu0 %v2393_v26  ;;  %v850_v24 = vsel %vm841_vm2, %v848_v17, %v849_v18  ;;  %v1175_v26 = vshll.u32 %v1091_v21, 16  ;;  %v2443_v17 = vld [vmem:[%s2947_s1 + $0x1e0] sm:$0xff]  }
  0x3b   : > { %2293 = vmatprep.subr.bf16.mxu1 %v2394_v30  ;;  %2187 = vmatprep.subr.bf16.mxu0 %v2395_v32  ;;  %v1174_v13 = vrot.slane %v1172_v25, 1  ;;  %v2414_v32 = vld [vmem:[%s2947_s1 + $0x258] sm:$0xff]  }
  0x3c   : > { %v1177_v29 = vrot.slane %v1175_v26, 2  ;;  %v1146_v26 = vshrl.u32 %v1092_v15, 16 }
  0x3d   : > { %717 = vmatmul.mubr.bf16.vlgmr.msra.gmra.mxu1 %v184_v31  ;;  %v1185_v31 = vrot.slane %v1183_v28, 2  ;;  %v1420_v28 = vld [vmem:[%s2540_s10] sm:$0xf0] }
  0x3e   : > { %2294 = vmatpush3.bf16.msra.mxu1 %v2394_v30  ;;  %2188 = vmatpush3.bf16.msra.mxu0 %v2396_v34  ;;  %v1182_v30 = vrot.slane %v1180_v27, 1  ;;  %v1178_v34 = vor.u32 %v1177_v29, %v1174_v13  ;;  %v1149_v27 = vshll.u32 %v1092_v15, 16 }
  0x3f   : > { %2295 = vmatprep.subr.bf16.mxu1 %v2397_v33  ;;  %724 = vmatprep.mubr.bf16.mxu1 %v188_v37 }
  0x40   : > { %2189 = vmatprep.subr.bf16.mxu0 %v2398_v35  ;;  %v1186_v35 = vor.u32 %v1185_v31, %v1182_v30 }
  0x42   : > { %2296 = vmatpush3.bf16.msra.mxu1 %v2397_v33  ;;  %2190 = vmatpush3.bf16.msra.mxu0 %v2399_v40  ;;  %v2415_v33 = vld [vmem:[%s2947_s1 + $0x218] sm:$0xff]   ;;  %v1187_v37 = vsel %vm1136_vm3, %v1178_v34, %v1186_v35  ;;  %v2419_v40 = vld [vmem:[%s2947_s1 + $0x210] sm:$0xff]   ;;  %v1151_v34 = vrot.slane %v1149_v27, 2 }
  0x43   : > { %2297 = vmatprep.subr.bf16.mxu1 %v2400_v39  ;;  %2191 = vmatprep.subr.bf16.mxu0 %v2401_v43  ;;  %v2421_v43 = vld [vmem:[%s2947_s1 + $0x2b0] sm:$0xff]  }
  0x45   : > { %725 = vmatmul.mubr.bf16.gmra.mxu1 %v187_v41  ;;  %v2420_v41 = vld [vmem:[%s2947_s1 + $0x2f0] sm:$0xff]  }
  0x46   : > { %2298 = vmatpush3.bf16.msra.mxu1 %v2400_v39  ;;  %2301 = vmatprep.mubr.msk.bf16.mxu1 %vm453_vm1, %v186_v51  ;;  %v2418_v39 = vld [vmem:[%s2947_s1 + $0x250] sm:$0xff]   ;;  %v2426_v51 = vld [vmem:[%s2947_s1 + $0x240] sm:$0xff]  }
  0x47   : > { %2299 = vmatprep.subr.bf16.mxu1 %v2403_v45  ;;  %2192 = vmatpush3.bf16.msra.mxu0 %v2402_v46  ;;  %v2423_v46 = vld [vmem:[%s2947_s1 + $0x208] sm:$0xff]  }
  0x48   : > { %2193 = vmatprep.subr.bf16.mxu0 %v2404_v47  ;;  %v2424_v47 = vld [vmem:[%s2947_s1 + $0x2e8] sm:$0xff]  }
  0x4a   : > { %2300 = vmatpush3.bf16.msra.mxu1 %v2403_v45  ;;  %v2422_v45 = vld [vmem:[%s2947_s1 + $0x248] sm:$0xff]  }
  0x4b   : > { %2305 = vmatprep.subr.bf16.mxu1 %v2406_v56  ;;  %2194 = vmatpush3.bf16.msra.mxu0 %v2405_v53  ;;  %v2428_v53 = vld [vmem:[%s2947_s1 + $0x2e0] sm:$0xff]  }
  0x4c   : > { %2317 = vmatprep.subr.bf16.mxu0 %v2407_v1 }
  0x4d   : > { %2302 = vmatmul.mubr.msk.bf16.vlgmr.msra.gmra.mxu1 %vm453_vm1, %v189_v62  ;;  %v2437_v62 = vld [vmem:[%s2947_s1 + $0x290] sm:$0xff]  }
  0x4e   : > { %2306 = vmatpush3.bf16.msra.mxu1 %v2406_v56  ;;  %1014 = vmatmul.mubr.bf16.vlgmr.msra.gmra.mxu0 %v844_v7  ;;  %v2431_v56 = vld [vmem:[%s2947_s1 + $0x1f8] sm:$0xff]   ;;  %v1093_v7 = vpack.c.bf16 %v1087_v4, %v2613_v44 }
  0x4f   : > { %2307 = vmatprep.subr.bf16.mxu1 %v2408_v6  ;;  %2318 = vmatpush3.bf16.msra.mxu0 %v2407_v1  ;;  %v2440_v1 = vld [vmem:[%s2947_s1 + $0x2c8] sm:$0xff]  }
  0x50   : > { %1021 = vmatprep.mubr.bf16.mxu0 %v846_v0  ;;  %2319 = vmatprep.subr.bf16.mxu0 %v2409_v8  ;;  %v2439_v0 = vld [vmem:[%s2947_s1 + $0x1e8] sm:$0xff]   ;;  %v1163_v20 = vshrl.u32 %v1093_v7, 16  ;;  %v1166_v21 = vshll.u32 %v1093_v7, 16 }
  0x51   : > { %2313 = vmatprep.mubr.msk.bf16.mxu1 %vm453_vm1, %v850_v24 }
  0x52   : > { %2308 = vmatpush3.bf16.msra.mxu1 %v2408_v6  ;;  %v1090_v6 = vpack.c.bf16 %v2607_v42, %v1084_v3  ;;  %v1165_v29 = vrot.slane %v1163_v20, 1  ;;  %v1168_v30 = vrot.slane %v1166_v21, 2 }
  0x53   : > { %2309 = vmatprep.subr.bf16.mxu1 %v2410_v11  ;;  %2320 = vmatpush3.bf16.msra.mxu0 %v2409_v8  ;;  %v1083_v8 = vld [vmem:[%s2540_s10] sm:$0xf8] }
  0x54   : > { %2321 = vmatprep.subr.bf16.mxu0 %v2411_v16  ;;  %v1089_v14 = vpack.c.bf16 %v2620_v49, %v1083_v8  ;;  %v1158_v19 = vshll.u32 %v1090_v6, 16 }
  0x56   : > { %2310 = vmatpush3.bf16.msra.mxu1 %v2410_v11  ;;  %1022 = vmatmul.mubr.bf16.gmra.mxu0 %v843_v5  ;;  %v2441_v5 = vld [vmem:[%s2947_s1 + $0x288] sm:$0xff]   ;;  %v2444_v11 = vld [vmem:[%s2947_s1 + $0x2c0] sm:$0xff]   ;;  %v1138_v24 = vshrl.u32 %v1089_v14, 16  ;;  %v1141_v25 = vshll.u32 %v1089_v14, 16  ;;  %v1160_v13 = vrot.slane %v1158_v19, 2 }
  0x57   : > { %2311 = vmatprep.subr.bf16.mxu1 %v2412_v23  ;;  %2322 = vmatpush3.bf16.msra.mxu0 %v2411_v16  ;;  %v1427_v16 = vpack.c.bf16 %v2607_v42, %v1421_v10  ;;  %v2446_v42 = vld [vmem:[%s2947_s1 + $0x318] sm:$0xff]  }
  0x58   : > { %2323 = vmatprep.subr.bf16.mxu0 %v2413_v12  ;;  %2325 = vmatprep.mubr.msk.bf16.mxu0 %vm453_vm1, %v1187_v37  ;;  %v1140_v31 = vrot.slane %v1138_v24, 1  ;;  %v1169_v37 = vor.u32 %v1168_v30, %v1165_v29 }
  0x5a   : > { %2312 = vmatpush3.bf16.msra.mxu1 %v2412_v23  ;;  %v1423_v23 = vld [vmem:[%s2540_s10 + $0x48] sm:$0xff] }
  0x5b   : > { %2213 = vmatprep.subr.bf16.mxu1 %v2414_v32  ;;  %2324 = vmatpush3.bf16.msra.mxu0 %v2413_v12  ;;  %v1143_v32 = vrot.slane %v1141_v25, 2 }
  0x5c   : > { %2247 = vmatprep.subr.bf16.mxu0 %v2416_v36 }
  0x5d   : > { %2314 = vmatmul.mubr.msk.bf16.vlgmr.msra.gmra.mxu1 %vm453_vm1, %v849_v18  ;;  %v1155_v18 = vshrl.u32 %v1090_v6, 16 }
  0x5e   : > { %2214 = vmatpush3.bf16.msra.mxu1 %v2415_v33  ;;  %2326 = vmatmul.mubr.msk.bf16.vlgmr.msra.gmra.mxu0 %vm453_vm1, %v1186_v35  ;;  %v1148_v33 = vrot.slane %v1146_v26, 1  ;;  %v2445_v35 = vld [vmem:[%s2947_s1 + $0x280] sm:$0xff]  }
  0x5f   : > { %2215 = vmatprep.subr.bf16.mxu1 %v2418_v39  ;;  %2248 = vmatpush3.bf16.msra.mxu0 %v2417_v38  ;;  %v1157_v12 = vrot.slane %v1155_v18, 1  ;;  %v1430_v38 = vpack.c.bf16 %v1424_v22, %v2613_v44  ;;  %v1483_v39 = vrot.slane %v1427_v16, 2 }
  0x60   : > { %2249 = vmatprep.subr.bf16.mxu0 %v2420_v41  ;;  %v1152_v41 = vor.u32 %v1151_v34, %v1148_v33 }
  0x61   : > { %v1161_v36 = vor.u32 %v1160_v13, %v1157_v12 }
  0x62   : > { %2216 = vmatpush3.bf16.msra.mxu1 %v2419_v40  ;;  %v1144_v40 = vor.u32 %v1143_v32, %v1140_v31 }
  0x63   : > { %2217 = vmatprep.subr.bf16.mxu1 %v2422_v45  ;;  %2250 = vmatpush3.bf16.msra.mxu0 %v2421_v43  ;;  %v1426_v43 = vpack.c.bf16 %v2620_v49, %v1420_v28  ;;  %v1429_v45 = vpack.c.bf16 %v1423_v23, %v2623_v50  ;;  %v2466_v49 = vld [vmem:[%s2540_s10 + $0x28] sm:$0xff] }
  0x64   : > { %2251 = vmatprep.subr.bf16.mxu0 %v2424_v47  ;;  %v1484_v47 = vrot.slane %v1430_v38, 2 }
  0x65   : > { %v1480_v44 = vrot.slane %v1426_v43, 2 }
  0x66   : > { %2218 = vmatpush3.bf16.msra.mxu1 %v2423_v46  ;;  %v1170_v46 = vsel %vm1136_vm3, %v1161_v36, %v1169_v37  ;;  %v1485_v50 = vsel %vm1479_vm4, %v1483_v39, %v1484_v47 }
  0x67   : > { %2219 = vmatprep.subr.bf16.mxu1 %v2426_v51  ;;  %2252 = vmatpush3.bf16.msra.mxu0 %v2425_v48  ;;  %v1422_v48 = vld [vmem:[%s2540_s10 + $0x10] sm:$0xf0]  ;;  %v1425_v51 = vld [vmem:[%s2540_s10 + $0x58] sm:$0xff] }
  0x68   : > { %2253 = vmatprep.subr.bf16.mxu0 %v2428_v53  ;;  %1350 = vmatprep.mubr.bf16.mxu1 %v1170_v46  ;;  %v1481_v53 = vrot.slane %v1429_v45, 2 }
  0x69   : > { %1651 = vmatprep.mubr.bf16.mxu0 %v1485_v50 }
  0x6a   : > { %2220 = vmatpush3.bf16.msra.mxu1 %v2427_v52  ;;  %v1153_v52 = vsel %vm1136_vm3, %v1144_v40, %v1152_v41 }
  0x6b   : > { %2221 = vmatprep.subr.bf16.mxu1 %v2430_v55  ;;  %2254 = vmatpush3.bf16.msra.mxu0 %v2429_v54  ;;  %v2447_v54 = vld [vmem:[%s2947_s1 + $0x310] sm:$0xff]   ;;  %v1428_v55 = vpack.c.bf16 %v2466_v49, %v1422_v48 }
  0x6c   : > { %2255 = vmatprep.subr.bf16.mxu0 %v2432_v57 }
  0x6e   : > { %2222 = vmatpush3.bf16.msra.mxu1 %v2431_v56  ;;  %v2467_v56 = vld [vmem:[%s2540_s10 + $0x40] sm:$0xff] }
  0x6f   : > { %2223 = vmatprep.subr.bf16.mxu1 %v2434_v59  ;;  %2256 = vmatpush3.bf16.msra.mxu0 %v2433_v58  ;;  %v1431_v57 = vpack.c.bf16 %v1425_v51, %v2467_v56  ;;  %v1482_v58 = vsel %vm1479_vm4, %v1480_v44, %v1481_v53  ;;  %v2448_v59 = vld [vmem:[%s2947_s1 + $0x308] sm:$0xff]  }
  0x70   : > { %2257 = vmatprep.subr.bf16.mxu0 %v2436_v61 }
  0x71   : > { %v1487_v61 = vrot.slane %v1431_v57, 2 }
  0x72   : > { %2224 = vmatpush3.bf16.msra.mxu1 %v2435_v60  ;;  %v1486_v60 = vrot.slane %v1428_v55, 2 }
  0x73   : > { %2225 = vmatprep.subr.bf16.mxu1 %v2438_v63  ;;  %2258 = vmatpush3.bf16.msra.mxu0 %v2437_v62  ;;  %v2449_v62 = vld [vmem:[%s2947_s1 + $0x300] sm:$0xff]  }
  0x74   : > { %2259 = vmatprep.subr.bf16.mxu0 %v2440_v1  ;;  %v1488_v63 = vsel %vm1479_vm4, %v1486_v60, %v1487_v61 }
  0x76   : > { %2226 = vmatpush3.bf16.msra.mxu1 %v2439_v0 }
  0x77   : > { %2227 = vmatprep.subr.bf16.mxu1 %v2442_v2  ;;  %2260 = vmatpush3.bf16.msra.mxu0 %v2441_v5 }
  0x78   : > { %2261 = vmatprep.subr.bf16.mxu0 %v2444_v11 }
  0x7a   : > { %2228 = vmatpush3.bf16.msra.mxu1 %v2443_v17 }
  0x7b   : > { %2329 = vmatprep.subr.bf16.mxu1 %v2446_v42  ;;  %2262 = vmatpush3.bf16.msra.mxu0 %v2445_v35 }
  0x7d   : > { %1351 = vmatmul.mubr.bf16.vlgmr.msra.gmra.mxu1 %v1153_v52 }
  0x7e   : > { %2330 = vmatpush3.bf16.msra.mxu1 %v2446_v42  ;;  %1358 = vmatprep.mubr.bf16.mxu1 %v1169_v37 }
  0x7f   : > { %1652 = vmatmul.mubr.bf16.vlgmr.msra.gmra.mxu0 %v1482_v58  ;;  %2331 = vmatprep.subr.bf16.mxu1 %v2447_v54 }
  0x80   : > { %1659 = vmatprep.mubr.bf16.mxu0 %v1484_v47 }
  0x82   : > { %2332 = vmatpush3.bf16.msra.mxu1 %v2447_v54 }
  0x83   : > { %2333 = vmatprep.subr.bf16.mxu1 %v2448_v59 }
  0x85   : > { %1359 = vmatmul.mubr.bf16.gmra.mxu1 %v1152_v41 }
  0x86   : > { %2334 = vmatpush3.bf16.msra.mxu1 %v2448_v59  ;;  %2337 = vmatprep.mubr.msk.bf16.mxu1 %vm453_vm1, %v1488_v63 }
  0x87   : > { %1660 = vmatmul.mubr.bf16.gmra.mxu0 %v1481_v53  ;;  %2335 = vmatprep.subr.bf16.mxu1 %v2449_v62 }
  0x8a   : > { %2336 = vmatpush3.bf16.msra.mxu1 %v2449_v62 }
  0x8d   : > { %2338 = vmatmul.mubr.msk.bf16.vlgmr.msra.gmra.mxu1 %vm453_vm1, %v1487_v61 }
  0xdd   : > { %v2291_v0 = vpop.f32.mrf.mxu1 }
  0xdf   : > { %v543_v2 = vpop.f32.mrf.mxu1 }
  0xe1   : > { %v2292_v4 = vpop.f32.mrf.mxu1 }
  0xe3   : > { %v2912_v6 = vpop.f32.mrf.mxu1 }
  0xed   : > { %v2127_v1 = vpop.f32.mrf.mxu0 }
  0xef   : > { %v2128_v3 = vpop.f32.mrf.mxu0 }
  0xf0   : > { %v2129_v47 = vadd.f32 %v2128_v3, %v2127_v1 }
  0xf1   : > { %v2130_v5 = vpop.f32.mrf.mxu0 }
  0xf2   : > { %v544_v56 = vadd.f32 %v2129_v47, %v543_v2 }
  0xf3   : > { %v2131_v7 = vpop.f32.mrf.mxu0 }
  0xf4   : > { %v2132_v57 = vadd.f32 %v2131_v7, %v2130_v5 }
  0xf5   : > { %v2133_v9 = vpop.f32.mrf.mxu0 }
  0xf7   : > { %v2134_v11 = vpop.f32.mrf.mxu0 }
  0xf8   : > { %v2135_v46 = vadd.f32 %v2134_v11, %v2133_v9 }
  0xf9   : > { %v2136_v15 = vpop.f32.mrf.mxu0 }
  0xfa   : > { %v552_v50 = vadd.f32 %v2291_v0, %v2135_v46 }
  0xfb   : > { %v2137_v17 = vpop.f32.mrf.mxu0 }
  0xfc   : > { %v2138_v53 = vadd.f32 %v2137_v17, %v2136_v15 }
  0xfd   : > { %v2161_v8 = vpop.f32.mrf.mxu1 }
  0xfe   : > { %v555_v3 = vadd.f32 %v2292_v4, %v2138_v53 }
  0xff   : > { %v2162_v10 = vpop.f32.mrf.mxu1 }
 0x100   : > { %v2163_v54 = vadd.f32 %v2162_v10, %v2161_v8 }
 0x101   : > { %v2914_v14 = vpop.f32.mrf.mxu1 }
 0x102   : > { %v719_v11 = vadd.f32 %v2163_v54, %v544_v56 }
 0x103   : > { %v2165_v16 = vpop.f32.mrf.mxu1 }
 0x104   : > { %v2166_v0 = vadd.f32 %v2165_v16, %v2914_v14 }
 0x105   : > { %v2167_v18 = vpop.f32.mrf.mxu1 }
 0x107   : > { %v2168_v20 = vpop.f32.mrf.mxu1 }
 0x108   : > { %v2169_v52 = vadd.f32 %v2168_v20, %v2167_v18 }
 0x109   : > { %v2170_v22 = vpop.f32.mrf.mxu1 }
 0x10a   : > { %v727_v62 = vadd.f32 %v2169_v52, %v552_v50 }
 0x10b   : > { %v2171_v24 = vpop.f32.mrf.mxu1 }
 0x10c   : > { %v2172_v58 = vadd.f32 %v2171_v24, %v2170_v22  ;;  %v547_v22 = vadd.f32 %v2132_v57, %v2912_v6  ;;  %v2107_v6 = vld [vmem:[%s2948_s2] ss:$0 sm:$0xff] }
 0x10d   : > { %v2303_v26 = vpop.f32.mrf.mxu1 }
 0x10e   : > { %v2195_v19 = vpop.f32.mrf.mxu0  ;;  %v776_v8 = vadd.f32 %v2303_v26, %v727_v62  ;;  %v730_v5 = vadd.f32 %v2172_v58, %v555_v3 }
 0x10f   : > { %v767_v42 = vpop.f32.mrf.mxu1 }
 0x110   : > { %v2196_v21 = vpop.f32.mrf.mxu0  ;;  %v768_v2 = vadd.f32 %v767_v42, %v719_v11 }
 0x111   : > { %v2304_v12 = vpop.f32.mrf.mxu1  ;;  %v2197_v59 = vadd.f32 %v2196_v21, %v2195_v19 }
 0x112   : > { %v2916_v23 = vpop.f32.mrf.mxu0 }
 0x113   : > { %v2920_v29 = vpop.f32.mrf.mxu1 }
 0x114   : > { %v2918_v25 = vpop.f32.mrf.mxu0 }
 0x116   : > { %v2201_v27 = vpop.f32.mrf.mxu0 }
 0x118   : > { %v2202_v28 = vpop.f32.mrf.mxu0 }
 0x119   : > { %v2203_v44 = vadd.f32 %v2202_v28, %v2201_v27  ;;  %v779_v28 = vadd.f32 %v2304_v12, %v730_v5 }
 0x11a   : > { %v2204_v13 = vpop.f32.mrf.mxu0 }
 0x11c   : > { %v2205_v30 = vpop.f32.mrf.mxu0 }
 0x11d   : > { %v2315_v31 = vpop.f32.mrf.mxu1 }
 0x11e   : > { %v2327_v32 = vpop.f32.mrf.mxu0  ;;  %v1073_v63 = vadd.f32 %v2315_v31, %v2203_v44 }
 0x11f   : > { %v1064_v33 = vpop.f32.mrf.mxu1 }
 0x120   : > { %v1401_v34 = vpop.f32.mrf.mxu0  ;;  %v1065_v18 = vadd.f32 %v2197_v59, %v1064_v33  ;;  %v1081_v24 = vadd.f32 %v1073_v63, %v776_v8 }
 0x121   : > { %v2316_v35 = vpop.f32.mrf.mxu1 }
 0x122   : > { %v2328_v36 = vpop.f32.mrf.mxu0 }
 0x123   : > { %v1067_v37 = vpop.f32.mrf.mxu1 }
 0x124   : > { %v2922_v38 = vpop.f32.mrf.mxu0 }
 0x13d   : > { %v2229_v39 = vpop.f32.mrf.mxu1 }
 0x13f   : > { %v2263_v40 = vpop.f32.mrf.mxu0  ;;  %v2230_v41 = vpop.f32.mrf.mxu1 }
 0x140   : > { %v2231_v9 = vadd.f32 %v2230_v41, %v2229_v39 }
 0x141   : > { %v2264_v43 = vpop.f32.mrf.mxu0  ;;  %v2232_v45 = vpop.f32.mrf.mxu1 }
 0x142   : > { %v1402_v27 = vadd.f32 %v2231_v9, %v1401_v34  ;;  %v2265_v33 = vadd.f32 %v2264_v43, %v2263_v40 }
 0x143   : > { %v2924_v48 = vpop.f32.mrf.mxu0  ;;  %v2233_v51 = vpop.f32.mrf.mxu1 }
 0x144   : > { %2950 = vst [vmem:[#allocation2_spill] sm:$0xff] %v2924_v48  ;;  %v2206_v48 = vadd.f32 %v2205_v30, %v2204_v13  ;;  %v2200_v13 = vadd.f32 %v2918_v25, %v2916_v23  ;;  %v1079_v30 = vadd.f32 %v1065_v18, %v768_v2  ;;  %v2234_v26 = vadd.f32 %v2233_v51, %v2232_v45 }
 0x145   : > { %v2267_v49 = vpop.f32.mrf.mxu0  ;;  %v2235_v55 = vpop.f32.mrf.mxu1 }
 0x146   : > { %v1076_v7 = vadd.f32 %v2316_v35, %v2206_v48  ;;  %v722_v35 = vadd.f32 %v2166_v0, %v547_v22  ;;  %v1068_v41 = vadd.f32 %v2200_v13, %v1067_v37  ;;  %v1416_v47 = vadd.f32 %v1402_v27, %v1079_v30 }
 0x147   : > { %v2269_v60 = vpop.f32.mrf.mxu0  ;;  %v2236_v61 = vpop.f32.mrf.mxu1  ;;  %v1405_v45 = vadd.f32 %v2234_v26, %v2922_v38 }
 0x148   : > { %v2237_v1 = vadd.f32 %v2236_v61, %v2235_v55  ;;  %v1082_v39 = vadd.f32 %v1076_v7, %v779_v28  ;;  %v771_v25 = vadd.f32 %v2920_v29, %v722_v35 }
 0x149   : > { %v2270_v20 = vpop.f32.mrf.mxu0  ;;  %v2238_v15 = vpop.f32.mrf.mxu1 }
 0x14a   : > { %v1410_v10 = vadd.f32 %v2327_v32, %v2237_v1  ;;  %v2271_v17 = vadd.f32 %v2270_v20, %v2269_v60  ;;  %v1080_v52 = vadd.f32 %v1068_v41, %v771_v25 }
 0x14b   : > { %v2272_v19 = vpop.f32.mrf.mxu0  ;;  %v2239_v21 = vpop.f32.mrf.mxu1  ;;  %v2951_v37 = vld [vmem:[#allocation2_spill] sm:$0xff] }
 0x14c   : > { %v2240_v4 = vadd.f32 %v2239_v21, %v2238_v15  ;;  %v1418_v16 = vadd.f32 %v1410_v10, %v1081_v24  ;;  %v2268_v44 = vadd.f32 %v2267_v49, %v2951_v37  ;;  %v1417_v56 = vadd.f32 %v1405_v45, %v1080_v52 }
 0x14d   : > { %v2273_v31 = vpop.f32.mrf.mxu0  ;;  %v2339_v32 = vpop.f32.mrf.mxu1 }
 0x14e   : > { %v1413_v14 = vadd.f32 %v2328_v36, %v2240_v4  ;;  %v1711_v42 = vadd.f32 %v2339_v32, %v2271_v17  ;;  %v2274_v12 = vadd.f32 %v2273_v31, %v2272_v19 }
 0x14f   : > { %v1702_v34 = vpop.f32.mrf.mxu1 }
 0x150   : > { %v1719_v46 = vadd.f32 %v1711_v42, %v1418_v16  ;;  %v1703_v23 = vadd.f32 %v2265_v33, %v1702_v34  ;;  %v1419_v48 = vadd.f32 %v1413_v14, %v1082_v39 }
 0x151   : > { %v2340_v40 = vpop.f32.mrf.mxu1 }
 0x152   : > { %v1730_v36 = vadd.f32 %v2107_v6, %v1719_v46  ;;  %v1717_v43 = vadd.f32 %v1703_v23, %v1416_v47  ;;  %v1714_v51 = vadd.f32 %v2340_v40, %v2274_v12 }
 0x153   : > { %v1705_v53 = vpop.f32.mrf.mxu1 }
 0x154   : > { %v1734_v54 = vmin.f32 %v1730_v36, 0.0  ;;  %v1728_v55 = vadd.f32 %v2107_v6, %v1717_v43  ;;  %v1720_v50 = vadd.f32 %v1714_v51, %v1419_v48  ;;  %v1706_v57 = vadd.f32 %v2268_v44, %v1705_v53 }
 0x155   : > { %vm1762_vm6 = vcmp.gt.f32.partialorder %v1730_v36, 0.0 }
 0x156   : > { %v1738_v58 = vmul.f32 0.5, %v1734_v54  ;;  %v1748_v59 = vmul.f32 1.442695, %v1734_v54  ;;  %v1732_v60 = vmin.f32 %v1728_v55, 0.0  ;;  %v1731_v29 = vadd.f32 %v2107_v6, %v1720_v50 }
 0x157   : > { %v1718_v61 = vadd.f32 %v1706_v57, %v1417_v56  ;;  %vm1760_vm7 = vcmp.gt.f32.partialorder %v1728_v55, 0.0 }
 0x158   : > { %v1744_v38 = vmul.f32 1.442695, %v1732_v60  ;;  %2450 = vpow2.f32 %v1748_v59  ;;  %v1736_v62 = vmul.f32 0.5, %v1732_v60  ;;  %v1735_v63 = vmin.f32 %v1731_v29, 0.0 }
 0x159   : > { %v1729_v9 = vadd.f32 %v2107_v6, %v1718_v61  ;;  %2452 = vtanh.f32 %v1738_v58  ;;  %vm1763_vm9 = vcmp.gt.f32.partialorder %v1731_v29, 0.0 }
 0x15a   : > { %2454 = vpow2.f32 %v1744_v38  ;;  %v1739_v49 = vmul.f32 0.5, %v1735_v63  ;;  %v1750_v1 = vmul.f32 1.442695, %v1735_v63 }
 0x15b   : > { %v1733_v3 = vmin.f32 %v1729_v9, 0.0  ;;  %2456 = vtanh.f32 %v1736_v62  ;;  %vm1761_vm10 = vcmp.gt.f32.partialorder %v1729_v9, 0.0 }
 0x15c   : > { %2458 = vpow2.f32 %v1750_v1 }
 0x15d   : > { %v1746_v11 = vmul.f32 1.442695, %v1733_v3  ;;  %v1737_v18 = vmul.f32 0.5, %v1733_v3  ;;  %2460 = vtanh.f32 %v1739_v49 }
 0x15f   : > { %2462 = vpow2.f32 %v1746_v11 }
 0x160   : > { %2464 = vtanh.f32 %v1737_v18 }
 0x165   : > { %v2451_v20 = vpop.eup %2450 }
 0x166   : > { %v2453_v15 = vpop.eup %2452  ;;  %v1754_v8 = vadd.f32 1.0, %v2451_v20 }
 0x167   : > { %v2455_v10 = vpop.eup %2454 }
 0x168   : > { %v1758_v17 = vmul.f32 %v2453_v15, %v1754_v8  ;;  %v1752_v0 = vadd.f32 1.0, %v2455_v10  ;;  %v2457_v2 = vpop.eup %2456 }
 0x169   : > { %v2459_v5 = vpop.eup %2458 }
 0x16a   : > { %v1766_v7 = vsel %vm1762_vm6, %v1730_v36, %v1758_v17  ;;  %v1756_v19 = vmul.f32 %v2457_v2, %v1752_v0  ;;  %v2461_v21 = vpop.eup %2460  ;;  %v1755_v22 = vadd.f32 1.0, %v2459_v5 }
 0x16b   : > { %1771 = vst.msk [vmem:[%s170_s29 + $0x10] sm:$0xff] %vm1768_vm5, %v1766_v7 }
 0x16c   : > { %v2463_v24 = vpop.eup %2462  ;;  %v1764_v27 = vsel %vm1760_vm7, %v1728_v55, %v1756_v19  ;;  %v1759_v4 = vmul.f32 %v2461_v21, %v1755_v22 }
 0x16d   : > { %1769 = vst.msk [vmem:[%s170_s29] sm:$0xff] %vm1768_vm5, %v1764_v27  ;;  %v1753_v28 = vadd.f32 1.0, %v2463_v24  ;;  %v2465_v13 = vpop.eup %2464 }
 0x16e   : > { %v1767_v30 = vsel %vm1763_vm9, %v1731_v29, %v1759_v4 }
 0x16f   : > { %v1757_v26 = vmul.f32 %v2465_v13, %v1753_v28  ;;  %1773 = vst.msk [vmem:[%s170_s29 + $0x18] sm:$0xf] %vm1772_vm8, %v1767_v30 }
 0x171   : > { %v1765_v31 = vsel %vm1761_vm10, %v1729_v9, %v1757_v26 }
 0x172   : > { %1770 = vst.msk [vmem:[%s170_s29 + $0x8] sm:$0xff] %vm1768_vm5, %v1765_v31 }
 0x173 PF: > { %s13_s12 = sadd.s32 1, %s2474_s12  }
 0x174   : > { %p10_p4 = scmp.ge.s32.totalorder %s13_s12, 4  }
 0x176   :  { %12 = sbr.rel (!%p10_p4) target bundleno = 1 (0x1), region = 66 }

</bundles_post_ra>
